<compile_context>
chip_gen: v7x
topology: tpu7x:2x2x1
jax: 0.10.0
libtpu: 0.0.40
codegen_flags: <defaults>
</compile_context>

<pallas_src>
import functools

import jax
import jax.numpy as jnp
import numpy as np
from jax.experimental import pallas as pl
from jax.experimental.pallas import tpu as pltpu

HIDDEN = 256
NUM_LSTM_LAYERS = 6
LANE = 128
SUBLANE = 8


# ----------------------------------------------------------------------------
# Fused kernel body: one grid step == one LSTM layer.  PyTorch gate order
# i, f, g, o.  All activations stay in VMEM scratch across grid steps.
# ----------------------------------------------------------------------------
def critic_fused_kernel(x_ref,        # (Sp, D)      f32   resident input (flattened, padded)
                        wih0_ref,     # (D, 4H)      bf16  layer-0 input weights (resident)
                        wih_ref,      # (1, H, 4H)   bf16  layer-l input weights (streamed)
                        whh_ref,      # (1, H, 4H)   bf16  layer-l recurrent weights (streamed)
                        b_ref,        # (1, 1, 4H)   f32   layer-l combined bias (streamed)
                        w1_ref, b1_ref,   # (H, H) bf16, (1, H) f32
                        w2_ref, b2_ref,   # (H, H) bf16, (1, H) f32
                        w3_ref, b3_ref,   # (H, 128) bf16, (1, 128) f32  (lane-padded 256->1)
                        out_ref,      # (Sp, 128) f32  (written only on last layer)
                        xproj_scr,    # (Sp, 4H) f32   persistent scratch
                        act_scr,      # (Sp, H)  f32   persistent scratch
                        *, seq, bp):
    H = act_scr.shape[1]
    layer = pl.program_id(0)
    last = pl.num_programs(0) - 1

    # --- hoisted input projection for ALL timesteps of this layer (1 MXU matmul) ---
    @pl.when(layer == 0)
    def _():
        xproj_scr[...] = (
            jnp.dot(x_ref[...].astype(jnp.bfloat16), wih0_ref[...],
                    preferred_element_type=jnp.float32)
            + b_ref[0])

    @pl.when(layer > 0)
    def _():
        # act_scr still holds the previous layer's full sequence output here;
        # reads precede the per-step overwrites below (program order on the ref).
        xproj_scr[...] = (
            jnp.dot(act_scr[...].astype(jnp.bfloat16), wih_ref[0],
                    preferred_element_type=jnp.float32)
            + b_ref[0])

    # --- serial recurrence: only h @ Whh remains on the per-step path ---
    whh = whh_ref[0]                                   # hoisted out of the time loop
    h = jnp.zeros((bp, H), dtype=jnp.float32)
    c = jnp.zeros((bp, H), dtype=jnp.float32)
    for t in range(seq):                               # unrolled; static, 8-aligned slices
        row = t * bp
        gates = xproj_scr[row:row + bp, :] + jnp.dot(
            h.astype(jnp.bfloat16), whh, preferred_element_type=jnp.float32)
        if_g = jax.nn.sigmoid(gates[:, :2 * H])        # i and f in one dispatch
        g_g = jnp.tanh(gates[:, 2 * H:3 * H])
        o_g = jax.nn.sigmoid(gates[:, 3 * H:])
        c = if_g[:, H:] * c + if_g[:, :H] * g_g
        h = o_g * jnp.tanh(c)
        act_scr[row:row + bp, :] = h

    # --- fused MLP head + single lane-dense output store on the last layer ---
    @pl.when(layer == last)
    def _():
        y = act_scr[...]
        y = jnp.tanh(jnp.dot(y.astype(jnp.bfloat16), w1_ref[...],
                             preferred_element_type=jnp.float32) + b1_ref[...])
        y = jnp.tanh(jnp.dot(y.astype(jnp.bfloat16), w2_ref[...],
                             preferred_element_type=jnp.float32) + b2_ref[...])
        out_ref[...] = (jnp.dot(y.astype(jnp.bfloat16), w3_ref[...],
                                preferred_element_type=jnp.float32) + b3_ref[...])


# ----------------------------------------------------------------------------
# Wrapper: pad batch to a sublane tile, flatten to 2-D, run the layer-grid call.
# NOTE: any outer batching (minibatch of sequences) should be folded into B
# before calling — extra multiples of 8 rows are essentially free here.
# ----------------------------------------------------------------------------
def critic_forward_pallas(s, lstm_params, mlp_params):
    seq, B, D = s.shape
    H = HIDDEN
    Bp = max(SUBLANE, ((B + SUBLANE - 1) // SUBLANE) * SUBLANE)
    Sp = seq * Bp

    # zero-pad batch so per-step slices are (8,128)-aligned; pad rows discarded later
    s_pad = jnp.pad(s, ((0, 0), (0, Bp - B), (0, 0)))
    x2d = s_pad.reshape(Sp, D)

    wih0, wihs, whhs, bs = lstm_params            # wihs padded to (L, H, 4H); index 0 unused
    w1, b1, w2, b2, w3p, b3p = mlp_params
    L = whhs.shape[0]

    kernel = functools.partial(critic_fused_kernel, seq=seq, bp=Bp)

    out2d = pl.pallas_call(
        kernel,
        out_shape=jax.ShapeDtypeStruct((Sp, LANE), jnp.float32),
        grid=(L,),
        in_specs=[
            pl.BlockSpec((Sp, D), lambda l: (0, 0)),            # x (resident)
            pl.BlockSpec((D, 4 * H), lambda l: (0, 0)),         # Wih layer 0 (resident)
            pl.BlockSpec((1, H, 4 * H), lambda l: (l, 0, 0)),   # Wih layers (streamed)
            pl.BlockSpec((1, H, 4 * H), lambda l: (l, 0, 0)),   # Whh (streamed)
            pl.BlockSpec((1, 1, 4 * H), lambda l: (l, 0, 0)),   # biases (streamed)
            pl.BlockSpec((H, H), lambda l: (0, 0)),             # w1
            pl.BlockSpec((1, H), lambda l: (0, 0)),             # b1
            pl.BlockSpec((H, H), lambda l: (0, 0)),             # w2
            pl.BlockSpec((1, H), lambda l: (0, 0)),             # b2
            pl.BlockSpec((H, LANE), lambda l: (0, 0)),          # w3 (lane-padded)
            pl.BlockSpec((1, LANE), lambda l: (0, 0)),          # b3 (lane-padded)
        ],
        out_specs=pl.BlockSpec((Sp, LANE), lambda l: (0, 0)),
        scratch_shapes=[
            pltpu.VMEM((Sp, 4 * H), jnp.float32),   # hoisted input projection
            pltpu.VMEM((Sp, H), jnp.float32),       # per-layer sequence activations
        ],
        compiler_params=pltpu.CompilerParams(
            dimension_semantics=("arbitrary",),      # layers are sequential
        ),
    )(x2d, wih0, wihs, whhs, bs, w1, b1, w2, b2, w3p, b3p)

    return out2d.reshape(seq, Bp, LANE)[:, :B, :1]


# ----------------------------------------------------------------------------
# Parameter construction (deterministic, in-script; mirrors module __init__).
# Weights stored bf16 (matmul inputs); biases / states stay f32.
# ----------------------------------------------------------------------------
def init_params(key, state_dim):
    H = HIDDEN
    k = 1.0 / np.sqrt(H)
    wih_l, whh_l, b_l = [], [], []
    for layer in range(NUM_LSTM_LAYERS):
        d_in = state_dim if layer == 0 else H
        key, k1, k2, k3, k4 = jax.random.split(key, 5)
        w_ih = jax.random.uniform(k1, (4 * H, d_in), jnp.float32, -k, k)
        w_hh = jax.random.uniform(k2, (4 * H, H), jnp.float32, -k, k)
        b_ih = jax.random.uniform(k3, (4 * H,), jnp.float32, -k, k)
        b_hh = jax.random.uniform(k4, (4 * H,), jnp.float32, -k, k)
        wih_l.append(w_ih.T)                   # (d_in, 4H)  pre-transposed
        whh_l.append(w_hh.T)                   # (H, 4H)
        b_l.append((b_ih + b_hh)[None, :])     # (1, 4H)     combined bias

    wih0 = wih_l[0].astype(jnp.bfloat16)       # (D, 4H), layer-0 special (D != H)
    # pad with a dummy zero block at index 0 so the streamed index map is just
    # lambda l: (l, 0, 0); block 0 is DMA'd once, overlapped, never read.
    wihs = jnp.stack([jnp.zeros((H, 4 * H), jnp.float32)] + wih_l[1:]
                     ).astype(jnp.bfloat16)    # (L, H, 4H)
    whhs = jnp.stack(whh_l).astype(jnp.bfloat16)   # (L, H, 4H)
    bs = jnp.stack(b_l)                            # (L, 1, 4H) f32

    # MLP: xavier_normal with tanh gain (5/3), zero biases
    gain = 5.0 / 3.0

    def xavier(kk, fan_in, fan_out):
        std = gain * np.sqrt(2.0 / (fan_in + fan_out))
        return std * jax.random.normal(kk, (fan_in, fan_out), jnp.float32)

    key, k1, k2, k3 = jax.random.split(key, 4)
    w1 = xavier(k1, H, H).astype(jnp.bfloat16)
    b1 = jnp.zeros((1, H), jnp.float32)
    w2 = xavier(k2, H, H).astype(jnp.bfloat16)
    b2 = jnp.zeros((1, H), jnp.float32)
    w3 = xavier(k3, H, 1)
    b3 = jnp.zeros((1, 1), jnp.float32)
    # pad the 256->1 head to 128 lanes so the kernel's final store is lane-dense
    w3p = jnp.pad(w3, ((0, 0), (0, LANE - 1))).astype(jnp.bfloat16)
    b3p = jnp.pad(b3, ((0, 0), (0, LANE - 1)))
    return (wih0, wihs, whhs, bs), (w1, b1, w2, b2, w3p, b3p)


# ----------------------------------------------------------------------------
# Pure-JAX f32 reference (PyTorch semantics) using the SAME bf16-stored weights
# upcast to f32, so the check isolates kernel-side numerics.
# ----------------------------------------------------------------------------
def critic_forward_ref(s, lstm_params, mlp_params):
    wih0, wihs, whhs, bs = lstm_params
    w1, b1, w2, b2, w3p, b3p = mlp_params
    f32 = lambda a: a.astype(jnp.float32)
    seq, B, _ = s.shape
    H = HIDDEN
    h_all = s
    for layer in range(NUM_LSTM_LAYERS):
        wih = f32(wih0) if layer == 0 else f32(wihs[layer])
        whh = f32(whhs[layer])
        b = bs[layer]
        h = jnp.zeros((B, H), jnp.float32)
        c = jnp.zeros((B, H), jnp.float32)
        outs = []
        for t in range(seq):
            gates = h_all[t] @ wih + h @ whh + b
            i_g = jax.nn.sigmoid(gates[:, 0 * H:1 * H])
            f_g = jax.nn.sigmoid(gates[:, 1 * H:2 * H])
            g_g = jnp.tanh(gates[:, 2 * H:3 * H])
            o_g = jax.nn.sigmoid(gates[:, 3 * H:4 * H])
            c = f_g * c + i_g * g_g
            h = o_g * jnp.tanh(c)
            outs.append(h)
        h_all = jnp.stack(outs)
    x = jnp.tanh(h_all @ f32(w1) + b1)
    x = jnp.tanh(x @ f32(w2) + b2)
    return (x @ f32(w3p) + b3p)[..., :1]


if __name__ == "__main__":
    SEQ, BATCH, STATE_DIM = 8, 2, 32

    root = jax.random.PRNGKey(0)
    k_params, k_input = jax.random.split(root)
    lstm_params, mlp_params = init_params(k_params, STATE_DIM)

    s = jax.random.normal(k_input, (SEQ, BATCH, STATE_DIM), jnp.float32)

    fwd = jax.jit(critic_forward_pallas)
    out = jax.block_until_ready(fwd(s, lstm_params, mlp_params))
    assert out.shape == (SEQ, BATCH, 1), out.shape

    ref = critic_forward_ref(s, lstm_params, mlp_params)
    # Tolerance accounts for per-matmul bf16 activation casts compounding over
    # 6 LSTM layers x 8 timesteps (weights are identical bf16 in kernel & ref).
    np.testing.assert_allclose(np.asarray(out), np.asarray(ref),
                               rtol=3e-2, atol=3e-2)

    print("KERNEL_OK")
</pallas_src>

<mosaic_0001>
module attributes {stable_mosaic.version = 11 : i64} {
  func.func @critic_fused_kernel(%arg0: i32, %arg1: memref<64x32xf32, #tpu.memory_space<vmem>>, %arg2: memref<32x1024xbf16, #tpu.memory_space<vmem>>, %arg3: memref<1x256x1024xbf16, #tpu.memory_space<vmem>>, %arg4: memref<1x256x1024xbf16, #tpu.memory_space<vmem>>, %arg5: memref<1x1x1024xf32, #tpu.memory_space<vmem>>, %arg6: memref<256x256xbf16, #tpu.memory_space<vmem>>, %arg7: memref<1x256xf32, #tpu.memory_space<vmem>>, %arg8: memref<256x256xbf16, #tpu.memory_space<vmem>>, %arg9: memref<1x256xf32, #tpu.memory_space<vmem>>, %arg10: memref<256x128xbf16, #tpu.memory_space<vmem>>, %arg11: memref<1x128xf32, #tpu.memory_space<vmem>>, %arg12: memref<64x128xf32, #tpu.memory_space<vmem>>, %arg13: memref<64x1024xf32, #tpu.memory_space<vmem>>, %arg14: memref<64x256xf32, #tpu.memory_space<vmem>>) attributes {dimension_semantics = [#tpu.dimension_semantics<arbitrary>], iteration_bounds = array<i64: 6>, scalar_prefetch = 0 : i64, scratch_operands = 2 : i64, tpu.core_type = #tpu.core_type<tc>, window_params = [{pipeline_mode = #tpu.pipeline_mode<synchronous>, transform_indices = @transform_0, window_bounds = array<i64: 64, 32>}, {pipeline_mode = #tpu.pipeline_mode<synchronous>, transform_indices = @transform_1, window_bounds = array<i64: 32, 1024>}, {transform_indices = @transform_2, window_bounds = array<i64: 1, 256, 1024>}, {transform_indices = @transform_3, window_bounds = array<i64: 1, 256, 1024>}, {transform_indices = @transform_4, window_bounds = array<i64: 1, 1, 1024>}, {pipeline_mode = #tpu.pipeline_mode<synchronous>, transform_indices = @transform_5, window_bounds = array<i64: 256, 256>}, {pipeline_mode = #tpu.pipeline_mode<synchronous>, transform_indices = @transform_6, window_bounds = array<i64: 1, 256>}, {pipeline_mode = #tpu.pipeline_mode<synchronous>, transform_indices = @transform_7, window_bounds = array<i64: 256, 256>}, {pipeline_mode = #tpu.pipeline_mode<synchronous>, transform_indices = @transform_8, window_bounds = array<i64: 1, 256>}, {pipeline_mode = #tpu.pipeline_mode<synchronous>, transform_indices = @transform_9, window_bounds = array<i64: 256, 128>}, {pipeline_mode = #tpu.pipeline_mode<synchronous>, transform_indices = @transform_10, window_bounds = array<i64: 1, 128>}, {pipeline_mode = #tpu.pipeline_mode<synchronous>, transform_indices = @transform_11, window_bounds = array<i64: 64, 128>}]} {
    %c0_i32 = arith.constant 0 : i32
    %0 = arith.cmpi eq, %arg0, %c0_i32 : i32
    %1 = arith.extui %0 : i1 to i32
    %c0_i32_0 = arith.constant 0 : i32
    %2 = arith.cmpi ne, %1, %c0_i32_0 : i32
    scf.if %2 {
      %c0_56 = arith.constant 0 : index
      %c0_57 = arith.constant 0 : index
      %221 = vector.load %arg1[%c0_56, %c0_57] : memref<64x32xf32, #tpu.memory_space<vmem>>, vector<64x32xf32>
      %222 = arith.truncf %221 : vector<64x32xf32> to vector<64x32xbf16>
      %c0_58 = arith.constant 0 : index
      %c0_59 = arith.constant 0 : index
      %223 = vector.load %arg2[%c0_58, %c0_59] : memref<32x1024xbf16, #tpu.memory_space<vmem>>, vector<32x1024xbf16>
      %cst_60 = arith.constant dense<0.000000e+00> : vector<64x1024xf32>
      %224 = tpu.matmul %222, %223, %cst_60 {dimension_numbers = #tpu.dot_dimension_numbers<[1], [0], [0], [1], [0, 0, 1, 1], [], []>} : vector<64x32xbf16>, vector<32x1024xbf16>, vector<64x1024xf32> -> vector<64x1024xf32>
      %c0_61 = arith.constant 0 : index
      %c0_62 = arith.constant 0 : index
      %c0_63 = arith.constant 0 : index
      %225 = vector.load %arg5[%c0_61, %c0_62, %c0_63] : memref<1x1x1024xf32, #tpu.memory_space<vmem>>, vector<1x1x1024xf32>
      %226 = vector.shape_cast %225 : vector<1x1x1024xf32> to vector<1x1024xf32>
      %227 = vector.broadcast %226 : vector<1x1024xf32> to vector<64x1024xf32>
      %228 = arith.addf %224, %227 : vector<64x1024xf32>
      %c0_64 = arith.constant 0 : index
      %c0_65 = arith.constant 0 : index
      %229 = vector.load %arg13[%c0_64, %c0_65] : memref<64x1024xf32, #tpu.memory_space<vmem>>, vector<64x1024xf32>
      tpu.vector_store %arg13[%c0_64, %c0_65], %228 {strides = array<i32>} : memref<64x1024xf32, #tpu.memory_space<vmem>>, vector<64x1024xf32>,
    } else {
    }
    %c0_i32_1 = arith.constant 0 : i32
    %3 = arith.cmpi sgt, %arg0, %c0_i32_1 : i32
    %4 = arith.extui %3 : i1 to i32
    %c0_i32_2 = arith.constant 0 : i32
    %5 = arith.cmpi ne, %4, %c0_i32_2 : i32
    scf.if %5 {
      %c0_56 = arith.constant 0 : index
      %c0_57 = arith.constant 0 : index
      %221 = vector.load %arg14[%c0_56, %c0_57] : memref<64x256xf32, #tpu.memory_space<vmem>>, vector<64x256xf32>
      %222 = arith.truncf %221 : vector<64x256xf32> to vector<64x256xbf16>
      %c0_58 = arith.constant 0 : index
      %c0_59 = arith.constant 0 : index
      %c0_60 = arith.constant 0 : index
      %223 = vector.load %arg3[%c0_58, %c0_59, %c0_60] : memref<1x256x1024xbf16, #tpu.memory_space<vmem>>, vector<1x256x1024xbf16>
      %224 = vector.shape_cast %223 : vector<1x256x1024xbf16> to vector<256x1024xbf16>
      %cst_61 = arith.constant dense<0.000000e+00> : vector<64x1024xf32>
      %225 = tpu.matmul %222, %224, %cst_61 {dimension_numbers = #tpu.dot_dimension_numbers<[1], [0], [0], [1], [0, 0, 1, 1], [], []>} : vector<64x256xbf16>, vector<256x1024xbf16>, vector<64x1024xf32> -> vector<64x1024xf32>
      %c0_62 = arith.constant 0 : index
      %c0_63 = arith.constant 0 : index
      %c0_64 = arith.constant 0 : index
      %226 = vector.load %arg5[%c0_62, %c0_63, %c0_64] : memref<1x1x1024xf32, #tpu.memory_space<vmem>>, vector<1x1x1024xf32>
      %227 = vector.shape_cast %226 : vector<1x1x1024xf32> to vector<1x1024xf32>
      %228 = vector.broadcast %227 : vector<1x1024xf32> to vector<64x1024xf32>
      %229 = arith.addf %225, %228 : vector<64x1024xf32>
      %c0_65 = arith.constant 0 : index
      %c0_66 = arith.constant 0 : index
      %230 = vector.load %arg13[%c0_65, %c0_66] : memref<64x1024xf32, #tpu.memory_space<vmem>>, vector<64x1024xf32>
      tpu.vector_store %arg13[%c0_65, %c0_66], %229 {strides = array<i32>} : memref<64x1024xf32, #tpu.memory_space<vmem>>, vector<64x1024xf32>,
    } else {
    }
    %c0 = arith.constant 0 : index
    %c0_3 = arith.constant 0 : index
    %c0_4 = arith.constant 0 : index
    %6 = vector.load %arg4[%c0, %c0_3, %c0_4] : memref<1x256x1024xbf16, #tpu.memory_space<vmem>>, vector<1x256x1024xbf16>
    %7 = vector.shape_cast %6 : vector<1x256x1024xbf16> to vector<256x1024xbf16>
    %cst = arith.constant 0.000000e+00 : f32
    %8 = vector.broadcast %cst : f32 to vector<8x256xf32>
    %cst_5 = arith.constant 0.000000e+00 : f32
    %9 = vector.broadcast %cst_5 : f32 to vector<8x256xf32>
    %c0_6 = arith.constant 0 : index
    %c0_7 = arith.constant 0 : index
    %10 = vector.load %arg13[%c0_6, %c0_7] : memref<64x1024xf32, #tpu.memory_space<vmem>>, vector<8x1024xf32>
    %11 = arith.truncf %8 : vector<8x256xf32> to vector<8x256xbf16>
    %cst_8 = arith.constant dense<0.000000e+00> : vector<8x1024xf32>
    %12 = tpu.matmul %11, %7, %cst_8 {dimension_numbers = #tpu.dot_dimension_numbers<[1], [0], [0], [1], [0, 0, 1, 1], [], []>} : vector<8x256xbf16>, vector<256x1024xbf16>, vector<8x1024xf32> -> vector<8x1024xf32>
    %13 = arith.addf %10, %12 : vector<8x1024xf32>
    %14 = vector.extract_strided_slice %13 {offsets = [0, 0], sizes = [8, 512], strides = [1, 1]} : vector<8x1024xf32> to vector<8x512xf32>
    %15 = arith.negf %14 : vector<8x512xf32>
    %16 = math.exp %15 : vector<8x512xf32>
    %cst_9 = arith.constant 1.000000e+00 : f32
    %17 = vector.broadcast %cst_9 : f32 to vector<8x512xf32>
    %18 = arith.addf %17, %16 : vector<8x512xf32>
    %19 = arith.divf %17, %18 : vector<8x512xf32>
    %20 = vector.extract_strided_slice %13 {offsets = [0, 512], sizes = [8, 256], strides = [1, 1]} : vector<8x1024xf32> to vector<8x256xf32>
    %21 = math.tanh %20 : vector<8x256xf32>
    %22 = vector.extract_strided_slice %13 {offsets = [0, 768], sizes = [8, 256], strides = [1, 1]} : vector<8x1024xf32> to vector<8x256xf32>
    %23 = arith.negf %22 : vector<8x256xf32>
    %24 = math.exp %23 : vector<8x256xf32>
    %cst_10 = arith.constant 1.000000e+00 : f32
    %25 = vector.broadcast %cst_10 : f32 to vector<8x256xf32>
    %26 = arith.addf %25, %24 : vector<8x256xf32>
    %27 = arith.divf %25, %26 : vector<8x256xf32>
    %28 = vector.extract_strided_slice %19 {offsets = [0, 256], sizes = [8, 256], strides = [1, 1]} : vector<8x512xf32> to vector<8x256xf32>
    %29 = arith.mulf %28, %9 : vector<8x256xf32>
    %30 = vector.extract_strided_slice %19 {offsets = [0, 0], sizes = [8, 256], strides = [1, 1]} : vector<8x512xf32> to vector<8x256xf32>
    %31 = arith.mulf %30, %21 : vector<8x256xf32>
    %32 = arith.addf %29, %31 : vector<8x256xf32>
    %33 = math.tanh %32 : vector<8x256xf32>
    %34 = arith.mulf %27, %33 : vector<8x256xf32>
    %c0_11 = arith.constant 0 : index
    %c0_12 = arith.constant 0 : index
    %35 = vector.load %arg14[%c0_11, %c0_12] : memref<64x256xf32, #tpu.memory_space<vmem>>, vector<8x256xf32>
    tpu.vector_store %arg14[%c0_11, %c0_12], %34 {strides = array<i32>} : memref<64x256xf32, #tpu.memory_space<vmem>>, vector<8x256xf32>,
    %c8 = arith.constant 8 : index
    %c0_13 = arith.constant 0 : index
    %36 = vector.load %arg13[%c8, %c0_13] : memref<64x1024xf32, #tpu.memory_space<vmem>>, vector<8x1024xf32>
    %37 = arith.truncf %34 : vector<8x256xf32> to vector<8x256xbf16>
    %cst_14 = arith.constant dense<0.000000e+00> : vector<8x1024xf32>
    %38 = tpu.matmul %37, %7, %cst_14 {dimension_numbers = #tpu.dot_dimension_numbers<[1], [0], [0], [1], [0, 0, 1, 1], [], []>} : vector<8x256xbf16>, vector<256x1024xbf16>, vector<8x1024xf32> -> vector<8x1024xf32>
    %39 = arith.addf %36, %38 : vector<8x1024xf32>
    %40 = vector.extract_strided_slice %39 {offsets = [0, 0], sizes = [8, 512], strides = [1, 1]} : vector<8x1024xf32> to vector<8x512xf32>
    %41 = arith.negf %40 : vector<8x512xf32>
    %42 = math.exp %41 : vector<8x512xf32>
    %cst_15 = arith.constant 1.000000e+00 : f32
    %43 = vector.broadcast %cst_15 : f32 to vector<8x512xf32>
    %44 = arith.addf %43, %42 : vector<8x512xf32>
    %45 = arith.divf %43, %44 : vector<8x512xf32>
    %46 = vector.extract_strided_slice %39 {offsets = [0, 512], sizes = [8, 256], strides = [1, 1]} : vector<8x1024xf32> to vector<8x256xf32>
    %47 = math.tanh %46 : vector<8x256xf32>
    %48 = vector.extract_strided_slice %39 {offsets = [0, 768], sizes = [8, 256], strides = [1, 1]} : vector<8x1024xf32> to vector<8x256xf32>
    %49 = arith.negf %48 : vector<8x256xf32>
    %50 = math.exp %49 : vector<8x256xf32>
    %cst_16 = arith.constant 1.000000e+00 : f32
    %51 = vector.broadcast %cst_16 : f32 to vector<8x256xf32>
    %52 = arith.addf %51, %50 : vector<8x256xf32>
    %53 = arith.divf %51, %52 : vector<8x256xf32>
    %54 = vector.extract_strided_slice %45 {offsets = [0, 256], sizes = [8, 256], strides = [1, 1]} : vector<8x512xf32> to vector<8x256xf32>
    %55 = arith.mulf %54, %32 : vector<8x256xf32>
    %56 = vector.extract_strided_slice %45 {offsets = [0, 0], sizes = [8, 256], strides = [1, 1]} : vector<8x512xf32> to vector<8x256xf32>
    %57 = arith.mulf %56, %47 : vector<8x256xf32>
    %58 = arith.addf %55, %57 : vector<8x256xf32>
    %59 = math.tanh %58 : vector<8x256xf32>
    %60 = arith.mulf %53, %59 : vector<8x256xf32>
    %c8_17 = arith.constant 8 : index
    %c0_18 = arith.constant 0 : index
    %61 = vector.load %arg14[%c8_17, %c0_18] : memref<64x256xf32, #tpu.memory_space<vmem>>, vector<8x256xf32>
    tpu.vector_store %arg14[%c8_17, %c0_18], %60 {strides = array<i32>} : memref<64x256xf32, #tpu.memory_space<vmem>>, vector<8x256xf32>,
    %c16 = arith.constant 16 : index
    %c0_19 = arith.constant 0 : index
    %62 = vector.load %arg13[%c16, %c0_19] : memref<64x1024xf32, #tpu.memory_space<vmem>>, vector<8x1024xf32>
    %63 = arith.truncf %60 : vector<8x256xf32> to vector<8x256xbf16>
    %cst_20 = arith.constant dense<0.000000e+00> : vector<8x1024xf32>
    %64 = tpu.matmul %63, %7, %cst_20 {dimension_numbers = #tpu.dot_dimension_numbers<[1], [0], [0], [1], [0, 0, 1, 1], [], []>} : vector<8x256xbf16>, vector<256x1024xbf16>, vector<8x1024xf32> -> vector<8x1024xf32>
    %65 = arith.addf %62, %64 : vector<8x1024xf32>
    %66 = vector.extract_strided_slice %65 {offsets = [0, 0], sizes = [8, 512], strides = [1, 1]} : vector<8x1024xf32> to vector<8x512xf32>
    %67 = arith.negf %66 : vector<8x512xf32>
    %68 = math.exp %67 : vector<8x512xf32>
    %cst_21 = arith.constant 1.000000e+00 : f32
    %69 = vector.broadcast %cst_21 : f32 to vector<8x512xf32>
    %70 = arith.addf %69, %68 : vector<8x512xf32>
    %71 = arith.divf %69, %70 : vector<8x512xf32>
    %72 = vector.extract_strided_slice %65 {offsets = [0, 512], sizes = [8, 256], strides = [1, 1]} : vector<8x1024xf32> to vector<8x256xf32>
    %73 = math.tanh %72 : vector<8x256xf32>
    %74 = vector.extract_strided_slice %65 {offsets = [0, 768], sizes = [8, 256], strides = [1, 1]} : vector<8x1024xf32> to vector<8x256xf32>
    %75 = arith.negf %74 : vector<8x256xf32>
    %76 = math.exp %75 : vector<8x256xf32>
    %cst_22 = arith.constant 1.000000e+00 : f32
    %77 = vector.broadcast %cst_22 : f32 to vector<8x256xf32>
    %78 = arith.addf %77, %76 : vector<8x256xf32>
    %79 = arith.divf %77, %78 : vector<8x256xf32>
    %80 = vector.extract_strided_slice %71 {offsets = [0, 256], sizes = [8, 256], strides = [1, 1]} : vector<8x512xf32> to vector<8x256xf32>
    %81 = arith.mulf %80, %58 : vector<8x256xf32>
    %82 = vector.extract_strided_slice %71 {offsets = [0, 0], sizes = [8, 256], strides = [1, 1]} : vector<8x512xf32> to vector<8x256xf32>
    %83 = arith.mulf %82, %73 : vector<8x256xf32>
    %84 = arith.addf %81, %83 : vector<8x256xf32>
    %85 = math.tanh %84 : vector<8x256xf32>
    %86 = arith.mulf %79, %85 : vector<8x256xf32>
    %c16_23 = arith.constant 16 : index
    %c0_24 = arith.constant 0 : index
    %87 = vector.load %arg14[%c16_23, %c0_24] : memref<64x256xf32, #tpu.memory_space<vmem>>, vector<8x256xf32>
    tpu.vector_store %arg14[%c16_23, %c0_24], %86 {strides = array<i32>} : memref<64x256xf32, #tpu.memory_space<vmem>>, vector<8x256xf32>,
    %c24 = arith.constant 24 : index
    %c0_25 = arith.constant 0 : index
    %88 = vector.load %arg13[%c24, %c0_25] : memref<64x1024xf32, #tpu.memory_space<vmem>>, vector<8x1024xf32>
    %89 = arith.truncf %86 : vector<8x256xf32> to vector<8x256xbf16>
    %cst_26 = arith.constant dense<0.000000e+00> : vector<8x1024xf32>
    %90 = tpu.matmul %89, %7, %cst_26 {dimension_numbers = #tpu.dot_dimension_numbers<[1], [0], [0], [1], [0, 0, 1, 1], [], []>} : vector<8x256xbf16>, vector<256x1024xbf16>, vector<8x1024xf32> -> vector<8x1024xf32>
    %91 = arith.addf %88, %90 : vector<8x1024xf32>
    %92 = vector.extract_strided_slice %91 {offsets = [0, 0], sizes = [8, 512], strides = [1, 1]} : vector<8x1024xf32> to vector<8x512xf32>
    %93 = arith.negf %92 : vector<8x512xf32>
    %94 = math.exp %93 : vector<8x512xf32>
    %cst_27 = arith.constant 1.000000e+00 : f32
    %95 = vector.broadcast %cst_27 : f32 to vector<8x512xf32>
    %96 = arith.addf %95, %94 : vector<8x512xf32>
    %97 = arith.divf %95, %96 : vector<8x512xf32>
    %98 = vector.extract_strided_slice %91 {offsets = [0, 512], sizes = [8, 256], strides = [1, 1]} : vector<8x1024xf32> to vector<8x256xf32>
    %99 = math.tanh %98 : vector<8x256xf32>
    %100 = vector.extract_strided_slice %91 {offsets = [0, 768], sizes = [8, 256], strides = [1, 1]} : vector<8x1024xf32> to vector<8x256xf32>
    %101 = arith.negf %100 : vector<8x256xf32>
    %102 = math.exp %101 : vector<8x256xf32>
    %cst_28 = arith.constant 1.000000e+00 : f32
    %103 = vector.broadcast %cst_28 : f32 to vector<8x256xf32>
    %104 = arith.addf %103, %102 : vector<8x256xf32>
    %105 = arith.divf %103, %104 : vector<8x256xf32>
    %106 = vector.extract_strided_slice %97 {offsets = [0, 256], sizes = [8, 256], strides = [1, 1]} : vector<8x512xf32> to vector<8x256xf32>
    %107 = arith.mulf %106, %84 : vector<8x256xf32>
    %108 = vector.extract_strided_slice %97 {offsets = [0, 0], sizes = [8, 256], strides = [1, 1]} : vector<8x512xf32> to vector<8x256xf32>
    %109 = arith.mulf %108, %99 : vector<8x256xf32>
    %110 = arith.addf %107, %109 : vector<8x256xf32>
    %111 = math.tanh %110 : vector<8x256xf32>
    %112 = arith.mulf %105, %111 : vector<8x256xf32>
    %c24_29 = arith.constant 24 : index
    %c0_30 = arith.constant 0 : index
    %113 = vector.load %arg14[%c24_29, %c0_30] : memref<64x256xf32, #tpu.memory_space<vmem>>, vector<8x256xf32>
    tpu.vector_store %arg14[%c24_29, %c0_30], %112 {strides = array<i32>} : memref<64x256xf32, #tpu.memory_space<vmem>>, vector<8x256xf32>,
    %c32 = arith.constant 32 : index
    %c0_31 = arith.constant 0 : index
    %114 = vector.load %arg13[%c32, %c0_31] : memref<64x1024xf32, #tpu.memory_space<vmem>>, vector<8x1024xf32>
    %115 = arith.truncf %112 : vector<8x256xf32> to vector<8x256xbf16>
    %cst_32 = arith.constant dense<0.000000e+00> : vector<8x1024xf32>
    %116 = tpu.matmul %115, %7, %cst_32 {dimension_numbers = #tpu.dot_dimension_numbers<[1], [0], [0], [1], [0, 0, 1, 1], [], []>} : vector<8x256xbf16>, vector<256x1024xbf16>, vector<8x1024xf32> -> vector<8x1024xf32>
    %117 = arith.addf %114, %116 : vector<8x1024xf32>
    %118 = vector.extract_strided_slice %117 {offsets = [0, 0], sizes = [8, 512], strides = [1, 1]} : vector<8x1024xf32> to vector<8x512xf32>
    %119 = arith.negf %118 : vector<8x512xf32>
    %120 = math.exp %119 : vector<8x512xf32>
    %cst_33 = arith.constant 1.000000e+00 : f32
    %121 = vector.broadcast %cst_33 : f32 to vector<8x512xf32>
    %122 = arith.addf %121, %120 : vector<8x512xf32>
    %123 = arith.divf %121, %122 : vector<8x512xf32>
    %124 = vector.extract_strided_slice %117 {offsets = [0, 512], sizes = [8, 256], strides = [1, 1]} : vector<8x1024xf32> to vector<8x256xf32>
    %125 = math.tanh %124 : vector<8x256xf32>
    %126 = vector.extract_strided_slice %117 {offsets = [0, 768], sizes = [8, 256], strides = [1, 1]} : vector<8x1024xf32> to vector<8x256xf32>
    %127 = arith.negf %126 : vector<8x256xf32>
    %128 = math.exp %127 : vector<8x256xf32>
    %cst_34 = arith.constant 1.000000e+00 : f32
    %129 = vector.broadcast %cst_34 : f32 to vector<8x256xf32>
    %130 = arith.addf %129, %128 : vector<8x256xf32>
    %131 = arith.divf %129, %130 : vector<8x256xf32>
    %132 = vector.extract_strided_slice %123 {offsets = [0, 256], sizes = [8, 256], strides = [1, 1]} : vector<8x512xf32> to vector<8x256xf32>
    %133 = arith.mulf %132, %110 : vector<8x256xf32>
    %134 = vector.extract_strided_slice %123 {offsets = [0, 0], sizes = [8, 256], strides = [1, 1]} : vector<8x512xf32> to vector<8x256xf32>
    %135 = arith.mulf %134, %125 : vector<8x256xf32>
    %136 = arith.addf %133, %135 : vector<8x256xf32>
    %137 = math.tanh %136 : vector<8x256xf32>
    %138 = arith.mulf %131, %137 : vector<8x256xf32>
    %c32_35 = arith.constant 32 : index
    %c0_36 = arith.constant 0 : index
    %139 = vector.load %arg14[%c32_35, %c0_36] : memref<64x256xf32, #tpu.memory_space<vmem>>, vector<8x256xf32>
    tpu.vector_store %arg14[%c32_35, %c0_36], %138 {strides = array<i32>} : memref<64x256xf32, #tpu.memory_space<vmem>>, vector<8x256xf32>,
    %c40 = arith.constant 40 : index
    %c0_37 = arith.constant 0 : index
    %140 = vector.load %arg13[%c40, %c0_37] : memref<64x1024xf32, #tpu.memory_space<vmem>>, vector<8x1024xf32>
    %141 = arith.truncf %138 : vector<8x256xf32> to vector<8x256xbf16>
    %cst_38 = arith.constant dense<0.000000e+00> : vector<8x1024xf32>
    %142 = tpu.matmul %141, %7, %cst_38 {dimension_numbers = #tpu.dot_dimension_numbers<[1], [0], [0], [1], [0, 0, 1, 1], [], []>} : vector<8x256xbf16>, vector<256x1024xbf16>, vector<8x1024xf32> -> vector<8x1024xf32>
    %143 = arith.addf %140, %142 : vector<8x1024xf32>
    %144 = vector.extract_strided_slice %143 {offsets = [0, 0], sizes = [8, 512], strides = [1, 1]} : vector<8x1024xf32> to vector<8x512xf32>
    %145 = arith.negf %144 : vector<8x512xf32>
    %146 = math.exp %145 : vector<8x512xf32>
    %cst_39 = arith.constant 1.000000e+00 : f32
    %147 = vector.broadcast %cst_39 : f32 to vector<8x512xf32>
    %148 = arith.addf %147, %146 : vector<8x512xf32>
    %149 = arith.divf %147, %148 : vector<8x512xf32>
    %150 = vector.extract_strided_slice %143 {offsets = [0, 512], sizes = [8, 256], strides = [1, 1]} : vector<8x1024xf32> to vector<8x256xf32>
    %151 = math.tanh %150 : vector<8x256xf32>
    %152 = vector.extract_strided_slice %143 {offsets = [0, 768], sizes = [8, 256], strides = [1, 1]} : vector<8x1024xf32> to vector<8x256xf32>
    %153 = arith.negf %152 : vector<8x256xf32>
    %154 = math.exp %153 : vector<8x256xf32>
    %cst_40 = arith.constant 1.000000e+00 : f32
    %155 = vector.broadcast %cst_40 : f32 to vector<8x256xf32>
    %156 = arith.addf %155, %154 : vector<8x256xf32>
    %157 = arith.divf %155, %156 : vector<8x256xf32>
    %158 = vector.extract_strided_slice %149 {offsets = [0, 256], sizes = [8, 256], strides = [1, 1]} : vector<8x512xf32> to vector<8x256xf32>
    %159 = arith.mulf %158, %136 : vector<8x256xf32>
    %160 = vector.extract_strided_slice %149 {offsets = [0, 0], sizes = [8, 256], strides = [1, 1]} : vector<8x512xf32> to vector<8x256xf32>
    %161 = arith.mulf %160, %151 : vector<8x256xf32>
    %162 = arith.addf %159, %161 : vector<8x256xf32>
    %163 = math.tanh %162 : vector<8x256xf32>
    %164 = arith.mulf %157, %163 : vector<8x256xf32>
    %c40_41 = arith.constant 40 : index
    %c0_42 = arith.constant 0 : index
    %165 = vector.load %arg14[%c40_41, %c0_42] : memref<64x256xf32, #tpu.memory_space<vmem>>, vector<8x256xf32>
    tpu.vector_store %arg14[%c40_41, %c0_42], %164 {strides = array<i32>} : memref<64x256xf32, #tpu.memory_space<vmem>>, vector<8x256xf32>,
    %c48 = arith.constant 48 : index
    %c0_43 = arith.constant 0 : index
    %166 = vector.load %arg13[%c48, %c0_43] : memref<64x1024xf32, #tpu.memory_space<vmem>>, vector<8x1024xf32>
    %167 = arith.truncf %164 : vector<8x256xf32> to vector<8x256xbf16>
    %cst_44 = arith.constant dense<0.000000e+00> : vector<8x1024xf32>
    %168 = tpu.matmul %167, %7, %cst_44 {dimension_numbers = #tpu.dot_dimension_numbers<[1], [0], [0], [1], [0, 0, 1, 1], [], []>} : vector<8x256xbf16>, vector<256x1024xbf16>, vector<8x1024xf32> -> vector<8x1024xf32>
    %169 = arith.addf %166, %168 : vector<8x1024xf32>
    %170 = vector.extract_strided_slice %169 {offsets = [0, 0], sizes = [8, 512], strides = [1, 1]} : vector<8x1024xf32> to vector<8x512xf32>
    %171 = arith.negf %170 : vector<8x512xf32>
    %172 = math.exp %171 : vector<8x512xf32>
    %cst_45 = arith.constant 1.000000e+00 : f32
    %173 = vector.broadcast %cst_45 : f32 to vector<8x512xf32>
    %174 = arith.addf %173, %172 : vector<8x512xf32>
    %175 = arith.divf %173, %174 : vector<8x512xf32>
    %176 = vector.extract_strided_slice %169 {offsets = [0, 512], sizes = [8, 256], strides = [1, 1]} : vector<8x1024xf32> to vector<8x256xf32>
    %177 = math.tanh %176 : vector<8x256xf32>
    %178 = vector.extract_strided_slice %169 {offsets = [0, 768], sizes = [8, 256], strides = [1, 1]} : vector<8x1024xf32> to vector<8x256xf32>
    %179 = arith.negf %178 : vector<8x256xf32>
    %180 = math.exp %179 : vector<8x256xf32>
    %cst_46 = arith.constant 1.000000e+00 : f32
    %181 = vector.broadcast %cst_46 : f32 to vector<8x256xf32>
    %182 = arith.addf %181, %180 : vector<8x256xf32>
    %183 = arith.divf %181, %182 : vector<8x256xf32>
    %184 = vector.extract_strided_slice %175 {offsets = [0, 256], sizes = [8, 256], strides = [1, 1]} : vector<8x512xf32> to vector<8x256xf32>
    %185 = arith.mulf %184, %162 : vector<8x256xf32>
    %186 = vector.extract_strided_slice %175 {offsets = [0, 0], sizes = [8, 256], strides = [1, 1]} : vector<8x512xf32> to vector<8x256xf32>
    %187 = arith.mulf %186, %177 : vector<8x256xf32>
    %188 = arith.addf %185, %187 : vector<8x256xf32>
    %189 = math.tanh %188 : vector<8x256xf32>
    %190 = arith.mulf %183, %189 : vector<8x256xf32>
    %c48_47 = arith.constant 48 : index
    %c0_48 = arith.constant 0 : index
    %191 = vector.load %arg14[%c48_47, %c0_48] : memref<64x256xf32, #tpu.memory_space<vmem>>, vector<8x256xf32>
    tpu.vector_store %arg14[%c48_47, %c0_48], %190 {strides = array<i32>} : memref<64x256xf32, #tpu.memory_space<vmem>>, vector<8x256xf32>,
    %c56 = arith.constant 56 : index
    %c0_49 = arith.constant 0 : index
    %192 = vector.load %arg13[%c56, %c0_49] : memref<64x1024xf32, #tpu.memory_space<vmem>>, vector<8x1024xf32>
    %193 = arith.truncf %190 : vector<8x256xf32> to vector<8x256xbf16>
    %cst_50 = arith.constant dense<0.000000e+00> : vector<8x1024xf32>
    %194 = tpu.matmul %193, %7, %cst_50 {dimension_numbers = #tpu.dot_dimension_numbers<[1], [0], [0], [1], [0, 0, 1, 1], [], []>} : vector<8x256xbf16>, vector<256x1024xbf16>, vector<8x1024xf32> -> vector<8x1024xf32>
    %195 = arith.addf %192, %194 : vector<8x1024xf32>
    %196 = vector.extract_strided_slice %195 {offsets = [0, 0], sizes = [8, 512], strides = [1, 1]} : vector<8x1024xf32> to vector<8x512xf32>
    %197 = arith.negf %196 : vector<8x512xf32>
    %198 = math.exp %197 : vector<8x512xf32>
    %cst_51 = arith.constant 1.000000e+00 : f32
    %199 = vector.broadcast %cst_51 : f32 to vector<8x512xf32>
    %200 = arith.addf %199, %198 : vector<8x512xf32>
    %201 = arith.divf %199, %200 : vector<8x512xf32>
    %202 = vector.extract_strided_slice %195 {offsets = [0, 512], sizes = [8, 256], strides = [1, 1]} : vector<8x1024xf32> to vector<8x256xf32>
    %203 = math.tanh %202 : vector<8x256xf32>
    %204 = vector.extract_strided_slice %195 {offsets = [0, 768], sizes = [8, 256], strides = [1, 1]} : vector<8x1024xf32> to vector<8x256xf32>
    %205 = arith.negf %204 : vector<8x256xf32>
    %206 = math.exp %205 : vector<8x256xf32>
    %cst_52 = arith.constant 1.000000e+00 : f32
    %207 = vector.broadcast %cst_52 : f32 to vector<8x256xf32>
    %208 = arith.addf %207, %206 : vector<8x256xf32>
    %209 = arith.divf %207, %208 : vector<8x256xf32>
    %210 = vector.extract_strided_slice %201 {offsets = [0, 256], sizes = [8, 256], strides = [1, 1]} : vector<8x512xf32> to vector<8x256xf32>
    %211 = arith.mulf %210, %188 : vector<8x256xf32>
    %212 = vector.extract_strided_slice %201 {offsets = [0, 0], sizes = [8, 256], strides = [1, 1]} : vector<8x512xf32> to vector<8x256xf32>
    %213 = arith.mulf %212, %203 : vector<8x256xf32>
    %214 = arith.addf %211, %213 : vector<8x256xf32>
    %215 = math.tanh %214 : vector<8x256xf32>
    %216 = arith.mulf %209, %215 : vector<8x256xf32>
    %c56_53 = arith.constant 56 : index
    %c0_54 = arith.constant 0 : index
    %217 = vector.load %arg14[%c56_53, %c0_54] : memref<64x256xf32, #tpu.memory_space<vmem>>, vector<8x256xf32>
    tpu.vector_store %arg14[%c56_53, %c0_54], %216 {strides = array<i32>} : memref<64x256xf32, #tpu.memory_space<vmem>>, vector<8x256xf32>,
    %c5_i32 = arith.constant 5 : i32
    %218 = arith.cmpi eq, %arg0, %c5_i32 : i32
    %219 = arith.extui %218 : i1 to i32
    %c0_i32_55 = arith.constant 0 : i32
    %220 = arith.cmpi ne, %219, %c0_i32_55 : i32
    scf.if %220 {
      %c0_56 = arith.constant 0 : index
      %c0_57 = arith.constant 0 : index
      %221 = vector.load %arg14[%c0_56, %c0_57] : memref<64x256xf32, #tpu.memory_space<vmem>>, vector<64x256xf32>
      %222 = arith.truncf %221 : vector<64x256xf32> to vector<64x256xbf16>
      %c0_58 = arith.constant 0 : index
      %c0_59 = arith.constant 0 : index
      %223 = vector.load %arg6[%c0_58, %c0_59] : memref<256x256xbf16, #tpu.memory_space<vmem>>, vector<256x256xbf16>
      %cst_60 = arith.constant dense<0.000000e+00> : vector<64x256xf32>
      %224 = tpu.matmul %222, %223, %cst_60 {dimension_numbers = #tpu.dot_dimension_numbers<[1], [0], [0], [1], [0, 0, 1, 1], [], []>} : vector<64x256xbf16>, vector<256x256xbf16>, vector<64x256xf32> -> vector<64x256xf32>
      %c0_61 = arith.constant 0 : index
      %c0_62 = arith.constant 0 : index
      %225 = vector.load %arg7[%c0_61, %c0_62] : memref<1x256xf32, #tpu.memory_space<vmem>>, vector<1x256xf32>
      %226 = vector.broadcast %225 : vector<1x256xf32> to vector<64x256xf32>
      %227 = arith.addf %224, %226 : vector<64x256xf32>
      %228 = math.tanh %227 : vector<64x256xf32>
      %229 = arith.truncf %228 : vector<64x256xf32> to vector<64x256xbf16>
      %c0_63 = arith.constant 0 : index
      %c0_64 = arith.constant 0 : index
      %230 = vector.load %arg8[%c0_63, %c0_64] : memref<256x256xbf16, #tpu.memory_space<vmem>>, vector<256x256xbf16>
      %cst_65 = arith.constant dense<0.000000e+00> : vector<64x256xf32>
      %231 = tpu.matmul %229, %230, %cst_65 {dimension_numbers = #tpu.dot_dimension_numbers<[1], [0], [0], [1], [0, 0, 1, 1], [], []>} : vector<64x256xbf16>, vector<256x256xbf16>, vector<64x256xf32> -> vector<64x256xf32>
      %c0_66 = arith.constant 0 : index
      %c0_67 = arith.constant 0 : index
      %232 = vector.load %arg9[%c0_66, %c0_67] : memref<1x256xf32, #tpu.memory_space<vmem>>, vector<1x256xf32>
      %233 = vector.broadcast %232 : vector<1x256xf32> to vector<64x256xf32>
      %234 = arith.addf %231, %233 : vector<64x256xf32>
      %235 = math.tanh %234 : vector<64x256xf32>
      %236 = arith.truncf %235 : vector<64x256xf32> to vector<64x256xbf16>
      %c0_68 = arith.constant 0 : index
      %c0_69 = arith.constant 0 : index
      %237 = vector.load %arg10[%c0_68, %c0_69] : memref<256x128xbf16, #tpu.memory_space<vmem>>, vector<256x128xbf16>
      %cst_70 = arith.constant dense<0.000000e+00> : vector<64x128xf32>
      %238 = tpu.matmul %236, %237, %cst_70 {dimension_numbers = #tpu.dot_dimension_numbers<[1], [0], [0], [1], [0, 0, 1, 1], [], []>} : vector<64x256xbf16>, vector<256x128xbf16>, vector<64x128xf32> -> vector<64x128xf32>
      %c0_71 = arith.constant 0 : index
      %c0_72 = arith.constant 0 : index
      %239 = vector.load %arg11[%c0_71, %c0_72] : memref<1x128xf32, #tpu.memory_space<vmem>>, vector<1x128xf32>
      %240 = vector.broadcast %239 : vector<1x128xf32> to vector<64x128xf32>
      %241 = arith.addf %238, %240 : vector<64x128xf32>
      %c0_73 = arith.constant 0 : index
      %c0_74 = arith.constant 0 : index
      %242 = vector.load %arg12[%c0_73, %c0_74] : memref<64x128xf32, #tpu.memory_space<vmem>>, vector<64x128xf32>
      tpu.vector_store %arg12[%c0_73, %c0_74], %241 {strides = array<i32>} : memref<64x128xf32, #tpu.memory_space<vmem>>, vector<64x128xf32>,
    } else {
    }
    return
  }
  func.func @transform_0(%arg0: i32) -> (i32, i32) {
    %c0_i32 = arith.constant 0 : i32
    %c0_i32_0 = arith.constant 0 : i32
    %c0_i32_1 = arith.constant 0 : i32
    return %c0_i32, %c0_i32_0 : i32, i32
  }
  func.func @transform_1(%arg0: i32) -> (i32, i32) {
    %c0_i32 = arith.constant 0 : i32
    %c0_i32_0 = arith.constant 0 : i32
    %c0_i32_1 = arith.constant 0 : i32
    return %c0_i32, %c0_i32_0 : i32, i32
  }
  func.func @transform_2(%arg0: i32) -> (i32, i32, i32) {
    %c0_i32 = arith.constant 0 : i32
    %c0_i32_0 = arith.constant 0 : i32
    %c0_i32_1 = arith.constant 0 : i32
    return %arg0, %c0_i32, %c0_i32_0 : i32, i32, i32
  }
  func.func @transform_3(%arg0: i32) -> (i32, i32, i32) {
    %c0_i32 = arith.constant 0 : i32
    %c0_i32_0 = arith.constant 0 : i32
    %c0_i32_1 = arith.constant 0 : i32
    return %arg0, %c0_i32, %c0_i32_0 : i32, i32, i32
  }
  func.func @transform_4(%arg0: i32) -> (i32, i32, i32) {
    %c0_i32 = arith.constant 0 : i32
    %c0_i32_0 = arith.constant 0 : i32
    %c0_i32_1 = arith.constant 0 : i32
    return %arg0, %c0_i32, %c0_i32_0 : i32, i32, i32
  }
  func.func @transform_5(%arg0: i32) -> (i32, i32) {
    %c0_i32 = arith.constant 0 : i32
    %c0_i32_0 = arith.constant 0 : i32
    %c0_i32_1 = arith.constant 0 : i32
    return %c0_i32, %c0_i32_0 : i32, i32
  }
  func.func @transform_6(%arg0: i32) -> (i32, i32) {
    %c0_i32 = arith.constant 0 : i32
    %c0_i32_0 = arith.constant 0 : i32
    %c0_i32_1 = arith.constant 0 : i32
    return %c0_i32, %c0_i32_0 : i32, i32
  }
  func.func @transform_7(%arg0: i32) -> (i32, i32) {
    %c0_i32 = arith.constant 0 : i32
    %c0_i32_0 = arith.constant 0 : i32
    %c0_i32_1 = arith.constant 0 : i32
    return %c0_i32, %c0_i32_0 : i32, i32
  }
  func.func @transform_8(%arg0: i32) -> (i32, i32) {
    %c0_i32 = arith.constant 0 : i32
    %c0_i32_0 = arith.constant 0 : i32
    %c0_i32_1 = arith.constant 0 : i32
    return %c0_i32, %c0_i32_0 : i32, i32
  }
  func.func @transform_9(%arg0: i32) -> (i32, i32) {
    %c0_i32 = arith.constant 0 : i32
    %c0_i32_0 = arith.constant 0 : i32
    %c0_i32_1 = arith.constant 0 : i32
    return %c0_i32, %c0_i32_0 : i32, i32
  }
  func.func @transform_10(%arg0: i32) -> (i32, i32) {
    %c0_i32 = arith.constant 0 : i32
    %c0_i32_0 = arith.constant 0 : i32
    %c0_i32_1 = arith.constant 0 : i32
    return %c0_i32, %c0_i32_0 : i32, i32
  }
  func.func @transform_11(%arg0: i32) -> (i32, i32) {
    %c0_i32 = arith.constant 0 : i32
    %c0_i32_0 = arith.constant 0 : i32
    %c0_i32_1 = arith.constant 0 : i32
    return %c0_i32, %c0_i32_0 : i32, i32
  }
}

</mosaic_0001>

<bundles_post_ra>
// kernel: critic_forward_pallas.1
= control target key start
LH: loop header
LB: loop body
LE: loop exit
PB: predicated region body
PF: predicated region fallthrough
CT: control target
= control target key end

     0   :  { %s9794_s0 = inlined_call_operand.vmem [shape: f32[64,32], index: 0, kind: input, shape index: {}]   ;;  %s9795_s1 = inlined_call_operand.hbm [shape: bf16[32,1024], index: 1, kind: input, shape index: {}]   ;;  %s9796_s2 = inlined_call_operand.hbm [shape: bf16[6,256,1024], index: 2, kind: input, shape index: {}]   ;;  %s9797_s3 = inlined_call_operand.hbm [shape: bf16[6,256,1024], index: 3, kind: input, shape index: {}]   ;;  %s9798_s4 = inlined_call_operand.hbm [shape: f32[6,1,1024], index: 4, kind: input, shape index: {}]   ;;  %s9799_s5 = inlined_call_operand.hbm [shape: bf16[256,256], index: 5, kind: input, shape index: {}]   ;;  %s9800_s6 = inlined_call_operand.hbm [shape: f32[1,256], index: 6, kind: input, shape index: {}]   ;;  %s9801_s7 = inlined_call_operand.hbm [shape: bf16[256,256], index: 7, kind: input, shape index: {}]   ;;  %s9802_s8 = inlined_call_operand.hbm [shape: f32[1,256], index: 8, kind: input, shape index: {}]   ;;  %s9803_s9 = inlined_call_operand.hbm [shape: bf16[256,128], index: 9, kind: input, shape index: {}]   ;;  %s9804_s10 = inlined_call_operand.hbm [shape: f32[1,128], index: 10, kind: input, shape index: {}]   ;;  %s9805_s11 = inlined_call_operand.vmem [shape: f32[64,128], index: 11, kind: output, shape index: {}]  }
   0x1   :  { %10099 = sst [smem:[#allocation160_spill]] %s9794_s0 }
   0x2   :  { %10100 = sst [smem:[#allocation161_spill]] %s9796_s2 }
   0x3   :  { %10101 = sst [smem:[#allocation162_spill]] %s9799_s5 }
   0x4   :  { %10102 = sst [smem:[#allocation163_spill]] %s9800_s6 }
   0x5   :  { %10103 = sst [smem:[#allocation164_spill]] %s9802_s8 }
   0x6   :  { %10104 = sst [smem:[#allocation165_spill]] %s9805_s11 }
   0x7   :  { %16 = vsyncpa [#allocation5], 0 }
   0x8   :  { %17 = vsyncpa [#allocation7], 0 }
   0x9   :  { %19 = vsyncpa [#allocation7 + $0x1], 0 }
   0xa   :  { %20 = vsyncpa [#allocation10], 0 }
   0xb   :  { %22 = vsyncpa [#allocation10 + $0x1], 0 }
   0xc   :  { %23 = vsyncpa [#allocation13], 0 }
   0xd   :  { %24 = vsyncpa [#allocation16], 0 }
   0xe   :  { %25 = vsyncpa [#allocation19], 0  ;;  %s7387_s17 = smov 0   ;;  %s7389_s18 = smov 0  }
   0xf   :  { %s7391_s19 = smov 0   ;;  %s7393_s20 = smov 0  }
  0x10 LB: > { %10105 = sst [smem:[#allocation27_spill]] %s7299_s18  ;;  %s7309_s21 = smov [#allocation11]   ;;  %s7307_s20 = sphi %s7393_s20, %s10856_s20   ;;  %s7303_s19 = sphi %s7391_s19, %s10860_s19   ;;  %s7299_s18 = sphi %s7389_s18, %s10859_s18   ;;  %s7295_s17 = sphi %s7387_s17, %s10857_s17  }
  0x11   : > { %s331_s22 = sshll.u32 %s7309_s21, 4  ;;  %s7408_s23 = sadd.s32 4294967295, %s7307_s20   ;;  %s7414_s22 = int_to_ptr.vmem [resolvable:$true] %s331_s22 }
  0x12   : > { %p5893_p0 = scmp.ge.s32.totalorder %s7307_s20, 1  ;;  %p9812_p1 = scmp.eq.s32.totalorder %s7408_s23, 0 }
  0x13   : > { %p303_p2 = scmp.lt.s32.totalorder %s7307_s20, 7  ;;  %s7310_s25 = smov [#allocation12]  }
  0x14   : > { %s345_s26 = sshll.u32 %s7310_s25, 4  ;;  %s7311_s28 = smov [#allocation15]   ;;  %s7428_s26 = int_to_ptr.vmem [resolvable:$true] %s345_s26 }
  0x15   : > { %p7416_p4 = pnand %p5893_p0, %p303_p2  ;;  %s369_s29 = sshll.u32 %s7311_s28, 4  ;;  %s7430_s29 = int_to_ptr.vmem [resolvable:$true] %s369_s29 }
  0x16   : > { %s10109_s5 = sld [smem:[#allocation162_spill]] }
  0x17   : > { %s10106_s24 = scalar_select %p7416_p4, 1, 0 }
  0x18   : > { %p6437_p5 = pneg %p7416_p4 }
  0x19   : > { %10107 = sst [smem:[#allocation28_spill]] %s10106_s24 }
  0x1a   : > { %p7424_p6 = pnand %p6437_p5, %p9812_p1 }
  0x1c   : > { %s10108_s27 = scalar_select %p7424_p6, 1, 0 }
  0x1d   : > { %s6963_s13 = scalar_lea.hbm %s10109_s5, 4096  ;;  %p7440_p8 = pneg %p7424_p6 }
  0x1e   : > { %p6964_p7 = scmp.ne.s32.totalorder %s10109_s5, %s6963_s13  ;;  %p6970_p11 = scmp.lt.u32.totalorder %s6963_s13, %s10109_s5 }
  0x1f   : > { %s10110_s16 = scalar_select %p7440_p8, 1, 0 }
  0x20   : > { %p6966_p9 = pnand %p7440_p8, %p6964_p7 }
  0x22   : > { %p6967_p10 = pneg %p6966_p9 }
  0x24   : > { %p6972_p12 = pnand %p6970_p11, %p6967_p10 }
  0x26   : > { %6975 = shalt.err (!%p6972_p12)
}
  0x27   : > { %s6976_s28 = scalar_lea.vmem %s7414_s22, 4096  ;;  %p6984_p5 = scmp.lt.s32.totalorder %s7414_s22, %s7414_s22 }
  0x28   : > { %p6977_p13 = scmp.ne.s32.totalorder %s7414_s22, %s6976_s28  ;;  %p6985_p3 = scmp.lt.s32.totalorder %s6976_s28, %s6976_s28 }
  0x2a   : > { %p6979_p0 = pnand %p6977_p13, %p7440_p8  ;;  %p6986_p7 = por %p6985_p3, %p6984_p5 }
  0x2c   : > { %p6980_p2 = pneg %p6979_p0 }
  0x2e   : > { %p6987_p9 = pnand %p6986_p7, %p6980_p2 }
  0x30   : > { %6990 = shalt.err (!%p6987_p9)
}
  0x31   : > { %s9810_s30 = smov 128   ;;  %s9811_s12 = smov 8  }
  0x32   : > { %6443 = dma.hbm_to_vmem [thread:$0]  (!%p7424_p6), %s10109_s5, 4096, %s7414_s22, [#allocation10], %s9810_s30, %s9810_s30, %s9811_s12  }
  0x33   : > { %s10111_s6 = sld [smem:[#allocation163_spill]] }
  0x39   : > { %s6991_s25 = scalar_lea.hbm %s10111_s6, 32 }
  0x3a   : > { %p6992_p3 = scmp.ne.s32.totalorder %s10111_s6, %s6991_s25  ;;  %p6998_p12 = scmp.lt.u32.totalorder %s6991_s25, %s10111_s6 }
  0x3c   : > { %p6994_p10 = pnand %p6992_p3, %p7440_p8 }
  0x3e   : > { %p6995_p11 = pneg %p6994_p10 }
  0x40   : > { %p7000_p13 = pnand %p6998_p12, %p6995_p11 }
  0x42   : > { %7003 = shalt.err (!%p7000_p13)
}
  0x43   : > { %s7004_s22 = scalar_lea.vmem %s7428_s26, 32  ;;  %p7012_p7 = scmp.lt.s32.totalorder %s7428_s26, %s7428_s26 }
  0x44   : > { %p7005_p0 = scmp.ne.s32.totalorder %s7428_s26, %s7004_s22  ;;  %p7013_p9 = scmp.lt.s32.totalorder %s7004_s22, %s7004_s22 }
  0x46   : > { %p7007_p2 = pnand %p7005_p0, %p7440_p8  ;;  %p7014_p3 = por %p7013_p9, %p7012_p7 }
  0x48   : > { %p7008_p5 = pneg %p7007_p2 }
  0x4a   : > { %p7015_p10 = pnand %p7014_p3, %p7008_p5 }
  0x4c   : > { %7018 = shalt.err (!%p7015_p10)
}
  0x4d   : > { %6446 = dma.hbm_to_vmem [thread:$0]  (!%p7424_p6), %s10111_s6, 32, %s7428_s26, [#allocation13]  }
  0x4e   : > { %s10112_s8 = sld [smem:[#allocation164_spill]] }
  0x54   : > { %s7019_s14 = scalar_lea.hbm %s10112_s8, 32 }
  0x55   : > { %p7020_p11 = scmp.ne.s32.totalorder %s10112_s8, %s7019_s14  ;;  %p7026_p0 = scmp.lt.u32.totalorder %s7019_s14, %s10112_s8 }
  0x57   : > { %p7022_p12 = pnand %p7020_p11, %p7440_p8 }
  0x59   : > { %p7023_p13 = pneg %p7022_p12 }
  0x5b   : > { %p7028_p2 = pnand %p7026_p0, %p7023_p13 }
  0x5d   : > { %7031 = shalt.err (!%p7028_p2)
}
  0x5e   : > { %s7032_s26 = scalar_lea.vmem %s7430_s29, 32  ;;  %p7040_p3 = scmp.lt.s32.totalorder %s7430_s29, %s7430_s29 }
  0x5f   : > { %p7033_p5 = scmp.ne.s32.totalorder %s7430_s29, %s7032_s26  ;;  %p7041_p10 = scmp.lt.s32.totalorder %s7032_s26, %s7032_s26 }
  0x61   : > { %p7035_p7 = pnand %p7033_p5, %p7440_p8  ;;  %p7042_p11 = por %p7041_p10, %p7040_p3 }
  0x63   : > { %p7036_p9 = pneg %p7035_p7 }
  0x65   : > { %p7043_p12 = pnand %p7042_p11, %p7036_p9 }
  0x67   : > { %7046 = shalt.err (!%p7043_p12)
}
  0x68   : > { %6452 = dma.hbm_to_vmem [thread:$0]  (!%p7424_p6), %s10112_s8, 32, %s7430_s29, [#allocation16]  }
  0x69   : > { %s7511_s11 = sadd.s32 1, %s7307_s20   ;;  %s80_s13 = sadd.s32 1, %s7303_s19 }
  0x6a   : > { %10113 = sst [smem:[#allocation29_spill]] %s7511_s11  ;;  %s77_s24 = ssub.s32 %s7307_s20, %s7511_s11 }
  0x6b   : > { %p78_p13 = scmp.eq.s32.totalorder %s77_s24, 0  ;;  %p87_p0 = scmp.ne.s32.totalorder %s7303_s19, %s7299_s18 }
  0x6c   : > { %p88_p2 = scmp.eq.s32.totalorder %s7307_s20, 0  ;;  %p93_p5 = scmp.ne.s32.totalorder %s7299_s18, %s7295_s17 }
  0x6d   : > { %s7522_s14 = scalar_select %p78_p13, %s7303_s19, %s80_s13  }
  0x6e   : > { %p89_p7 = por %p88_p2, %p87_p0  ;;  %p7526_p9 = por %p9812_p1, %p93_p5 }
  0x6f   : > { %10114 = sst [smem:[#allocation30_spill]] %s7522_s14  ;;  %p6476_p3 = scmp.lt.s32.totalorder %s7307_s20, 6 }
  0x70   : > { %s10115_s15 = scalar_select %p7526_p9, 1, 0 }
  0x71   : > { %s9814_s29 = sand.u32 1, %s7307_s20   ;;  %s9809_s21 = sand.u32 1, %s7303_s19  }
  0x72   : > { %10116 = sst [smem:[#allocation31_spill]] %s10115_s15  ;;  %s7535_s25 = sshll.u32 %s9809_s21, 10 }
  0x73   : > { %s6344_s28 = sshll.u32 %s7307_s20, 14  ;;  %s10117_s2 = sld [smem:[#allocation161_spill]] }
  0x74   : > { %s408_s0 = scalar_lea.vmem [#allocation6], %s7535_s25  ;;  %p7544_p10 = pnand %p6476_p3, %p89_p7 }
  0x75   : > { %s415_s24 = sshll.u32 %s408_s0, 4  ;;  %s7553_s12 = scalar_lea.hbm %s9797_s3, %s6344_s28  ;;  %s7548_s24 = int_to_ptr.vmem [resolvable:$true] %s415_s24 }
  0x76   : > { %s10118_s13 = scalar_select %p7544_p10, 1, 0 }
  0x77   : > { %s7557_s26 = scalar_lea.sflag [#allocation7], %s9814_s29  ;;  %p7563_p12 = pneg %p7544_p10 }
  0x79   : > { %s7541_s17 = scalar_lea.hbm %s10117_s2, %s6344_s28  ;;  %s7052_s30 = scalar_lea.hbm %s10117_s2, 98304 }
  0x7a   : > { %s7047_s22 = scalar_lea.hbm %s7541_s17, 16384  ;;  %p7053_p2 = scmp.lt.u32.totalorder %s7541_s17, %s10117_s2 }
  0x7b   : > { %p7048_p11 = scmp.ne.s32.totalorder %s7541_s17, %s7047_s22  ;;  %p7054_p5 = scmp.lt.u32.totalorder %s7052_s30, %s7047_s22 }
  0x7c   : > { %s10119_s0 = scalar_select %p7563_p12, 1, 0 }
  0x7d   : > { %p7050_p13 = pnand %p7563_p12, %p7048_p11  ;;  %p7055_p7 = por %p7054_p5, %p7053_p2 }
  0x7e   : > { %p7056_p3 = scmp.lt.u32.totalorder %s7047_s22, %s7541_s17 }
  0x7f   : > { %p7051_p0 = pneg %p7050_p13 }
  0x80   : > { %p7057_p1 = por %p7056_p3, %p7055_p7 }
  0x82   : > { %p7058_p9 = pnand %p7057_p1, %p7051_p0 }
  0x84   : > { %7061 = shalt.err (!%p7058_p9)
}
  0x85   : > { %s7062_s29 = scalar_lea.vmem %s7548_s24, 16384  ;;  %s7314_s5 = smov [#allocation6]  }
  0x86   : > { %p7063_p11 = scmp.ne.s32.totalorder %s7548_s24, %s7062_s29  ;;  %s7067_s6 = sshll.u32 %s7314_s5, 4  ;;  %s7068_s6 = int_to_ptr.vmem [resolvable:$false] %s7067_s6 }
  0x87   : > { %s7069_s21 = scalar_lea.vmem %s7068_s6, 32768  ;;  %p7070_p6 = scmp.lt.s32.totalorder %s7548_s24, %s7068_s6 }
  0x88   : > { %p7065_p13 = pnand %p7063_p11, %p7563_p12  ;;  %p7071_p8 = scmp.lt.s32.totalorder %s7069_s21, %s7062_s29 }
  0x8a   : > { %p7066_p4 = pneg %p7065_p13  ;;  %p7072_p2 = por %p7071_p8, %p7070_p6 }
  0x8c   : > { %p7073_p5 = pnand %p7072_p2, %p7066_p4 }
  0x8e   : > { %7076 = shalt.err (!%p7073_p5)
}
  0x8f   : > { %s9829_s22 = smov 512   ;;  %s9830_s30 = smov 32  }
  0x90   : > { %6462 = dma.hbm_to_vmem [thread:$0]  (!%p7544_p10), %s7541_s17, 16384, %s7548_s24, %s7557_s26, %s9829_s22, %s9829_s22, %s9830_s30  }
  0x91   : > { %s429_s28 = scalar_lea.vmem [#allocation8], %s7535_s25  ;;  %s7317_s29 = smov [#allocation4]  }
  0x92   : > { %s436_s5 = sshll.u32 %s429_s28, 4  ;;  %s318_s6 = sshll.u32 %s7317_s29, 4  ;;  %s7591_s5 = int_to_ptr.vmem [resolvable:$true] %s436_s5  ;;  %s319_s6 = int_to_ptr.vmem [resolvable:$true] %s318_s6 }
  0x93   : > { %s7077_s8 = scalar_lea.hbm %s9795_s1, 2048  ;;  %p10120_p4 = scmp.ne.s32.totalorder %s10110_s16, 0 }
  0x94   : > { %p7078_p1 = scmp.ne.s32.totalorder %s9795_s1, %s7077_s8  ;;  %p7084_p9 = scmp.lt.u32.totalorder %s7077_s8, %s9795_s1 }
  0x96   : > { %p7080_p6 = pnand %p7078_p1, %p10120_p4 }
  0x98   : > { %p7081_p8 = pneg %p7080_p6 }
  0x9a   : > { %p7086_p0 = pnand %p7084_p9, %p7081_p8 }
  0x9c   : > { %7089 = shalt.err (!%p7086_p0)
}
  0x9d   : > { %s7090_s25 = scalar_lea.vmem %s319_s6, 2048  ;;  %p7098_p13 = scmp.lt.s32.totalorder %s319_s6, %s319_s6 }
  0x9e   : > { %p7091_p7 = scmp.ne.s32.totalorder %s319_s6, %s7090_s25  ;;  %p7099_p2 = scmp.lt.s32.totalorder %s7090_s25, %s7090_s25 }
  0xa0   : > { %p7093_p3 = pnand %p7091_p7, %p10120_p4  ;;  %p7100_p5 = por %p7099_p2, %p7098_p13 }
  0xa2   : > { %p7094_p11 = pneg %p7093_p3 }
  0xa4   : > { %p7101_p10 = pnand %p7100_p5, %p7094_p11 }
  0xa6   : > { %7104 = shalt.err (!%p7101_p10)
}
  0xa7   : > { %p10121_p1 = scmp.ne.s32.totalorder %s10108_s27, 0  ;;  %s7318_s11 = smov [#allocation14]  }
  0xa8   : > { %s355_s14 = sshll.u32 %s7318_s11, 4  ;;  %s7319_s15 = smov [#allocation17]   ;;  %s356_s14 = int_to_ptr.vmem [resolvable:$true] %s355_s14 }
  0xa9   : > { %6440 = dma.hbm_to_vmem [thread:$0]  (!%p10121_p1), %s9795_s1, 2048, %s319_s6, [#allocation5], %s9829_s22, %s9829_s22, %s9830_s30  }
  0xaa   : > { %s379_s24 = sshll.u32 %s7319_s15, 4  ;;  %s7105_s21 = scalar_lea.hbm %s9801_s7, 4096  ;;  %s380_s24 = int_to_ptr.vmem [resolvable:$true] %s379_s24 }
  0xab   : > { %p7106_p10 = scmp.ne.s32.totalorder %s9801_s7, %s7105_s21  ;;  %p7112_p9 = scmp.lt.u32.totalorder %s7105_s21, %s9801_s7 }
  0xad   : > { %p7108_p6 = pnand %p7106_p10, %p10120_p4 }
  0xaf   : > { %p7109_p8 = pneg %p7108_p6 }
  0xb1   : > { %p7114_p0 = pnand %p7112_p9, %p7109_p8 }
  0xb3   : > { %7117 = shalt.err (!%p7114_p0)
}
  0xb4   : > { %s7118_s6 = scalar_lea.vmem %s356_s14, 4096  ;;  %p7126_p13 = scmp.lt.s32.totalorder %s356_s14, %s356_s14 }
  0xb5   : > { %p7119_p7 = scmp.ne.s32.totalorder %s356_s14, %s7118_s6  ;;  %p7127_p2 = scmp.lt.s32.totalorder %s7118_s6, %s7118_s6 }
  0xb7   : > { %p7121_p3 = pnand %p7119_p7, %p10120_p4  ;;  %p7128_p5 = por %p7127_p2, %p7126_p13 }
  0xb9   : > { %p7122_p11 = pneg %p7121_p3 }
  0xbb   : > { %p7129_p12 = pnand %p7128_p5, %p7122_p11 }
  0xbd   : > { %7132 = shalt.err (!%p7129_p12)
}
  0xbe   : > { %s10122_s8 = smov 8   ;;  %s10123_s11 = smov 128  }
  0xbf   : > { %6449 = dma.hbm_to_vmem [thread:$0]  (!%p10121_p1), %s9801_s7, 4096, %s356_s14, [#allocation13], %s10123_s11, %s10123_s11, %s10122_s8  }
  0xc0   : > { %s7133_s21 = scalar_lea.hbm %s9803_s9, 2048 }
  0xc1   : > { %p7134_p10 = scmp.ne.s32.totalorder %s9803_s9, %s7133_s21  ;;  %p7140_p8 = scmp.lt.u32.totalorder %s7133_s21, %s9803_s9 }
  0xc3   : > { %p7136_p12 = pnand %p7134_p10, %p10120_p4 }
  0xc5   : > { %p7137_p6 = pneg %p7136_p12 }
  0xc7   : > { %p7142_p9 = pnand %p7140_p8, %p7137_p6 }
  0xc9   : > { %7145 = shalt.err (!%p7142_p9)
}
  0xca   : > { %s7146_s18 = scalar_lea.vmem %s380_s24, 2048  ;;  %p7154_p11 = scmp.lt.s32.totalorder %s380_s24, %s380_s24 }
  0xcb   : > { %p7147_p0 = scmp.ne.s32.totalorder %s380_s24, %s7146_s18  ;;  %p7155_p13 = scmp.lt.s32.totalorder %s7146_s18, %s7146_s18 }
  0xcd   : > { %p7149_p7 = pnand %p7147_p0, %p10120_p4  ;;  %p7156_p2 = por %p7155_p13, %p7154_p11 }
  0xcf   : > { %p7150_p3 = pneg %p7149_p7 }
  0xd1   : > { %p7157_p5 = pnand %p7156_p2, %p7150_p3 }
  0xd3   : > { %7160 = shalt.err (!%p7157_p5)
}
  0xd4   : > { %s7320_s14 = smov 64   ;;  %s7321_s8 = smov 4  }
  0xd5   : > { %6455 = dma.hbm_to_vmem [thread:$0]  (!%p10121_p1), %s9803_s9, 2048, %s380_s24, [#allocation16], %s7320_s14, %s7320_s14, %s7321_s8  }
  0xd6   : > { %s7322_s28 = smov [#allocation18]   ;;  %s10124_s21 = sand.u32 1, %s7303_s19  }
  0xd7   : > { %s393_s29 = sshll.u32 %s7322_s28, 4  ;;  %s7655_s17 = sshll.u32 %s10124_s21, 3  ;;  %s394_s29 = int_to_ptr.vmem [resolvable:$true] %s393_s29 }
  0xd8   : > { %s7161_s6 = scalar_lea.hbm %s9804_s10, 16 }
  0xd9   : > { %p7162_p10 = scmp.ne.s32.totalorder %s9804_s10, %s7161_s6  ;;  %p7168_p8 = scmp.lt.u32.totalorder %s7161_s6, %s9804_s10 }
  0xdb   : > { %p7164_p12 = pnand %p7162_p10, %p10120_p4 }
  0xdd   : > { %p7165_p6 = pneg %p7164_p12 }
  0xdf   : > { %p7170_p9 = pnand %p7168_p8, %p7165_p6 }
  0xe1   : > { %7173 = shalt.err (!%p7170_p9)
}
  0xe2   : > { %s7174_s24 = scalar_lea.vmem %s394_s29, 16  ;;  %s7181_s14 = scalar_lea.vmem %s394_s29, 32 }
  0xe3   : > { %p7175_p0 = scmp.ne.s32.totalorder %s394_s29, %s7174_s24  ;;  %p7182_p11 = scmp.lt.s32.totalorder %s394_s29, %s394_s29 }
  0xe4   : > { %p7183_p13 = scmp.lt.s32.totalorder %s7181_s14, %s7174_s24 }
  0xe5   : > { %p7177_p7 = pnand %p7175_p0, %p10120_p4 }
  0xe6   : > { %p7184_p2 = por %p7183_p13, %p7182_p11 }
  0xe7   : > { %p7178_p3 = pneg %p7177_p7 }
  0xe9   : > { %p7185_p5 = pnand %p7184_p2, %p7178_p3 }
  0xeb   : > { %7188 = shalt.err (!%p7185_p5)
}
  0xec   : > { %6458 = dma.hbm_to_vmem [thread:$0]  (!%p10121_p1), %s9804_s10, 16, %s394_s29, [#allocation19]  }
  0xed   : > { %s7189_s16 = scalar_lea.hbm %s7553_s12, 16384  ;;  %p10125_p10 = scmp.ne.s32.totalorder %s10119_s0, 0 }
  0xee   : > { %p7190_p4 = scmp.ne.s32.totalorder %s7553_s12, %s7189_s16  ;;  %s7194_s28 = scalar_lea.hbm %s9797_s3, 98304 }
  0xef   : > { %p7195_p8 = scmp.lt.u32.totalorder %s7553_s12, %s9797_s3  ;;  %p7196_p9 = scmp.lt.u32.totalorder %s7194_s28, %s7189_s16 }
  0xf0   : > { %p7192_p12 = pnand %p7190_p4, %p10125_p10  ;;  %p7198_p7 = scmp.lt.u32.totalorder %s7189_s16, %s7553_s12 }
  0xf1   : > { %p7197_p0 = por %p7196_p9, %p7195_p8 }
  0xf2   : > { %p7193_p6 = pneg %p7192_p12 }
  0xf3   : > { %p7199_p3 = por %p7198_p7, %p7197_p0 }
  0xf5   : > { %p7200_p11 = pnand %p7199_p3, %p7193_p6 }
  0xf7   : > { %7203 = shalt.err (!%p7200_p11)
}
  0xf8   : > { %s7204_s29 = scalar_lea.vmem %s7591_s5, 16384  ;;  %s7323_s25 = smov [#allocation8]  }
  0xf9   : > { %p7205_p1 = scmp.ne.s32.totalorder %s7591_s5, %s7204_s29  ;;  %s7209_s2 = sshll.u32 %s7323_s25, 4  ;;  %s7210_s2 = int_to_ptr.vmem [resolvable:$false] %s7209_s2 }
  0xfa   : > { %s7211_s6 = scalar_lea.vmem %s7210_s2, 32768  ;;  %p7212_p5 = scmp.lt.s32.totalorder %s7591_s5, %s7210_s2 }
  0xfb   : > { %p7207_p13 = pnand %p7205_p1, %p10125_p10  ;;  %p7213_p4 = scmp.lt.s32.totalorder %s7211_s6, %s7204_s29 }
  0xfd   : > { %p7208_p2 = pneg %p7207_p13  ;;  %p7214_p12 = por %p7213_p4, %p7212_p5 }
  0xff   : > { %p7215_p8 = pnand %p7214_p12, %p7208_p2 }
 0x101   : > { %7218 = shalt.err (!%p7215_p8)
}
 0x102   : > { %p10126_p6 = scmp.ne.s32.totalorder %s10118_s13, 0  ;;  %s10127_s18 = smov 32  }
 0x103   : > { %s10128_s11 = smov 512   ;;  %s6346_s24 = sshll.u32 %s7307_s20, 7 }
 0x104   : > { %6465 = dma.hbm_to_vmem [thread:$0]  (!%p10126_p6), %s7553_s12, 16384, %s7591_s5, %s7557_s26, %s10128_s11, %s10128_s11, %s10127_s18  }
 0x105   : > { %s7704_s8 = scalar_lea.hbm %s9798_s4, %s6346_s24  ;;  %s450_s16 = scalar_lea.vmem [#allocation9], %s7655_s17 }
 0x106   : > { %s458_s30 = sshll.u32 %s450_s16, 4  ;;  %s10129_s15 = sand.u32 1, %s7307_s20   ;;  %s459_s30 = int_to_ptr.vmem [resolvable:$true] %s458_s30 }
 0x107   : > { %s447_s28 = scalar_lea.sflag [#allocation10], %s10129_s15  ;;  %s7219_s21 = scalar_lea.hbm %s7704_s8, 128 }
 0x108   : > { %p7220_p9 = scmp.ne.s32.totalorder %s7704_s8, %s7219_s21  ;;  %s7224_s5 = scalar_lea.hbm %s9798_s4, 768 }
 0x109   : > { %p7225_p3 = scmp.lt.u32.totalorder %s7704_s8, %s9798_s4  ;;  %p7226_p11 = scmp.lt.u32.totalorder %s7224_s5, %s7219_s21 }
 0x10a   : > { %p7222_p0 = pnand %p7220_p9, %p10125_p10  ;;  %p7228_p13 = scmp.lt.u32.totalorder %s7219_s21, %s7704_s8 }
 0x10b   : > { %p7227_p1 = por %p7226_p11, %p7225_p3 }
 0x10c   : > { %p7223_p7 = pneg %p7222_p0 }
 0x10d   : > { %p7229_p2 = por %p7228_p13, %p7227_p1 }
 0x10f   : > { %p7230_p5 = pnand %p7229_p2, %p7223_p7 }
 0x111   : > { %7233 = shalt.err (!%p7230_p5)
}
 0x112   : > { %s7234_s20 = scalar_lea.vmem %s459_s30, 128  ;;  %s7324_s17 = smov [#allocation9]  }
 0x113   : > { %p7235_p4 = scmp.ne.s32.totalorder %s459_s30, %s7234_s20  ;;  %s7239_s25 = sshll.u32 %s7324_s17, 4  ;;  %s7240_s25 = int_to_ptr.vmem [resolvable:$false] %s7239_s25 }
 0x114   : > { %s7241_s2 = scalar_lea.vmem %s7240_s25, 256  ;;  %p7242_p9 = scmp.lt.s32.totalorder %s459_s30, %s7240_s25 }
 0x115   : > { %p7237_p12 = pnand %p7235_p4, %p10125_p10  ;;  %p7243_p0 = scmp.lt.s32.totalorder %s7241_s2, %s7234_s20 }
 0x117   : > { %p7238_p8 = pneg %p7237_p12  ;;  %p7244_p6 = por %p7243_p0, %p7242_p9 }
 0x119   : > { %p7245_p3 = pnand %p7244_p6, %p7238_p8 }
 0x11b   : > { %7248 = shalt.err (!%p7245_p3)
}
 0x11c   : > { %p10130_p11 = scmp.ne.s32.totalorder %s10118_s13, 0  ;;  %s10131_s6 = sld [smem:[#allocation28_spill]] }
 0x11e   : > { %6468 = dma.hbm_to_vmem [thread:$0]  (!%p10130_p11), %s7704_s8, 128, %s459_s30, %s447_s28  }
 0x122   : > { %p10132_p7 = scmp.ne.s32.totalorder %s10131_s6, 0 }
 0x124   : > { %467 = sbr.rel (%p10132_p7) target bundleno = 4255 (0x109f), region = 64 }
 0x12b   : > { %p10133_p1 = scmp.eq.s32.totalorder %s7408_s23, 0 }
 0x12d   : > { %7266 = dma.done.wait (%p10133_p1), [#allocation5], 2048   ;;  %p10134_p10 = pmov %p10133_p1 }
 0x12e   : > { %s10135_s0 = sld [smem:[#allocation27_spill]]  ;;  %s10136_s18 = sld [smem:[#allocation31_spill]] }
 0x12f   : > { %7268 = vsyncadd (%p10134_p10), [#allocation5], 4294965248  ;;  %s473_s11 = sand.u32 1, %s7408_s23  }
 0x130   : > { %s474_s22 = scalar_lea.sflag [#allocation7], %s473_s11 }
 0x134   : > { %s475_s24 = sand.u32 1, %s10135_s0   ;;  %p10137_p6 = scmp.ne.s32.totalorder %s10136_s18, 0 }
 0x135   : > { %s5913_s14 = sshll.u32 %s475_s24, 10 }
 0x136   : > { %s7734_s16 = scalar_lea.vmem [#allocation6], %s5913_s14 }
 0x137   : > { %7270 = dma.done.wait (%p10137_p6), %s474_s22, 32768  }
 0x138   : > { %7272 = vsyncadd (%p10137_p6), %s474_s22, 4294934528  ;;  %s7740_s13 = sshll.u32 %s475_s24, 3  ;;  %s7742_s8 = scalar_lea.vmem [#allocation8], %s5913_s14 }
 0x139   : > { %s492_s30 = scalar_lea.sflag [#allocation10], %s473_s11  ;;  %s495_s15 = scalar_lea.vmem [#allocation9], %s7740_s13 }
 0x13a   : > { %7274 = dma.done.wait (%p10137_p6), %s492_s30, 128  }
 0x13b   : > { %7276 = vsyncadd (%p10137_p6), %s492_s30, 4294967168  ;;  %p10138_p13 = pmov %p10133_p1 }
 0x13c   : > { %p10139_p2 = pmov %p10133_p1 }
 0x13d   : > { %7278 = dma.done.wait (%p10138_p13), [#allocation10], 4096  }
 0x13e   : > { %7280 = vsyncadd (%p10139_p2), [#allocation10], 4294963200  ;;  %p10140_p5 = pmov %p10133_p1 }
 0x13f   : > { %p10141_p4 = pmov %p10133_p1 }
 0x140   : > { %7282 = dma.done.wait (%p10140_p5), [#allocation13], 4128  }
 0x141   : > { %7284 = vsyncadd (%p10141_p4), [#allocation13], 4294963168  ;;  %p10142_p12 = pmov %p10133_p1 }
 0x142   : > { %p10143_p8 = pmov %p10133_p1 }
 0x143   : > { %7286 = dma.done.wait (%p10142_p12), [#allocation16], 2080  }
 0x144   : > { %7288 = vsyncadd (%p10143_p8), [#allocation16], 4294965216  ;;  %p10144_p9 = pmov %p10133_p1 }
 0x145   : > { %p10145_p0 = pmov %p10133_p1 }
 0x146   : > { %7290 = dma.done.wait (%p10144_p9), [#allocation19], 16  }
 0x147   : > { %7292 = vsyncadd (%p10145_p0), [#allocation19], 4294967280  ;;  %p10146_p3 = scmp.ne.s32.totalorder %s7408_s23, 0 }
 0x148   : > { %v580_v0 = vld [vmem:[#allocation4] sm:$0xff] (!%p10146_p3)  ;;  %v581_v2 = vld [vmem:[#allocation4 + $0x8] sm:$0xff] (!%p10146_p3)  ;;  %v7325_v8 = vmov (!%p10146_p3), 0   ;;  %s10147_s12 = sld [smem:[#allocation160_spill]] (!%p10146_p3)  ;;  %v582_v16 = vld [vmem:[#allocation4 + $0x10] sm:$0xff] (!%p10146_p3)  ;;  %vm718_vm0 = vcmask (!%p10146_p3), 261120   ;;  %v598_v45 = vlaneseq (!%p10146_p3) }
 0x149   : > { %567 = sbr.rel (%p10146_p3) target bundleno = 614 (0x266), region = 108  ;;  %v584_v1 = vld [vmem:[#allocation4 + $0x20] sm:$0xff] (!%p10146_p3)  ;;  %v585_v4 = vld [vmem:[#allocation4 + $0x28] sm:$0xff] (!%p10146_p3)  ;;  %763 = vmatprep.mubr.bf16.mxu0 (!%p10146_p3), %v7325_v8  ;;  %836 = vmatprep.mubr.bf16.mxu1 (!%p10146_p3), %v7325_v8  ;;  %v586_v17 = vld [vmem:[#allocation4 + $0x30] sm:$0xff] (!%p10146_p3) }
 0x14a   : > { %v5924_v3 = vcombine.high (!%p10146_p3), %v580_v0, %v584_v1  ;;  %v5923_v5 = vcombine.low (!%p10146_p3), %v580_v0, %v584_v1  ;;  %v588_v6 = vld [vmem:[#allocation4 + $0x40] sm:$0xff] (!%p10146_p3)  ;;  %v5926_v9 = vcombine.high (!%p10146_p3), %v581_v2, %v585_v4  ;;  %v5925_v10 = vcombine.low (!%p10146_p3), %v581_v2, %v585_v4  ;;  %v589_v12 = vld [vmem:[#allocation4 + $0x48] sm:$0xff] (!%p10146_p3)  ;;  %v583_v20 = vld [vmem:[#allocation4 + $0x18] sm:$0xff] (!%p10146_p3) }
 0x14b   : > { %v592_v7 = vld [vmem:[#allocation4 + $0x60] sm:$0xff] (!%p10146_p3)  ;;  %v593_v13 = vld [vmem:[#allocation4 + $0x68] sm:$0xff] (!%p10146_p3)  ;;  %v587_v21 = vld [vmem:[#allocation4 + $0x38] sm:$0xff] (!%p10146_p3)  ;;  %v5928_v23 = vcombine.high (!%p10146_p3), %v582_v16, %v586_v17  ;;  %v5927_v28 = vcombine.low (!%p10146_p3), %v582_v16, %v586_v17  ;;  %v7823_v46 = vshrl.u32 (!%p10146_p3), %v598_v45, 7 }
 0x14c   : > { %v5932_v11 = vcombine.high (!%p10146_p3), %v588_v6, %v592_v7  ;;  %731 = vmatprep.subr.bf16.mxu0 (!%p10146_p3), %v5924_v3  ;;  %v5934_v14 = vcombine.high (!%p10146_p3), %v589_v12, %v593_v13  ;;  %804 = vmatprep.subr.bf16.mxu1 (!%p10146_p3), %v5926_v9  ;;  %v5931_v18 = vcombine.low (!%p10146_p3), %v588_v6, %v592_v7  ;;  %v590_v26 = vld [vmem:[#allocation4 + $0x50] sm:$0xff] (!%p10146_p3)  ;;  %v591_v29 = vld [vmem:[#allocation4 + $0x58] sm:$0xff] (!%p10146_p3)  ;;  %v7828_v48 = vld [vmem:[%s495_s15] sm:$0xff] (!%p10146_p3) }
 0x14d   : > { %732 = vmatpush1.bf16.msra.mxu0 (!%p10146_p3), %v5923_v5  ;;  %805 = vmatpush1.bf16.msra.mxu1 (!%p10146_p3), %v5925_v10  ;;  %v5933_v22 = vcombine.low (!%p10146_p3), %v589_v12, %v593_v13  ;;  %v5930_v24 = vcombine.high (!%p10146_p3), %v583_v20, %v587_v21  ;;  %v594_v27 = vld [vmem:[#allocation4 + $0x70] sm:$0xff] (!%p10146_p3)  ;;  %v595_v30 = vld [vmem:[#allocation4 + $0x78] sm:$0xff] (!%p10146_p3)  ;;  %v5929_v31 = vcombine.low (!%p10146_p3), %v583_v20, %v587_v21  ;;  %v600_v47 = vsub.s32 (!%p10146_p3), 0, %v7823_v46 }
 0x14e   : > { %v568_v15 = vld [vmem:[%s10147_s12] sm:$0xff] (!%p10146_p3)  ;;  %v569_v19 = vld [vmem:[%s10147_s12 + $0x8] sm:$0xff] (!%p10146_p3)  ;;  %733 = vmatprep.subr.bf16.mxu0 (!%p10146_p3), %v5932_v11  ;;  %806 = vmatprep.subr.bf16.mxu1 (!%p10146_p3), %v5934_v14  ;;  %v5936_v32 = vcombine.high (!%p10146_p3), %v590_v26, %v594_v27  ;;  %v5938_v33 = vcombine.high (!%p10146_p3), %v591_v29, %v595_v30  ;;  %v570_v34 = vld [vmem:[%s10147_s12 + $0x10] sm:$0xff] (!%p10146_p3)  ;;  %v5935_v36 = vcombine.low (!%p10146_p3), %v590_v26, %v594_v27  ;;  %v608_v49 = vsub.s32 (!%p10146_p3), 2, %v7823_v46 }
 0x14f   : > { %v576_v25 = vpack.c.bf16 (!%p10146_p3), %v569_v19, %v568_v15  ;;  %v571_v35 = vld [vmem:[%s10147_s12 + $0x18] sm:$0xff] (!%p10146_p3)  ;;  %v5937_v37 = vcombine.low (!%p10146_p3), %v591_v29, %v595_v30  ;;  %v572_v39 = vld [vmem:[%s10147_s12 + $0x20] sm:$0xff] (!%p10146_p3)  ;;  %v573_v40 = vld [vmem:[%s10147_s12 + $0x28] sm:$0xff] (!%p10146_p3)  ;;  %v604_v50 = vsub.s32 (!%p10146_p3), 1, %v7823_v46  ;;  %v612_v51 = vsub.s32 (!%p10146_p3), 3, %v7823_v46 }
 0x150   : > { %v577_v38 = vpack.c.bf16 %v571_v35, %v570_v34  ;;  %v578_v41 = vpack.c.bf16 %v573_v40, %v572_v39  ;;  %v574_v42 = vld [vmem:[%s10147_s12 + $0x30] sm:$0xff]  ;;  %v575_v43 = vld [vmem:[%s10147_s12 + $0x38] sm:$0xff]  ;;  %v7834_v52 = vrot.slane %v7828_v48, %v600_v47  ;;  %v7837_v53 = vrot.slane %v7828_v48, %v608_v49 }
 0x151   : > { %734 = vmatpush1.bf16.msra.mxu0 %v5931_v18  ;;  %807 = vmatpush1.bf16.msra.mxu1 %v5933_v22  ;;  %v579_v44 = vpack.c.bf16 %v575_v43, %v574_v42  ;;  %v7840_v54 = vrot.slane %v7828_v48, %v604_v50  ;;  %v7843_v55 = vrot.slane %v7828_v48, %v612_v51  ;;  %v624_v51 = vsub.s32 6, %v7823_v46 }
 0x152   : > { %877 = vmatprep.subr.bf16.mxu0 %v5928_v23  ;;  %950 = vmatprep.subr.bf16.mxu1 %v5930_v24 }
 0x154   : > { %5939 = vmatmul.mubr.msk.bf16.vlgmr.msra.gmra.mrb[0].mxu0 %vm718_vm0, %v576_v25  ;;  %5943 = vmatmul.mubr.msk.bf16.vlgmr.msra.gmra.mrb[0].mxu1 %vm718_vm0, %v576_v25 }
 0x155   : > { %878 = vmatpush1.bf16.msra.mxu0 %v5927_v28  ;;  %951 = vmatpush1.bf16.msra.mxu1 %v5929_v31 }
 0x156   : > { %773 = vmatprep.mubr.bf16.mxu0 %v7325_v8  ;;  %846 = vmatprep.mubr.bf16.mxu1 %v7325_v8 }
 0x157   : > { %879 = vmatprep.subr.bf16.mxu0 %v5936_v32  ;;  %952 = vmatprep.subr.bf16.mxu1 %v5938_v33 }
 0x159   : > { %880 = vmatpush1.bf16.msra.mxu0 %v5935_v36  ;;  %953 = vmatpush1.bf16.msra.mxu1 %v5937_v37 }
 0x15c   : > { %5940 = vmatmul.mubr.msk.bf16.gmra.mrb[4].mxu0 %vm718_vm0, %v577_v38  ;;  %5944 = vmatmul.mubr.msk.bf16.gmra.mrb[4].mxu1 %vm718_vm0, %v577_v38 }
 0x15d   : > { %783 = vmatprep.mubr.bf16.mxu0 %v7325_v8  ;;  %856 = vmatprep.mubr.bf16.mxu1 %v7325_v8 }
 0x164   : > { %5941 = vmatmul.mubr.msk.bf16.gmra.mrb[8].mxu0 %vm718_vm0, %v578_v41  ;;  %5945 = vmatmul.mubr.msk.bf16.gmra.mrb[8].mxu1 %vm718_vm0, %v578_v41 }
 0x165   : > { %793 = vmatprep.mubr.bf16.mxu0 %v7325_v8  ;;  %866 = vmatprep.mubr.bf16.mxu1 %v7325_v8 }
 0x16c   : > { %5942 = vmatmul.mubr.msk.bf16.gmra.mrb[12].mxu0 %vm718_vm0, %v579_v44  ;;  %5946 = vmatmul.mubr.msk.bf16.gmra.mrb[12].mxu1 %vm718_vm0, %v579_v44 }
 0x16d   : > { %909 = vmatprep.mubr.bf16.mxu0 %v7325_v8  ;;  %982 = vmatprep.mubr.bf16.mxu1 %v7325_v8 }
 0x174   : > { %5947 = vmatmul.mubr.msk.bf16.vlgmr.msra.gmra.mrb[16].mxu0 %vm718_vm0, %v576_v25  ;;  %5951 = vmatmul.mubr.msk.bf16.vlgmr.msra.gmra.mrb[16].mxu1 %vm718_vm0, %v576_v25 }
 0x175   : > { %919 = vmatprep.mubr.bf16.mxu0 %v7325_v8  ;;  %992 = vmatprep.mubr.bf16.mxu1 %v7325_v8 }
 0x17c   : > { %5948 = vmatmul.mubr.msk.bf16.gmra.mrb[20].mxu0 %vm718_vm0, %v577_v38  ;;  %5952 = vmatmul.mubr.msk.bf16.gmra.mrb[20].mxu1 %vm718_vm0, %v577_v38 }
 0x17d   : > { %929 = vmatprep.mubr.bf16.mxu0 %v7325_v8  ;;  %1002 = vmatprep.mubr.bf16.mxu1 %v7325_v8 }
 0x184   : > { %5949 = vmatmul.mubr.msk.bf16.gmra.mrb[24].mxu0 %vm718_vm0, %v578_v41  ;;  %5953 = vmatmul.mubr.msk.bf16.gmra.mrb[24].mxu1 %vm718_vm0, %v578_v41 }
 0x185   : > { %939 = vmatprep.mubr.bf16.mxu0 %v7325_v8  ;;  %1012 = vmatprep.mubr.bf16.mxu1 %v7325_v8 }
 0x18c   : > { %5950 = vmatmul.mubr.msk.bf16.gmra.mrb[28].mxu0 %vm718_vm0, %v579_v44  ;;  %5954 = vmatmul.mubr.msk.bf16.gmra.mrb[28].mxu1 %vm718_vm0, %v579_v44  ;;  %v616_v44 = vsub.s32 4, %v7823_v46 }
 0x227   : > { %v765_v56 = vpop.f32.mrb[0].mxu0  ;;  %v838_v58 = vpop.f32.mrb[0].mxu1 }
 0x228   : > { %v766_v57 = vadd.f32 %v765_v56, %v7834_v52  ;;  %v767_v59 = vpop.f32.mrb[1].mxu0  ;;  %v839_v60 = vadd.f32 %v838_v58, %v7837_v53  ;;  %v840_v62 = vpop.f32.mrb[1].mxu1  ;;  %v620_v56 = vsub.s32 5, %v7823_v46 }
 0x229   : > { %v768_v61 = vadd.f32 %v767_v59, %v7840_v54  ;;  %v769_v63 = vpop.f32.mrb[2].mxu0  ;;  %v841_v0 = vadd.f32 %v840_v62, %v7843_v55  ;;  %v842_v2 = vpop.f32.mrb[2].mxu1 }
 0x22a   : > { %1023 = vst [vmem:[#allocation2] sm:$0xff] %v766_v57  ;;  %v770_v1 = vadd.f32 %v769_v63, %v7834_v52  ;;  %v771_v3 = vpop.f32.mrb[3].mxu0  ;;  %1025 = vst [vmem:[#allocation2 + $0x10] sm:$0xff] %v839_v60  ;;  %v843_v4 = vadd.f32 %v842_v2, %v7837_v53  ;;  %v844_v6 = vpop.f32.mrb[3].mxu1  ;;  %v7882_v2 = vrot.slane %v7828_v48, %v616_v44 }
 0x22b   : > { %1024 = vst [vmem:[#allocation2 + $0x8] sm:$0xff] %v768_v61  ;;  %v772_v5 = vadd.f32 %v771_v3, %v7840_v54  ;;  %1026 = vst [vmem:[#allocation2 + $0x18] sm:$0xff] %v841_v0  ;;  %v845_v7 = vadd.f32 %v844_v6, %v7843_v55  ;;  %v628_v61 = vsub.s32 7, %v7823_v46  ;;  %v7888_v46 = vrot.slane %v7828_v48, %v620_v56 }
 0x22c   : > { %1031 = vst [vmem:[#allocation2 + $0x40] sm:$0xff] %v770_v1  ;;  %1033 = vst [vmem:[#allocation2 + $0x50] sm:$0xff] %v843_v4 }
 0x22d   : > { %1032 = vst [vmem:[#allocation2 + $0x48] sm:$0xff] %v772_v5  ;;  %1034 = vst [vmem:[#allocation2 + $0x58] sm:$0xff] %v845_v7 }
 0x22f   : > { %v775_v8 = vpop.f32.mrb[4].mxu0  ;;  %v848_v10 = vpop.f32.mrb[4].mxu1 }
 0x230   : > { %v776_v9 = vadd.f32 %v775_v8, %v7834_v52  ;;  %v777_v11 = vpop.f32.mrb[5].mxu0  ;;  %v849_v12 = vadd.f32 %v848_v10, %v7837_v53  ;;  %v850_v14 = vpop.f32.mrb[5].mxu1 }
 0x231   : > { %v778_v13 = vadd.f32 %v777_v11, %v7840_v54  ;;  %v779_v15 = vpop.f32.mrb[6].mxu0  ;;  %v851_v16 = vadd.f32 %v850_v14, %v7843_v55  ;;  %v852_v18 = vpop.f32.mrb[6].mxu1 }
 0x232   : > { %1039 = vst [vmem:[#allocation2 + $0x80] sm:$0xff] %v776_v9  ;;  %v780_v17 = vadd.f32 %v779_v15, %v7834_v52  ;;  %v781_v19 = vpop.f32.mrb[7].mxu0  ;;  %1041 = vst [vmem:[#allocation2 + $0x90] sm:$0xff] %v849_v12  ;;  %v853_v20 = vadd.f32 %v852_v18, %v7837_v53  ;;  %v854_v22 = vpop.f32.mrb[7].mxu1 }
 0x233   : > { %1040 = vst [vmem:[#allocation2 + $0x88] sm:$0xff] %v778_v13  ;;  %v782_v21 = vadd.f32 %v781_v19, %v7840_v54  ;;  %1042 = vst [vmem:[#allocation2 + $0x98] sm:$0xff] %v851_v16  ;;  %v855_v23 = vadd.f32 %v854_v22, %v7843_v55 }
 0x234   : > { %1047 = vst [vmem:[#allocation2 + $0xc0] sm:$0xff] %v780_v17  ;;  %1049 = vst [vmem:[#allocation2 + $0xd0] sm:$0xff] %v853_v20 }
 0x235   : > { %1048 = vst [vmem:[#allocation2 + $0xc8] sm:$0xff] %v782_v21  ;;  %1050 = vst [vmem:[#allocation2 + $0xd8] sm:$0xff] %v855_v23 }
 0x237   : > { %v785_v24 = vpop.f32.mrb[8].mxu0  ;;  %v858_v26 = vpop.f32.mrb[8].mxu1 }
 0x238   : > { %v786_v25 = vadd.f32 %v785_v24, %v7834_v52  ;;  %v787_v27 = vpop.f32.mrb[9].mxu0  ;;  %v859_v28 = vadd.f32 %v858_v26, %v7837_v53  ;;  %v860_v30 = vpop.f32.mrb[9].mxu1 }
 0x239   : > { %v788_v29 = vadd.f32 %v787_v27, %v7840_v54  ;;  %v789_v31 = vpop.f32.mrb[10].mxu0  ;;  %v861_v32 = vadd.f32 %v860_v30, %v7843_v55  ;;  %v862_v34 = vpop.f32.mrb[10].mxu1 }
 0x23a   : > { %1055 = vst [vmem:[#allocation2 + $0x100] sm:$0xff] %v786_v25  ;;  %v790_v33 = vadd.f32 %v789_v31, %v7834_v52  ;;  %v791_v35 = vpop.f32.mrb[11].mxu0  ;;  %1057 = vst [vmem:[#allocation2 + $0x110] sm:$0xff] %v859_v28  ;;  %v863_v36 = vadd.f32 %v862_v34, %v7837_v53  ;;  %v864_v38 = vpop.f32.mrb[11].mxu1 }
 0x23b   : > { %1056 = vst [vmem:[#allocation2 + $0x108] sm:$0xff] %v788_v29  ;;  %v792_v37 = vadd.f32 %v791_v35, %v7840_v54  ;;  %1058 = vst [vmem:[#allocation2 + $0x118] sm:$0xff] %v861_v32  ;;  %v865_v39 = vadd.f32 %v864_v38, %v7843_v55 }
 0x23c   : > { %1063 = vst [vmem:[#allocation2 + $0x140] sm:$0xff] %v790_v33  ;;  %1065 = vst [vmem:[#allocation2 + $0x150] sm:$0xff] %v863_v36 }
 0x23d   : > { %1064 = vst [vmem:[#allocation2 + $0x148] sm:$0xff] %v792_v37  ;;  %1066 = vst [vmem:[#allocation2 + $0x158] sm:$0xff] %v865_v39 }
 0x23f   : > { %v795_v40 = vpop.f32.mrb[12].mxu0  ;;  %v868_v42 = vpop.f32.mrb[12].mxu1 }
 0x240   : > { %v796_v41 = vadd.f32 %v795_v40, %v7834_v52  ;;  %v797_v43 = vpop.f32.mrb[13].mxu0  ;;  %v869_v45 = vadd.f32 %v868_v42, %v7837_v53  ;;  %v870_v49 = vpop.f32.mrb[13].mxu1 }
 0x241   : > { %v798_v47 = vadd.f32 %v797_v43, %v7840_v54  ;;  %v799_v50 = vpop.f32.mrb[14].mxu0  ;;  %v871_v57 = vadd.f32 %v870_v49, %v7843_v55  ;;  %v872_v59 = vpop.f32.mrb[14].mxu1 }
 0x242   : > { %1071 = vst [vmem:[#allocation2 + $0x180] sm:$0xff] %v796_v41  ;;  %v800_v58 = vadd.f32 %v799_v50, %v7834_v52  ;;  %v801_v60 = vpop.f32.mrb[15].mxu0  ;;  %1073 = vst [vmem:[#allocation2 + $0x190] sm:$0xff] %v869_v45  ;;  %v873_v62 = vadd.f32 %v872_v59, %v7837_v53  ;;  %v874_v0 = vpop.f32.mrb[15].mxu1  ;;  %v7885_v52 = vrot.slane %v7828_v48, %v624_v51 }
 0x243   : > { %1072 = vst [vmem:[#allocation2 + $0x188] sm:$0xff] %v798_v47  ;;  %v802_v63 = vadd.f32 %v801_v60, %v7840_v54  ;;  %1074 = vst [vmem:[#allocation2 + $0x198] sm:$0xff] %v871_v57  ;;  %v875_v1 = vadd.f32 %v874_v0, %v7843_v55  ;;  %v7891_v53 = vrot.slane %v7828_v48, %v628_v61 }
 0x244   : > { %1079 = vst [vmem:[#allocation2 + $0x1c0] sm:$0xff] %v800_v58  ;;  %1081 = vst [vmem:[#allocation2 + $0x1d0] sm:$0xff] %v873_v62 }
 0x245   : > { %1080 = vst [vmem:[#allocation2 + $0x1c8] sm:$0xff] %v802_v63  ;;  %1082 = vst [vmem:[#allocation2 + $0x1d8] sm:$0xff] %v875_v1 }
 0x247   : > { %v911_v54 = vpop.f32.mrb[16].mxu0  ;;  %v984_v4 = vpop.f32.mrb[16].mxu1 }
 0x248   : > { %v912_v3 = vadd.f32 %v911_v54, %v7882_v2  ;;  %v913_v55 = vpop.f32.mrb[17].mxu0  ;;  %v985_v5 = vadd.f32 %v984_v4, %v7885_v52  ;;  %v986_v7 = vpop.f32.mrb[17].mxu1 }
 0x249   : > { %v914_v6 = vadd.f32 %v913_v55, %v7888_v46  ;;  %v915_v8 = vpop.f32.mrb[18].mxu0  ;;  %v987_v9 = vadd.f32 %v986_v7, %v7891_v53  ;;  %v988_v11 = vpop.f32.mrb[18].mxu1 }
 0x24a   : > { %1027 = vst [vmem:[#allocation2 + $0x20] sm:$0xff] %v912_v3  ;;  %v916_v10 = vadd.f32 %v915_v8, %v7882_v2  ;;  %v917_v12 = vpop.f32.mrb[19].mxu0  ;;  %1029 = vst [vmem:[#allocation2 + $0x30] sm:$0xff] %v985_v5  ;;  %v989_v48 = vadd.f32 %v988_v11, %v7885_v52  ;;  %v990_v14 = vpop.f32.mrb[19].mxu1 }
 0x24b   : > { %1028 = vst [vmem:[#allocation2 + $0x28] sm:$0xff] %v914_v6  ;;  %v918_v13 = vadd.f32 %v917_v12, %v7888_v46  ;;  %1030 = vst [vmem:[#allocation2 + $0x38] sm:$0xff] %v987_v9  ;;  %v991_v15 = vadd.f32 %v990_v14, %v7891_v53 }
 0x24c   : > { %1035 = vst [vmem:[#allocation2 + $0x60] sm:$0xff] %v916_v10  ;;  %1037 = vst [vmem:[#allocation2 + $0x70] sm:$0xff] %v989_v48 }
 0x24d   : > { %1036 = vst [vmem:[#allocation2 + $0x68] sm:$0xff] %v918_v13  ;;  %1038 = vst [vmem:[#allocation2 + $0x78] sm:$0xff] %v991_v15 }
 0x24f   : > { %v921_v16 = vpop.f32.mrb[20].mxu0  ;;  %v994_v18 = vpop.f32.mrb[20].mxu1 }
 0x250   : > { %v922_v17 = vadd.f32 %v921_v16, %v7882_v2  ;;  %v923_v19 = vpop.f32.mrb[21].mxu0  ;;  %v995_v20 = vadd.f32 %v994_v18, %v7885_v52  ;;  %v996_v22 = vpop.f32.mrb[21].mxu1 }
 0x251   : > { %v924_v21 = vadd.f32 %v923_v19, %v7888_v46  ;;  %v925_v23 = vpop.f32.mrb[22].mxu0  ;;  %v997_v24 = vadd.f32 %v996_v22, %v7891_v53  ;;  %v998_v26 = vpop.f32.mrb[22].mxu1 }
 0x252   : > { %1043 = vst [vmem:[#allocation2 + $0xa0] sm:$0xff] %v922_v17  ;;  %v926_v25 = vadd.f32 %v925_v23, %v7882_v2  ;;  %v927_v27 = vpop.f32.mrb[23].mxu0  ;;  %1045 = vst [vmem:[#allocation2 + $0xb0] sm:$0xff] %v995_v20  ;;  %v999_v28 = vadd.f32 %v998_v26, %v7885_v52  ;;  %v1000_v30 = vpop.f32.mrb[23].mxu1 }
 0x253   : > { %1044 = vst [vmem:[#allocation2 + $0xa8] sm:$0xff] %v924_v21  ;;  %v928_v29 = vadd.f32 %v927_v27, %v7888_v46  ;;  %1046 = vst [vmem:[#allocation2 + $0xb8] sm:$0xff] %v997_v24  ;;  %v1001_v31 = vadd.f32 %v1000_v30, %v7891_v53 }
 0x254   : > { %1051 = vst [vmem:[#allocation2 + $0xe0] sm:$0xff] %v926_v25  ;;  %1053 = vst [vmem:[#allocation2 + $0xf0] sm:$0xff] %v999_v28 }
 0x255   : > { %1052 = vst [vmem:[#allocation2 + $0xe8] sm:$0xff] %v928_v29  ;;  %1054 = vst [vmem:[#allocation2 + $0xf8] sm:$0xff] %v1001_v31 }
 0x257   : > { %v931_v32 = vpop.f32.mrb[24].mxu0  ;;  %v1004_v34 = vpop.f32.mrb[24].mxu1 }
 0x258   : > { %v932_v33 = vadd.f32 %v931_v32, %v7882_v2  ;;  %v933_v35 = vpop.f32.mrb[25].mxu0  ;;  %v1005_v36 = vadd.f32 %v1004_v34, %v7885_v52  ;;  %v1006_v38 = vpop.f32.mrb[25].mxu1 }
 0x259   : > { %v934_v37 = vadd.f32 %v933_v35, %v7888_v46  ;;  %v935_v39 = vpop.f32.mrb[26].mxu0  ;;  %v1007_v40 = vadd.f32 %v1006_v38, %v7891_v53  ;;  %v1008_v42 = vpop.f32.mrb[26].mxu1 }
 0x25a   : > { %1059 = vst [vmem:[#allocation2 + $0x120] sm:$0xff] %v932_v33  ;;  %v936_v41 = vadd.f32 %v935_v39, %v7882_v2  ;;  %v937_v43 = vpop.f32.mrb[27].mxu0  ;;  %1061 = vst [vmem:[#allocation2 + $0x130] sm:$0xff] %v1005_v36  ;;  %v1009_v44 = vadd.f32 %v1008_v42, %v7885_v52  ;;  %v1010_v47 = vpop.f32.mrb[27].mxu1 }
 0x25b   : > { %1060 = vst [vmem:[#allocation2 + $0x128] sm:$0xff] %v934_v37  ;;  %v938_v45 = vadd.f32 %v937_v43, %v7888_v46  ;;  %1062 = vst [vmem:[#allocation2 + $0x138] sm:$0xff] %v1007_v40  ;;  %v1011_v49 = vadd.f32 %v1010_v47, %v7891_v53 }
 0x25c   : > { %1067 = vst [vmem:[#allocation2 + $0x160] sm:$0xff] %v936_v41  ;;  %1069 = vst [vmem:[#allocation2 + $0x170] sm:$0xff] %v1009_v44 }
 0x25d   : > { %1068 = vst [vmem:[#allocation2 + $0x168] sm:$0xff] %v938_v45  ;;  %1070 = vst [vmem:[#allocation2 + $0x178] sm:$0xff] %v1011_v49 }
 0x25f   : > { %v941_v50 = vpop.f32.mrb[28].mxu0  ;;  %v1014_v56 = vpop.f32.mrb[28].mxu1 }
 0x260   : > { %v942_v51 = vadd.f32 %v941_v50, %v7882_v2  ;;  %v943_v57 = vpop.f32.mrb[29].mxu0  ;;  %v1015_v58 = vadd.f32 %v1014_v56, %v7885_v52  ;;  %v1016_v60 = vpop.f32.mrb[29].mxu1 }
 0x261   : > { %v944_v59 = vadd.f32 %v943_v57, %v7888_v46  ;;  %v945_v61 = vpop.f32.mrb[30].mxu0  ;;  %v1017_v62 = vadd.f32 %v1016_v60, %v7891_v53  ;;  %v1018_v0 = vpop.f32.mrb[30].mxu1 }
 0x262   : > { %1075 = vst [vmem:[#allocation2 + $0x1a0] sm:$0xff] %v942_v51  ;;  %v946_v63 = vadd.f32 %v945_v61, %v7882_v2  ;;  %v947_v1 = vpop.f32.mrb[31].mxu0  ;;  %1077 = vst [vmem:[#allocation2 + $0x1b0] sm:$0xff] %v1015_v58  ;;  %v1019_v54 = vadd.f32 %v1018_v0, %v7885_v52  ;;  %v1020_v4 = vpop.f32.mrb[31].mxu1 }
 0x263   : > { %1076 = vst [vmem:[#allocation2 + $0x1a8] sm:$0xff] %v944_v59  ;;  %v948_v3 = vadd.f32 %v947_v1, %v7888_v46  ;;  %1078 = vst [vmem:[#allocation2 + $0x1b8] sm:$0xff] %v1017_v62  ;;  %v1021_v55 = vadd.f32 %v1020_v4, %v7891_v53 }
 0x264   : > { %1083 = vst [vmem:[#allocation2 + $0x1e0] sm:$0xff] %v946_v63  ;;  %1085 = vst [vmem:[#allocation2 + $0x1f0] sm:$0xff] %v1019_v54 }
 0x265   : > { %1084 = vst [vmem:[#allocation2 + $0x1e8] sm:$0xff] %v948_v3  ;;  %1086 = vst [vmem:[#allocation2 + $0x1f8] sm:$0xff] %v1021_v55 }
 0x266 PF: > { %p5955_p11 = scmp.le.s32.totalorder %s7408_s23, 0 }
 0x267   : > { %v1115_v2 = vld [vmem:[%s7734_s16] sm:$0xff] (!%p5955_p11)  ;;  %v1116_v46 = vld [vmem:[%s7734_s16 + $0x8] sm:$0xff] (!%p5955_p11)  ;;  %v1094_v60 = vld [vmem:[#allocation3 + $0x18] sm:$0xff] (!%p5955_p11) }
 0x268   : > { %1090 = sbr.rel (%p5955_p11) target bundleno = 989 (0x3dd), region = 112  ;;  %v1119_v52 = vld [vmem:[%s7734_s16 + $0x20] sm:$0xff] (!%p5955_p11)  ;;  %v1120_v5 = vld [vmem:[%s7734_s16 + $0x28] sm:$0xff] (!%p5955_p11) }
 0x269   : > { %v5957_v53 = vcombine.high (!%p5955_p11), %v1115_v2, %v1119_v52  ;;  %v5956_v6 = vcombine.low (!%p5955_p11), %v1115_v2, %v1119_v52  ;;  %v1123_v7 = vld [vmem:[%s7734_s16 + $0x40] sm:$0xff] (!%p5955_p11)  ;;  %v5959_v9 = vcombine.high (!%p5955_p11), %v1116_v46, %v1120_v5  ;;  %v5958_v10 = vcombine.low (!%p5955_p11), %v1116_v46, %v1120_v5  ;;  %v1124_v12 = vld [vmem:[%s7734_s16 + $0x48] sm:$0xff] (!%p5955_p11) }
 0x26a   : > { %v1127_v8 = vld [vmem:[%s7734_s16 + $0x60] sm:$0xff] (!%p5955_p11)  ;;  %v1128_v48 = vld [vmem:[%s7734_s16 + $0x68] sm:$0xff] (!%p5955_p11) }
 0x26b   : > { %v5965_v11 = vcombine.high (!%p5955_p11), %v1123_v7, %v1127_v8  ;;  %v1131_v13 = vld [vmem:[%s7734_s16 + $0x80] sm:$0xff] (!%p5955_p11)  ;;  %1925 = vmatprep.subr.bf16.mxu0 (!%p5955_p11), %v5957_v53  ;;  %v5967_v14 = vcombine.high (!%p5955_p11), %v1124_v12, %v1128_v48  ;;  %v1132_v16 = vld [vmem:[%s7734_s16 + $0x88] sm:$0xff] (!%p5955_p11)  ;;  %1998 = vmatprep.subr.bf16.mxu1 (!%p5955_p11), %v5959_v9  ;;  %v5964_v18 = vcombine.low (!%p5955_p11), %v1123_v7, %v1127_v8 }
 0x26c   : > { %v1135_v15 = vld [vmem:[%s7734_s16 + $0xa0] sm:$0xff] (!%p5955_p11)  ;;  %v1136_v17 = vld [vmem:[%s7734_s16 + $0xa8] sm:$0xff] (!%p5955_p11)  ;;  %1926 = vmatpush1.bf16.msra.mxu0 (!%p5955_p11), %v5956_v6  ;;  %1999 = vmatpush1.bf16.msra.mxu1 (!%p5955_p11), %v5958_v10  ;;  %v5966_v19 = vcombine.low (!%p5955_p11), %v1124_v12, %v1128_v48 }
 0x26d   : > { %1927 = vmatprep.subr.bf16.mxu0 (!%p5955_p11), %v5965_v11  ;;  %v5973_v20 = vcombine.high (!%p5955_p11), %v1131_v13, %v1135_v15  ;;  %2000 = vmatprep.subr.bf16.mxu1 (!%p5955_p11), %v5967_v14  ;;  %v5975_v21 = vcombine.high (!%p5955_p11), %v1132_v16, %v1136_v17  ;;  %v1139_v22 = vld [vmem:[%s7734_s16 + $0xc0] sm:$0xff] (!%p5955_p11)  ;;  %v1140_v24 = vld [vmem:[%s7734_s16 + $0xc8] sm:$0xff] (!%p5955_p11)  ;;  %v5972_v26 = vcombine.low (!%p5955_p11), %v1131_v13, %v1135_v15 }
 0x26e   : > { %v1143_v23 = vld [vmem:[%s7734_s16 + $0xe0] sm:$0xff] (!%p5955_p11)  ;;  %v1144_v25 = vld [vmem:[%s7734_s16 + $0xe8] sm:$0xff] (!%p5955_p11)  ;;  %v5974_v27 = vcombine.low (!%p5955_p11), %v1132_v16, %v1136_v17 }
 0x26f   : > { %v5981_v28 = vcombine.high %v1139_v22, %v1143_v23  ;;  %v5983_v29 = vcombine.high %v1140_v24, %v1144_v25  ;;  %v1147_v30 = vld [vmem:[%s7734_s16 + $0x100] sm:$0xff]  ;;  %v1148_v32 = vld [vmem:[%s7734_s16 + $0x108] sm:$0xff]  ;;  %v5980_v34 = vcombine.low %v1139_v22, %v1143_v23  ;;  %v5982_v35 = vcombine.low %v1140_v24, %v1144_v25 }
 0x270   : > { %1928 = vmatpush1.bf16.msra.mxu0 %v5964_v18  ;;  %2001 = vmatpush1.bf16.msra.mxu1 %v5966_v19  ;;  %v1151_v31 = vld [vmem:[%s7734_s16 + $0x120] sm:$0xff]  ;;  %v1152_v33 = vld [vmem:[%s7734_s16 + $0x128] sm:$0xff] }
 0x271   : > { %1929 = vmatprep.subr.bf16.mxu0 %v5973_v20  ;;  %2002 = vmatprep.subr.bf16.mxu1 %v5975_v21  ;;  %v5989_v36 = vcombine.high %v1147_v30, %v1151_v31  ;;  %v5991_v37 = vcombine.high %v1148_v32, %v1152_v33  ;;  %v1155_v38 = vld [vmem:[%s7734_s16 + $0x140] sm:$0xff]  ;;  %v1156_v40 = vld [vmem:[%s7734_s16 + $0x148] sm:$0xff]  ;;  %v5988_v42 = vcombine.low %v1147_v30, %v1151_v31 }
 0x272   : > { %v1159_v39 = vld [vmem:[%s7734_s16 + $0x160] sm:$0xff]  ;;  %v1160_v41 = vld [vmem:[%s7734_s16 + $0x168] sm:$0xff]  ;;  %v5990_v43 = vcombine.low %v1148_v32, %v1152_v33 }
 0x273   : > { %v5997_v44 = vcombine.high %v1155_v38, %v1159_v39  ;;  %v5999_v45 = vcombine.high %v1156_v40, %v1160_v41  ;;  %v1163_v47 = vld [vmem:[%s7734_s16 + $0x180] sm:$0xff]  ;;  %v1164_v50 = vld [vmem:[%s7734_s16 + $0x188] sm:$0xff]  ;;  %v5996_v56 = vcombine.low %v1155_v38, %v1159_v39  ;;  %v5998_v57 = vcombine.low %v1156_v40, %v1160_v41 }
 0x274   : > { %1930 = vmatpush1.bf16.msra.mxu0 %v5972_v26  ;;  %2003 = vmatpush1.bf16.msra.mxu1 %v5974_v27  ;;  %v1167_v49 = vld [vmem:[%s7734_s16 + $0x1a0] sm:$0xff]  ;;  %v1168_v51 = vld [vmem:[%s7734_s16 + $0x1a8] sm:$0xff] }
 0x275   : > { %1931 = vmatprep.subr.bf16.mxu0 %v5981_v28  ;;  %2004 = vmatprep.subr.bf16.mxu1 %v5983_v29  ;;  %v6005_v58 = vcombine.high %v1163_v47, %v1167_v49  ;;  %v1092_v59 = vld [vmem:[#allocation3 + $0x8] sm:$0xff]  ;;  %v6007_v61 = vcombine.high %v1164_v50, %v1168_v51  ;;  %v1171_v62 = vld [vmem:[%s7734_s16 + $0x1c0] sm:$0xff]  ;;  %v6004_v3 = vcombine.low %v1163_v47, %v1167_v49 }
 0x276   : > { %v1175_v63 = vld [vmem:[%s7734_s16 + $0x1e0] sm:$0xff]  ;;  %v7956_v0 = vpack.c.bf16 %v1094_v60, %v1092_v59  ;;  %v1172_v1 = vld [vmem:[%s7734_s16 + $0x1c8] sm:$0xff]  ;;  %v6006_v4 = vcombine.low %v1164_v50, %v1168_v51 }
 0x277   : > { %v1176_v54 = vld [vmem:[%s7734_s16 + $0x1e8] sm:$0xff]  ;;  %v6013_v55 = vcombine.high %v1171_v62, %v1175_v63  ;;  %v1179_v52 = vld [vmem:[%s7734_s16 + $0x200] sm:$0xff]  ;;  %v6012_v6 = vcombine.low %v1171_v62, %v1175_v63 }
 0x278   : > { %1932 = vmatpush1.bf16.msra.mxu0 %v5980_v34  ;;  %2005 = vmatpush1.bf16.msra.mxu1 %v5982_v35  ;;  %v6015_v2 = vcombine.high %v1172_v1, %v1176_v54  ;;  %v1183_v46 = vld [vmem:[%s7734_s16 + $0x220] sm:$0xff]  ;;  %v1180_v53 = vld [vmem:[%s7734_s16 + $0x208] sm:$0xff]  ;;  %v6014_v7 = vcombine.low %v1172_v1, %v1176_v54 }
 0x279   : > { %1933 = vmatprep.subr.bf16.mxu0 %v5989_v36  ;;  %2006 = vmatprep.subr.bf16.mxu1 %v5991_v37  ;;  %v1184_v5 = vld [vmem:[%s7734_s16 + $0x228] sm:$0xff]  ;;  %v6021_v8 = vcombine.high %v1179_v52, %v1183_v46  ;;  %v1187_v10 = vld [vmem:[%s7734_s16 + $0x240] sm:$0xff]  ;;  %v6020_v13 = vcombine.low %v1179_v52, %v1183_v46  ;;  %v1117_v46 = vld [vmem:[%s7734_s16 + $0x10] sm:$0xff] }
 0x27a   : > { %1957 = vmatprep.mubr.bf16.mxu0 %v7956_v0  ;;  %2030 = vmatprep.mubr.bf16.mxu1 %v7956_v0  ;;  %v6023_v9 = vcombine.high %v1180_v53, %v1184_v5  ;;  %v1191_v11 = vld [vmem:[%s7734_s16 + $0x260] sm:$0xff]  ;;  %v1188_v12 = vld [vmem:[%s7734_s16 + $0x248] sm:$0xff]  ;;  %v6022_v14 = vcombine.low %v1180_v53, %v1184_v5  ;;  %v1121_v53 = vld [vmem:[%s7734_s16 + $0x30] sm:$0xff] }
 0x27b   : > { %v1192_v48 = vld [vmem:[%s7734_s16 + $0x268] sm:$0xff]  ;;  %v6029_v15 = vcombine.high %v1187_v10, %v1191_v11  ;;  %v1195_v17 = vld [vmem:[%s7734_s16 + $0x280] sm:$0xff]  ;;  %v6028_v21 = vcombine.low %v1187_v10, %v1191_v11  ;;  %v1118_v5 = vld [vmem:[%s7734_s16 + $0x18] sm:$0xff]  ;;  %v5961_v11 = vcombine.high %v1117_v46, %v1121_v53 }
 0x27c   : > { %1934 = vmatpush1.bf16.msra.mxu0 %v5988_v42  ;;  %2007 = vmatpush1.bf16.msra.mxu1 %v5990_v43  ;;  %v6031_v16 = vcombine.high %v1188_v12, %v1192_v48  ;;  %v1199_v18 = vld [vmem:[%s7734_s16 + $0x2a0] sm:$0xff]  ;;  %v1196_v19 = vld [vmem:[%s7734_s16 + $0x288] sm:$0xff]  ;;  %v6030_v22 = vcombine.low %v1188_v12, %v1192_v48  ;;  %v1125_v48 = vld [vmem:[%s7734_s16 + $0x50] sm:$0xff] }
 0x27d   : > { %1935 = vmatprep.subr.bf16.mxu0 %v5997_v44  ;;  %2008 = vmatprep.subr.bf16.mxu1 %v5999_v45  ;;  %v1200_v20 = vld [vmem:[%s7734_s16 + $0x2a8] sm:$0xff]  ;;  %v6037_v23 = vcombine.high %v1195_v17, %v1199_v18  ;;  %v1203_v25 = vld [vmem:[%s7734_s16 + $0x2c0] sm:$0xff]  ;;  %v6036_v29 = vcombine.low %v1195_v17, %v1199_v18  ;;  %v1098_v18 = vld [vmem:[#allocation3 + $0x38] sm:$0xff] }
 0x27e   : > { %v6039_v24 = vcombine.high %v1196_v19, %v1200_v20  ;;  %v1207_v26 = vld [vmem:[%s7734_s16 + $0x2e0] sm:$0xff]  ;;  %v1204_v27 = vld [vmem:[%s7734_s16 + $0x2c8] sm:$0xff]  ;;  %v6038_v30 = vcombine.low %v1196_v19, %v1200_v20  ;;  %v5960_v19 = vcombine.low %v1117_v46, %v1121_v53 }
 0x27f   : > { %v1208_v28 = vld [vmem:[%s7734_s16 + $0x2e8] sm:$0xff]  ;;  %v6045_v31 = vcombine.high %v1203_v25, %v1207_v26  ;;  %v1211_v33 = vld [vmem:[%s7734_s16 + $0x300] sm:$0xff]  ;;  %v6044_v37 = vcombine.low %v1203_v25, %v1207_v26  ;;  %v1134_v26 = vld [vmem:[%s7734_s16 + $0x98] sm:$0xff] }
 0x280   : > { %1936 = vmatpush1.bf16.msra.mxu0 %v5996_v56  ;;  %2009 = vmatpush1.bf16.msra.mxu1 %v5998_v57  ;;  %v6047_v32 = vcombine.high %v1204_v27, %v1208_v28  ;;  %v1215_v34 = vld [vmem:[%s7734_s16 + $0x320] sm:$0xff]  ;;  %v1212_v35 = vld [vmem:[%s7734_s16 + $0x308] sm:$0xff]  ;;  %v6046_v38 = vcombine.low %v1204_v27, %v1208_v28  ;;  %v1138_v27 = vld [vmem:[%s7734_s16 + $0xb8] sm:$0xff] }
 0x281   : > { %1937 = vmatprep.subr.bf16.mxu0 %v6005_v58  ;;  %2010 = vmatprep.subr.bf16.mxu1 %v6007_v61  ;;  %v1216_v36 = vld [vmem:[%s7734_s16 + $0x328] sm:$0xff]  ;;  %v6053_v39 = vcombine.high %v1211_v33, %v1215_v34  ;;  %v1219_v41 = vld [vmem:[%s7734_s16 + $0x340] sm:$0xff]  ;;  %v6052_v45 = vcombine.low %v1211_v33, %v1215_v34  ;;  %v5979_v33 = vcombine.high %v1134_v26, %v1138_v27  ;;  %v1141_v34 = vld [vmem:[%s7734_s16 + $0xd0] sm:$0xff] }
 0x282   : > { %v6055_v40 = vcombine.high %v1212_v35, %v1216_v36  ;;  %v1223_v42 = vld [vmem:[%s7734_s16 + $0x360] sm:$0xff]  ;;  %v1220_v43 = vld [vmem:[%s7734_s16 + $0x348] sm:$0xff]  ;;  %v6054_v47 = vcombine.low %v1212_v35, %v1216_v36  ;;  %v1145_v35 = vld [vmem:[%s7734_s16 + $0xf0] sm:$0xff] }
 0x283   : > { %v1224_v44 = vld [vmem:[%s7734_s16 + $0x368] sm:$0xff]  ;;  %v6061_v49 = vcombine.high %v1219_v41, %v1223_v42  ;;  %v1227_v51 = vld [vmem:[%s7734_s16 + $0x380] sm:$0xff]  ;;  %v6060_v59 = vcombine.low %v1219_v41, %v1223_v42  ;;  %v1142_v36 = vld [vmem:[%s7734_s16 + $0xd8] sm:$0xff]  ;;  %v5978_v42 = vcombine.low %v1134_v26, %v1138_v27 }
 0x284   : > { %1938 = vmatpush1.bf16.msra.mxu0 %v6004_v3  ;;  %2011 = vmatpush1.bf16.msra.mxu1 %v6006_v4  ;;  %v6063_v50 = vcombine.high %v1220_v43, %v1224_v44  ;;  %v1231_v56 = vld [vmem:[%s7734_s16 + $0x3a0] sm:$0xff]  ;;  %v1228_v57 = vld [vmem:[%s7734_s16 + $0x388] sm:$0xff]  ;;  %v6062_v60 = vcombine.low %v1220_v43, %v1224_v44  ;;  %v5985_v43 = vcombine.high %v1141_v34, %v1145_v35  ;;  %v1181_v26 = vld [vmem:[%s7734_s16 + $0x210] sm:$0xff] }
 0x285   : > { %1939 = vmatprep.subr.bf16.mxu0 %v6013_v55  ;;  %2012 = vmatprep.subr.bf16.mxu1 %v6015_v2  ;;  %v1232_v58 = vld [vmem:[%s7734_s16 + $0x3a8] sm:$0xff]  ;;  %v6069_v61 = vcombine.high %v1227_v51, %v1231_v56  ;;  %v1235_v63 = vld [vmem:[%s7734_s16 + $0x3c0] sm:$0xff]  ;;  %v6068_v4 = vcombine.low %v1227_v51, %v1231_v56  ;;  %v1154_v51 = vld [vmem:[%s7734_s16 + $0x138] sm:$0xff]  ;;  %v5984_v56 = vcombine.low %v1141_v34, %v1145_v35 }
 0x286   : > { %v6071_v62 = vcombine.high %v1228_v57, %v1232_v58  ;;  %v1239_v1 = vld [vmem:[%s7734_s16 + $0x3e0] sm:$0xff]  ;;  %v1236_v54 = vld [vmem:[%s7734_s16 + $0x3c8] sm:$0xff]  ;;  %v6070_v55 = vcombine.low %v1228_v57, %v1232_v58  ;;  %v1101_v58 = vld [vmem:[#allocation3 + $0x50] sm:$0xff] }
 0x287   : > { %v1240_v3 = vld [vmem:[%s7734_s16 + $0x3e8] sm:$0xff]  ;;  %v6077_v2 = vcombine.high %v1235_v63, %v1239_v1  ;;  %v1099_v57 = vld [vmem:[#allocation3 + $0x40] sm:$0xff]  ;;  %v1185_v27 = vld [vmem:[%s7734_s16 + $0x230] sm:$0xff] }
 0x288   : > { %1940 = vmatpush1.bf16.msra.mxu0 %v6012_v6  ;;  %2013 = vmatpush1.bf16.msra.mxu1 %v6014_v7  ;;  %v6079_v52 = vcombine.high %v1236_v54, %v1240_v3  ;;  %v1122_v6 = vld [vmem:[%s7734_s16 + $0x38] sm:$0xff]  ;;  %v6076_v7 = vcombine.low %v1235_v63, %v1239_v1  ;;  %v6078_v10 = vcombine.low %v1236_v54, %v1240_v3  ;;  %v1096_v17 = vld [vmem:[#allocation3 + $0x28] sm:$0xff]  ;;  %v1161_v63 = vld [vmem:[%s7734_s16 + $0x170] sm:$0xff] }
 0x289   : > { %1941 = vmatprep.subr.bf16.mxu0 %v6021_v8  ;;  %2014 = vmatprep.subr.bf16.mxu1 %v6023_v9  ;;  %v1091_v8 = vld [vmem:[#allocation3] sm:$0xff]  ;;  %v1093_v9 = vld [vmem:[#allocation3 + $0x10] sm:$0xff]  ;;  %v5963_v12 = vcombine.high %v1118_v5, %v1122_v6  ;;  %v5962_v20 = vcombine.low %v1118_v5, %v1122_v6  ;;  %v8006_v25 = vpack.c.bf16 %v1098_v18, %v1096_v17  ;;  %v1158_v1 = vld [vmem:[%s7734_s16 + $0x158] sm:$0xff] }
 0x28a   : > { %v1162_v54 = vld [vmem:[%s7734_s16 + $0x178] sm:$0xff]  ;;  %v8034_v3 = vpack.c.bf16 %v1101_v58, %v1099_v57  ;;  %v1165_v5 = vld [vmem:[%s7734_s16 + $0x190] sm:$0xff] }
 0x28b   : > { %v6003_v53 = vcombine.high %v1158_v1, %v1162_v54  ;;  %v1169_v6 = vld [vmem:[%s7734_s16 + $0x1b0] sm:$0xff]  ;;  %v1174_v18 = vld [vmem:[%s7734_s16 + $0x1d8] sm:$0xff] }
 0x28c   : > { %1942 = vmatpush1.bf16.msra.mxu0 %v6020_v13  ;;  %2015 = vmatpush1.bf16.msra.mxu1 %v6022_v14  ;;  %v1129_v13 = vld [vmem:[%s7734_s16 + $0x70] sm:$0xff]  ;;  %v1126_v14 = vld [vmem:[%s7734_s16 + $0x58] sm:$0xff] }
 0x28d   : > { %1943 = vmatprep.subr.bf16.mxu0 %v6029_v15  ;;  %2016 = vmatprep.subr.bf16.mxu1 %v6031_v16  ;;  %v8001_v15 = vpack.c.bf16 %v1093_v9, %v1091_v8  ;;  %v1130_v16 = vld [vmem:[%s7734_s16 + $0x78] sm:$0xff]  ;;  %v5968_v28 = vcombine.low %v1125_v48, %v1129_v13  ;;  %v1177_v17 = vld [vmem:[%s7734_s16 + $0x1f0] sm:$0xff] }
 0x28e   : > { %v1166_v8 = vld [vmem:[%s7734_s16 + $0x198] sm:$0xff]  ;;  %v1189_v34 = vld [vmem:[%s7734_s16 + $0x250] sm:$0xff] }
 0x28f   : > { %v1170_v9 = vld [vmem:[%s7734_s16 + $0x1b8] sm:$0xff]  ;;  %v1193_v35 = vld [vmem:[%s7734_s16 + $0x270] sm:$0xff] }
 0x290   : > { %1944 = vmatpush1.bf16.msra.mxu0 %v6028_v21  ;;  %2017 = vmatpush1.bf16.msra.mxu1 %v6030_v22  ;;  %v5969_v21 = vcombine.high %v1125_v48, %v1129_v13  ;;  %v5971_v22 = vcombine.high %v1126_v14, %v1130_v16  ;;  %v6002_v48 = vcombine.low %v1158_v1, %v1162_v54  ;;  %v1205_v57 = vld [vmem:[%s7734_s16 + $0x2d0] sm:$0xff] }
 0x291   : > { %1945 = vmatprep.subr.bf16.mxu0 %v6037_v23  ;;  %2018 = vmatprep.subr.bf16.mxu1 %v6039_v24  ;;  %v1133_v23 = vld [vmem:[%s7734_s16 + $0x90] sm:$0xff]  ;;  %v6009_v13 = vcombine.high %v1165_v5, %v1169_v6 }
 0x292   : > { %v1137_v24 = vld [vmem:[%s7734_s16 + $0xb0] sm:$0xff] }
 0x293   : > { %v5976_v41 = vcombine.low %v1133_v23, %v1137_v24  ;;  %v1209_v58 = vld [vmem:[%s7734_s16 + $0x2f0] sm:$0xff] }
 0x294   : > { %1946 = vmatpush1.bf16.msra.mxu0 %v6036_v29  ;;  %2019 = vmatpush1.bf16.msra.mxu1 %v6038_v30  ;;  %v1095_v29 = vld [vmem:[#allocation3 + $0x20] sm:$0xff]  ;;  %v1097_v30 = vld [vmem:[#allocation3 + $0x30] sm:$0xff] }
 0x295   : > { %1947 = vmatprep.subr.bf16.mxu0 %v6045_v31  ;;  %2020 = vmatprep.subr.bf16.mxu1 %v6047_v32  ;;  %v5970_v31 = vcombine.low %v1126_v14, %v1130_v16  ;;  %v5977_v32 = vcombine.high %v1133_v23, %v1137_v24  ;;  %v6011_v14 = vcombine.high %v1166_v8, %v1170_v9  ;;  %v1173_v16 = vld [vmem:[%s7734_s16 + $0x1d0] sm:$0xff] }
 0x296   : > { %v6017_v23 = vcombine.high %v1173_v16, %v1177_v17  ;;  %v1213_v54 = vld [vmem:[%s7734_s16 + $0x310] sm:$0xff] }
 0x298   : > { %1948 = vmatpush1.bf16.msra.mxu0 %v6044_v37  ;;  %2021 = vmatpush1.bf16.msra.mxu1 %v6046_v38  ;;  %v1146_v37 = vld [vmem:[%s7734_s16 + $0xf8] sm:$0xff]  ;;  %v8018_v38 = vpack.c.bf16 %v1097_v30, %v1095_v29  ;;  %v6016_v30 = vcombine.low %v1173_v16, %v1177_v17  ;;  %v1233_v16 = vld [vmem:[%s7734_s16 + $0x3b0] sm:$0xff] }
 0x299   : > { %1949 = vmatprep.subr.bf16.mxu0 %v6053_v39  ;;  %2022 = vmatprep.subr.bf16.mxu1 %v6055_v40  ;;  %v1100_v39 = vld [vmem:[#allocation3 + $0x48] sm:$0xff]  ;;  %v1102_v40 = vld [vmem:[#allocation3 + $0x58] sm:$0xff]  ;;  %v5987_v44 = vcombine.high %v1142_v36, %v1146_v37 }
 0x29a   : > { %v1186_v29 = vld [vmem:[%s7734_s16 + $0x238] sm:$0xff] }
 0x29b   : > { %v1230_v17 = vld [vmem:[%s7734_s16 + $0x398] sm:$0xff] }
 0x29c   : > { %1950 = vmatpush1.bf16.msra.mxu0 %v6052_v45  ;;  %2023 = vmatpush1.bf16.msra.mxu1 %v6054_v47  ;;  %v1149_v45 = vld [vmem:[%s7734_s16 + $0x110] sm:$0xff] }
 0x29d   : > { %1951 = vmatprep.subr.bf16.mxu0 %v6061_v49  ;;  %2024 = vmatprep.subr.bf16.mxu1 %v6063_v50  ;;  %v1153_v47 = vld [vmem:[%s7734_s16 + $0x130] sm:$0xff]  ;;  %v8022_v49 = vpack.c.bf16 %v1102_v40, %v1100_v39  ;;  %v1150_v50 = vld [vmem:[%s7734_s16 + $0x118] sm:$0xff]  ;;  %v6024_v39 = vcombine.low %v1181_v26, %v1185_v27 }
 0x2a0   : > { %1952 = vmatpush1.bf16.msra.mxu0 %v6060_v59  ;;  %2025 = vmatpush1.bf16.msra.mxu1 %v6062_v60  ;;  %v5986_v59 = vcombine.low %v1142_v36, %v1146_v37  ;;  %v5993_v60 = vcombine.high %v1149_v45, %v1153_v47  ;;  %v1190_v36 = vld [vmem:[%s7734_s16 + $0x258] sm:$0xff] }
 0x2a1   : > { %1953 = vmatprep.subr.bf16.mxu0 %v6069_v61  ;;  %2026 = vmatprep.subr.bf16.mxu1 %v6071_v62  ;;  %v5995_v61 = vcombine.high %v1150_v50, %v1154_v51  ;;  %v1157_v62 = vld [vmem:[%s7734_s16 + $0x150] sm:$0xff]  ;;  %v1194_v37 = vld [vmem:[%s7734_s16 + $0x278] sm:$0xff] }
 0x2a2   : > { %v6001_v46 = vcombine.high %v1157_v62, %v1161_v63 }
 0x2a4   : > { %1954 = vmatpush1.bf16.msra.mxu0 %v6068_v4  ;;  %2027 = vmatpush1.bf16.msra.mxu1 %v6070_v55  ;;  %v1104_v4 = vld [vmem:[#allocation3 + $0x68] sm:$0xff]  ;;  %v1106_v55 = vld [vmem:[#allocation3 + $0x78] sm:$0xff] }
 0x2a5   : > { %1955 = vmatprep.subr.bf16.mxu0 %v6077_v2  ;;  %2028 = vmatprep.subr.bf16.mxu1 %v6079_v52  ;;  %v5992_v2 = vcombine.low %v1149_v45, %v1153_v47  ;;  %v5994_v52 = vcombine.low %v1150_v50, %v1154_v51  ;;  %v1198_v45 = vld [vmem:[%s7734_s16 + $0x298] sm:$0xff]  ;;  %v6032_v50 = vcombine.low %v1189_v34, %v1193_v35 }
 0x2a6   : > { %v1202_v47 = vld [vmem:[%s7734_s16 + $0x2b8] sm:$0xff] }
 0x2a8   : > { %1956 = vmatpush1.bf16.msra.mxu0 %v6076_v7  ;;  %2029 = vmatpush1.bf16.msra.mxu1 %v6078_v10  ;;  %v8038_v7 = vpack.c.bf16 %v1106_v55, %v1104_v4  ;;  %v6000_v10 = vcombine.low %v1157_v62, %v1161_v63  ;;  %v6042_v62 = vcombine.low %v1198_v45, %v1202_v47  ;;  %v1217_v4 = vld [vmem:[%s7734_s16 + $0x330] sm:$0xff]  ;;  %v1214_v55 = vld [vmem:[%s7734_s16 + $0x318] sm:$0xff] }
 0x2a9   : > { %2071 = vmatprep.subr.bf16.mxu0 %v5961_v11  ;;  %2144 = vmatprep.subr.bf16.mxu1 %v5963_v12  ;;  %v1103_v11 = vld [vmem:[#allocation3 + $0x60] sm:$0xff]  ;;  %v1105_v12 = vld [vmem:[#allocation3 + $0x70] sm:$0xff]  ;;  %v6049_v63 = vcombine.high %v1205_v57, %v1209_v58 }
 0x2ab   : > { %1958 = vmatmul.mubr.bf16.vlgmr.msra.gmra.mrb[0].mxu0 %v8001_v15  ;;  %2031 = vmatmul.mubr.bf16.vlgmr.msra.gmra.mrb[0].mxu1 %v8001_v15 }
 0x2ac   : > { %2072 = vmatpush1.bf16.msra.mxu0 %v5960_v19  ;;  %2145 = vmatpush1.bf16.msra.mxu1 %v5962_v20  ;;  %v1178_v19 = vld [vmem:[%s7734_s16 + $0x1f8] sm:$0xff]  ;;  %v8050_v20 = vpack.c.bf16 %v1105_v12, %v1103_v11  ;;  %v6056_v11 = vcombine.low %v1213_v54, %v1217_v4 }
 0x2ad   : > { %2073 = vmatprep.subr.bf16.mxu0 %v5969_v21  ;;  %2146 = vmatprep.subr.bf16.mxu1 %v5971_v22  ;;  %v6008_v21 = vcombine.low %v1165_v5, %v1169_v6  ;;  %v6010_v22 = vcombine.low %v1166_v8, %v1170_v9  ;;  %v6019_v24 = vcombine.high %v1174_v18, %v1178_v19  ;;  %v1221_v6 = vld [vmem:[%s7734_s16 + $0x350] sm:$0xff]  ;;  %v1222_v9 = vld [vmem:[%s7734_s16 + $0x358] sm:$0xff] }
 0x2ae   : > { %1967 = vmatprep.mubr.bf16.mxu0 %v8006_v25  ;;  %2040 = vmatprep.mubr.bf16.mxu1 %v8006_v25  ;;  %v1225_v8 = vld [vmem:[%s7734_s16 + $0x370] sm:$0xff] }
 0x2b0   : > { %2074 = vmatpush1.bf16.msra.mxu0 %v5968_v28  ;;  %2147 = vmatpush1.bf16.msra.mxu1 %v5970_v31  ;;  %v1182_v28 = vld [vmem:[%s7734_s16 + $0x218] sm:$0xff]  ;;  %v6018_v31 = vcombine.low %v1174_v18, %v1178_v19  ;;  %v6064_v19 = vcombine.low %v1221_v6, %v1225_v8 }
 0x2b1   : > { %2075 = vmatprep.subr.bf16.mxu0 %v5977_v32  ;;  %2148 = vmatprep.subr.bf16.mxu1 %v5979_v33  ;;  %v6025_v32 = vcombine.high %v1181_v26, %v1185_v27  ;;  %v6027_v33 = vcombine.high %v1182_v28, %v1186_v29  ;;  %v6026_v40 = vcombine.low %v1182_v28, %v1186_v29  ;;  %v1234_v18 = vld [vmem:[%s7734_s16 + $0x3b8] sm:$0xff]  ;;  %v1241_v26 = vld [vmem:[%s7734_s16 + $0x3f0] sm:$0xff] }
 0x2b2   : > { %v1238_v27 = vld [vmem:[%s7734_s16 + $0x3d8] sm:$0xff] }
 0x2b3   : > { %1968 = vmatmul.mubr.bf16.gmra.mrb[4].mxu0 %v8018_v38  ;;  %2041 = vmatmul.mubr.bf16.gmra.mrb[4].mxu1 %v8018_v38  ;;  %v1242_v28 = vld [vmem:[%s7734_s16 + $0x3f8] sm:$0xff] }
 0x2b4   : > { %2076 = vmatpush1.bf16.msra.mxu0 %v5976_v41  ;;  %2149 = vmatpush1.bf16.msra.mxu1 %v5978_v42  ;;  %v6033_v41 = vcombine.high %v1189_v34, %v1193_v35  ;;  %v6035_v42 = vcombine.high %v1190_v36, %v1194_v37  ;;  %v6082_v34 = vcombine.low %v1238_v27, %v1242_v28  ;;  %v8107_v35 = vld [vmem:[%s495_s15] sm:$0xff] }
 0x2b5   : > { %2077 = vmatprep.subr.bf16.mxu0 %v5985_v43  ;;  %2150 = vmatprep.subr.bf16.mxu1 %v5987_v44  ;;  %v1197_v43 = vld [vmem:[%s7734_s16 + $0x290] sm:$0xff] }
 0x2b6   : > { %1977 = vmatprep.mubr.bf16.mxu0 %v8022_v49  ;;  %2050 = vmatprep.mubr.bf16.mxu1 %v8022_v49  ;;  %v1201_v44 = vld [vmem:[%s7734_s16 + $0x2b0] sm:$0xff] }
 0x2b7   : > { %v6041_v51 = vcombine.high %v1197_v43, %v1201_v44 }
 0x2b8   : > { %2078 = vmatpush1.bf16.msra.mxu0 %v5984_v56  ;;  %2151 = vmatpush1.bf16.msra.mxu1 %v5986_v59  ;;  %v6043_v56 = vcombine.high %v1198_v45, %v1202_v47  ;;  %v1206_v59 = vld [vmem:[%s7734_s16 + $0x2d8] sm:$0xff] }
 0x2b9   : > { %2079 = vmatprep.subr.bf16.mxu0 %v5993_v60  ;;  %2152 = vmatprep.subr.bf16.mxu1 %v5995_v61  ;;  %v1210_v60 = vld [vmem:[%s7734_s16 + $0x2f8] sm:$0xff]  ;;  %v6040_v61 = vcombine.low %v1197_v43, %v1201_v44 }
 0x2ba   : > { %v6051_v1 = vcombine.high %v1206_v59, %v1210_v60 }
 0x2bb   : > { %1978 = vmatmul.mubr.bf16.gmra.mrb[8].mxu0 %v8034_v3  ;;  %2051 = vmatmul.mubr.bf16.gmra.mrb[8].mxu1 %v8034_v3 }
 0x2bc   : > { %2080 = vmatpush1.bf16.msra.mxu0 %v5992_v2  ;;  %2153 = vmatpush1.bf16.msra.mxu1 %v5994_v52  ;;  %v1218_v2 = vld [vmem:[%s7734_s16 + $0x338] sm:$0xff]  ;;  %v6048_v52 = vcombine.low %v1205_v57, %v1209_v58 }
 0x2bd   : > { %2081 = vmatprep.subr.bf16.mxu0 %v6001_v46  ;;  %2154 = vmatprep.subr.bf16.mxu1 %v6003_v53  ;;  %v6050_v46 = vcombine.low %v1206_v59, %v1210_v60  ;;  %v6057_v53 = vcombine.high %v1213_v54, %v1217_v4  ;;  %v6059_v5 = vcombine.high %v1214_v55, %v1218_v2 }
 0x2be   : > { %1987 = vmatprep.mubr.bf16.mxu0 %v8038_v7  ;;  %2060 = vmatprep.mubr.bf16.mxu1 %v8038_v7  ;;  %v6058_v12 = vcombine.low %v1214_v55, %v1218_v2 }
 0x2c0   : > { %2082 = vmatpush1.bf16.msra.mxu0 %v6000_v10  ;;  %2155 = vmatpush1.bf16.msra.mxu1 %v6002_v48  ;;  %v1226_v10 = vld [vmem:[%s7734_s16 + $0x378] sm:$0xff]  ;;  %v6065_v48 = vcombine.high %v1221_v6, %v1225_v8 }
 0x2c1   : > { %2083 = vmatprep.subr.bf16.mxu0 %v6009_v13  ;;  %2156 = vmatprep.subr.bf16.mxu1 %v6011_v14  ;;  %v6067_v13 = vcombine.high %v1222_v9, %v1226_v10  ;;  %v1229_v14 = vld [vmem:[%s7734_s16 + $0x390] sm:$0xff] }
 0x2c2   : > { %v6072_v29 = vcombine.low %v1229_v14, %v1233_v16 }
 0x2c3   : > { %1988 = vmatmul.mubr.bf16.gmra.mrb[12].mxu0 %v8050_v20  ;;  %2061 = vmatmul.mubr.bf16.gmra.mrb[12].mxu1 %v8050_v20 }
 0x2c4   : > { %2084 = vmatpush1.bf16.msra.mxu0 %v6008_v21  ;;  %2157 = vmatpush1.bf16.msra.mxu1 %v6010_v22  ;;  %v6066_v21 = vcombine.low %v1222_v9, %v1226_v10  ;;  %v6073_v22 = vcombine.high %v1229_v14, %v1233_v16 }
 0x2c5   : > { %2085 = vmatprep.subr.bf16.mxu0 %v6017_v23  ;;  %2158 = vmatprep.subr.bf16.mxu1 %v6019_v24  ;;  %v6075_v23 = vcombine.high %v1230_v17, %v1234_v18  ;;  %v1237_v24 = vld [vmem:[%s7734_s16 + $0x3d0] sm:$0xff] }
 0x2c6   : > { %2103 = vmatprep.mubr.bf16.mxu0 %v7956_v0  ;;  %2176 = vmatprep.mubr.bf16.mxu1 %v7956_v0  ;;  %v6034_v0 = vcombine.low %v1190_v36, %v1194_v37 }
 0x2c8   : > { %2086 = vmatpush1.bf16.msra.mxu0 %v6016_v30  ;;  %2159 = vmatpush1.bf16.msra.mxu1 %v6018_v31  ;;  %v6074_v30 = vcombine.low %v1230_v17, %v1234_v18  ;;  %v6081_v31 = vcombine.high %v1237_v24, %v1241_v26 }
 0x2c9   : > { %2087 = vmatprep.subr.bf16.mxu0 %v6025_v32  ;;  %2160 = vmatprep.subr.bf16.mxu1 %v6027_v33  ;;  %v6083_v32 = vcombine.high %v1238_v27, %v1242_v28  ;;  %v6080_v33 = vcombine.low %v1237_v24, %v1241_v26 }
 0x2cc   : > { %2088 = vmatpush1.bf16.msra.mxu0 %v6024_v39  ;;  %2161 = vmatpush1.bf16.msra.mxu1 %v6026_v40 }
 0x2cd   : > { %2089 = vmatprep.subr.bf16.mxu0 %v6033_v41  ;;  %2162 = vmatprep.subr.bf16.mxu1 %v6035_v42 }
 0x2d0   : > { %2090 = vmatpush1.bf16.msra.mxu0 %v6032_v50  ;;  %2163 = vmatpush1.bf16.msra.mxu1 %v6034_v0 }
 0x2d1   : > { %2091 = vmatprep.subr.bf16.mxu0 %v6041_v51  ;;  %2164 = vmatprep.subr.bf16.mxu1 %v6043_v56 }
 0x2d4   : > { %2092 = vmatpush1.bf16.msra.mxu0 %v6040_v61  ;;  %2165 = vmatpush1.bf16.msra.mxu1 %v6042_v62 }
 0x2d5   : > { %2093 = vmatprep.subr.bf16.mxu0 %v6049_v63  ;;  %2166 = vmatprep.subr.bf16.mxu1 %v6051_v1 }
 0x2d8   : > { %2094 = vmatpush1.bf16.msra.mxu0 %v6048_v52  ;;  %2167 = vmatpush1.bf16.msra.mxu1 %v6050_v46 }
 0x2d9   : > { %2095 = vmatprep.subr.bf16.mxu0 %v6057_v53  ;;  %2168 = vmatprep.subr.bf16.mxu1 %v6059_v5 }
 0x2dc   : > { %2096 = vmatpush1.bf16.msra.mxu0 %v6056_v11  ;;  %2169 = vmatpush1.bf16.msra.mxu1 %v6058_v12 }
 0x2dd   : > { %2097 = vmatprep.subr.bf16.mxu0 %v6065_v48  ;;  %2170 = vmatprep.subr.bf16.mxu1 %v6067_v13 }
 0x2e0   : > { %2098 = vmatpush1.bf16.msra.mxu0 %v6064_v19  ;;  %2171 = vmatpush1.bf16.msra.mxu1 %v6066_v21 }
 0x2e1   : > { %2099 = vmatprep.subr.bf16.mxu0 %v6073_v22  ;;  %2172 = vmatprep.subr.bf16.mxu1 %v6075_v23 }
 0x2e4   : > { %2100 = vmatpush1.bf16.msra.mxu0 %v6072_v29  ;;  %2173 = vmatpush1.bf16.msra.mxu1 %v6074_v30 }
 0x2e5   : > { %2101 = vmatprep.subr.bf16.mxu0 %v6081_v31  ;;  %2174 = vmatprep.subr.bf16.mxu1 %v6083_v32 }
 0x2e8   : > { %2102 = vmatpush1.bf16.msra.mxu0 %v6080_v33  ;;  %2175 = vmatpush1.bf16.msra.mxu1 %v6082_v34 }
 0x2eb   : > { %2104 = vmatmul.mubr.bf16.vlgmr.msra.gmra.mrb[16].mxu0 %v8001_v15  ;;  %2177 = vmatmul.mubr.bf16.vlgmr.msra.gmra.mrb[16].mxu1 %v8001_v15  ;;  %v1245_v15 = vlaneseq }
 0x2ec   : > { %2113 = vmatprep.mubr.bf16.mxu0 %v8006_v25  ;;  %2186 = vmatprep.mubr.bf16.mxu1 %v8006_v25 }
 0x2ed   : > { %v8102_v25 = vshrl.u32 %v1245_v15, 7 }
 0x2ef   : > { %v1259_v36 = vsub.s32 3, %v8102_v25 }
 0x2f1   : > { %v8122_v39 = vrot.slane %v8107_v35, %v1259_v36 }
 0x2f3   : > { %2114 = vmatmul.mubr.bf16.gmra.mrb[20].mxu0 %v8018_v38  ;;  %2187 = vmatmul.mubr.bf16.gmra.mrb[20].mxu1 %v8018_v38  ;;  %v1247_v38 = vsub.s32 0, %v8102_v25 }
 0x2f4   : > { %2123 = vmatprep.mubr.bf16.mxu0 %v8022_v49  ;;  %2196 = vmatprep.mubr.bf16.mxu1 %v8022_v49  ;;  %v1255_v49 = vsub.s32 2, %v8102_v25 }
 0x2f6   : > { %v8116_v37 = vrot.slane %v8107_v35, %v1255_v49 }
 0x2fb   : > { %2124 = vmatmul.mubr.bf16.gmra.mrb[24].mxu0 %v8034_v3  ;;  %2197 = vmatmul.mubr.bf16.gmra.mrb[24].mxu1 %v8034_v3  ;;  %v1251_v3 = vsub.s32 1, %v8102_v25 }
 0x2fc   : > { %2133 = vmatprep.mubr.bf16.mxu0 %v8038_v7  ;;  %2206 = vmatprep.mubr.bf16.mxu1 %v8038_v7  ;;  %v8113_v7 = vrot.slane %v8107_v35, %v1247_v38 }
 0x303   : > { %2134 = vmatmul.mubr.bf16.gmra.mrb[28].mxu0 %v8050_v20  ;;  %2207 = vmatmul.mubr.bf16.gmra.mrb[28].mxu1 %v8050_v20  ;;  %v8119_v20 = vrot.slane %v8107_v35, %v1251_v3 }
 0x37e   : > { %v1959_v40 = vpop.f32.mrb[0].mxu0  ;;  %v2032_v42 = vpop.f32.mrb[0].mxu1 }
 0x37f   : > { %v1960_v41 = vadd.f32 %v1959_v40, %v8113_v7  ;;  %v1961_v43 = vpop.f32.mrb[1].mxu0  ;;  %v2033_v44 = vadd.f32 %v2032_v42, %v8116_v37  ;;  %v2034_v47 = vpop.f32.mrb[1].mxu1 }
 0x380   : > { %v1962_v45 = vadd.f32 %v1961_v43, %v8119_v20  ;;  %v1963_v50 = vpop.f32.mrb[2].mxu0  ;;  %v2035_v0 = vadd.f32 %v2034_v47, %v8122_v39  ;;  %v2036_v56 = vpop.f32.mrb[2].mxu1  ;;  %v1263_v47 = vsub.s32 4, %v8102_v25 }
 0x381   : > { %2217 = vst [vmem:[#allocation2] sm:$0xff] %v1960_v41  ;;  %v1964_v51 = vadd.f32 %v1963_v50, %v8113_v7  ;;  %v1965_v57 = vpop.f32.mrb[3].mxu0  ;;  %2219 = vst [vmem:[#allocation2 + $0x10] sm:$0xff] %v2033_v44  ;;  %v2037_v58 = vadd.f32 %v2036_v56, %v8116_v37  ;;  %v2038_v60 = vpop.f32.mrb[3].mxu1  ;;  %v1267_v50 = vsub.s32 5, %v8102_v25 }
 0x382   : > { %2218 = vst [vmem:[#allocation2 + $0x8] sm:$0xff] %v1962_v45  ;;  %v1966_v59 = vadd.f32 %v1965_v57, %v8119_v20  ;;  %2220 = vst [vmem:[#allocation2 + $0x18] sm:$0xff] %v2035_v0  ;;  %v2039_v61 = vadd.f32 %v2038_v60, %v8122_v39  ;;  %v1275_v0 = vsub.s32 7, %v8102_v25 }
 0x383   : > { %2225 = vst [vmem:[#allocation2 + $0x40] sm:$0xff] %v1964_v51  ;;  %2227 = vst [vmem:[#allocation2 + $0x50] sm:$0xff] %v2037_v58  ;;  %v8167_v51 = vrot.slane %v8107_v35, %v1267_v50 }
 0x384   : > { %2226 = vst [vmem:[#allocation2 + $0x48] sm:$0xff] %v1966_v59  ;;  %2228 = vst [vmem:[#allocation2 + $0x58] sm:$0xff] %v2039_v61 }
 0x386   : > { %v1969_v62 = vpop.f32.mrb[4].mxu0  ;;  %v2042_v1 = vpop.f32.mrb[4].mxu1 }
 0x387   : > { %v1970_v63 = vadd.f32 %v1969_v62, %v8113_v7  ;;  %v1971_v54 = vpop.f32.mrb[5].mxu0  ;;  %v2043_v4 = vadd.f32 %v2042_v1, %v8116_v37  ;;  %v2044_v2 = vpop.f32.mrb[5].mxu1 }
 0x388   : > { %v1972_v55 = vadd.f32 %v1971_v54, %v8119_v20  ;;  %v1973_v52 = vpop.f32.mrb[6].mxu0  ;;  %v2045_v46 = vadd.f32 %v2044_v2, %v8122_v39  ;;  %v2046_v5 = vpop.f32.mrb[6].mxu1 }
 0x389   : > { %2233 = vst [vmem:[#allocation2 + $0x80] sm:$0xff] %v1970_v63  ;;  %v1974_v53 = vadd.f32 %v1973_v52, %v8113_v7  ;;  %v1975_v6 = vpop.f32.mrb[7].mxu0  ;;  %2235 = vst [vmem:[#allocation2 + $0x90] sm:$0xff] %v2043_v4  ;;  %v2047_v8 = vadd.f32 %v2046_v5, %v8116_v37  ;;  %v2048_v10 = vpop.f32.mrb[7].mxu1 }
 0x38a   : > { %2234 = vst [vmem:[#allocation2 + $0x88] sm:$0xff] %v1972_v55  ;;  %v1976_v9 = vadd.f32 %v1975_v6, %v8119_v20  ;;  %2236 = vst [vmem:[#allocation2 + $0x98] sm:$0xff] %v2045_v46  ;;  %v2049_v11 = vadd.f32 %v2048_v10, %v8122_v39 }
 0x38b   : > { %2241 = vst [vmem:[#allocation2 + $0xc0] sm:$0xff] %v1974_v53  ;;  %2243 = vst [vmem:[#allocation2 + $0xd0] sm:$0xff] %v2047_v8 }
 0x38c   : > { %2242 = vst [vmem:[#allocation2 + $0xc8] sm:$0xff] %v1976_v9  ;;  %2244 = vst [vmem:[#allocation2 + $0xd8] sm:$0xff] %v2049_v11 }
 0x38e   : > { %v1979_v12 = vpop.f32.mrb[8].mxu0  ;;  %v2052_v13 = vpop.f32.mrb[8].mxu1 }
 0x38f   : > { %v1980_v48 = vadd.f32 %v1979_v12, %v8113_v7  ;;  %v1981_v14 = vpop.f32.mrb[9].mxu0  ;;  %v2053_v16 = vadd.f32 %v2052_v13, %v8116_v37  ;;  %v2054_v18 = vpop.f32.mrb[9].mxu1 }
 0x390   : > { %v1982_v17 = vadd.f32 %v1981_v14, %v8119_v20  ;;  %v1983_v19 = vpop.f32.mrb[10].mxu0  ;;  %v2055_v21 = vadd.f32 %v2054_v18, %v8122_v39  ;;  %v2056_v23 = vpop.f32.mrb[10].mxu1 }
 0x391   : > { %2249 = vst [vmem:[#allocation2 + $0x100] sm:$0xff] %v1980_v48  ;;  %v1984_v22 = vadd.f32 %v1983_v19, %v8113_v7  ;;  %v1985_v24 = vpop.f32.mrb[11].mxu0  ;;  %2251 = vst [vmem:[#allocation2 + $0x110] sm:$0xff] %v2053_v16  ;;  %v2057_v26 = vadd.f32 %v2056_v23, %v8116_v37  ;;  %v2058_v28 = vpop.f32.mrb[11].mxu1 }
 0x392   : > { %2250 = vst [vmem:[#allocation2 + $0x108] sm:$0xff] %v1982_v17  ;;  %v1986_v27 = vadd.f32 %v1985_v24, %v8119_v20  ;;  %2252 = vst [vmem:[#allocation2 + $0x118] sm:$0xff] %v2055_v21  ;;  %v2059_v29 = vadd.f32 %v2058_v28, %v8122_v39 }
 0x393   : > { %2257 = vst [vmem:[#allocation2 + $0x140] sm:$0xff] %v1984_v22  ;;  %2259 = vst [vmem:[#allocation2 + $0x150] sm:$0xff] %v2057_v26 }
 0x394   : > { %2258 = vst [vmem:[#allocation2 + $0x148] sm:$0xff] %v1986_v27  ;;  %2260 = vst [vmem:[#allocation2 + $0x158] sm:$0xff] %v2059_v29 }
 0x396   : > { %v1989_v30 = vpop.f32.mrb[12].mxu0  ;;  %v2062_v32 = vpop.f32.mrb[12].mxu1 }
 0x397   : > { %v1990_v31 = vadd.f32 %v1989_v30, %v8113_v7  ;;  %v1991_v33 = vpop.f32.mrb[13].mxu0  ;;  %v2063_v34 = vadd.f32 %v2062_v32, %v8116_v37  ;;  %v2064_v38 = vpop.f32.mrb[13].mxu1 }
 0x398   : > { %v1992_v15 = vadd.f32 %v1991_v33, %v8119_v20  ;;  %v1993_v49 = vpop.f32.mrb[14].mxu0  ;;  %v2065_v3 = vadd.f32 %v2064_v38, %v8122_v39  ;;  %v2066_v40 = vpop.f32.mrb[14].mxu1 }
 0x399   : > { %2265 = vst [vmem:[#allocation2 + $0x180] sm:$0xff] %v1990_v31  ;;  %v1994_v36 = vadd.f32 %v1993_v49, %v8113_v7  ;;  %v1995_v41 = vpop.f32.mrb[15].mxu0  ;;  %2267 = vst [vmem:[#allocation2 + $0x190] sm:$0xff] %v2063_v34  ;;  %v2067_v42 = vadd.f32 %v2066_v40, %v8116_v37  ;;  %v2068_v44 = vpop.f32.mrb[15].mxu1  ;;  %v1271_v7 = vsub.s32 6, %v8102_v25  ;;  %v8161_v37 = vrot.slane %v8107_v35, %v1263_v47 }
 0x39a   : > { %2266 = vst [vmem:[#allocation2 + $0x188] sm:$0xff] %v1992_v15  ;;  %v1996_v43 = vadd.f32 %v1995_v41, %v8119_v20  ;;  %2268 = vst [vmem:[#allocation2 + $0x198] sm:$0xff] %v2065_v3  ;;  %v2069_v45 = vadd.f32 %v2068_v44, %v8122_v39  ;;  %v8170_v39 = vrot.slane %v8107_v35, %v1275_v0 }
 0x39b   : > { %2273 = vst [vmem:[#allocation2 + $0x1c0] sm:$0xff] %v1994_v36  ;;  %2275 = vst [vmem:[#allocation2 + $0x1d0] sm:$0xff] %v2067_v42  ;;  %v8164_v20 = vrot.slane %v8107_v35, %v1271_v7 }
 0x39c   : > { %2274 = vst [vmem:[#allocation2 + $0x1c8] sm:$0xff] %v1996_v43  ;;  %2276 = vst [vmem:[#allocation2 + $0x1d8] sm:$0xff] %v2069_v45 }
 0x3be   : > { %v2105_v56 = vpop.f32.mrb[16].mxu0  ;;  %v2178_v58 = vpop.f32.mrb[16].mxu1 }
 0x3bf   : > { %v2106_v57 = vadd.f32 %v2105_v56, %v8161_v37  ;;  %v2107_v59 = vpop.f32.mrb[17].mxu0  ;;  %v2179_v60 = vadd.f32 %v2178_v58, %v8164_v20  ;;  %v2180_v61 = vpop.f32.mrb[17].mxu1 }
 0x3c0   : > { %v2108_v25 = vadd.f32 %v2107_v59, %v8167_v51  ;;  %v2109_v62 = vpop.f32.mrb[18].mxu0  ;;  %v2181_v63 = vadd.f32 %v2180_v61, %v8170_v39  ;;  %v2182_v54 = vpop.f32.mrb[18].mxu1 }
 0x3c1   : > { %2221 = vst [vmem:[#allocation2 + $0x20] sm:$0xff] %v2106_v57  ;;  %v2110_v1 = vadd.f32 %v2109_v62, %v8161_v37  ;;  %v2111_v4 = vpop.f32.mrb[19].mxu0  ;;  %2223 = vst [vmem:[#allocation2 + $0x30] sm:$0xff] %v2179_v60  ;;  %v2183_v35 = vadd.f32 %v2182_v54, %v8164_v20  ;;  %v2184_v2 = vpop.f32.mrb[19].mxu1 }
 0x3c2   : > { %2222 = vst [vmem:[#allocation2 + $0x28] sm:$0xff] %v2108_v25  ;;  %v2112_v55 = vadd.f32 %v2111_v4, %v8167_v51  ;;  %2224 = vst [vmem:[#allocation2 + $0x38] sm:$0xff] %v2181_v63  ;;  %v2185_v52 = vadd.f32 %v2184_v2, %v8170_v39 }
 0x3c3   : > { %2229 = vst [vmem:[#allocation2 + $0x60] sm:$0xff] %v2110_v1  ;;  %2231 = vst [vmem:[#allocation2 + $0x70] sm:$0xff] %v2183_v35 }
 0x3c4   : > { %2230 = vst [vmem:[#allocation2 + $0x68] sm:$0xff] %v2112_v55  ;;  %2232 = vst [vmem:[#allocation2 + $0x78] sm:$0xff] %v2185_v52 }
 0x3c6   : > { %v2115_v46 = vpop.f32.mrb[20].mxu0  ;;  %v2188_v5 = vpop.f32.mrb[20].mxu1 }
 0x3c7   : > { %v2116_v53 = vadd.f32 %v2115_v46, %v8161_v37  ;;  %v2117_v6 = vpop.f32.mrb[21].mxu0  ;;  %v2189_v8 = vadd.f32 %v2188_v5, %v8164_v20  ;;  %v2190_v10 = vpop.f32.mrb[21].mxu1 }
 0x3c8   : > { %v2118_v9 = vadd.f32 %v2117_v6, %v8167_v51  ;;  %v2119_v11 = vpop.f32.mrb[22].mxu0  ;;  %v2191_v12 = vadd.f32 %v2190_v10, %v8170_v39  ;;  %v2192_v13 = vpop.f32.mrb[22].mxu1 }
 0x3c9   : > { %2237 = vst [vmem:[#allocation2 + $0xa0] sm:$0xff] %v2116_v53  ;;  %v2120_v48 = vadd.f32 %v2119_v11, %v8161_v37  ;;  %v2121_v14 = vpop.f32.mrb[23].mxu0  ;;  %2239 = vst [vmem:[#allocation2 + $0xb0] sm:$0xff] %v2189_v8  ;;  %v2193_v16 = vadd.f32 %v2192_v13, %v8164_v20  ;;  %v2194_v18 = vpop.f32.mrb[23].mxu1 }
 0x3ca   : > { %2238 = vst [vmem:[#allocation2 + $0xa8] sm:$0xff] %v2118_v9  ;;  %v2122_v17 = vadd.f32 %v2121_v14, %v8167_v51  ;;  %2240 = vst [vmem:[#allocation2 + $0xb8] sm:$0xff] %v2191_v12  ;;  %v2195_v19 = vadd.f32 %v2194_v18, %v8170_v39 }
 0x3cb   : > { %2245 = vst [vmem:[#allocation2 + $0xe0] sm:$0xff] %v2120_v48  ;;  %2247 = vst [vmem:[#allocation2 + $0xf0] sm:$0xff] %v2193_v16 }
 0x3cc   : > { %2246 = vst [vmem:[#allocation2 + $0xe8] sm:$0xff] %v2122_v17  ;;  %2248 = vst [vmem:[#allocation2 + $0xf8] sm:$0xff] %v2195_v19 }
 0x3ce   : > { %v2125_v21 = vpop.f32.mrb[24].mxu0  ;;  %v2198_v23 = vpop.f32.mrb[24].mxu1 }
 0x3cf   : > { %v2126_v22 = vadd.f32 %v2125_v21, %v8161_v37  ;;  %v2127_v24 = vpop.f32.mrb[25].mxu0  ;;  %v2199_v26 = vadd.f32 %v2198_v23, %v8164_v20  ;;  %v2200_v28 = vpop.f32.mrb[25].mxu1 }
 0x3d0   : > { %v2128_v27 = vadd.f32 %v2127_v24, %v8167_v51  ;;  %v2129_v29 = vpop.f32.mrb[26].mxu0  ;;  %v2201_v30 = vadd.f32 %v2200_v28, %v8170_v39  ;;  %v2202_v32 = vpop.f32.mrb[26].mxu1 }
 0x3d1   : > { %2253 = vst [vmem:[#allocation2 + $0x120] sm:$0xff] %v2126_v22  ;;  %v2130_v31 = vadd.f32 %v2129_v29, %v8161_v37  ;;  %v2131_v33 = vpop.f32.mrb[27].mxu0  ;;  %2255 = vst [vmem:[#allocation2 + $0x130] sm:$0xff] %v2199_v26  ;;  %v2203_v34 = vadd.f32 %v2202_v32, %v8164_v20  ;;  %v2204_v38 = vpop.f32.mrb[27].mxu1 }
 0x3d2   : > { %2254 = vst [vmem:[#allocation2 + $0x128] sm:$0xff] %v2128_v27  ;;  %v2132_v15 = vadd.f32 %v2131_v33, %v8167_v51  ;;  %2256 = vst [vmem:[#allocation2 + $0x138] sm:$0xff] %v2201_v30  ;;  %v2205_v49 = vadd.f32 %v2204_v38, %v8170_v39 }
 0x3d3   : > { %2261 = vst [vmem:[#allocation2 + $0x160] sm:$0xff] %v2130_v31  ;;  %2263 = vst [vmem:[#allocation2 + $0x170] sm:$0xff] %v2203_v34 }
 0x3d4   : > { %2262 = vst [vmem:[#allocation2 + $0x168] sm:$0xff] %v2132_v15  ;;  %2264 = vst [vmem:[#allocation2 + $0x178] sm:$0xff] %v2205_v49 }
 0x3d6   : > { %v2135_v3 = vpop.f32.mrb[28].mxu0  ;;  %v2208_v40 = vpop.f32.mrb[28].mxu1 }
 0x3d7   : > { %v2136_v36 = vadd.f32 %v2135_v3, %v8161_v37  ;;  %v2137_v41 = vpop.f32.mrb[29].mxu0  ;;  %v2209_v42 = vadd.f32 %v2208_v40, %v8164_v20  ;;  %v2210_v44 = vpop.f32.mrb[29].mxu1 }
 0x3d8   : > { %v2138_v43 = vadd.f32 %v2137_v41, %v8167_v51  ;;  %v2139_v45 = vpop.f32.mrb[30].mxu0  ;;  %v2211_v47 = vadd.f32 %v2210_v44, %v8170_v39  ;;  %v2212_v50 = vpop.f32.mrb[30].mxu1 }
 0x3d9   : > { %2269 = vst [vmem:[#allocation2 + $0x1a0] sm:$0xff] %v2136_v36  ;;  %v2140_v7 = vadd.f32 %v2139_v45, %v8161_v37  ;;  %v2141_v0 = vpop.f32.mrb[31].mxu0  ;;  %2271 = vst [vmem:[#allocation2 + $0x1b0] sm:$0xff] %v2209_v42  ;;  %v2213_v56 = vadd.f32 %v2212_v50, %v8164_v20  ;;  %v2214_v58 = vpop.f32.mrb[31].mxu1 }
 0x3da   : > { %2270 = vst [vmem:[#allocation2 + $0x1a8] sm:$0xff] %v2138_v43  ;;  %v2142_v57 = vadd.f32 %v2141_v0, %v8167_v51  ;;  %2272 = vst [vmem:[#allocation2 + $0x1b8] sm:$0xff] %v2211_v47  ;;  %v2215_v59 = vadd.f32 %v2214_v58, %v8170_v39 }
 0x3db   : > { %2277 = vst [vmem:[#allocation2 + $0x1e0] sm:$0xff] %v2140_v7  ;;  %2279 = vst [vmem:[#allocation2 + $0x1f0] sm:$0xff] %v2213_v56 }
 0x3dc   : > { %2278 = vst [vmem:[#allocation2 + $0x1e8] sm:$0xff] %v2142_v57  ;;  %2280 = vst [vmem:[#allocation2 + $0x1f8] sm:$0xff] %v2215_v59 }
 0x3dd PF: > { %v2281_v37 = vld [vmem:[%s7742_s8] sm:$0xff]  ;;  %v2282_v51 = vld [vmem:[%s7742_s8 + $0x8] sm:$0xff]  ;;  %v9831_v63 = vmov 0   ;;  %p6260_p7 = scmp.ne.s32.totalorder %s7408_s23, 5 }
 0x3de   : > { %v2285_v20 = vld [vmem:[%s7742_s8 + $0x20] sm:$0xff]  ;;  %v2286_v39 = vld [vmem:[%s7742_s8 + $0x28] sm:$0xff]  ;;  %3089 = vmatprep.mubr.bf16.mxu0 %v9831_v63  ;;  %3130 = vmatprep.mubr.bf16.mxu1 %v9831_v63  ;;  %s10855_s16 = sld [smem:[#allocation165_spill]] (!%p6260_p7) }
 0x3df   : > { %v8207_v60 = vcombine.high %v2281_v37, %v2285_v20  ;;  %v8210_v25 = vcombine.low %v2281_v37, %v2285_v20  ;;  %v2289_v61 = vld [vmem:[%s7742_s8 + $0x40] sm:$0xff]  ;;  %v8216_v1 = vcombine.high %v2282_v51, %v2286_v39  ;;  %v8218_v54 = vcombine.low %v2282_v51, %v2286_v39  ;;  %v2290_v35 = vld [vmem:[%s7742_s8 + $0x48] sm:$0xff] }
 0x3e0   : > { %v2293_v62 = vld [vmem:[%s7742_s8 + $0x60] sm:$0xff]  ;;  %v2294_v55 = vld [vmem:[%s7742_s8 + $0x68] sm:$0xff] }
 0x3e1   : > { %10148 = vst [vmem:[#allocation32_spill] sm:$0xff] %v8207_v60  ;;  %10149 = vst [vmem:[#allocation33_spill] sm:$0xff] %v8210_v25  ;;  %v8220_v4 = vcombine.high %v2289_v61, %v2293_v62  ;;  %v2297_v2 = vld [vmem:[%s7742_s8 + $0x80] sm:$0xff]  ;;  %3057 = vmatprep.subr.bf16.mxu0 %v8207_v60  ;;  %v8226_v52 = vcombine.high %v2290_v35, %v2294_v55  ;;  %v2298_v53 = vld [vmem:[%s7742_s8 + $0x88] sm:$0xff]  ;;  %3098 = vmatprep.subr.bf16.mxu1 %v8216_v1 }
 0x3e2   : > { %10150 = vst [vmem:[#allocation34_spill] sm:$0xff] %v8216_v1  ;;  %10151 = vst [vmem:[#allocation35_spill] sm:$0xff] %v8218_v54  ;;  %v2301_v46 = vld [vmem:[%s7742_s8 + $0xa0] sm:$0xff]  ;;  %v2302_v5 = vld [vmem:[%s7742_s8 + $0xa8] sm:$0xff]  ;;  %3058 = vmatpush1.bf16.msra.mxu0 %v8210_v25  ;;  %v8233_v6 = vcombine.low %v2289_v61, %v2293_v62  ;;  %3099 = vmatpush1.bf16.msra.mxu1 %v8218_v54  ;;  %v8237_v8 = vcombine.low %v2290_v35, %v2294_v55 }
 0x3e3   : > { %10152 = vst [vmem:[#allocation36_spill] sm:$0xff] %v8220_v4  ;;  %10153 = vst [vmem:[#allocation37_spill] sm:$0xff] %v8226_v52  ;;  %3059 = vmatprep.subr.bf16.mxu0 %v8220_v4  ;;  %v8239_v9 = vcombine.high %v2297_v2, %v2301_v46  ;;  %3100 = vmatprep.subr.bf16.mxu1 %v8226_v52  ;;  %v8242_v10 = vcombine.high %v2298_v53, %v2302_v5  ;;  %v2305_v11 = vld [vmem:[%s7742_s8 + $0xc0] sm:$0xff]  ;;  %v2306_v48 = vld [vmem:[%s7742_s8 + $0xc8] sm:$0xff] }
 0x3e4   : > { %10154 = vst [vmem:[#allocation38_spill] sm:$0xff] %v8233_v6  ;;  %10155 = vst [vmem:[#allocation39_spill] sm:$0xff] %v8237_v8  ;;  %v2309_v12 = vld [vmem:[%s7742_s8 + $0xe0] sm:$0xff]  ;;  %v2310_v13 = vld [vmem:[%s7742_s8 + $0xe8] sm:$0xff]  ;;  %v8249_v14 = vcombine.low %v2297_v2, %v2301_v46  ;;  %v8253_v16 = vcombine.low %v2298_v53, %v2302_v5 }
 0x3e5   : > { %10156 = vst [vmem:[#allocation40_spill] sm:$0xff] %v8239_v9  ;;  %10157 = vst [vmem:[#allocation41_spill] sm:$0xff] %v8242_v10  ;;  %v8255_v17 = vcombine.high %v2305_v11, %v2309_v12  ;;  %v8258_v18 = vcombine.high %v2306_v48, %v2310_v13  ;;  %v2313_v19 = vld [vmem:[%s7742_s8 + $0x100] sm:$0xff]  ;;  %v2314_v22 = vld [vmem:[%s7742_s8 + $0x108] sm:$0xff]  ;;  %v8265_v24 = vcombine.low %v2305_v11, %v2309_v12 }
 0x3e6   : > { %3060 = vmatpush1.bf16.msra.mxu0 %v8233_v6  ;;  %10158 = vst [vmem:[#allocation42_spill] sm:$0xff] %v8249_v14  ;;  %3101 = vmatpush1.bf16.msra.mxu1 %v8237_v8  ;;  %10159 = vst [vmem:[#allocation43_spill] sm:$0xff] %v8253_v16  ;;  %v2317_v21 = vld [vmem:[%s7742_s8 + $0x120] sm:$0xff]  ;;  %v2318_v23 = vld [vmem:[%s7742_s8 + $0x128] sm:$0xff]  ;;  %v8269_v26 = vcombine.low %v2306_v48, %v2310_v13 }
 0x3e7   : > { %3061 = vmatprep.subr.bf16.mxu0 %v8239_v9  ;;  %10160 = vst [vmem:[#allocation44_spill] sm:$0xff] %v8255_v17  ;;  %3102 = vmatprep.subr.bf16.mxu1 %v8242_v10  ;;  %10161 = vst [vmem:[#allocation45_spill] sm:$0xff] %v8258_v18  ;;  %v8271_v27 = vcombine.high %v2313_v19, %v2317_v21  ;;  %v8274_v28 = vcombine.high %v2314_v22, %v2318_v23  ;;  %v2321_v29 = vld [vmem:[%s7742_s8 + $0x140] sm:$0xff]  ;;  %v2322_v31 = vld [vmem:[%s7742_s8 + $0x148] sm:$0xff] }
 0x3e8   : > { %10162 = vst [vmem:[#allocation46_spill] sm:$0xff] %v8265_v24  ;;  %10163 = vst [vmem:[#allocation47_spill] sm:$0xff] %v8269_v26  ;;  %v2325_v30 = vld [vmem:[%s7742_s8 + $0x160] sm:$0xff]  ;;  %v2326_v32 = vld [vmem:[%s7742_s8 + $0x168] sm:$0xff]  ;;  %v8281_v33 = vcombine.low %v2313_v19, %v2317_v21  ;;  %v8285_v34 = vcombine.low %v2314_v22, %v2318_v23 }
 0x3e9   : > { %10164 = vst [vmem:[#allocation48_spill] sm:$0xff] %v8271_v27  ;;  %10165 = vst [vmem:[#allocation49_spill] sm:$0xff] %v8274_v28  ;;  %v8287_v15 = vcombine.high %v2321_v29, %v2325_v30  ;;  %v8290_v38 = vcombine.high %v2322_v31, %v2326_v32  ;;  %v2329_v49 = vld [vmem:[%s7742_s8 + $0x180] sm:$0xff]  ;;  %v2330_v36 = vld [vmem:[%s7742_s8 + $0x188] sm:$0xff]  ;;  %v8297_v41 = vcombine.low %v2321_v29, %v2325_v30 }
 0x3ea   : > { %3062 = vmatpush1.bf16.msra.mxu0 %v8249_v14  ;;  %3103 = vmatpush1.bf16.msra.mxu1 %v8253_v16  ;;  %10166 = vst [vmem:[#allocation50_spill] sm:$0xff] %v8281_v33  ;;  %10167 = vst [vmem:[#allocation51_spill] sm:$0xff] %v8285_v34  ;;  %v2333_v3 = vld [vmem:[%s7742_s8 + $0x1a0] sm:$0xff]  ;;  %v2334_v40 = vld [vmem:[%s7742_s8 + $0x1a8] sm:$0xff]  ;;  %v8301_v42 = vcombine.low %v2322_v31, %v2326_v32 }
 0x3eb   : > { %3063 = vmatprep.subr.bf16.mxu0 %v8255_v17  ;;  %3104 = vmatprep.subr.bf16.mxu1 %v8258_v18  ;;  %10168 = vst [vmem:[#allocation52_spill] sm:$0xff] %v8287_v15  ;;  %10169 = vst [vmem:[#allocation53_spill] sm:$0xff] %v8290_v38  ;;  %v8303_v43 = vcombine.high %v2329_v49, %v2333_v3  ;;  %v8306_v44 = vcombine.high %v2330_v36, %v2334_v40  ;;  %v2337_v45 = vld [vmem:[%s7742_s8 + $0x1c0] sm:$0xff]  ;;  %v2338_v7 = vld [vmem:[%s7742_s8 + $0x1c8] sm:$0xff] }
 0x3ec   : > { %10170 = vst [vmem:[#allocation54_spill] sm:$0xff] %v8297_v41  ;;  %10171 = vst [vmem:[#allocation55_spill] sm:$0xff] %v8301_v42  ;;  %v2341_v47 = vld [vmem:[%s7742_s8 + $0x1e0] sm:$0xff]  ;;  %v2342_v50 = vld [vmem:[%s7742_s8 + $0x1e8] sm:$0xff]  ;;  %v8313_v0 = vcombine.low %v2329_v49, %v2333_v3  ;;  %v8317_v56 = vcombine.low %v2330_v36, %v2334_v40 }
 0x3ed   : > { %10172 = vst [vmem:[#allocation56_spill] sm:$0xff] %v8303_v43  ;;  %10173 = vst [vmem:[#allocation57_spill] sm:$0xff] %v8306_v44  ;;  %v8319_v57 = vcombine.high %v2337_v45, %v2341_v47  ;;  %v8322_v58 = vcombine.high %v2338_v7, %v2342_v50  ;;  %v2345_v59 = vld [vmem:[%s7742_s8 + $0x200] sm:$0xff]  ;;  %v2346_v20 = vld [vmem:[%s7742_s8 + $0x208] sm:$0xff]  ;;  %v8329_v39 = vcombine.low %v2337_v45, %v2341_v47 }
 0x3ee   : > { %3064 = vmatpush1.bf16.msra.mxu0 %v8265_v24  ;;  %3105 = vmatpush1.bf16.msra.mxu1 %v8269_v26  ;;  %10174 = vst [vmem:[#allocation58_spill] sm:$0xff] %v8313_v0  ;;  %10175 = vst [vmem:[#allocation59_spill] sm:$0xff] %v8317_v56  ;;  %v2349_v37 = vld [vmem:[%s7742_s8 + $0x220] sm:$0xff]  ;;  %v2350_v51 = vld [vmem:[%s7742_s8 + $0x228] sm:$0xff]  ;;  %v8333_v61 = vcombine.low %v2338_v7, %v2342_v50 }
 0x3ef   : > { %3065 = vmatprep.subr.bf16.mxu0 %v8271_v27  ;;  %3106 = vmatprep.subr.bf16.mxu1 %v8274_v28  ;;  %10176 = vst [vmem:[#allocation60_spill] sm:$0xff] %v8319_v57  ;;  %10177 = vst [vmem:[#allocation61_spill] sm:$0xff] %v8322_v58  ;;  %v8335_v62 = vcombine.high %v2345_v59, %v2349_v37  ;;  %v8338_v35 = vcombine.high %v2346_v20, %v2350_v51  ;;  %v2353_v55 = vld [vmem:[%s7742_s8 + $0x240] sm:$0xff]  ;;  %v2354_v46 = vld [vmem:[%s7742_s8 + $0x248] sm:$0xff] }
 0x3f0   : > { %10178 = vst [vmem:[#allocation62_spill] sm:$0xff] %v8329_v39  ;;  %10179 = vst [vmem:[#allocation63_spill] sm:$0xff] %v8333_v61  ;;  %v2357_v2 = vld [vmem:[%s7742_s8 + $0x260] sm:$0xff]  ;;  %v2358_v53 = vld [vmem:[%s7742_s8 + $0x268] sm:$0xff]  ;;  %v8345_v5 = vcombine.low %v2345_v59, %v2349_v37  ;;  %v8349_v11 = vcombine.low %v2346_v20, %v2350_v51 }
 0x3f1   : > { %10180 = vst [vmem:[#allocation64_spill] sm:$0xff] %v8335_v62  ;;  %10181 = vst [vmem:[#allocation65_spill] sm:$0xff] %v8338_v35  ;;  %v8351_v12 = vcombine.high %v2353_v55, %v2357_v2  ;;  %v8354_v48 = vcombine.high %v2354_v46, %v2358_v53  ;;  %v2361_v13 = vld [vmem:[%s7742_s8 + $0x280] sm:$0xff]  ;;  %v2362_v21 = vld [vmem:[%s7742_s8 + $0x288] sm:$0xff]  ;;  %v8361_v23 = vcombine.low %v2353_v55, %v2357_v2 }
 0x3f2   : > { %3066 = vmatpush1.bf16.msra.mxu0 %v8281_v33  ;;  %3107 = vmatpush1.bf16.msra.mxu1 %v8285_v34  ;;  %10182 = vst [vmem:[#allocation66_spill] sm:$0xff] %v8345_v5  ;;  %10183 = vst [vmem:[#allocation67_spill] sm:$0xff] %v8349_v11  ;;  %v2365_v19 = vld [vmem:[%s7742_s8 + $0x2a0] sm:$0xff]  ;;  %v2366_v22 = vld [vmem:[%s7742_s8 + $0x2a8] sm:$0xff]  ;;  %v8365_v29 = vcombine.low %v2354_v46, %v2358_v53 }
 0x3f3   : > { %3067 = vmatprep.subr.bf16.mxu0 %v8287_v15  ;;  %3108 = vmatprep.subr.bf16.mxu1 %v8290_v38  ;;  %10184 = vst [vmem:[#allocation68_spill] sm:$0xff] %v8351_v12  ;;  %10185 = vst [vmem:[#allocation69_spill] sm:$0xff] %v8354_v48  ;;  %v8367_v30 = vcombine.high %v2361_v13, %v2365_v19  ;;  %v8370_v31 = vcombine.high %v2362_v21, %v2366_v22  ;;  %v2369_v32 = vld [vmem:[%s7742_s8 + $0x2c0] sm:$0xff]  ;;  %v2370_v3 = vld [vmem:[%s7742_s8 + $0x2c8] sm:$0xff] }
 0x3f4   : > { %10186 = vst [vmem:[#allocation70_spill] sm:$0xff] %v8361_v23  ;;  %10187 = vst [vmem:[#allocation71_spill] sm:$0xff] %v8365_v29  ;;  %v2373_v49 = vld [vmem:[%s7742_s8 + $0x2e0] sm:$0xff]  ;;  %v2374_v36 = vld [vmem:[%s7742_s8 + $0x2e8] sm:$0xff]  ;;  %v8377_v40 = vcombine.low %v2361_v13, %v2365_v19  ;;  %v8381_v45 = vcombine.low %v2362_v21, %v2366_v22 }
 0x3f5   : > { %10188 = vst [vmem:[#allocation72_spill] sm:$0xff] %v8367_v30  ;;  %10189 = vst [vmem:[#allocation73_spill] sm:$0xff] %v8370_v31  ;;  %v8383_v47 = vcombine.high %v2369_v32, %v2373_v49  ;;  %v8386_v7 = vcombine.high %v2370_v3, %v2374_v36  ;;  %v2377_v50 = vld [vmem:[%s7742_s8 + $0x300] sm:$0xff]  ;;  %v2378_v37 = vld [vmem:[%s7742_s8 + $0x308] sm:$0xff]  ;;  %v8393_v51 = vcombine.low %v2369_v32, %v2373_v49 }
 0x3f6   : > { %3068 = vmatpush1.bf16.msra.mxu0 %v8297_v41  ;;  %3109 = vmatpush1.bf16.msra.mxu1 %v8301_v42  ;;  %10190 = vst [vmem:[#allocation74_spill] sm:$0xff] %v8377_v40  ;;  %10191 = vst [vmem:[#allocation75_spill] sm:$0xff] %v8381_v45  ;;  %v2381_v59 = vld [vmem:[%s7742_s8 + $0x320] sm:$0xff]  ;;  %v2382_v20 = vld [vmem:[%s7742_s8 + $0x328] sm:$0xff]  ;;  %v8397_v55 = vcombine.low %v2370_v3, %v2374_v36 }
 0x3f7   : > { %3069 = vmatprep.subr.bf16.mxu0 %v8303_v43  ;;  %3110 = vmatprep.subr.bf16.mxu1 %v8306_v44  ;;  %10192 = vst [vmem:[#allocation76_spill] sm:$0xff] %v8383_v47  ;;  %10193 = vst [vmem:[#allocation77_spill] sm:$0xff] %v8386_v7  ;;  %v8399_v2 = vcombine.high %v2377_v50, %v2381_v59  ;;  %v8402_v46 = vcombine.high %v2378_v37, %v2382_v20  ;;  %v2385_v53 = vld [vmem:[%s7742_s8 + $0x340] sm:$0xff]  ;;  %v2386_v19 = vld [vmem:[%s7742_s8 + $0x348] sm:$0xff] }
 0x3f8   : > { %10194 = vst [vmem:[#allocation78_spill] sm:$0xff] %v8393_v51  ;;  %10195 = vst [vmem:[#allocation79_spill] sm:$0xff] %v8397_v55  ;;  %v2389_v13 = vld [vmem:[%s7742_s8 + $0x360] sm:$0xff]  ;;  %v2390_v21 = vld [vmem:[%s7742_s8 + $0x368] sm:$0xff]  ;;  %v8409_v22 = vcombine.low %v2377_v50, %v2381_v59  ;;  %v8413_v32 = vcombine.low %v2378_v37, %v2382_v20 }
 0x3f9   : > { %10196 = vst [vmem:[#allocation80_spill] sm:$0xff] %v8399_v2  ;;  %10197 = vst [vmem:[#allocation81_spill] sm:$0xff] %v8402_v46  ;;  %v8415_v49 = vcombine.high %v2385_v53, %v2389_v13  ;;  %v8418_v3 = vcombine.high %v2386_v19, %v2390_v21  ;;  %v2393_v36 = vld [vmem:[%s7742_s8 + $0x380] sm:$0xff]  ;;  %v2394_v50 = vld [vmem:[%s7742_s8 + $0x388] sm:$0xff]  ;;  %v8429_v37 = vcombine.low %v2386_v19, %v2390_v21 }
 0x3fa   : > { %3070 = vmatpush1.bf16.msra.mxu0 %v8313_v0  ;;  %3111 = vmatpush1.bf16.msra.mxu1 %v8317_v56  ;;  %10198 = vst [vmem:[#allocation82_spill] sm:$0xff] %v8409_v22  ;;  %10199 = vst [vmem:[#allocation83_spill] sm:$0xff] %v8413_v32  ;;  %v2397_v63 = vld [vmem:[%s7742_s8 + $0x3a0] sm:$0xff]  ;;  %v2398_v59 = vld [vmem:[%s7742_s8 + $0x3a8] sm:$0xff] }
 0x3fb   : > { %3071 = vmatprep.subr.bf16.mxu0 %v8319_v57  ;;  %3112 = vmatprep.subr.bf16.mxu1 %v8322_v58  ;;  %10200 = vst [vmem:[#allocation84_spill] sm:$0xff] %v8415_v49  ;;  %10201 = vst [vmem:[#allocation85_spill] sm:$0xff] %v8418_v3  ;;  %v8431_v20 = vcombine.high %v2393_v36, %v2397_v63  ;;  %v8445_v19 = vcombine.low %v2394_v50, %v2398_v59 }
 0x3fc   : > { %10203 = vst [vmem:[#allocation87_spill] sm:$0xff] %v8429_v37 }
 0x3fd   : > { %10204 = vst [vmem:[#allocation88_spill] sm:$0xff] %v8431_v20  ;;  %10207 = vst [vmem:[#allocation91_spill] sm:$0xff] %v8445_v19 }
 0x3fe   : > { %3072 = vmatpush1.bf16.msra.mxu0 %v8329_v39  ;;  %3113 = vmatpush1.bf16.msra.mxu1 %v8333_v61 }
 0x3ff   : > { %3073 = vmatprep.subr.bf16.mxu0 %v8335_v62  ;;  %3114 = vmatprep.subr.bf16.mxu1 %v8338_v35 }
 0x402   : > { %3074 = vmatpush1.bf16.msra.mxu0 %v8345_v5  ;;  %3115 = vmatpush1.bf16.msra.mxu1 %v8349_v11 }
 0x403   : > { %3075 = vmatprep.subr.bf16.mxu0 %v8351_v12  ;;  %3116 = vmatprep.subr.bf16.mxu1 %v8354_v48 }
 0x406   : > { %3076 = vmatpush1.bf16.msra.mxu0 %v8361_v23  ;;  %3117 = vmatpush1.bf16.msra.mxu1 %v8365_v29 }
 0x407   : > { %3077 = vmatprep.subr.bf16.mxu0 %v8367_v30  ;;  %3118 = vmatprep.subr.bf16.mxu1 %v8370_v31 }
 0x40a   : > { %3078 = vmatpush1.bf16.msra.mxu0 %v8377_v40  ;;  %3119 = vmatpush1.bf16.msra.mxu1 %v8381_v45  ;;  %v2408_v45 = vld [vmem:[%s7742_s8 + $0x3f8] sm:$0xff] }
 0x40b   : > { %3079 = vmatprep.subr.bf16.mxu0 %v8383_v47  ;;  %3120 = vmatprep.subr.bf16.mxu1 %v8386_v7  ;;  %v10218_v7 = vmov 0   ;;  %v2404_v47 = vld [vmem:[%s7742_s8 + $0x3d8] sm:$0xff] }
 0x40e   : > { %3080 = vmatpush1.bf16.msra.mxu0 %v8393_v51  ;;  %3121 = vmatpush1.bf16.msra.mxu1 %v8397_v55  ;;  %v8425_v55 = vcombine.low %v2385_v53, %v2389_v13  ;;  %v2402_v53 = vld [vmem:[%s7742_s8 + $0x3c8] sm:$0xff]  ;;  %v2303_v51 = vld [vmem:[%s7742_s8 + $0xb0] sm:$0xff] }
 0x40f   : > { %3081 = vmatprep.subr.bf16.mxu0 %v8399_v2  ;;  %3122 = vmatprep.subr.bf16.mxu1 %v8402_v46  ;;  %v8434_v46 = vcombine.high %v2394_v50, %v2398_v59  ;;  %v2401_v2 = vld [vmem:[%s7742_s8 + $0x3c0] sm:$0xff]  ;;  %v2406_v13 = vld [vmem:[%s7742_s8 + $0x3e8] sm:$0xff] }
 0x410   : > { %10202 = vst [vmem:[#allocation86_spill] sm:$0xff] %v8425_v55  ;;  %v8461_v50 = vcombine.low %v2402_v53, %v2406_v13 }
 0x411   : > { %10205 = vst [vmem:[#allocation89_spill] sm:$0xff] %v8434_v46 }
 0x412   : > { %3082 = vmatpush1.bf16.msra.mxu0 %v8409_v22  ;;  %3123 = vmatpush1.bf16.msra.mxu1 %v8413_v32  ;;  %v2405_v22 = vld [vmem:[%s7742_s8 + $0x3e0] sm:$0xff]  ;;  %v8441_v32 = vcombine.low %v2393_v36, %v2397_v63  ;;  %v2284_v63 = vld [vmem:[%s7742_s8 + $0x18] sm:$0xff]  ;;  %10211 = vst [vmem:[#allocation95_spill] sm:$0xff] %v8461_v50 }
 0x413   : > { %3083 = vmatprep.subr.bf16.mxu0 %v8415_v49  ;;  %3124 = vmatprep.subr.bf16.mxu1 %v8418_v3  ;;  %v8447_v21 = vcombine.high %v2401_v2, %v2405_v22  ;;  %v8450_v3 = vcombine.high %v2402_v53, %v2406_v13  ;;  %v2283_v49 = vld [vmem:[%s7742_s8 + $0x10] sm:$0xff]  ;;  %v2288_v36 = vld [vmem:[%s7742_s8 + $0x38] sm:$0xff] }
 0x414   : > { %10206 = vst [vmem:[#allocation90_spill] sm:$0xff] %v8441_v32  ;;  %v8477_v53 = vcombine.low %v2284_v63, %v2288_v36 }
 0x415   : > { %10208 = vst [vmem:[#allocation92_spill] sm:$0xff] %v8447_v21  ;;  %10209 = vst [vmem:[#allocation93_spill] sm:$0xff] %v8450_v3 }
 0x416   : > { %3084 = vmatpush1.bf16.msra.mxu0 %v8425_v55  ;;  %3125 = vmatpush1.bf16.msra.mxu1 %v8429_v37  ;;  %v2287_v55 = vld [vmem:[%s7742_s8 + $0x30] sm:$0xff]  ;;  %v8457_v37 = vcombine.low %v2401_v2, %v2405_v22  ;;  %v2292_v2 = vld [vmem:[%s7742_s8 + $0x58] sm:$0xff]  ;;  %10215 = vst [vmem:[#allocation99_spill] sm:$0xff] %v8477_v53 }
 0x417   : > { %3085 = vmatprep.subr.bf16.mxu0 %v8431_v20  ;;  %3126 = vmatprep.subr.bf16.mxu1 %v8434_v46  ;;  %v8463_v59 = vcombine.high %v2283_v49, %v2287_v55  ;;  %v8466_v46 = vcombine.high %v2284_v63, %v2288_v36  ;;  %v2291_v20 = vld [vmem:[%s7742_s8 + $0x50] sm:$0xff]  ;;  %v2296_v22 = vld [vmem:[%s7742_s8 + $0x78] sm:$0xff] }
 0x418   : > { %10210 = vst [vmem:[#allocation94_spill] sm:$0xff] %v8457_v37  ;;  %v8495_v36 = vcombine.low %v2292_v2, %v2296_v22 }
 0x419   : > { %10212 = vst [vmem:[#allocation96_spill] sm:$0xff] %v8463_v59  ;;  %10213 = vst [vmem:[#allocation97_spill] sm:$0xff] %v8466_v46 }
 0x41a   : > { %3086 = vmatpush1.bf16.msra.mxu0 %v8441_v32  ;;  %3127 = vmatpush1.bf16.msra.mxu1 %v8445_v19  ;;  %v2295_v32 = vld [vmem:[%s7742_s8 + $0x70] sm:$0xff]  ;;  %v8473_v19 = vcombine.low %v2283_v49, %v2287_v55  ;;  %v2300_v55 = vld [vmem:[%s7742_s8 + $0x98] sm:$0xff]  ;;  %10220 = vst [vmem:[#allocation103_spill] sm:$0xff] %v8495_v36 }
 0x41b   : > { %3087 = vmatprep.subr.bf16.mxu0 %v8447_v21  ;;  %3128 = vmatprep.subr.bf16.mxu1 %v8450_v3  ;;  %v8479_v13 = vcombine.high %v2291_v20, %v2295_v32  ;;  %v8482_v3 = vcombine.high %v2292_v2, %v2296_v22  ;;  %v2299_v21 = vld [vmem:[%s7742_s8 + $0x90] sm:$0xff]  ;;  %v2304_v49 = vld [vmem:[%s7742_s8 + $0xb8] sm:$0xff]  ;;  %v8491_v63 = vcombine.low %v2291_v20, %v2295_v32 }
 0x41c   : > { %10214 = vst [vmem:[#allocation98_spill] sm:$0xff] %v8473_v19  ;;  %v2308_v32 = vld [vmem:[%s7742_s8 + $0xd8] sm:$0xff]  ;;  %v8509_v2 = vcombine.low %v2299_v21, %v2303_v51  ;;  %v8513_v22 = vcombine.low %v2300_v55, %v2304_v49 }
 0x41d   : > { %10216 = vst [vmem:[#allocation100_spill] sm:$0xff] %v8479_v13  ;;  %10217 = vst [vmem:[#allocation101_spill] sm:$0xff] %v8482_v3  ;;  %v2312_v20 = vld [vmem:[%s7742_s8 + $0xf8] sm:$0xff] }
 0x41e   : > { %3088 = vmatpush1.bf16.msra.mxu0 %v8457_v37  ;;  %3129 = vmatpush1.bf16.msra.mxu1 %v8461_v50  ;;  %10219 = vst [vmem:[#allocation102_spill] sm:$0xff] %v8491_v63  ;;  %v2307_v50 = vld [vmem:[%s7742_s8 + $0xd0] sm:$0xff]  ;;  %10223 = vst [vmem:[#allocation106_spill] sm:$0xff] %v8509_v2 }
 0x41f   : > { %3139 = vmatprep.subr.bf16.mxu0 %v8463_v59  ;;  %3180 = vmatprep.subr.bf16.mxu1 %v8466_v46  ;;  %v8497_v46 = vcombine.high %v2299_v21, %v2303_v51  ;;  %v8500_v59 = vcombine.high %v2300_v55, %v2304_v49  ;;  %v2311_v37 = vld [vmem:[%s7742_s8 + $0xf0] sm:$0xff]  ;;  %10224 = vst [vmem:[#allocation107_spill] sm:$0xff] %v8513_v22  ;;  %v2316_v51 = vld [vmem:[%s7742_s8 + $0x118] sm:$0xff] }
 0x420   : > { %v2320_v21 = vld [vmem:[%s7742_s8 + $0x138] sm:$0xff]  ;;  %v8529_v55 = vcombine.low %v2308_v32, %v2312_v20 }
 0x421   : > { %3090 = vmatmul.mubr.bf16.vlgmr.msra.gmra.mrb[0].mxu0 %v10218_v7  ;;  %3131 = vmatmul.mubr.bf16.vlgmr.msra.gmra.mrb[0].mxu1 %v10218_v7  ;;  %10221 = vst [vmem:[#allocation104_spill] sm:$0xff] %v8497_v46  ;;  %10222 = vst [vmem:[#allocation105_spill] sm:$0xff] %v8500_v59 }
 0x422   : > { %3140 = vmatpush1.bf16.msra.mxu0 %v8473_v19  ;;  %3181 = vmatpush1.bf16.msra.mxu1 %v8477_v53  ;;  %v2315_v53 = vld [vmem:[%s7742_s8 + $0x110] sm:$0xff]  ;;  %10228 = vst [vmem:[#allocation111_spill] sm:$0xff] %v8529_v55 }
 0x423   : > { %3141 = vmatprep.subr.bf16.mxu0 %v8479_v13  ;;  %3182 = vmatprep.subr.bf16.mxu1 %v8482_v3  ;;  %v8515_v3 = vcombine.high %v2307_v50, %v2311_v37  ;;  %v8518_v13 = vcombine.high %v2308_v32, %v2312_v20  ;;  %v8545_v32 = vcombine.low %v2316_v51, %v2320_v21  ;;  %v2407_v19 = vld [vmem:[%s7742_s8 + $0x3f0] sm:$0xff] }
 0x424   : > { %3171 = vmatprep.mubr.bf16.mxu0 %v10218_v7  ;;  %3212 = vmatprep.mubr.bf16.mxu1 %v10218_v7 }
 0x425   : > { %10225 = vst [vmem:[#allocation108_spill] sm:$0xff] %v8515_v3  ;;  %10226 = vst [vmem:[#allocation109_spill] sm:$0xff] %v8518_v13 }
 0x426   : > { %3142 = vmatpush1.bf16.msra.mxu0 %v8491_v63  ;;  %3183 = vmatpush1.bf16.msra.mxu1 %v8495_v36  ;;  %v2319_v63 = vld [vmem:[%s7742_s8 + $0x130] sm:$0xff]  ;;  %v8525_v36 = vcombine.low %v2307_v50, %v2311_v37  ;;  %v2324_v37 = vld [vmem:[%s7742_s8 + $0x158] sm:$0xff]  ;;  %10232 = vst [vmem:[#allocation115_spill] sm:$0xff] %v8545_v32 }
 0x427   : > { %3143 = vmatprep.subr.bf16.mxu0 %v8497_v46  ;;  %3184 = vmatprep.subr.bf16.mxu1 %v8500_v59  ;;  %v8531_v49 = vcombine.high %v2315_v53, %v2319_v63  ;;  %v8534_v59 = vcombine.high %v2316_v51, %v2320_v21  ;;  %v2323_v46 = vld [vmem:[%s7742_s8 + $0x150] sm:$0xff]  ;;  %v2328_v50 = vld [vmem:[%s7742_s8 + $0x178] sm:$0xff] }
 0x428   : > { %10227 = vst [vmem:[#allocation110_spill] sm:$0xff] %v8525_v36  ;;  %v8561_v51 = vcombine.low %v2324_v37, %v2328_v50 }
 0x429   : > { %10229 = vst [vmem:[#allocation112_spill] sm:$0xff] %v8531_v49  ;;  %10230 = vst [vmem:[#allocation113_spill] sm:$0xff] %v8534_v59 }
 0x42a   : > { %3144 = vmatpush1.bf16.msra.mxu0 %v8509_v2  ;;  %3185 = vmatpush1.bf16.msra.mxu1 %v8513_v22  ;;  %v2327_v2 = vld [vmem:[%s7742_s8 + $0x170] sm:$0xff]  ;;  %v8541_v22 = vcombine.low %v2315_v53, %v2319_v63  ;;  %v2332_v53 = vld [vmem:[%s7742_s8 + $0x198] sm:$0xff]  ;;  %10236 = vst [vmem:[#allocation119_spill] sm:$0xff] %v8561_v51 }
 0x42b   : > { %3145 = vmatprep.subr.bf16.mxu0 %v8515_v3  ;;  %3186 = vmatprep.subr.bf16.mxu1 %v8518_v13  ;;  %v8547_v20 = vcombine.high %v2323_v46, %v2327_v2  ;;  %v8550_v13 = vcombine.high %v2324_v37, %v2328_v50  ;;  %v2331_v3 = vld [vmem:[%s7742_s8 + $0x190] sm:$0xff]  ;;  %v2336_v63 = vld [vmem:[%s7742_s8 + $0x1b8] sm:$0xff] }
 0x42c   : > { %10231 = vst [vmem:[#allocation114_spill] sm:$0xff] %v8541_v22  ;;  %v8577_v37 = vcombine.low %v2332_v53, %v2336_v63 }
 0x42d   : > { %10233 = vst [vmem:[#allocation116_spill] sm:$0xff] %v8547_v20  ;;  %10234 = vst [vmem:[#allocation117_spill] sm:$0xff] %v8550_v13 }
 0x42e   : > { %3146 = vmatpush1.bf16.msra.mxu0 %v8525_v36  ;;  %3187 = vmatpush1.bf16.msra.mxu1 %v8529_v55  ;;  %v2335_v36 = vld [vmem:[%s7742_s8 + $0x1b0] sm:$0xff]  ;;  %v8557_v55 = vcombine.low %v2323_v46, %v2327_v2  ;;  %v2340_v46 = vld [vmem:[%s7742_s8 + $0x1d8] sm:$0xff]  ;;  %10240 = vst [vmem:[#allocation123_spill] sm:$0xff] %v8577_v37 }
 0x42f   : > { %3147 = vmatprep.subr.bf16.mxu0 %v8531_v49  ;;  %3188 = vmatprep.subr.bf16.mxu1 %v8534_v59  ;;  %v8563_v21 = vcombine.high %v2331_v3, %v2335_v36  ;;  %v8566_v59 = vcombine.high %v2332_v53, %v2336_v63  ;;  %v2339_v49 = vld [vmem:[%s7742_s8 + $0x1d0] sm:$0xff]  ;;  %v2344_v2 = vld [vmem:[%s7742_s8 + $0x1f8] sm:$0xff] }
 0x430   : > { %10235 = vst [vmem:[#allocation118_spill] sm:$0xff] %v8557_v55  ;;  %v8593_v53 = vcombine.low %v2340_v46, %v2344_v2 }
 0x431   : > { %10237 = vst [vmem:[#allocation120_spill] sm:$0xff] %v8563_v21  ;;  %10238 = vst [vmem:[#allocation121_spill] sm:$0xff] %v8566_v59 }
 0x432   : > { %3148 = vmatpush1.bf16.msra.mxu0 %v8541_v22  ;;  %3189 = vmatpush1.bf16.msra.mxu1 %v8545_v32  ;;  %v2343_v22 = vld [vmem:[%s7742_s8 + $0x1f0] sm:$0xff]  ;;  %v8573_v32 = vcombine.low %v2331_v3, %v2335_v36  ;;  %v2348_v3 = vld [vmem:[%s7742_s8 + $0x218] sm:$0xff]  ;;  %10244 = vst [vmem:[#allocation127_spill] sm:$0xff] %v8593_v53 }
 0x433   : > { %3149 = vmatprep.subr.bf16.mxu0 %v8547_v20  ;;  %3190 = vmatprep.subr.bf16.mxu1 %v8550_v13  ;;  %v8579_v50 = vcombine.high %v2339_v49, %v2343_v22  ;;  %v8582_v13 = vcombine.high %v2340_v46, %v2344_v2  ;;  %v2347_v20 = vld [vmem:[%s7742_s8 + $0x210] sm:$0xff]  ;;  %v2352_v36 = vld [vmem:[%s7742_s8 + $0x238] sm:$0xff] }
 0x434   : > { %10239 = vst [vmem:[#allocation122_spill] sm:$0xff] %v8573_v32  ;;  %v8609_v46 = vcombine.low %v2348_v3, %v2352_v36 }
 0x435   : > { %10241 = vst [vmem:[#allocation124_spill] sm:$0xff] %v8579_v50  ;;  %10242 = vst [vmem:[#allocation125_spill] sm:$0xff] %v8582_v13 }
 0x436   : > { %3150 = vmatpush1.bf16.msra.mxu0 %v8557_v55  ;;  %3191 = vmatpush1.bf16.msra.mxu1 %v8561_v51  ;;  %v2351_v55 = vld [vmem:[%s7742_s8 + $0x230] sm:$0xff]  ;;  %v8589_v51 = vcombine.low %v2339_v49, %v2343_v22  ;;  %v2356_v22 = vld [vmem:[%s7742_s8 + $0x258] sm:$0xff]  ;;  %10248 = vst [vmem:[#allocation131_spill] sm:$0xff] %v8609_v46 }
 0x437   : > { %3151 = vmatprep.subr.bf16.mxu0 %v8563_v21  ;;  %3192 = vmatprep.subr.bf16.mxu1 %v8566_v59  ;;  %v8595_v63 = vcombine.high %v2347_v20, %v2351_v55  ;;  %v8598_v59 = vcombine.high %v2348_v3, %v2352_v36  ;;  %v2355_v21 = vld [vmem:[%s7742_s8 + $0x250] sm:$0xff]  ;;  %v2360_v49 = vld [vmem:[%s7742_s8 + $0x278] sm:$0xff] }
 0x438   : > { %10243 = vst [vmem:[#allocation126_spill] sm:$0xff] %v8589_v51  ;;  %v8625_v3 = vcombine.low %v2356_v22, %v2360_v49 }
 0x439   : > { %10245 = vst [vmem:[#allocation128_spill] sm:$0xff] %v8595_v63  ;;  %10246 = vst [vmem:[#allocation129_spill] sm:$0xff] %v8598_v59 }
 0x43a   : > { %3152 = vmatpush1.bf16.msra.mxu0 %v8573_v32  ;;  %3193 = vmatpush1.bf16.msra.mxu1 %v8577_v37  ;;  %v2359_v32 = vld [vmem:[%s7742_s8 + $0x270] sm:$0xff]  ;;  %v8605_v37 = vcombine.low %v2347_v20, %v2351_v55  ;;  %v2364_v55 = vld [vmem:[%s7742_s8 + $0x298] sm:$0xff]  ;;  %10252 = vst [vmem:[#allocation135_spill] sm:$0xff] %v8625_v3 }
 0x43b   : > { %3153 = vmatprep.subr.bf16.mxu0 %v8579_v50  ;;  %3194 = vmatprep.subr.bf16.mxu1 %v8582_v13  ;;  %v8611_v2 = vcombine.high %v2355_v21, %v2359_v32  ;;  %v8614_v13 = vcombine.high %v2356_v22, %v2360_v49  ;;  %v2363_v50 = vld [vmem:[%s7742_s8 + $0x290] sm:$0xff]  ;;  %v2368_v20 = vld [vmem:[%s7742_s8 + $0x2b8] sm:$0xff] }
 0x43c   : > { %10247 = vst [vmem:[#allocation130_spill] sm:$0xff] %v8605_v37  ;;  %v8641_v22 = vcombine.low %v2364_v55, %v2368_v20 }
 0x43d   : > { %10249 = vst [vmem:[#allocation132_spill] sm:$0xff] %v8611_v2  ;;  %10250 = vst [vmem:[#allocation133_spill] sm:$0xff] %v8614_v13 }
 0x43e   : > { %3154 = vmatpush1.bf16.msra.mxu0 %v8589_v51  ;;  %3195 = vmatpush1.bf16.msra.mxu1 %v8593_v53  ;;  %v2367_v51 = vld [vmem:[%s7742_s8 + $0x2b0] sm:$0xff]  ;;  %v8621_v53 = vcombine.low %v2355_v21, %v2359_v32  ;;  %v2372_v32 = vld [vmem:[%s7742_s8 + $0x2d8] sm:$0xff]  ;;  %10256 = vst [vmem:[#allocation139_spill] sm:$0xff] %v8641_v22 }
 0x43f   : > { %3155 = vmatprep.subr.bf16.mxu0 %v8595_v63  ;;  %3196 = vmatprep.subr.bf16.mxu1 %v8598_v59  ;;  %v8627_v36 = vcombine.high %v2363_v50, %v2367_v51  ;;  %v8630_v59 = vcombine.high %v2364_v55, %v2368_v20  ;;  %v2371_v63 = vld [vmem:[%s7742_s8 + $0x2d0] sm:$0xff]  ;;  %v2376_v21 = vld [vmem:[%s7742_s8 + $0x2f8] sm:$0xff] }
 0x440   : > { %10251 = vst [vmem:[#allocation134_spill] sm:$0xff] %v8621_v53  ;;  %v8657_v55 = vcombine.low %v2372_v32, %v2376_v21 }
 0x441   : > { %10253 = vst [vmem:[#allocation136_spill] sm:$0xff] %v8627_v36  ;;  %10254 = vst [vmem:[#allocation137_spill] sm:$0xff] %v8630_v59 }
 0x442   : > { %3156 = vmatpush1.bf16.msra.mxu0 %v8605_v37  ;;  %3197 = vmatpush1.bf16.msra.mxu1 %v8609_v46  ;;  %v2375_v37 = vld [vmem:[%s7742_s8 + $0x2f0] sm:$0xff]  ;;  %v8637_v46 = vcombine.low %v2363_v50, %v2367_v51  ;;  %v2380_v51 = vld [vmem:[%s7742_s8 + $0x318] sm:$0xff]  ;;  %10260 = vst [vmem:[#allocation143_spill] sm:$0xff] %v8657_v55 }
 0x443   : > { %3157 = vmatprep.subr.bf16.mxu0 %v8611_v2  ;;  %3198 = vmatprep.subr.bf16.mxu1 %v8614_v13  ;;  %v8643_v49 = vcombine.high %v2371_v63, %v2375_v37  ;;  %v8646_v13 = vcombine.high %v2372_v32, %v2376_v21  ;;  %v2379_v2 = vld [vmem:[%s7742_s8 + $0x310] sm:$0xff]  ;;  %v2384_v50 = vld [vmem:[%s7742_s8 + $0x338] sm:$0xff] }
 0x444   : > { %10255 = vst [vmem:[#allocation138_spill] sm:$0xff] %v8637_v46  ;;  %v8673_v32 = vcombine.low %v2380_v51, %v2384_v50 }
 0x445   : > { %10257 = vst [vmem:[#allocation140_spill] sm:$0xff] %v8643_v49  ;;  %10258 = vst [vmem:[#allocation141_spill] sm:$0xff] %v8646_v13 }
 0x446   : > { %3158 = vmatpush1.bf16.msra.mxu0 %v8621_v53  ;;  %3199 = vmatpush1.bf16.msra.mxu1 %v8625_v3  ;;  %v2383_v53 = vld [vmem:[%s7742_s8 + $0x330] sm:$0xff]  ;;  %v8653_v3 = vcombine.low %v2371_v63, %v2375_v37  ;;  %v2388_v37 = vld [vmem:[%s7742_s8 + $0x358] sm:$0xff]  ;;  %10264 = vst [vmem:[#allocation147_spill] sm:$0xff] %v8673_v32 }
 0x447   : > { %3159 = vmatprep.subr.bf16.mxu0 %v8627_v36  ;;  %3200 = vmatprep.subr.bf16.mxu1 %v8630_v59  ;;  %v8659_v20 = vcombine.high %v2379_v2, %v2383_v53  ;;  %v8662_v59 = vcombine.high %v2380_v51, %v2384_v50  ;;  %v2387_v36 = vld [vmem:[%s7742_s8 + $0x350] sm:$0xff]  ;;  %v2392_v63 = vld [vmem:[%s7742_s8 + $0x378] sm:$0xff] }
 0x448   : > { %10259 = vst [vmem:[#allocation142_spill] sm:$0xff] %v8653_v3  ;;  %v8689_v51 = vcombine.low %v2388_v37, %v2392_v63 }
 0x449   : > { %10261 = vst [vmem:[#allocation144_spill] sm:$0xff] %v8659_v20  ;;  %10262 = vst [vmem:[#allocation145_spill] sm:$0xff] %v8662_v59 }
 0x44a   : > { %3160 = vmatpush1.bf16.msra.mxu0 %v8637_v46  ;;  %3201 = vmatpush1.bf16.msra.mxu1 %v8641_v22  ;;  %v2391_v46 = vld [vmem:[%s7742_s8 + $0x370] sm:$0xff]  ;;  %v8669_v22 = vcombine.low %v2379_v2, %v2383_v53  ;;  %v2396_v53 = vld [vmem:[%s7742_s8 + $0x398] sm:$0xff]  ;;  %10268 = vst [vmem:[#allocation151_spill] sm:$0xff] %v8689_v51 }
 0x44b   : > { %3161 = vmatprep.subr.bf16.mxu0 %v8643_v49  ;;  %3202 = vmatprep.subr.bf16.mxu1 %v8646_v13  ;;  %v8675_v21 = vcombine.high %v2387_v36, %v2391_v46  ;;  %v8678_v13 = vcombine.high %v2388_v37, %v2392_v63  ;;  %v2395_v49 = vld [vmem:[%s7742_s8 + $0x390] sm:$0xff]  ;;  %v2400_v2 = vld [vmem:[%s7742_s8 + $0x3b8] sm:$0xff]  ;;  %v8710_v63 = vcombine.high %v2404_v47, %v2408_v45 }
 0x44c   : > { %10263 = vst [vmem:[#allocation146_spill] sm:$0xff] %v8669_v22 }
 0x44d   : > { %10265 = vst [vmem:[#allocation148_spill] sm:$0xff] %v8675_v21  ;;  %10266 = vst [vmem:[#allocation149_spill] sm:$0xff] %v8678_v13 }
 0x44e   : > { %3162 = vmatpush1.bf16.msra.mxu0 %v8653_v3  ;;  %3203 = vmatpush1.bf16.msra.mxu1 %v8657_v55  ;;  %v2399_v3 = vld [vmem:[%s7742_s8 + $0x3b0] sm:$0xff]  ;;  %v8685_v55 = vcombine.low %v2387_v36, %v2391_v46  ;;  %v8705_v36 = vcombine.low %v2396_v53, %v2400_v2  ;;  %10274 = vst [vmem:[#allocation157_spill] sm:$0xff] %v8710_v63 }
 0x44f   : > { %3163 = vmatprep.subr.bf16.mxu0 %v8659_v20  ;;  %3204 = vmatprep.subr.bf16.mxu1 %v8662_v59  ;;  %v8691_v50 = vcombine.high %v2395_v49, %v2399_v3  ;;  %v8694_v59 = vcombine.high %v2396_v53, %v2400_v2  ;;  %v2403_v20 = vld [vmem:[%s7742_s8 + $0x3d0] sm:$0xff]  ;;  %v8701_v46 = vcombine.low %v2395_v49, %v2399_v3  ;;  %v10283_v53 = vld [vmem:[#allocation81_spill] sm:$0xff]  ;;  %v10284_v2 = vld [vmem:[#allocation82_spill] sm:$0xff] }
 0x450   : > { %10267 = vst [vmem:[#allocation150_spill] sm:$0xff] %v8685_v55  ;;  %10272 = vst [vmem:[#allocation155_spill] sm:$0xff] %v8705_v36  ;;  %v8707_v37 = vcombine.high %v2403_v20, %v2407_v19  ;;  %v8717_v3 = vcombine.low %v2404_v47, %v2408_v45  ;;  %v10277_v45 = vld [vmem:[#allocation75_spill] sm:$0xff]  ;;  %v10278_v47 = vld [vmem:[#allocation76_spill] sm:$0xff] }
 0x451   : > { %10269 = vst [vmem:[#allocation152_spill] sm:$0xff] %v8691_v50  ;;  %10270 = vst [vmem:[#allocation153_spill] sm:$0xff] %v8694_v59  ;;  %v10281_v49 = vld [vmem:[#allocation79_spill] sm:$0xff] }
 0x452   : > { %3164 = vmatpush1.bf16.msra.mxu0 %v8669_v22  ;;  %3205 = vmatpush1.bf16.msra.mxu1 %v8673_v32  ;;  %10271 = vst [vmem:[#allocation154_spill] sm:$0xff] %v8701_v46  ;;  %10273 = vst [vmem:[#allocation156_spill] sm:$0xff] %v8707_v37 }
 0x453   : > { %3165 = vmatprep.subr.bf16.mxu0 %v8675_v21  ;;  %3206 = vmatprep.subr.bf16.mxu1 %v8678_v13  ;;  %v8713_v13 = vcombine.low %v2403_v20, %v2407_v19  ;;  %10276 = vst [vmem:[#allocation159_spill] sm:$0xff] %v8717_v3  ;;  %v10280_v19 = vld [vmem:[#allocation78_spill] sm:$0xff]  ;;  %v10282_v20 = vld [vmem:[#allocation80_spill] sm:$0xff] }
 0x455   : > { %10275 = vst [vmem:[#allocation158_spill] sm:$0xff] %v8713_v13 }
 0x456   : > { %3166 = vmatpush1.bf16.msra.mxu0 %v8685_v55  ;;  %3207 = vmatpush1.bf16.msra.mxu1 %v8689_v51 }
 0x457   : > { %3167 = vmatprep.subr.bf16.mxu0 %v8691_v50  ;;  %3208 = vmatprep.subr.bf16.mxu1 %v8694_v59 }
 0x45a   : > { %3168 = vmatpush1.bf16.msra.mxu0 %v8701_v46  ;;  %3209 = vmatpush1.bf16.msra.mxu1 %v8705_v36 }
 0x45b   : > { %3169 = vmatprep.subr.bf16.mxu0 %v8707_v37  ;;  %3210 = vmatprep.subr.bf16.mxu1 %v8710_v63 }
 0x45e   : > { %3170 = vmatpush1.bf16.msra.mxu0 %v8713_v13  ;;  %3211 = vmatpush1.bf16.msra.mxu1 %v8717_v3 }
 0x45f   : > { %3289 = vmatprep.subr.bf16.mxu0 %v8207_v60  ;;  %3330 = vmatprep.subr.bf16.mxu1 %v8216_v1 }
 0x461   : > { %3172 = vmatmul.mubr.bf16.vlgmr.msra.gmra.mrb[4].mxu0 %v10218_v7  ;;  %3213 = vmatmul.mubr.bf16.vlgmr.msra.gmra.mrb[4].mxu1 %v10218_v7  ;;  %v10279_v7 = vld [vmem:[#allocation77_spill] sm:$0xff] }
 0x462   : > { %3290 = vmatpush1.bf16.msra.mxu0 %v8210_v25  ;;  %3331 = vmatpush1.bf16.msra.mxu1 %v8218_v54 }
 0x463   : > { %3291 = vmatprep.subr.bf16.mxu0 %v8220_v4  ;;  %3332 = vmatprep.subr.bf16.mxu1 %v8226_v52 }
 0x466   : > { %3292 = vmatpush1.bf16.msra.mxu0 %v8233_v6  ;;  %3333 = vmatpush1.bf16.msra.mxu1 %v8237_v8 }
 0x467   : > { %3293 = vmatprep.subr.bf16.mxu0 %v8239_v9  ;;  %3334 = vmatprep.subr.bf16.mxu1 %v8242_v10 }
 0x46a   : > { %3294 = vmatpush1.bf16.msra.mxu0 %v8249_v14  ;;  %3335 = vmatpush1.bf16.msra.mxu1 %v8253_v16 }
 0x46b   : > { %3295 = vmatprep.subr.bf16.mxu0 %v8255_v17  ;;  %3336 = vmatprep.subr.bf16.mxu1 %v8258_v18 }
 0x46e   : > { %3296 = vmatpush1.bf16.msra.mxu0 %v8265_v24  ;;  %3337 = vmatpush1.bf16.msra.mxu1 %v8269_v26 }
 0x46f   : > { %3297 = vmatprep.subr.bf16.mxu0 %v8271_v27  ;;  %3338 = vmatprep.subr.bf16.mxu1 %v8274_v28 }
 0x472   : > { %3298 = vmatpush1.bf16.msra.mxu0 %v8281_v33  ;;  %3339 = vmatpush1.bf16.msra.mxu1 %v8285_v34 }
 0x473   : > { %3299 = vmatprep.subr.bf16.mxu0 %v8287_v15  ;;  %3340 = vmatprep.subr.bf16.mxu1 %v8290_v38 }
 0x476   : > { %3300 = vmatpush1.bf16.msra.mxu0 %v8297_v41  ;;  %3341 = vmatpush1.bf16.msra.mxu1 %v8301_v42 }
 0x477   : > { %3301 = vmatprep.subr.bf16.mxu0 %v8303_v43  ;;  %3342 = vmatprep.subr.bf16.mxu1 %v8306_v44 }
 0x47a   : > { %3302 = vmatpush1.bf16.msra.mxu0 %v8313_v0  ;;  %3343 = vmatpush1.bf16.msra.mxu1 %v8317_v56 }
 0x47b   : > { %3303 = vmatprep.subr.bf16.mxu0 %v8319_v57  ;;  %3344 = vmatprep.subr.bf16.mxu1 %v8322_v58 }
 0x47e   : > { %3304 = vmatpush1.bf16.msra.mxu0 %v8329_v39  ;;  %3345 = vmatpush1.bf16.msra.mxu1 %v8333_v61 }
 0x47f   : > { %3305 = vmatprep.subr.bf16.mxu0 %v8335_v62  ;;  %3346 = vmatprep.subr.bf16.mxu1 %v8338_v35 }
 0x482   : > { %3306 = vmatpush1.bf16.msra.mxu0 %v8345_v5  ;;  %3347 = vmatpush1.bf16.msra.mxu1 %v8349_v11  ;;  %v2410_v11 = vld [vmem:[#allocation2 + $0x8] sm:$0xff]  ;;  %v2412_v5 = vld [vmem:[#allocation2 + $0x18] sm:$0xff] }
 0x483   : > { %3307 = vmatprep.subr.bf16.mxu0 %v8351_v12  ;;  %3348 = vmatprep.subr.bf16.mxu1 %v8354_v48  ;;  %v2409_v12 = vld [vmem:[#allocation2] sm:$0xff] }
 0x486   : > { %3308 = vmatpush1.bf16.msra.mxu0 %v8361_v23  ;;  %3349 = vmatpush1.bf16.msra.mxu1 %v8365_v29 }
 0x487   : > { %3309 = vmatprep.subr.bf16.mxu0 %v8367_v30  ;;  %3350 = vmatprep.subr.bf16.mxu1 %v8370_v31  ;;  %v10285_v30 = vld [vmem:[#allocation83_spill] sm:$0xff]  ;;  %v10286_v31 = vld [vmem:[#allocation84_spill] sm:$0xff] }
 0x48a   : > { %3310 = vmatpush1.bf16.msra.mxu0 %v8377_v40  ;;  %3351 = vmatpush1.bf16.msra.mxu1 %v10277_v45  ;;  %v10287_v40 = vld [vmem:[#allocation85_spill] sm:$0xff]  ;;  %v10288_v45 = vld [vmem:[#allocation86_spill] sm:$0xff] }
 0x48b   : > { %3311 = vmatprep.subr.bf16.mxu0 %v10278_v47  ;;  %3352 = vmatprep.subr.bf16.mxu1 %v10279_v7  ;;  %v10289_v47 = vld [vmem:[#allocation87_spill] sm:$0xff]  ;;  %v10290_v7 = vld [vmem:[#allocation88_spill] sm:$0xff] }
 0x48e   : > { %3312 = vmatpush1.bf16.msra.mxu0 %v10280_v19  ;;  %3353 = vmatpush1.bf16.msra.mxu1 %v10281_v49  ;;  %v10291_v19 = vld [vmem:[#allocation89_spill] sm:$0xff]  ;;  %v10292_v49 = vld [vmem:[#allocation90_spill] sm:$0xff] }
 0x48f   : > { %3313 = vmatprep.subr.bf16.mxu0 %v10282_v20  ;;  %3354 = vmatprep.subr.bf16.mxu1 %v10283_v53  ;;  %v10293_v20 = vld [vmem:[#allocation91_spill] sm:$0xff]  ;;  %v10294_v53 = vld [vmem:[#allocation92_spill] sm:$0xff] }
 0x492   : > { %3314 = vmatpush1.bf16.msra.mxu0 %v10284_v2  ;;  %3355 = vmatpush1.bf16.msra.mxu1 %v10285_v30  ;;  %v10295_v2 = vld [vmem:[#allocation93_spill] sm:$0xff]  ;;  %v10296_v30 = vld [vmem:[#allocation94_spill] sm:$0xff] }
 0x493   : > { %3315 = vmatprep.subr.bf16.mxu0 %v10286_v31  ;;  %3356 = vmatprep.subr.bf16.mxu1 %v10287_v40  ;;  %v10297_v31 = vld [vmem:[#allocation95_spill] sm:$0xff]  ;;  %v10298_v40 = vld [vmem:[#allocation96_spill] sm:$0xff] }
 0x496   : > { %3316 = vmatpush1.bf16.msra.mxu0 %v10288_v45  ;;  %3357 = vmatpush1.bf16.msra.mxu1 %v10289_v47  ;;  %v10299_v45 = vld [vmem:[#allocation97_spill] sm:$0xff] }
 0x497   : > { %3317 = vmatprep.subr.bf16.mxu0 %v10290_v7  ;;  %3358 = vmatprep.subr.bf16.mxu1 %v10291_v19 }
 0x49a   : > { %3318 = vmatpush1.bf16.msra.mxu0 %v10292_v49  ;;  %3359 = vmatpush1.bf16.msra.mxu1 %v10293_v20 }
 0x49b   : > { %3319 = vmatprep.subr.bf16.mxu0 %v10294_v53  ;;  %3360 = vmatprep.subr.bf16.mxu1 %v10295_v2  ;;  %v2411_v53 = vld [vmem:[#allocation2 + $0x10] sm:$0xff] }
 0x49e   : > { %3320 = vmatpush1.bf16.msra.mxu0 %v10296_v30  ;;  %3361 = vmatpush1.bf16.msra.mxu1 %v10297_v31 }
 0x49f   : > { %3371 = vmatprep.subr.bf16.mxu0 %v10298_v40  ;;  %3412 = vmatprep.subr.bf16.mxu1 %v10299_v45 }
 0x4f4   : > { %v3091_v47 = vpop.f32.mrb[0].mxu0  ;;  %v3132_v7 = vpop.f32.mrb[0].mxu1 }
 0x4f5   : > { %v3093_v29 = vpop.f32.mrb[1].mxu0  ;;  %v3134_v19 = vpop.f32.mrb[1].mxu1  ;;  %v3221_v2 = vadd.f32 %v3091_v47, %v2409_v12  ;;  %v3223_v30 = vadd.f32 %v3132_v7, %v2411_v53  ;;  %v2413_v47 = vld [vmem:[#allocation2 + $0x20] sm:$0xff] }
 0x4f6   : > { %v3095_v23 = vpop.f32.mrb[2].mxu0  ;;  %v3136_v49 = vpop.f32.mrb[2].mxu1  ;;  %v3222_v35 = vadd.f32 %v3093_v29, %v2410_v11  ;;  %v3224_v31 = vadd.f32 %v3134_v19, %v2412_v5  ;;  %v2415_v11 = vld [vmem:[#allocation2 + $0x30] sm:$0xff]  ;;  %v2414_v5 = vld [vmem:[#allocation2 + $0x28] sm:$0xff] }
 0x4f7   : > { %v3096_v48 = vpop.f32.mrb[3].mxu0  ;;  %v3137_v20 = vpop.f32.mrb[3].mxu1  ;;  %v6212_v62 = vmul.f32 -1.442695, %v3221_v2  ;;  %v6214_v40 = vmul.f32 -1.442695, %v3223_v30 }
 0x4f8   : > { %v6213_v61 = vmul.f32 -1.442695, %v3222_v35  ;;  %v6215_v45 = vmul.f32 -1.442695, %v3224_v31  ;;  %v2416_v35 = vld [vmem:[#allocation2 + $0x38] sm:$0xff] }
 0x4f9   : > { %6531 = vpow2.f32 %v6212_v62 }
 0x4fa   : > { %6533 = vpow2.f32 %v6214_v40 }
 0x4fb   : > { %6535 = vpow2.f32 %v6213_v61 }
 0x4fc   : > { %6537 = vpow2.f32 %v6215_v45 }
 0x503   : > { %v6532_v23 = vpop.eup %6531 }
 0x504   : > { %v6534_v49 = vpop.eup %6533  ;;  %v3241_v39 = vadd.f32 1.0, %v6532_v23 }
 0x505   : > { %v6536_v48 = vpop.eup %6535  ;;  %v3243_v58 = vadd.f32 1.0, %v6534_v49 }
 0x506   : > { %v6538_v20 = vpop.eup %6537  ;;  %v3242_v57 = vadd.f32 1.0, %v6536_v48  ;;  %6539 = vrcp.f32 %v3241_v39 }
 0x507   : > { %v3244_v12 = vadd.f32 1.0, %v6538_v20  ;;  %6541 = vrcp.f32 %v3243_v58 }
 0x508   : > { %6543 = vrcp.f32 %v3242_v57 }
 0x509   : > { %6545 = vrcp.f32 %v3244_v12 }
 0x510   : > { %v6540_v58 = vpop.eup %6539 }
 0x511   : > { %v6542_v57 = vpop.eup %6541 }
 0x512   : > { %v6544_v48 = vpop.eup %6543 }
 0x513   : > { %v6546_v20 = vpop.eup %6545 }
 0x534   : > { %v3173_v29 = vpop.f32.mrb[4].mxu0  ;;  %v3214_v30 = vpop.f32.mrb[4].mxu1 }
 0x535   : > { %v3225_v62 = vadd.f32 %v3173_v29, %v2413_v47  ;;  %v3175_v61 = vpop.f32.mrb[5].mxu0  ;;  %v3227_v31 = vadd.f32 %v3214_v30, %v2415_v11  ;;  %v3216_v45 = vpop.f32.mrb[5].mxu1  ;;  %v3267_v11 = vmul.f32 0.0, %v6542_v57  ;;  %v3268_v29 = vmul.f32 0.0, %v6546_v20  ;;  %v10300_v57 = vld [vmem:[#allocation98_spill] sm:$0xff]  ;;  %v10302_v20 = vld [vmem:[#allocation100_spill] sm:$0xff] }
 0x536   : > { %v3226_v40 = vadd.f32 %v3175_v61, %v2414_v5  ;;  %v3177_v7 = vpop.f32.mrb[6].mxu0  ;;  %v3228_v19 = vadd.f32 %v3216_v45, %v2416_v35  ;;  %v3218_v53 = vpop.f32.mrb[6].mxu1 }
 0x537   : > { %6547 = vtanh.f32 %v3225_v62  ;;  %v3178_v2 = vpop.f32.mrb[7].mxu0  ;;  %v6216_v23 = vmul.f32 -1.442695, %v3227_v31  ;;  %v3219_v39 = vpop.f32.mrb[7].mxu1 }
 0x538   : > { %6549 = vtanh.f32 %v3226_v40  ;;  %v6217_v49 = vmul.f32 -1.442695, %v3228_v19 }
 0x539   : > { %6551 = vpow2.f32 %v6216_v23 }
 0x53a   : > { %6553 = vpow2.f32 %v6217_v49 }
 0x541   : > { %v6548_v47 = vpop.eup %6547 }
 0x542   : > { %v6550_v12 = vpop.eup %6549  ;;  %v3269_v5 = vmul.f32 %v6548_v47, %v6540_v58  ;;  %v10303_v47 = vld [vmem:[#allocation101_spill] sm:$0xff] }
 0x543   : > { %v3270_v30 = vmul.f32 %v6550_v12, %v6544_v48  ;;  %v6552_v62 = vpop.eup %6551  ;;  %v10301_v48 = vld [vmem:[#allocation99_spill] sm:$0xff]  ;;  %v10304_v12 = vld [vmem:[#allocation102_spill] sm:$0xff] }
 0x544   : > { %v8790_v35 = vadd.f32 %v3269_v5, %v3267_v11  ;;  %v6554_v61 = vpop.eup %6553  ;;  %v3261_v31 = vadd.f32 1.0, %v6552_v62  ;;  %v10305_v11 = vld [vmem:[#allocation103_spill] sm:$0xff]  ;;  %v10306_v5 = vld [vmem:[#allocation104_spill] sm:$0xff] }
 0x545   : > { %v8792_v40 = vadd.f32 %v3270_v30, %v3268_v29  ;;  %v3262_v45 = vadd.f32 1.0, %v6554_v61  ;;  %v10307_v29 = vld [vmem:[#allocation105_spill] sm:$0xff]  ;;  %v10308_v30 = vld [vmem:[#allocation106_spill] sm:$0xff]  ;;  %v10309_v62 = vld [vmem:[#allocation107_spill] sm:$0xff] }
 0x546   : > { %6555 = vtanh.f32 %v8790_v35  ;;  %v10310_v61 = vld [vmem:[#allocation108_spill] sm:$0xff] }
 0x547   : > { %6557 = vrcp.f32 %v3261_v31  ;;  %v10311_v31 = vld [vmem:[#allocation109_spill] sm:$0xff] }
 0x548   : > { %6559 = vtanh.f32 %v8792_v40 }
 0x549   : > { %6561 = vrcp.f32 %v3262_v45  ;;  %v10312_v45 = vld [vmem:[#allocation110_spill] sm:$0xff] }
 0x550   : > { %v6556_v7 = vpop.eup %6555 }
 0x551   : > { %v6558_v19 = vpop.eup %6557 }
 0x552   : > { %v6560_v53 = vpop.eup %6559  ;;  %v3275_v2 = vmul.f32 %v6558_v19, %v6556_v7  ;;  %v10313_v7 = vld [vmem:[#allocation111_spill] sm:$0xff]  ;;  %v10314_v19 = vld [vmem:[#allocation112_spill] sm:$0xff] }
 0x553   : > { %v6562_v23 = vpop.eup %6561 }
 0x554   : > { %v3276_v39 = vmul.f32 %v6562_v23, %v6560_v53  ;;  %3277 = vst [vmem:[#allocation3] sm:$0xff] %v3275_v2  ;;  %v8796_v58 = vpack.c.bf16 %v3275_v2, %v3275_v2  ;;  %v10315_v53 = vld [vmem:[#allocation113_spill] sm:$0xff]  ;;  %v10316_v2 = vld [vmem:[#allocation114_spill] sm:$0xff]  ;;  %v10317_v23 = vld [vmem:[#allocation115_spill] sm:$0xff] }
 0x556   : > { %3278 = vst [vmem:[#allocation3 + $0x8] sm:$0xff] %v3276_v39  ;;  %v3288_v49 = vpack.c.bf16 %v3276_v39, %v3276_v39  ;;  %v10318_v39 = vld [vmem:[#allocation116_spill] sm:$0xff] }
 0x558   : > { %3321 = vmatprep.mubr.bf16.mxu0 %v3288_v49  ;;  %3362 = vmatprep.mubr.bf16.mxu1 %v3288_v49 }
 0x559   : > { %3322 = vmatmul.mubr.bf16.vlgmr.msra.gmra.mrb[8].mxu0 %v8796_v58  ;;  %3363 = vmatmul.mubr.bf16.vlgmr.msra.gmra.mrb[8].mxu1 %v8796_v58 }
 0x55a   : > { %3372 = vmatpush1.bf16.msra.mxu0 %v10300_v57  ;;  %3413 = vmatpush1.bf16.msra.mxu1 %v10301_v48 }
 0x55b   : > { %3403 = vmatprep.mubr.bf16.mxu0 %v3288_v49  ;;  %3444 = vmatprep.mubr.bf16.mxu1 %v3288_v49  ;;  %v10319_v49 = vld [vmem:[#allocation117_spill] sm:$0xff] }
 0x55c   : > { %3373 = vmatprep.subr.bf16.mxu0 %v10302_v20  ;;  %3414 = vmatprep.subr.bf16.mxu1 %v10303_v47 }
 0x55e   : > { %3374 = vmatpush1.bf16.msra.mxu0 %v10304_v12  ;;  %3415 = vmatpush1.bf16.msra.mxu1 %v10305_v11 }
 0x55f   : > { %3375 = vmatprep.subr.bf16.mxu0 %v10306_v5  ;;  %3416 = vmatprep.subr.bf16.mxu1 %v10307_v29 }
 0x562   : > { %3376 = vmatpush1.bf16.msra.mxu0 %v10308_v30  ;;  %3417 = vmatpush1.bf16.msra.mxu1 %v10309_v62  ;;  %v10320_v62 = vld [vmem:[#allocation118_spill] sm:$0xff] }
 0x563   : > { %3377 = vmatprep.subr.bf16.mxu0 %v10310_v61  ;;  %3418 = vmatprep.subr.bf16.mxu1 %v10311_v31  ;;  %v10321_v61 = vld [vmem:[#allocation119_spill] sm:$0xff]  ;;  %v10322_v31 = vld [vmem:[#allocation120_spill] sm:$0xff] }
 0x566   : > { %3378 = vmatpush1.bf16.msra.mxu0 %v10312_v45  ;;  %3419 = vmatpush1.bf16.msra.mxu1 %v10313_v7  ;;  %v10323_v45 = vld [vmem:[#allocation121_spill] sm:$0xff]  ;;  %v10324_v7 = vld [vmem:[#allocation122_spill] sm:$0xff] }
 0x567   : > { %3379 = vmatprep.subr.bf16.mxu0 %v10314_v19  ;;  %3420 = vmatprep.subr.bf16.mxu1 %v10315_v53  ;;  %v10325_v19 = vld [vmem:[#allocation123_spill] sm:$0xff]  ;;  %v10326_v53 = vld [vmem:[#allocation124_spill] sm:$0xff] }
 0x56a   : > { %3380 = vmatpush1.bf16.msra.mxu0 %v10316_v2  ;;  %3421 = vmatpush1.bf16.msra.mxu1 %v10317_v23  ;;  %v10327_v2 = vld [vmem:[#allocation125_spill] sm:$0xff]  ;;  %v10328_v23 = vld [vmem:[#allocation126_spill] sm:$0xff] }
 0x56b   : > { %3381 = vmatprep.subr.bf16.mxu0 %v10318_v39  ;;  %3422 = vmatprep.subr.bf16.mxu1 %v10319_v49  ;;  %v10329_v39 = vld [vmem:[#allocation127_spill] sm:$0xff]  ;;  %v10330_v49 = vld [vmem:[#allocation128_spill] sm:$0xff] }
 0x56e   : > { %3382 = vmatpush1.bf16.msra.mxu0 %v10320_v62  ;;  %3423 = vmatpush1.bf16.msra.mxu1 %v10321_v61  ;;  %v10331_v62 = vld [vmem:[#allocation129_spill] sm:$0xff]  ;;  %v10332_v61 = vld [vmem:[#allocation130_spill] sm:$0xff] }
 0x56f   : > { %3383 = vmatprep.subr.bf16.mxu0 %v10322_v31  ;;  %3424 = vmatprep.subr.bf16.mxu1 %v10323_v45  ;;  %v10333_v31 = vld [vmem:[#allocation131_spill] sm:$0xff]  ;;  %v10334_v45 = vld [vmem:[#allocation132_spill] sm:$0xff] }
 0x572   : > { %3384 = vmatpush1.bf16.msra.mxu0 %v10324_v7  ;;  %3425 = vmatpush1.bf16.msra.mxu1 %v10325_v19  ;;  %v10335_v7 = vld [vmem:[#allocation133_spill] sm:$0xff]  ;;  %v10336_v19 = vld [vmem:[#allocation134_spill] sm:$0xff] }
 0x573   : > { %3385 = vmatprep.subr.bf16.mxu0 %v10326_v53  ;;  %3426 = vmatprep.subr.bf16.mxu1 %v10327_v2  ;;  %v10337_v53 = vld [vmem:[#allocation135_spill] sm:$0xff]  ;;  %v10338_v2 = vld [vmem:[#allocation136_spill] sm:$0xff] }
 0x576   : > { %3386 = vmatpush1.bf16.msra.mxu0 %v10328_v23  ;;  %3427 = vmatpush1.bf16.msra.mxu1 %v10329_v39  ;;  %v10339_v23 = vld [vmem:[#allocation137_spill] sm:$0xff]  ;;  %v10340_v39 = vld [vmem:[#allocation138_spill] sm:$0xff] }
 0x577   : > { %3387 = vmatprep.subr.bf16.mxu0 %v10330_v49  ;;  %3428 = vmatprep.subr.bf16.mxu1 %v10331_v62  ;;  %v10341_v49 = vld [vmem:[#allocation139_spill] sm:$0xff]  ;;  %v10342_v62 = vld [vmem:[#allocation140_spill] sm:$0xff] }
 0x57a   : > { %3388 = vmatpush1.bf16.msra.mxu0 %v10332_v61  ;;  %3429 = vmatpush1.bf16.msra.mxu1 %v10333_v31  ;;  %v10343_v61 = vld [vmem:[#allocation141_spill] sm:$0xff]  ;;  %v10344_v31 = vld [vmem:[#allocation142_spill] sm:$0xff] }
 0x57b   : > { %3389 = vmatprep.subr.bf16.mxu0 %v10334_v45  ;;  %3430 = vmatprep.subr.bf16.mxu1 %v10335_v7  ;;  %v10345_v45 = vld [vmem:[#allocation143_spill] sm:$0xff]  ;;  %v10346_v7 = vld [vmem:[#allocation144_spill] sm:$0xff] }
 0x57e   : > { %3390 = vmatpush1.bf16.msra.mxu0 %v10336_v19  ;;  %3431 = vmatpush1.bf16.msra.mxu1 %v10337_v53  ;;  %v10347_v19 = vld [vmem:[#allocation145_spill] sm:$0xff] }
 0x57f   : > { %3391 = vmatprep.subr.bf16.mxu0 %v10338_v2  ;;  %3432 = vmatprep.subr.bf16.mxu1 %v10339_v23 }
 0x582   : > { %3392 = vmatpush1.bf16.msra.mxu0 %v10340_v39  ;;  %3433 = vmatpush1.bf16.msra.mxu1 %v10341_v49  ;;  %v10348_v39 = vld [vmem:[#allocation149_spill] sm:$0xff] }
 0x583   : > { %3393 = vmatprep.subr.bf16.mxu0 %v10342_v62  ;;  %3434 = vmatprep.subr.bf16.mxu1 %v10343_v61 }
 0x586   : > { %3394 = vmatpush1.bf16.msra.mxu0 %v10344_v31  ;;  %3435 = vmatpush1.bf16.msra.mxu1 %v10345_v45 }
 0x587   : > { %3395 = vmatprep.subr.bf16.mxu0 %v10346_v7  ;;  %3436 = vmatprep.subr.bf16.mxu1 %v10347_v19 }
 0x58a   : > { %3396 = vmatpush1.bf16.msra.mxu0 %v8669_v22  ;;  %3437 = vmatpush1.bf16.msra.mxu1 %v8673_v32 }
 0x58b   : > { %3397 = vmatprep.subr.bf16.mxu0 %v8675_v21  ;;  %3438 = vmatprep.subr.bf16.mxu1 %v10348_v39 }
 0x58e   : > { %3398 = vmatpush1.bf16.msra.mxu0 %v8685_v55  ;;  %3439 = vmatpush1.bf16.msra.mxu1 %v8689_v51 }
 0x58f   : > { %3399 = vmatprep.subr.bf16.mxu0 %v8691_v50  ;;  %3440 = vmatprep.subr.bf16.mxu1 %v8694_v59 }
 0x592   : > { %3400 = vmatpush1.bf16.msra.mxu0 %v8701_v46  ;;  %3441 = vmatpush1.bf16.msra.mxu1 %v8705_v36 }
 0x593   : > { %3401 = vmatprep.subr.bf16.mxu0 %v8707_v37  ;;  %3442 = vmatprep.subr.bf16.mxu1 %v8710_v63 }
 0x596   : > { %3402 = vmatpush1.bf16.msra.mxu0 %v8713_v13  ;;  %3443 = vmatpush1.bf16.msra.mxu1 %v8717_v3 }
 0x597   : > { %3521 = vmatprep.subr.bf16.mxu0 %v8207_v60  ;;  %3562 = vmatprep.subr.bf16.mxu1 %v8216_v1 }
 0x599   : > { %3404 = vmatmul.mubr.bf16.vlgmr.msra.gmra.mrb[12].mxu0 %v8796_v58  ;;  %3445 = vmatmul.mubr.bf16.vlgmr.msra.gmra.mrb[12].mxu1 %v8796_v58  ;;  %v10349_v58 = vld [vmem:[#allocation60_spill] sm:$0xff] }
 0x59a   : > { %3522 = vmatpush1.bf16.msra.mxu0 %v8210_v25  ;;  %3563 = vmatpush1.bf16.msra.mxu1 %v8218_v54 }
 0x59b   : > { %3523 = vmatprep.subr.bf16.mxu0 %v8220_v4  ;;  %3564 = vmatprep.subr.bf16.mxu1 %v8226_v52 }
 0x59e   : > { %3524 = vmatpush1.bf16.msra.mxu0 %v8233_v6  ;;  %3565 = vmatpush1.bf16.msra.mxu1 %v8237_v8 }
 0x59f   : > { %3525 = vmatprep.subr.bf16.mxu0 %v8239_v9  ;;  %3566 = vmatprep.subr.bf16.mxu1 %v8242_v10 }
 0x5a2   : > { %3526 = vmatpush1.bf16.msra.mxu0 %v8249_v14  ;;  %3567 = vmatpush1.bf16.msra.mxu1 %v8253_v16 }
 0x5a3   : > { %3527 = vmatprep.subr.bf16.mxu0 %v8255_v17  ;;  %3568 = vmatprep.subr.bf16.mxu1 %v8258_v18  ;;  %v3280_v18 = vld [vmem:[#allocation2 + $0x48] sm:$0xff]  ;;  %v3282_v17 = vld [vmem:[#allocation2 + $0x58] sm:$0xff] }
 0x5a6   : > { %3528 = vmatpush1.bf16.msra.mxu0 %v8265_v24  ;;  %3569 = vmatpush1.bf16.msra.mxu1 %v8269_v26  ;;  %v3279_v24 = vld [vmem:[#allocation2 + $0x40] sm:$0xff] }
 0x5a7   : > { %3529 = vmatprep.subr.bf16.mxu0 %v8271_v27  ;;  %3570 = vmatprep.subr.bf16.mxu1 %v8274_v28 }
 0x5aa   : > { %3530 = vmatpush1.bf16.msra.mxu0 %v8281_v33  ;;  %3571 = vmatpush1.bf16.msra.mxu1 %v8285_v34  ;;  %v10350_v33 = vld [vmem:[#allocation61_spill] sm:$0xff]  ;;  %v10351_v34 = vld [vmem:[#allocation62_spill] sm:$0xff] }
 0x5ab   : > { %3531 = vmatprep.subr.bf16.mxu0 %v8287_v15  ;;  %3572 = vmatprep.subr.bf16.mxu1 %v8290_v38  ;;  %v10352_v15 = vld [vmem:[#allocation63_spill] sm:$0xff]  ;;  %v10353_v38 = vld [vmem:[#allocation64_spill] sm:$0xff] }
 0x5ae   : > { %3532 = vmatpush1.bf16.msra.mxu0 %v8297_v41  ;;  %3573 = vmatpush1.bf16.msra.mxu1 %v8301_v42  ;;  %v10354_v41 = vld [vmem:[#allocation65_spill] sm:$0xff]  ;;  %v10355_v42 = vld [vmem:[#allocation66_spill] sm:$0xff] }
 0x5af   : > { %3533 = vmatprep.subr.bf16.mxu0 %v8303_v43  ;;  %3574 = vmatprep.subr.bf16.mxu1 %v8306_v44  ;;  %v10356_v43 = vld [vmem:[#allocation67_spill] sm:$0xff]  ;;  %v10357_v44 = vld [vmem:[#allocation68_spill] sm:$0xff] }
 0x5b2   : > { %3534 = vmatpush1.bf16.msra.mxu0 %v8313_v0  ;;  %3575 = vmatpush1.bf16.msra.mxu1 %v8317_v56  ;;  %v10358_v0 = vld [vmem:[#allocation69_spill] sm:$0xff]  ;;  %v10359_v56 = vld [vmem:[#allocation70_spill] sm:$0xff] }
 0x5b3   : > { %3535 = vmatprep.subr.bf16.mxu0 %v10349_v58  ;;  %3576 = vmatprep.subr.bf16.mxu1 %v10350_v33  ;;  %v10360_v58 = vld [vmem:[#allocation71_spill] sm:$0xff]  ;;  %v10361_v33 = vld [vmem:[#allocation72_spill] sm:$0xff] }
 0x5b6   : > { %3536 = vmatpush1.bf16.msra.mxu0 %v10351_v34  ;;  %3577 = vmatpush1.bf16.msra.mxu1 %v10352_v15  ;;  %v10362_v34 = vld [vmem:[#allocation73_spill] sm:$0xff]  ;;  %v10363_v15 = vld [vmem:[#allocation74_spill] sm:$0xff] }
 0x5b7   : > { %3537 = vmatprep.subr.bf16.mxu0 %v10353_v38  ;;  %3578 = vmatprep.subr.bf16.mxu1 %v10354_v41  ;;  %v10364_v38 = vld [vmem:[#allocation75_spill] sm:$0xff]  ;;  %v10365_v41 = vld [vmem:[#allocation76_spill] sm:$0xff] }
 0x5ba   : > { %3538 = vmatpush1.bf16.msra.mxu0 %v10355_v42  ;;  %3579 = vmatpush1.bf16.msra.mxu1 %v10356_v43  ;;  %v10366_v42 = vld [vmem:[#allocation77_spill] sm:$0xff]  ;;  %v10367_v43 = vld [vmem:[#allocation78_spill] sm:$0xff] }
 0x5bb   : > { %3539 = vmatprep.subr.bf16.mxu0 %v10357_v44  ;;  %3580 = vmatprep.subr.bf16.mxu1 %v10358_v0  ;;  %v10368_v44 = vld [vmem:[#allocation79_spill] sm:$0xff]  ;;  %v10369_v0 = vld [vmem:[#allocation80_spill] sm:$0xff] }
 0x5be   : > { %3540 = vmatpush1.bf16.msra.mxu0 %v10359_v56  ;;  %3581 = vmatpush1.bf16.msra.mxu1 %v10360_v58  ;;  %v10370_v56 = vld [vmem:[#allocation81_spill] sm:$0xff]  ;;  %v10371_v58 = vld [vmem:[#allocation82_spill] sm:$0xff] }
 0x5bf   : > { %3541 = vmatprep.subr.bf16.mxu0 %v10361_v33  ;;  %3582 = vmatprep.subr.bf16.mxu1 %v10362_v34  ;;  %v10372_v33 = vld [vmem:[#allocation83_spill] sm:$0xff]  ;;  %v10373_v34 = vld [vmem:[#allocation84_spill] sm:$0xff] }
 0x5c2   : > { %3542 = vmatpush1.bf16.msra.mxu0 %v10363_v15  ;;  %3583 = vmatpush1.bf16.msra.mxu1 %v10364_v38  ;;  %v10374_v15 = vld [vmem:[#allocation85_spill] sm:$0xff]  ;;  %v10375_v38 = vld [vmem:[#allocation86_spill] sm:$0xff] }
 0x5c3   : > { %3543 = vmatprep.subr.bf16.mxu0 %v10365_v41  ;;  %3584 = vmatprep.subr.bf16.mxu1 %v10366_v42  ;;  %v10376_v41 = vld [vmem:[#allocation87_spill] sm:$0xff]  ;;  %v10377_v42 = vld [vmem:[#allocation88_spill] sm:$0xff] }
 0x5c6   : > { %3544 = vmatpush1.bf16.msra.mxu0 %v10367_v43  ;;  %3585 = vmatpush1.bf16.msra.mxu1 %v10368_v44  ;;  %v10378_v43 = vld [vmem:[#allocation89_spill] sm:$0xff]  ;;  %v10379_v44 = vld [vmem:[#allocation90_spill] sm:$0xff] }
 0x5c7   : > { %3545 = vmatprep.subr.bf16.mxu0 %v10369_v0  ;;  %3586 = vmatprep.subr.bf16.mxu1 %v10370_v56  ;;  %v10380_v0 = vld [vmem:[#allocation91_spill] sm:$0xff]  ;;  %v10381_v56 = vld [vmem:[#allocation92_spill] sm:$0xff] }
 0x5ca   : > { %3546 = vmatpush1.bf16.msra.mxu0 %v10371_v58  ;;  %3587 = vmatpush1.bf16.msra.mxu1 %v10372_v33  ;;  %v10382_v58 = vld [vmem:[#allocation93_spill] sm:$0xff]  ;;  %v10383_v33 = vld [vmem:[#allocation94_spill] sm:$0xff] }
 0x5cb   : > { %3547 = vmatprep.subr.bf16.mxu0 %v10373_v34  ;;  %3588 = vmatprep.subr.bf16.mxu1 %v10374_v15  ;;  %v10384_v34 = vld [vmem:[#allocation95_spill] sm:$0xff]  ;;  %v10385_v15 = vld [vmem:[#allocation96_spill] sm:$0xff] }
 0x5ce   : > { %3548 = vmatpush1.bf16.msra.mxu0 %v10375_v38  ;;  %3589 = vmatpush1.bf16.msra.mxu1 %v10376_v41  ;;  %v10386_v38 = vld [vmem:[#allocation97_spill] sm:$0xff] }
 0x5cf   : > { %3549 = vmatprep.subr.bf16.mxu0 %v10377_v42  ;;  %3590 = vmatprep.subr.bf16.mxu1 %v10378_v43 }
 0x5d2   : > { %3550 = vmatpush1.bf16.msra.mxu0 %v10379_v44  ;;  %3591 = vmatpush1.bf16.msra.mxu1 %v10380_v0 }
 0x5d3   : > { %3551 = vmatprep.subr.bf16.mxu0 %v10381_v56  ;;  %3592 = vmatprep.subr.bf16.mxu1 %v10382_v58  ;;  %v3281_v56 = vld [vmem:[#allocation2 + $0x50] sm:$0xff] }
 0x5d6   : > { %3552 = vmatpush1.bf16.msra.mxu0 %v10383_v33  ;;  %3593 = vmatpush1.bf16.msra.mxu1 %v10384_v34 }
 0x5d7   : > { %3603 = vmatprep.subr.bf16.mxu0 %v10385_v15  ;;  %3644 = vmatprep.subr.bf16.mxu1 %v10386_v38 }
 0x62c   : > { %v3323_v41 = vpop.f32.mrb[8].mxu0  ;;  %v3364_v42 = vpop.f32.mrb[8].mxu1 }
 0x62d   : > { %v3325_v28 = vpop.f32.mrb[9].mxu0  ;;  %v3366_v43 = vpop.f32.mrb[9].mxu1  ;;  %v3453_v58 = vadd.f32 %v3323_v41, %v3279_v24  ;;  %v3455_v33 = vadd.f32 %v3364_v42, %v3281_v56  ;;  %v3283_v41 = vld [vmem:[#allocation2 + $0x60] sm:$0xff]  ;;  %v3285_v42 = vld [vmem:[#allocation2 + $0x70] sm:$0xff] }
 0x62e   : > { %v3327_v27 = vpop.f32.mrb[10].mxu0  ;;  %v3368_v44 = vpop.f32.mrb[10].mxu1  ;;  %v3454_v16 = vadd.f32 %v3325_v28, %v3280_v18  ;;  %v3456_v34 = vadd.f32 %v3366_v43, %v3282_v17  ;;  %v3284_v17 = vld [vmem:[#allocation2 + $0x68] sm:$0xff]  ;;  %v3286_v18 = vld [vmem:[#allocation2 + $0x78] sm:$0xff] }
 0x62f   : > { %v3328_v26 = vpop.f32.mrb[11].mxu0  ;;  %v3369_v0 = vpop.f32.mrb[11].mxu1  ;;  %v6218_v14 = vmul.f32 -1.442695, %v3453_v58  ;;  %v6220_v15 = vmul.f32 -1.442695, %v3455_v33 }
 0x630   : > { %v6219_v10 = vmul.f32 -1.442695, %v3454_v16  ;;  %v6221_v38 = vmul.f32 -1.442695, %v3456_v34 }
 0x631   : > { %6563 = vpow2.f32 %v6218_v14 }
 0x632   : > { %6565 = vpow2.f32 %v6220_v15 }
 0x633   : > { %6567 = vpow2.f32 %v6219_v10 }
 0x634   : > { %6569 = vpow2.f32 %v6221_v38 }
 0x63b   : > { %v6564_v27 = vpop.eup %6563 }
 0x63c   : > { %v6566_v44 = vpop.eup %6565  ;;  %v3473_v9 = vadd.f32 1.0, %v6564_v27 }
 0x63d   : > { %v6568_v26 = vpop.eup %6567  ;;  %v3475_v8 = vadd.f32 1.0, %v6566_v44 }
 0x63e   : > { %v6570_v0 = vpop.eup %6569  ;;  %v3474_v6 = vadd.f32 1.0, %v6568_v26  ;;  %6571 = vrcp.f32 %v3473_v9 }
 0x63f   : > { %v3476_v24 = vadd.f32 1.0, %v6570_v0  ;;  %6573 = vrcp.f32 %v3475_v8 }
 0x640   : > { %6575 = vrcp.f32 %v3474_v6 }
 0x641   : > { %6577 = vrcp.f32 %v3476_v24 }
 0x648   : > { %v6572_v8 = vpop.eup %6571 }
 0x649   : > { %v6574_v26 = vpop.eup %6573 }
 0x64a   : > { %v6576_v6 = vpop.eup %6575  ;;  %v3499_v24 = vmul.f32 %v6574_v26, %v8790_v35  ;;  %v10389_v26 = vld [vmem:[#allocation109_spill] sm:$0xff] }
 0x64b   : > { %v6578_v0 = vpop.eup %6577 }
 0x66c   : > { %v3405_v16 = vpop.f32.mrb[12].mxu0  ;;  %v3446_v28 = vpop.f32.mrb[12].mxu1 }
 0x66d   : > { %v3457_v14 = vadd.f32 %v3405_v16, %v3283_v41  ;;  %v3459_v10 = vadd.f32 %v3446_v28, %v3285_v42  ;;  %v3407_v33 = vpop.f32.mrb[13].mxu0  ;;  %v3448_v34 = vpop.f32.mrb[13].mxu1  ;;  %v3500_v16 = vmul.f32 %v6578_v0, %v8792_v40  ;;  %v10391_v0 = vld [vmem:[#allocation111_spill] sm:$0xff] }
 0x66e   : > { %v3458_v15 = vadd.f32 %v3407_v33, %v3284_v17  ;;  %v3460_v38 = vadd.f32 %v3448_v34, %v3286_v18  ;;  %v3409_v43 = vpop.f32.mrb[14].mxu0  ;;  %v3450_v56 = vpop.f32.mrb[14].mxu1 }
 0x66f   : > { %6579 = vtanh.f32 %v3457_v14  ;;  %v6222_v58 = vmul.f32 -1.442695, %v3459_v10  ;;  %v3410_v27 = vpop.f32.mrb[15].mxu0  ;;  %v3451_v44 = vpop.f32.mrb[15].mxu1 }
 0x670   : > { %6581 = vtanh.f32 %v3458_v15  ;;  %v6223_v9 = vmul.f32 -1.442695, %v3460_v38 }
 0x671   : > { %6583 = vpow2.f32 %v6222_v58 }
 0x672   : > { %6585 = vpow2.f32 %v6223_v9  ;;  %v10387_v9 = vld [vmem:[#allocation107_spill] sm:$0xff] }
 0x679   : > { %v6580_v41 = vpop.eup %6579 }
 0x67a   : > { %v6582_v42 = vpop.eup %6581  ;;  %v3501_v17 = vmul.f32 %v6580_v41, %v6572_v8  ;;  %v10388_v8 = vld [vmem:[#allocation108_spill] sm:$0xff] }
 0x67b   : > { %v6584_v18 = vpop.eup %6583  ;;  %v3502_v28 = vmul.f32 %v6582_v42, %v6576_v6  ;;  %v10390_v6 = vld [vmem:[#allocation110_spill] sm:$0xff]  ;;  %v10392_v41 = vld [vmem:[#allocation112_spill] sm:$0xff]  ;;  %v10393_v42 = vld [vmem:[#allocation113_spill] sm:$0xff] }
 0x67c   : > { %v6586_v14 = vpop.eup %6585  ;;  %v8932_v10 = vadd.f32 %v3501_v17, %v3499_v24  ;;  %v3493_v33 = vadd.f32 1.0, %v6584_v18  ;;  %v10394_v24 = vld [vmem:[#allocation114_spill] sm:$0xff]  ;;  %v10395_v17 = vld [vmem:[#allocation115_spill] sm:$0xff]  ;;  %v10396_v18 = vld [vmem:[#allocation116_spill] sm:$0xff] }
 0x67d   : > { %v8934_v34 = vadd.f32 %v3502_v28, %v3500_v16  ;;  %v3494_v15 = vadd.f32 1.0, %v6586_v14  ;;  %v10397_v16 = vld [vmem:[#allocation117_spill] sm:$0xff]  ;;  %v10398_v28 = vld [vmem:[#allocation118_spill] sm:$0xff]  ;;  %v10399_v14 = vld [vmem:[#allocation119_spill] sm:$0xff] }
 0x67e   : > { %6587 = vtanh.f32 %v8932_v10 }
 0x67f   : > { %6589 = vrcp.f32 %v3493_v33  ;;  %v10400_v33 = vld [vmem:[#allocation120_spill] sm:$0xff] }
 0x680   : > { %6591 = vtanh.f32 %v8934_v34 }
 0x681   : > { %6593 = vrcp.f32 %v3494_v15  ;;  %v10401_v15 = vld [vmem:[#allocation121_spill] sm:$0xff] }
 0x688   : > { %v6588_v38 = vpop.eup %6587 }
 0x689   : > { %v6590_v35 = vpop.eup %6589 }
 0x68a   : > { %v6592_v43 = vpop.eup %6591  ;;  %v3507_v56 = vmul.f32 %v6590_v35, %v6588_v38  ;;  %v10402_v38 = vld [vmem:[#allocation122_spill] sm:$0xff]  ;;  %v10403_v35 = vld [vmem:[#allocation123_spill] sm:$0xff] }
 0x68b   : > { %v6594_v58 = vpop.eup %6593 }
 0x68c   : > { %v3508_v40 = vmul.f32 %v6594_v58, %v6592_v43  ;;  %3509 = vst [vmem:[#allocation3 + $0x10] sm:$0xff] %v3507_v56  ;;  %v8938_v44 = vpack.c.bf16 %v3507_v56, %v3507_v56  ;;  %v10404_v43 = vld [vmem:[#allocation124_spill] sm:$0xff]  ;;  %v10405_v56 = vld [vmem:[#allocation125_spill] sm:$0xff]  ;;  %v10406_v58 = vld [vmem:[#allocation126_spill] sm:$0xff] }
 0x68e   : > { %3510 = vst [vmem:[#allocation3 + $0x18] sm:$0xff] %v3508_v40  ;;  %v3520_v27 = vpack.c.bf16 %v3508_v40, %v3508_v40  ;;  %v10407_v40 = vld [vmem:[#allocation127_spill] sm:$0xff] }
 0x690   : > { %3553 = vmatprep.mubr.bf16.mxu0 %v3520_v27  ;;  %3594 = vmatprep.mubr.bf16.mxu1 %v3520_v27 }
 0x691   : > { %3554 = vmatmul.mubr.bf16.vlgmr.msra.gmra.mrb[16].mxu0 %v8938_v44  ;;  %3595 = vmatmul.mubr.bf16.vlgmr.msra.gmra.mrb[16].mxu1 %v8938_v44 }
 0x692   : > { %3604 = vmatpush1.bf16.msra.mxu0 %v10300_v57  ;;  %3645 = vmatpush1.bf16.msra.mxu1 %v10301_v48 }
 0x693   : > { %3635 = vmatprep.mubr.bf16.mxu0 %v3520_v27  ;;  %3676 = vmatprep.mubr.bf16.mxu1 %v3520_v27  ;;  %v10408_v27 = vld [vmem:[#allocation128_spill] sm:$0xff] }
 0x694   : > { %3605 = vmatprep.subr.bf16.mxu0 %v10302_v20  ;;  %3646 = vmatprep.subr.bf16.mxu1 %v10303_v47 }
 0x696   : > { %3606 = vmatpush1.bf16.msra.mxu0 %v10304_v12  ;;  %3647 = vmatpush1.bf16.msra.mxu1 %v10305_v11 }
 0x697   : > { %3607 = vmatprep.subr.bf16.mxu0 %v10306_v5  ;;  %3648 = vmatprep.subr.bf16.mxu1 %v10307_v29 }
 0x69a   : > { %3608 = vmatpush1.bf16.msra.mxu0 %v10308_v30  ;;  %3649 = vmatpush1.bf16.msra.mxu1 %v10387_v9 }
 0x69b   : > { %3609 = vmatprep.subr.bf16.mxu0 %v10388_v8  ;;  %3650 = vmatprep.subr.bf16.mxu1 %v10389_v26 }
 0x69e   : > { %3610 = vmatpush1.bf16.msra.mxu0 %v10390_v6  ;;  %3651 = vmatpush1.bf16.msra.mxu1 %v10391_v0 }
 0x69f   : > { %3611 = vmatprep.subr.bf16.mxu0 %v10392_v41  ;;  %3652 = vmatprep.subr.bf16.mxu1 %v10393_v42 }
 0x6a2   : > { %3612 = vmatpush1.bf16.msra.mxu0 %v10394_v24  ;;  %3653 = vmatpush1.bf16.msra.mxu1 %v10395_v17 }
 0x6a3   : > { %3613 = vmatprep.subr.bf16.mxu0 %v10396_v18  ;;  %3654 = vmatprep.subr.bf16.mxu1 %v10397_v16 }
 0x6a6   : > { %3614 = vmatpush1.bf16.msra.mxu0 %v10398_v28  ;;  %3655 = vmatpush1.bf16.msra.mxu1 %v10399_v14  ;;  %v10409_v28 = vld [vmem:[#allocation129_spill] sm:$0xff]  ;;  %v10410_v14 = vld [vmem:[#allocation130_spill] sm:$0xff] }
 0x6a7   : > { %3615 = vmatprep.subr.bf16.mxu0 %v10400_v33  ;;  %3656 = vmatprep.subr.bf16.mxu1 %v10401_v15  ;;  %v10411_v33 = vld [vmem:[#allocation131_spill] sm:$0xff]  ;;  %v10412_v15 = vld [vmem:[#allocation132_spill] sm:$0xff] }
 0x6aa   : > { %3616 = vmatpush1.bf16.msra.mxu0 %v10402_v38  ;;  %3657 = vmatpush1.bf16.msra.mxu1 %v10403_v35  ;;  %v10413_v38 = vld [vmem:[#allocation133_spill] sm:$0xff]  ;;  %v10414_v35 = vld [vmem:[#allocation134_spill] sm:$0xff] }
 0x6ab   : > { %3617 = vmatprep.subr.bf16.mxu0 %v10404_v43  ;;  %3658 = vmatprep.subr.bf16.mxu1 %v10405_v56 }
 0x6ae   : > { %3618 = vmatpush1.bf16.msra.mxu0 %v10406_v58  ;;  %3659 = vmatpush1.bf16.msra.mxu1 %v10407_v40  ;;  %v10415_v40 = vld [vmem:[#allocation138_spill] sm:$0xff] }
 0x6af   : > { %3619 = vmatprep.subr.bf16.mxu0 %v10408_v27  ;;  %3660 = vmatprep.subr.bf16.mxu1 %v10409_v28 }
 0x6b2   : > { %3620 = vmatpush1.bf16.msra.mxu0 %v10410_v14  ;;  %3661 = vmatpush1.bf16.msra.mxu1 %v10411_v33 }
 0x6b3   : > { %3621 = vmatprep.subr.bf16.mxu0 %v10412_v15  ;;  %3662 = vmatprep.subr.bf16.mxu1 %v10413_v38 }
 0x6b6   : > { %3622 = vmatpush1.bf16.msra.mxu0 %v10414_v35  ;;  %3663 = vmatpush1.bf16.msra.mxu1 %v10337_v53 }
 0x6b7   : > { %3623 = vmatprep.subr.bf16.mxu0 %v10338_v2  ;;  %3664 = vmatprep.subr.bf16.mxu1 %v10339_v23 }
 0x6ba   : > { %3624 = vmatpush1.bf16.msra.mxu0 %v10415_v40  ;;  %3665 = vmatpush1.bf16.msra.mxu1 %v10341_v49 }
 0x6bb   : > { %3625 = vmatprep.subr.bf16.mxu0 %v10342_v62  ;;  %3666 = vmatprep.subr.bf16.mxu1 %v10343_v61 }
 0x6be   : > { %3626 = vmatpush1.bf16.msra.mxu0 %v10344_v31  ;;  %3667 = vmatpush1.bf16.msra.mxu1 %v10345_v45 }
 0x6bf   : > { %3627 = vmatprep.subr.bf16.mxu0 %v10346_v7  ;;  %3668 = vmatprep.subr.bf16.mxu1 %v10347_v19 }
 0x6c2   : > { %3628 = vmatpush1.bf16.msra.mxu0 %v8669_v22  ;;  %3669 = vmatpush1.bf16.msra.mxu1 %v8673_v32 }
 0x6c3   : > { %3629 = vmatprep.subr.bf16.mxu0 %v8675_v21  ;;  %3670 = vmatprep.subr.bf16.mxu1 %v10348_v39 }
 0x6c6   : > { %3630 = vmatpush1.bf16.msra.mxu0 %v8685_v55  ;;  %3671 = vmatpush1.bf16.msra.mxu1 %v8689_v51  ;;  %v3512_v51 = vld [vmem:[#allocation2 + $0x88] sm:$0xff]  ;;  %v3514_v55 = vld [vmem:[#allocation2 + $0x98] sm:$0xff] }
 0x6c7   : > { %3631 = vmatprep.subr.bf16.mxu0 %v8691_v50  ;;  %3672 = vmatprep.subr.bf16.mxu1 %v8694_v59  ;;  %v3511_v50 = vld [vmem:[#allocation2 + $0x80] sm:$0xff] }
 0x6ca   : > { %3632 = vmatpush1.bf16.msra.mxu0 %v8701_v46  ;;  %3673 = vmatpush1.bf16.msra.mxu1 %v8705_v36 }
 0x6cb   : > { %3633 = vmatprep.subr.bf16.mxu0 %v8707_v37  ;;  %3674 = vmatprep.subr.bf16.mxu1 %v8710_v63  ;;  %v10416_v63 = vld [vmem:[#allocation38_spill] sm:$0xff]  ;;  %v10421_v37 = vld [vmem:[#allocation43_spill] sm:$0xff] }
 0x6ce   : > { %3634 = vmatpush1.bf16.msra.mxu0 %v8713_v13  ;;  %3675 = vmatpush1.bf16.msra.mxu1 %v8717_v3  ;;  %v10417_v13 = vld [vmem:[#allocation39_spill] sm:$0xff]  ;;  %v10418_v3 = vld [vmem:[#allocation40_spill] sm:$0xff] }
 0x6cf   : > { %3753 = vmatprep.subr.bf16.mxu0 %v8207_v60  ;;  %3794 = vmatprep.subr.bf16.mxu1 %v8216_v1  ;;  %v10419_v60 = vld [vmem:[#allocation41_spill] sm:$0xff]  ;;  %v10420_v1 = vld [vmem:[#allocation42_spill] sm:$0xff] }
 0x6d1   : > { %3636 = vmatmul.mubr.bf16.vlgmr.msra.gmra.mrb[20].mxu0 %v8938_v44  ;;  %3677 = vmatmul.mubr.bf16.vlgmr.msra.gmra.mrb[20].mxu1 %v8938_v44  ;;  %v10422_v44 = vld [vmem:[#allocation44_spill] sm:$0xff] }
 0x6d2   : > { %3754 = vmatpush1.bf16.msra.mxu0 %v8210_v25  ;;  %3795 = vmatpush1.bf16.msra.mxu1 %v8218_v54  ;;  %v10423_v25 = vld [vmem:[#allocation45_spill] sm:$0xff]  ;;  %v10424_v54 = vld [vmem:[#allocation46_spill] sm:$0xff] }
 0x6d3   : > { %3755 = vmatprep.subr.bf16.mxu0 %v8220_v4  ;;  %3796 = vmatprep.subr.bf16.mxu1 %v8226_v52  ;;  %v10425_v4 = vld [vmem:[#allocation47_spill] sm:$0xff]  ;;  %v10426_v52 = vld [vmem:[#allocation48_spill] sm:$0xff] }
 0x6d6   : > { %3756 = vmatpush1.bf16.msra.mxu0 %v10416_v63  ;;  %3797 = vmatpush1.bf16.msra.mxu1 %v10417_v13  ;;  %v10427_v63 = vld [vmem:[#allocation49_spill] sm:$0xff]  ;;  %v10428_v13 = vld [vmem:[#allocation50_spill] sm:$0xff] }
 0x6d7   : > { %3757 = vmatprep.subr.bf16.mxu0 %v10418_v3  ;;  %3798 = vmatprep.subr.bf16.mxu1 %v10419_v60  ;;  %v10429_v3 = vld [vmem:[#allocation51_spill] sm:$0xff]  ;;  %v10430_v60 = vld [vmem:[#allocation52_spill] sm:$0xff] }
 0x6da   : > { %3758 = vmatpush1.bf16.msra.mxu0 %v10420_v1  ;;  %3799 = vmatpush1.bf16.msra.mxu1 %v10421_v37  ;;  %v10431_v1 = vld [vmem:[#allocation53_spill] sm:$0xff]  ;;  %v10432_v37 = vld [vmem:[#allocation54_spill] sm:$0xff] }
 0x6db   : > { %3759 = vmatprep.subr.bf16.mxu0 %v10422_v44  ;;  %3800 = vmatprep.subr.bf16.mxu1 %v10423_v25  ;;  %v10433_v44 = vld [vmem:[#allocation55_spill] sm:$0xff]  ;;  %v10434_v25 = vld [vmem:[#allocation56_spill] sm:$0xff] }
 0x6de   : > { %3760 = vmatpush1.bf16.msra.mxu0 %v10424_v54  ;;  %3801 = vmatpush1.bf16.msra.mxu1 %v10425_v4  ;;  %v10435_v54 = vld [vmem:[#allocation57_spill] sm:$0xff]  ;;  %v10436_v4 = vld [vmem:[#allocation58_spill] sm:$0xff] }
 0x6df   : > { %3761 = vmatprep.subr.bf16.mxu0 %v10426_v52  ;;  %3802 = vmatprep.subr.bf16.mxu1 %v10427_v63  ;;  %v10437_v52 = vld [vmem:[#allocation59_spill] sm:$0xff]  ;;  %v10438_v63 = vld [vmem:[#allocation60_spill] sm:$0xff] }
 0x6e2   : > { %3762 = vmatpush1.bf16.msra.mxu0 %v10428_v13  ;;  %3803 = vmatpush1.bf16.msra.mxu1 %v10429_v3  ;;  %v10439_v13 = vld [vmem:[#allocation61_spill] sm:$0xff]  ;;  %v10440_v3 = vld [vmem:[#allocation62_spill] sm:$0xff] }
 0x6e3   : > { %3763 = vmatprep.subr.bf16.mxu0 %v10430_v60  ;;  %3804 = vmatprep.subr.bf16.mxu1 %v10431_v1  ;;  %v10441_v60 = vld [vmem:[#allocation63_spill] sm:$0xff]  ;;  %v10442_v1 = vld [vmem:[#allocation64_spill] sm:$0xff] }
 0x6e6   : > { %3764 = vmatpush1.bf16.msra.mxu0 %v10432_v37  ;;  %3805 = vmatpush1.bf16.msra.mxu1 %v10433_v44  ;;  %v10443_v37 = vld [vmem:[#allocation65_spill] sm:$0xff]  ;;  %v10444_v44 = vld [vmem:[#allocation66_spill] sm:$0xff] }
 0x6e7   : > { %3765 = vmatprep.subr.bf16.mxu0 %v10434_v25  ;;  %3806 = vmatprep.subr.bf16.mxu1 %v10435_v54  ;;  %v10445_v25 = vld [vmem:[#allocation67_spill] sm:$0xff]  ;;  %v10446_v54 = vld [vmem:[#allocation68_spill] sm:$0xff] }
 0x6ea   : > { %3766 = vmatpush1.bf16.msra.mxu0 %v10436_v4  ;;  %3807 = vmatpush1.bf16.msra.mxu1 %v10437_v52  ;;  %v10447_v4 = vld [vmem:[#allocation69_spill] sm:$0xff]  ;;  %v10448_v52 = vld [vmem:[#allocation70_spill] sm:$0xff] }
 0x6eb   : > { %3767 = vmatprep.subr.bf16.mxu0 %v10438_v63  ;;  %3808 = vmatprep.subr.bf16.mxu1 %v10439_v13  ;;  %v10449_v63 = vld [vmem:[#allocation71_spill] sm:$0xff]  ;;  %v10450_v13 = vld [vmem:[#allocation72_spill] sm:$0xff] }
 0x6ee   : > { %3768 = vmatpush1.bf16.msra.mxu0 %v10440_v3  ;;  %3809 = vmatpush1.bf16.msra.mxu1 %v10441_v60  ;;  %v10451_v3 = vld [vmem:[#allocation73_spill] sm:$0xff]  ;;  %v10452_v60 = vld [vmem:[#allocation74_spill] sm:$0xff] }
 0x6ef   : > { %3769 = vmatprep.subr.bf16.mxu0 %v10442_v1  ;;  %3810 = vmatprep.subr.bf16.mxu1 %v10443_v37  ;;  %v10453_v1 = vld [vmem:[#allocation75_spill] sm:$0xff]  ;;  %v10454_v37 = vld [vmem:[#allocation76_spill] sm:$0xff] }
 0x6f2   : > { %3770 = vmatpush1.bf16.msra.mxu0 %v10444_v44  ;;  %3811 = vmatpush1.bf16.msra.mxu1 %v10445_v25  ;;  %v10455_v44 = vld [vmem:[#allocation77_spill] sm:$0xff]  ;;  %v10456_v25 = vld [vmem:[#allocation78_spill] sm:$0xff] }
 0x6f3   : > { %3771 = vmatprep.subr.bf16.mxu0 %v10446_v54  ;;  %3812 = vmatprep.subr.bf16.mxu1 %v10447_v4  ;;  %v10457_v54 = vld [vmem:[#allocation79_spill] sm:$0xff]  ;;  %v10458_v4 = vld [vmem:[#allocation80_spill] sm:$0xff] }
 0x6f6   : > { %3772 = vmatpush1.bf16.msra.mxu0 %v10448_v52  ;;  %3813 = vmatpush1.bf16.msra.mxu1 %v10449_v63  ;;  %v10459_v52 = vld [vmem:[#allocation81_spill] sm:$0xff]  ;;  %v10460_v63 = vld [vmem:[#allocation82_spill] sm:$0xff] }
 0x6f7   : > { %3773 = vmatprep.subr.bf16.mxu0 %v10450_v13  ;;  %3814 = vmatprep.subr.bf16.mxu1 %v10451_v3  ;;  %v10461_v13 = vld [vmem:[#allocation83_spill] sm:$0xff]  ;;  %v10462_v3 = vld [vmem:[#allocation84_spill] sm:$0xff] }
 0x6fa   : > { %3774 = vmatpush1.bf16.msra.mxu0 %v10452_v60  ;;  %3815 = vmatpush1.bf16.msra.mxu1 %v10453_v1  ;;  %v10463_v60 = vld [vmem:[#allocation85_spill] sm:$0xff]  ;;  %v10464_v1 = vld [vmem:[#allocation86_spill] sm:$0xff] }
 0x6fb   : > { %3775 = vmatprep.subr.bf16.mxu0 %v10454_v37  ;;  %3816 = vmatprep.subr.bf16.mxu1 %v10455_v44  ;;  %v10465_v37 = vld [vmem:[#allocation87_spill] sm:$0xff]  ;;  %v10466_v44 = vld [vmem:[#allocation88_spill] sm:$0xff] }
 0x6fe   : > { %3776 = vmatpush1.bf16.msra.mxu0 %v10456_v25  ;;  %3817 = vmatpush1.bf16.msra.mxu1 %v10457_v54  ;;  %v10467_v25 = vld [vmem:[#allocation89_spill] sm:$0xff]  ;;  %v10468_v54 = vld [vmem:[#allocation90_spill] sm:$0xff] }
 0x6ff   : > { %3777 = vmatprep.subr.bf16.mxu0 %v10458_v4  ;;  %3818 = vmatprep.subr.bf16.mxu1 %v10459_v52  ;;  %v10469_v4 = vld [vmem:[#allocation91_spill] sm:$0xff]  ;;  %v10470_v52 = vld [vmem:[#allocation92_spill] sm:$0xff] }
 0x702   : > { %3778 = vmatpush1.bf16.msra.mxu0 %v10460_v63  ;;  %3819 = vmatpush1.bf16.msra.mxu1 %v10461_v13  ;;  %v10471_v63 = vld [vmem:[#allocation93_spill] sm:$0xff]  ;;  %v10472_v13 = vld [vmem:[#allocation94_spill] sm:$0xff] }
 0x703   : > { %3779 = vmatprep.subr.bf16.mxu0 %v10462_v3  ;;  %3820 = vmatprep.subr.bf16.mxu1 %v10463_v60  ;;  %v10473_v3 = vld [vmem:[#allocation95_spill] sm:$0xff]  ;;  %v10474_v60 = vld [vmem:[#allocation96_spill] sm:$0xff] }
 0x706   : > { %3780 = vmatpush1.bf16.msra.mxu0 %v10464_v1  ;;  %3821 = vmatpush1.bf16.msra.mxu1 %v10465_v37  ;;  %v10475_v1 = vld [vmem:[#allocation97_spill] sm:$0xff] }
 0x707   : > { %3781 = vmatprep.subr.bf16.mxu0 %v10466_v44  ;;  %3822 = vmatprep.subr.bf16.mxu1 %v10467_v25 }
 0x70a   : > { %3782 = vmatpush1.bf16.msra.mxu0 %v10468_v54  ;;  %3823 = vmatpush1.bf16.msra.mxu1 %v10469_v4 }
 0x70b   : > { %3783 = vmatprep.subr.bf16.mxu0 %v10470_v52  ;;  %3824 = vmatprep.subr.bf16.mxu1 %v10471_v63  ;;  %v3513_v52 = vld [vmem:[#allocation2 + $0x90] sm:$0xff] }
 0x70e   : > { %3784 = vmatpush1.bf16.msra.mxu0 %v10472_v13  ;;  %3825 = vmatpush1.bf16.msra.mxu1 %v10473_v3 }
 0x70f   : > { %3835 = vmatprep.subr.bf16.mxu0 %v10474_v60  ;;  %3876 = vmatprep.subr.bf16.mxu1 %v10475_v1 }
 0x764   : > { %v3555_v37 = vpop.f32.mrb[16].mxu0  ;;  %v3596_v44 = vpop.f32.mrb[16].mxu1 }
 0x765   : > { %v3557_v36 = vpop.f32.mrb[17].mxu0  ;;  %v3598_v25 = vpop.f32.mrb[17].mxu1  ;;  %v3685_v63 = vadd.f32 %v3555_v37, %v3511_v50  ;;  %v3687_v13 = vadd.f32 %v3596_v44, %v3513_v52  ;;  %v3515_v37 = vld [vmem:[#allocation2 + $0xa0] sm:$0xff]  ;;  %v3517_v52 = vld [vmem:[#allocation2 + $0xb0] sm:$0xff] }
 0x766   : > { %v3559_v46 = vpop.f32.mrb[18].mxu0  ;;  %v3600_v54 = vpop.f32.mrb[18].mxu1  ;;  %v3686_v39 = vadd.f32 %v3557_v36, %v3512_v51  ;;  %v3688_v3 = vadd.f32 %v3598_v25, %v3514_v55  ;;  %v3516_v25 = vld [vmem:[#allocation2 + $0xa8] sm:$0xff]  ;;  %v3518_v55 = vld [vmem:[#allocation2 + $0xb8] sm:$0xff] }
 0x767   : > { %v3560_v59 = vpop.f32.mrb[19].mxu0  ;;  %v3601_v4 = vpop.f32.mrb[19].mxu1  ;;  %v6224_v21 = vmul.f32 -1.442695, %v3685_v63  ;;  %v6226_v60 = vmul.f32 -1.442695, %v3687_v13 }
 0x768   : > { %v6225_v32 = vmul.f32 -1.442695, %v3686_v39  ;;  %v6227_v1 = vmul.f32 -1.442695, %v3688_v3 }
 0x769   : > { %6595 = vpow2.f32 %v6224_v21 }
 0x76a   : > { %6597 = vpow2.f32 %v6226_v60 }
 0x76b   : > { %6599 = vpow2.f32 %v6225_v32 }
 0x76c   : > { %6601 = vpow2.f32 %v6227_v1 }
 0x773   : > { %v6596_v46 = vpop.eup %6595 }
 0x774   : > { %v6598_v54 = vpop.eup %6597  ;;  %v3705_v22 = vadd.f32 1.0, %v6596_v46 }
 0x775   : > { %v6600_v59 = vpop.eup %6599  ;;  %v3707_v19 = vadd.f32 1.0, %v6598_v54 }
 0x776   : > { %v6602_v4 = vpop.eup %6601  ;;  %v3706_v7 = vadd.f32 1.0, %v6600_v59  ;;  %6603 = vrcp.f32 %v3705_v22 }
 0x777   : > { %v3708_v50 = vadd.f32 1.0, %v6602_v4  ;;  %6605 = vrcp.f32 %v3707_v19 }
 0x778   : > { %6607 = vrcp.f32 %v3706_v7 }
 0x779   : > { %6609 = vrcp.f32 %v3708_v50 }
 0x780   : > { %v6604_v19 = vpop.eup %6603 }
 0x781   : > { %v6606_v59 = vpop.eup %6605 }
 0x782   : > { %v6608_v7 = vpop.eup %6607  ;;  %v3731_v50 = vmul.f32 %v6606_v59, %v8932_v10  ;;  %v10478_v59 = vld [vmem:[#allocation120_spill] sm:$0xff] }
 0x783   : > { %v6610_v4 = vpop.eup %6609 }
 0x7a4   : > { %v3637_v13 = vpop.f32.mrb[20].mxu0  ;;  %v3678_v51 = vpop.f32.mrb[20].mxu1 }
 0x7a5   : > { %v3689_v60 = vadd.f32 %v3637_v13, %v3515_v37  ;;  %v3691_v32 = vadd.f32 %v3678_v51, %v3517_v52  ;;  %v3639_v1 = vpop.f32.mrb[21].mxu0  ;;  %v3680_v21 = vpop.f32.mrb[21].mxu1  ;;  %v3732_v13 = vmul.f32 %v6610_v4, %v8934_v34  ;;  %v10480_v4 = vld [vmem:[#allocation122_spill] sm:$0xff] }
 0x7a6   : > { %v3690_v36 = vadd.f32 %v3639_v1, %v3516_v25  ;;  %v3692_v63 = vadd.f32 %v3680_v21, %v3518_v55  ;;  %v3641_v3 = vpop.f32.mrb[22].mxu0  ;;  %v3682_v39 = vpop.f32.mrb[22].mxu1 }
 0x7a7   : > { %6611 = vtanh.f32 %v3689_v60  ;;  %v6228_v44 = vmul.f32 -1.442695, %v3691_v32  ;;  %v3642_v46 = vpop.f32.mrb[23].mxu0  ;;  %v3683_v54 = vpop.f32.mrb[23].mxu1 }
 0x7a8   : > { %6613 = vtanh.f32 %v3690_v36  ;;  %v6229_v22 = vmul.f32 -1.442695, %v3692_v63 }
 0x7a9   : > { %6615 = vpow2.f32 %v6228_v44 }
 0x7aa   : > { %6617 = vpow2.f32 %v6229_v22  ;;  %v10476_v22 = vld [vmem:[#allocation118_spill] sm:$0xff] }
 0x7b1   : > { %v6612_v37 = vpop.eup %6611 }
 0x7b2   : > { %v6614_v52 = vpop.eup %6613  ;;  %v3733_v25 = vmul.f32 %v6612_v37, %v6604_v19  ;;  %v10477_v19 = vld [vmem:[#allocation119_spill] sm:$0xff] }
 0x7b3   : > { %v6616_v55 = vpop.eup %6615  ;;  %v3734_v51 = vmul.f32 %v6614_v52, %v6608_v7  ;;  %v10479_v7 = vld [vmem:[#allocation121_spill] sm:$0xff]  ;;  %v10481_v37 = vld [vmem:[#allocation123_spill] sm:$0xff] }
 0x7b4   : > { %v6618_v60 = vpop.eup %6617  ;;  %v9074_v32 = vadd.f32 %v3733_v25, %v3731_v50  ;;  %v3725_v1 = vadd.f32 1.0, %v6616_v55  ;;  %v10482_v52 = vld [vmem:[#allocation127_spill] sm:$0xff]  ;;  %v10483_v50 = vld [vmem:[#allocation144_spill] sm:$0xff]  ;;  %v10484_v25 = vld [vmem:[#allocation145_spill] sm:$0xff] }
 0x7b5   : > { %v9076_v21 = vadd.f32 %v3734_v51, %v3732_v13  ;;  %v3726_v36 = vadd.f32 1.0, %v6618_v60  ;;  %v10485_v55 = vld [vmem:[#allocation146_spill] sm:$0xff]  ;;  %v10486_v13 = vld [vmem:[#allocation147_spill] sm:$0xff]  ;;  %v10487_v51 = vld [vmem:[#allocation148_spill] sm:$0xff] }
 0x7b6   : > { %6619 = vtanh.f32 %v9074_v32  ;;  %v10488_v60 = vld [vmem:[#allocation149_spill] sm:$0xff] }
 0x7b7   : > { %6621 = vrcp.f32 %v3725_v1  ;;  %v10489_v1 = vld [vmem:[#allocation150_spill] sm:$0xff] }
 0x7b8   : > { %6623 = vtanh.f32 %v9076_v21 }
 0x7b9   : > { %6625 = vrcp.f32 %v3726_v36  ;;  %v10490_v36 = vld [vmem:[#allocation151_spill] sm:$0xff] }
 0x7c0   : > { %v6620_v63 = vpop.eup %6619 }
 0x7c1   : > { %v6622_v10 = vpop.eup %6621 }
 0x7c2   : > { %v6624_v3 = vpop.eup %6623  ;;  %v3739_v39 = vmul.f32 %v6622_v10, %v6620_v63  ;;  %v10491_v63 = vld [vmem:[#allocation152_spill] sm:$0xff]  ;;  %v10492_v10 = vld [vmem:[#allocation153_spill] sm:$0xff] }
 0x7c3   : > { %v6626_v44 = vpop.eup %6625 }
 0x7c4   : > { %v3740_v34 = vmul.f32 %v6626_v44, %v6624_v3  ;;  %3741 = vst [vmem:[#allocation3 + $0x20] sm:$0xff] %v3739_v39  ;;  %v9080_v54 = vpack.c.bf16 %v3739_v39, %v3739_v39  ;;  %v10493_v3 = vld [vmem:[#allocation154_spill] sm:$0xff]  ;;  %v10494_v39 = vld [vmem:[#allocation155_spill] sm:$0xff]  ;;  %v10495_v44 = vld [vmem:[#allocation156_spill] sm:$0xff] }
 0x7c6   : > { %3742 = vst [vmem:[#allocation3 + $0x28] sm:$0xff] %v3740_v34  ;;  %v3752_v46 = vpack.c.bf16 %v3740_v34, %v3740_v34  ;;  %v10496_v34 = vld [vmem:[#allocation157_spill] sm:$0xff] }
 0x7c8   : > { %3785 = vmatprep.mubr.bf16.mxu0 %v3752_v46  ;;  %3826 = vmatprep.mubr.bf16.mxu1 %v3752_v46 }
 0x7c9   : > { %3786 = vmatmul.mubr.bf16.vlgmr.msra.gmra.mrb[24].mxu0 %v9080_v54  ;;  %3827 = vmatmul.mubr.bf16.vlgmr.msra.gmra.mrb[24].mxu1 %v9080_v54 }
 0x7ca   : > { %3836 = vmatpush1.bf16.msra.mxu0 %v10300_v57  ;;  %3877 = vmatpush1.bf16.msra.mxu1 %v10301_v48 }
 0x7cb   : > { %3867 = vmatprep.mubr.bf16.mxu0 %v3752_v46  ;;  %3908 = vmatprep.mubr.bf16.mxu1 %v3752_v46  ;;  %v10497_v46 = vld [vmem:[#allocation158_spill] sm:$0xff] }
 0x7cc   : > { %3837 = vmatprep.subr.bf16.mxu0 %v10302_v20  ;;  %3878 = vmatprep.subr.bf16.mxu1 %v10303_v47 }
 0x7ce   : > { %3838 = vmatpush1.bf16.msra.mxu0 %v10304_v12  ;;  %3879 = vmatpush1.bf16.msra.mxu1 %v10305_v11 }
 0x7cf   : > { %3839 = vmatprep.subr.bf16.mxu0 %v10306_v5  ;;  %3880 = vmatprep.subr.bf16.mxu1 %v10307_v29 }
 0x7d2   : > { %3840 = vmatpush1.bf16.msra.mxu0 %v10308_v30  ;;  %3881 = vmatpush1.bf16.msra.mxu1 %v10387_v9 }
 0x7d3   : > { %3841 = vmatprep.subr.bf16.mxu0 %v10388_v8  ;;  %3882 = vmatprep.subr.bf16.mxu1 %v10389_v26 }
 0x7d6   : > { %3842 = vmatpush1.bf16.msra.mxu0 %v10390_v6  ;;  %3883 = vmatpush1.bf16.msra.mxu1 %v10391_v0 }
 0x7d7   : > { %3843 = vmatprep.subr.bf16.mxu0 %v10392_v41  ;;  %3884 = vmatprep.subr.bf16.mxu1 %v10393_v42 }
 0x7da   : > { %3844 = vmatpush1.bf16.msra.mxu0 %v10394_v24  ;;  %3885 = vmatpush1.bf16.msra.mxu1 %v10395_v17 }
 0x7db   : > { %3845 = vmatprep.subr.bf16.mxu0 %v10396_v18  ;;  %3886 = vmatprep.subr.bf16.mxu1 %v10397_v16 }
 0x7de   : > { %3846 = vmatpush1.bf16.msra.mxu0 %v10476_v22  ;;  %3887 = vmatpush1.bf16.msra.mxu1 %v10477_v19 }
 0x7df   : > { %3847 = vmatprep.subr.bf16.mxu0 %v10478_v59  ;;  %3888 = vmatprep.subr.bf16.mxu1 %v10479_v7 }
 0x7e2   : > { %3848 = vmatpush1.bf16.msra.mxu0 %v10480_v4  ;;  %3889 = vmatpush1.bf16.msra.mxu1 %v10481_v37 }
 0x7e3   : > { %3849 = vmatprep.subr.bf16.mxu0 %v10404_v43  ;;  %3890 = vmatprep.subr.bf16.mxu1 %v10405_v56 }
 0x7e6   : > { %3850 = vmatpush1.bf16.msra.mxu0 %v10406_v58  ;;  %3891 = vmatpush1.bf16.msra.mxu1 %v10482_v52 }
 0x7e7   : > { %3851 = vmatprep.subr.bf16.mxu0 %v10408_v27  ;;  %3892 = vmatprep.subr.bf16.mxu1 %v10409_v28 }
 0x7ea   : > { %3852 = vmatpush1.bf16.msra.mxu0 %v10410_v14  ;;  %3893 = vmatpush1.bf16.msra.mxu1 %v10411_v33 }
 0x7eb   : > { %3853 = vmatprep.subr.bf16.mxu0 %v10412_v15  ;;  %3894 = vmatprep.subr.bf16.mxu1 %v10413_v38 }
 0x7ee   : > { %3854 = vmatpush1.bf16.msra.mxu0 %v10414_v35  ;;  %3895 = vmatpush1.bf16.msra.mxu1 %v10337_v53 }
 0x7ef   : > { %3855 = vmatprep.subr.bf16.mxu0 %v10338_v2  ;;  %3896 = vmatprep.subr.bf16.mxu1 %v10339_v23 }
 0x7f2   : > { %3856 = vmatpush1.bf16.msra.mxu0 %v10415_v40  ;;  %3897 = vmatpush1.bf16.msra.mxu1 %v10341_v49 }
 0x7f3   : > { %3857 = vmatprep.subr.bf16.mxu0 %v10342_v62  ;;  %3898 = vmatprep.subr.bf16.mxu1 %v10343_v61 }
 0x7f6   : > { %3858 = vmatpush1.bf16.msra.mxu0 %v10344_v31  ;;  %3899 = vmatpush1.bf16.msra.mxu1 %v10345_v45  ;;  %v3746_v45 = vld [vmem:[#allocation2 + $0xd8] sm:$0xff] }
 0x7f7   : > { %3859 = vmatprep.subr.bf16.mxu0 %v10483_v50  ;;  %3900 = vmatprep.subr.bf16.mxu1 %v10484_v25  ;;  %v3743_v25 = vld [vmem:[#allocation2 + $0xc0] sm:$0xff]  ;;  %v3744_v50 = vld [vmem:[#allocation2 + $0xc8] sm:$0xff] }
 0x7fa   : > { %3860 = vmatpush1.bf16.msra.mxu0 %v10485_v55  ;;  %3901 = vmatpush1.bf16.msra.mxu1 %v10486_v13 }
 0x7fb   : > { %3861 = vmatprep.subr.bf16.mxu0 %v10487_v51  ;;  %3902 = vmatprep.subr.bf16.mxu1 %v10488_v60  ;;  %v10498_v51 = vld [vmem:[#allocation159_spill] sm:$0xff]  ;;  %v10499_v60 = vld [vmem:[#allocation32_spill] sm:$0xff] }
 0x7fe   : > { %3862 = vmatpush1.bf16.msra.mxu0 %v10489_v1  ;;  %3903 = vmatpush1.bf16.msra.mxu1 %v10490_v36  ;;  %v10500_v1 = vld [vmem:[#allocation34_spill] sm:$0xff] }
 0x7ff   : > { %3863 = vmatprep.subr.bf16.mxu0 %v10491_v63  ;;  %3904 = vmatprep.subr.bf16.mxu1 %v10492_v10  ;;  %v10501_v10 = vld [vmem:[#allocation33_spill] sm:$0xff]  ;;  %v10510_v63 = vld [vmem:[#allocation43_spill] sm:$0xff] }
 0x802   : > { %3864 = vmatpush1.bf16.msra.mxu0 %v10493_v3  ;;  %3905 = vmatpush1.bf16.msra.mxu1 %v10494_v39  ;;  %v10502_v3 = vld [vmem:[#allocation35_spill] sm:$0xff]  ;;  %v10503_v39 = vld [vmem:[#allocation36_spill] sm:$0xff] }
 0x803   : > { %3865 = vmatprep.subr.bf16.mxu0 %v10495_v44  ;;  %3906 = vmatprep.subr.bf16.mxu1 %v10496_v34  ;;  %v10504_v44 = vld [vmem:[#allocation37_spill] sm:$0xff]  ;;  %v10505_v34 = vld [vmem:[#allocation38_spill] sm:$0xff] }
 0x806   : > { %3866 = vmatpush1.bf16.msra.mxu0 %v10497_v46  ;;  %3907 = vmatpush1.bf16.msra.mxu1 %v10498_v51  ;;  %v10506_v46 = vld [vmem:[#allocation39_spill] sm:$0xff]  ;;  %v10507_v51 = vld [vmem:[#allocation40_spill] sm:$0xff] }
 0x807   : > { %3985 = vmatprep.subr.bf16.mxu0 %v10499_v60  ;;  %4026 = vmatprep.subr.bf16.mxu1 %v10500_v1  ;;  %v10508_v60 = vld [vmem:[#allocation41_spill] sm:$0xff]  ;;  %v10509_v1 = vld [vmem:[#allocation42_spill] sm:$0xff] }
 0x809   : > { %3868 = vmatmul.mubr.bf16.vlgmr.msra.gmra.mrb[28].mxu0 %v9080_v54  ;;  %3909 = vmatmul.mubr.bf16.vlgmr.msra.gmra.mrb[28].mxu1 %v9080_v54  ;;  %v10511_v54 = vld [vmem:[#allocation44_spill] sm:$0xff] }
 0x80a   : > { %3986 = vmatpush1.bf16.msra.mxu0 %v10501_v10  ;;  %4027 = vmatpush1.bf16.msra.mxu1 %v10502_v3  ;;  %v10512_v10 = vld [vmem:[#allocation45_spill] sm:$0xff]  ;;  %v10513_v3 = vld [vmem:[#allocation46_spill] sm:$0xff] }
 0x80b   : > { %3987 = vmatprep.subr.bf16.mxu0 %v10503_v39  ;;  %4028 = vmatprep.subr.bf16.mxu1 %v10504_v44  ;;  %v10514_v39 = vld [vmem:[#allocation47_spill] sm:$0xff]  ;;  %v10515_v44 = vld [vmem:[#allocation48_spill] sm:$0xff] }
 0x80e   : > { %3988 = vmatpush1.bf16.msra.mxu0 %v10505_v34  ;;  %4029 = vmatpush1.bf16.msra.mxu1 %v10506_v46  ;;  %v10516_v34 = vld [vmem:[#allocation49_spill] sm:$0xff]  ;;  %v10517_v46 = vld [vmem:[#allocation50_spill] sm:$0xff] }
 0x80f   : > { %3989 = vmatprep.subr.bf16.mxu0 %v10507_v51  ;;  %4030 = vmatprep.subr.bf16.mxu1 %v10508_v60  ;;  %v10518_v51 = vld [vmem:[#allocation51_spill] sm:$0xff]  ;;  %v10519_v60 = vld [vmem:[#allocation52_spill] sm:$0xff] }
 0x812   : > { %3990 = vmatpush1.bf16.msra.mxu0 %v10509_v1  ;;  %4031 = vmatpush1.bf16.msra.mxu1 %v10510_v63  ;;  %v10520_v1 = vld [vmem:[#allocation53_spill] sm:$0xff]  ;;  %v10521_v63 = vld [vmem:[#allocation54_spill] sm:$0xff] }
 0x813   : > { %3991 = vmatprep.subr.bf16.mxu0 %v10511_v54  ;;  %4032 = vmatprep.subr.bf16.mxu1 %v10512_v10  ;;  %v10522_v54 = vld [vmem:[#allocation55_spill] sm:$0xff]  ;;  %v10523_v10 = vld [vmem:[#allocation56_spill] sm:$0xff] }
 0x816   : > { %3992 = vmatpush1.bf16.msra.mxu0 %v10513_v3  ;;  %4033 = vmatpush1.bf16.msra.mxu1 %v10514_v39  ;;  %v10524_v3 = vld [vmem:[#allocation57_spill] sm:$0xff]  ;;  %v10525_v39 = vld [vmem:[#allocation58_spill] sm:$0xff] }
 0x817   : > { %3993 = vmatprep.subr.bf16.mxu0 %v10515_v44  ;;  %4034 = vmatprep.subr.bf16.mxu1 %v10516_v34  ;;  %v10526_v44 = vld [vmem:[#allocation59_spill] sm:$0xff]  ;;  %v10527_v34 = vld [vmem:[#allocation60_spill] sm:$0xff] }
 0x81a   : > { %3994 = vmatpush1.bf16.msra.mxu0 %v10517_v46  ;;  %4035 = vmatpush1.bf16.msra.mxu1 %v10518_v51  ;;  %v10528_v46 = vld [vmem:[#allocation61_spill] sm:$0xff]  ;;  %v10529_v51 = vld [vmem:[#allocation62_spill] sm:$0xff] }
 0x81b   : > { %3995 = vmatprep.subr.bf16.mxu0 %v10519_v60  ;;  %4036 = vmatprep.subr.bf16.mxu1 %v10520_v1  ;;  %v10530_v60 = vld [vmem:[#allocation63_spill] sm:$0xff]  ;;  %v10531_v1 = vld [vmem:[#allocation64_spill] sm:$0xff] }
 0x81e   : > { %3996 = vmatpush1.bf16.msra.mxu0 %v10521_v63  ;;  %4037 = vmatpush1.bf16.msra.mxu1 %v10522_v54  ;;  %v10532_v63 = vld [vmem:[#allocation65_spill] sm:$0xff]  ;;  %v10533_v54 = vld [vmem:[#allocation66_spill] sm:$0xff] }
 0x81f   : > { %3997 = vmatprep.subr.bf16.mxu0 %v10523_v10  ;;  %4038 = vmatprep.subr.bf16.mxu1 %v10524_v3  ;;  %v10534_v10 = vld [vmem:[#allocation67_spill] sm:$0xff]  ;;  %v10535_v3 = vld [vmem:[#allocation68_spill] sm:$0xff] }
 0x822   : > { %3998 = vmatpush1.bf16.msra.mxu0 %v10525_v39  ;;  %4039 = vmatpush1.bf16.msra.mxu1 %v10526_v44  ;;  %v10536_v39 = vld [vmem:[#allocation69_spill] sm:$0xff]  ;;  %v10537_v44 = vld [vmem:[#allocation70_spill] sm:$0xff] }
 0x823   : > { %3999 = vmatprep.subr.bf16.mxu0 %v10527_v34  ;;  %4040 = vmatprep.subr.bf16.mxu1 %v10528_v46  ;;  %v10538_v34 = vld [vmem:[#allocation71_spill] sm:$0xff]  ;;  %v10539_v46 = vld [vmem:[#allocation72_spill] sm:$0xff] }
 0x826   : > { %4000 = vmatpush1.bf16.msra.mxu0 %v10529_v51  ;;  %4041 = vmatpush1.bf16.msra.mxu1 %v10530_v60  ;;  %v10540_v51 = vld [vmem:[#allocation73_spill] sm:$0xff]  ;;  %v10541_v60 = vld [vmem:[#allocation74_spill] sm:$0xff] }
 0x827   : > { %4001 = vmatprep.subr.bf16.mxu0 %v10531_v1  ;;  %4042 = vmatprep.subr.bf16.mxu1 %v10532_v63  ;;  %v10542_v1 = vld [vmem:[#allocation75_spill] sm:$0xff]  ;;  %v10543_v63 = vld [vmem:[#allocation76_spill] sm:$0xff] }
 0x82a   : > { %4002 = vmatpush1.bf16.msra.mxu0 %v10533_v54  ;;  %4043 = vmatpush1.bf16.msra.mxu1 %v10534_v10  ;;  %v10544_v54 = vld [vmem:[#allocation77_spill] sm:$0xff]  ;;  %v10545_v10 = vld [vmem:[#allocation78_spill] sm:$0xff] }
 0x82b   : > { %4003 = vmatprep.subr.bf16.mxu0 %v10535_v3  ;;  %4044 = vmatprep.subr.bf16.mxu1 %v10536_v39  ;;  %v10546_v3 = vld [vmem:[#allocation79_spill] sm:$0xff]  ;;  %v10547_v39 = vld [vmem:[#allocation80_spill] sm:$0xff] }
 0x82e   : > { %4004 = vmatpush1.bf16.msra.mxu0 %v10537_v44  ;;  %4045 = vmatpush1.bf16.msra.mxu1 %v10538_v34  ;;  %v10548_v44 = vld [vmem:[#allocation81_spill] sm:$0xff]  ;;  %v10549_v34 = vld [vmem:[#allocation82_spill] sm:$0xff] }
 0x82f   : > { %4005 = vmatprep.subr.bf16.mxu0 %v10539_v46  ;;  %4046 = vmatprep.subr.bf16.mxu1 %v10540_v51  ;;  %v10550_v46 = vld [vmem:[#allocation83_spill] sm:$0xff]  ;;  %v10551_v51 = vld [vmem:[#allocation84_spill] sm:$0xff] }
 0x832   : > { %4006 = vmatpush1.bf16.msra.mxu0 %v10541_v60  ;;  %4047 = vmatpush1.bf16.msra.mxu1 %v10542_v1  ;;  %v10552_v60 = vld [vmem:[#allocation85_spill] sm:$0xff]  ;;  %v10553_v1 = vld [vmem:[#allocation86_spill] sm:$0xff] }
 0x833   : > { %4007 = vmatprep.subr.bf16.mxu0 %v10543_v63  ;;  %4048 = vmatprep.subr.bf16.mxu1 %v10544_v54  ;;  %v10554_v63 = vld [vmem:[#allocation87_spill] sm:$0xff]  ;;  %v10555_v54 = vld [vmem:[#allocation88_spill] sm:$0xff] }
 0x836   : > { %4008 = vmatpush1.bf16.msra.mxu0 %v10545_v10  ;;  %4049 = vmatpush1.bf16.msra.mxu1 %v10546_v3  ;;  %v10556_v10 = vld [vmem:[#allocation89_spill] sm:$0xff]  ;;  %v10557_v3 = vld [vmem:[#allocation90_spill] sm:$0xff] }
 0x837   : > { %4009 = vmatprep.subr.bf16.mxu0 %v10547_v39  ;;  %4050 = vmatprep.subr.bf16.mxu1 %v10548_v44  ;;  %v10558_v39 = vld [vmem:[#allocation91_spill] sm:$0xff]  ;;  %v10559_v44 = vld [vmem:[#allocation92_spill] sm:$0xff] }
 0x83a   : > { %4010 = vmatpush1.bf16.msra.mxu0 %v10549_v34  ;;  %4051 = vmatpush1.bf16.msra.mxu1 %v10550_v46  ;;  %v10560_v34 = vld [vmem:[#allocation93_spill] sm:$0xff]  ;;  %v10561_v46 = vld [vmem:[#allocation94_spill] sm:$0xff] }
 0x83b   : > { %4011 = vmatprep.subr.bf16.mxu0 %v10551_v51  ;;  %4052 = vmatprep.subr.bf16.mxu1 %v10552_v60  ;;  %v10562_v51 = vld [vmem:[#allocation95_spill] sm:$0xff]  ;;  %v10563_v60 = vld [vmem:[#allocation96_spill] sm:$0xff] }
 0x83e   : > { %4012 = vmatpush1.bf16.msra.mxu0 %v10553_v1  ;;  %4053 = vmatpush1.bf16.msra.mxu1 %v10554_v63  ;;  %v10564_v1 = vld [vmem:[#allocation97_spill] sm:$0xff] }
 0x83f   : > { %4013 = vmatprep.subr.bf16.mxu0 %v10555_v54  ;;  %4054 = vmatprep.subr.bf16.mxu1 %v10556_v10 }
 0x842   : > { %4014 = vmatpush1.bf16.msra.mxu0 %v10557_v3  ;;  %4055 = vmatpush1.bf16.msra.mxu1 %v10558_v39 }
 0x843   : > { %4015 = vmatprep.subr.bf16.mxu0 %v10559_v44  ;;  %4056 = vmatprep.subr.bf16.mxu1 %v10560_v34  ;;  %v3745_v44 = vld [vmem:[#allocation2 + $0xd0] sm:$0xff] }
 0x846   : > { %4016 = vmatpush1.bf16.msra.mxu0 %v10561_v46  ;;  %4057 = vmatpush1.bf16.msra.mxu1 %v10562_v51 }
 0x847   : > { %4067 = vmatprep.subr.bf16.mxu0 %v10563_v60  ;;  %4108 = vmatprep.subr.bf16.mxu1 %v10564_v1 }
 0x89c   : > { %v3787_v63 = vpop.f32.mrb[24].mxu0  ;;  %v3828_v54 = vpop.f32.mrb[24].mxu1 }
 0x89d   : > { %v3789_v36 = vpop.f32.mrb[25].mxu0  ;;  %v3830_v10 = vpop.f32.mrb[25].mxu1  ;;  %v3917_v34 = vadd.f32 %v3787_v63, %v3743_v25  ;;  %v3919_v46 = vadd.f32 %v3828_v54, %v3745_v44  ;;  %v3747_v63 = vld [vmem:[#allocation2 + $0xe0] sm:$0xff]  ;;  %v3749_v44 = vld [vmem:[#allocation2 + $0xf0] sm:$0xff] }
 0x89e   : > { %v3791_v13 = vpop.f32.mrb[26].mxu0  ;;  %v3832_v3 = vpop.f32.mrb[26].mxu1  ;;  %v3918_v31 = vadd.f32 %v3789_v36, %v3744_v50  ;;  %v3920_v51 = vadd.f32 %v3830_v10, %v3746_v45  ;;  %v3748_v45 = vld [vmem:[#allocation2 + $0xe8] sm:$0xff]  ;;  %v3750_v50 = vld [vmem:[#allocation2 + $0xf8] sm:$0xff] }
 0x89f   : > { %v3792_v55 = vpop.f32.mrb[27].mxu0  ;;  %v3833_v39 = vpop.f32.mrb[27].mxu1  ;;  %v6230_v61 = vmul.f32 -1.442695, %v3917_v34  ;;  %v6232_v60 = vmul.f32 -1.442695, %v3919_v46 }
 0x8a0   : > { %v6231_v62 = vmul.f32 -1.442695, %v3918_v31  ;;  %v6233_v1 = vmul.f32 -1.442695, %v3920_v51 }
 0x8a1   : > { %6627 = vpow2.f32 %v6230_v61 }
 0x8a2   : > { %6629 = vpow2.f32 %v6232_v60 }
 0x8a3   : > { %6631 = vpow2.f32 %v6231_v62 }
 0x8a4   : > { %6633 = vpow2.f32 %v6233_v1 }
 0x8ab   : > { %v6628_v13 = vpop.eup %6627 }
 0x8ac   : > { %v6630_v3 = vpop.eup %6629  ;;  %v3937_v49 = vadd.f32 1.0, %v6628_v13 }
 0x8ad   : > { %v6632_v55 = vpop.eup %6631  ;;  %v3939_v40 = vadd.f32 1.0, %v6630_v3 }
 0x8ae   : > { %v6634_v39 = vpop.eup %6633  ;;  %v3938_v23 = vadd.f32 1.0, %v6632_v55  ;;  %6635 = vrcp.f32 %v3937_v49 }
 0x8af   : > { %v3940_v25 = vadd.f32 1.0, %v6634_v39  ;;  %6637 = vrcp.f32 %v3939_v40 }
 0x8b0   : > { %6639 = vrcp.f32 %v3938_v23 }
 0x8b1   : > { %6641 = vrcp.f32 %v3940_v25 }
 0x8b8   : > { %v6636_v40 = vpop.eup %6635 }
 0x8b9   : > { %v6638_v55 = vpop.eup %6637 }
 0x8ba   : > { %v6640_v23 = vpop.eup %6639  ;;  %v3963_v25 = vmul.f32 %v6638_v55, %v9074_v32  ;;  %v10567_v55 = vld [vmem:[#allocation139_spill] sm:$0xff] }
 0x8bb   : > { %v6642_v39 = vpop.eup %6641 }
 0x8dc   : > { %v3869_v31 = vpop.f32.mrb[28].mxu0  ;;  %v3910_v51 = vpop.f32.mrb[28].mxu1 }
 0x8dd   : > { %v3921_v61 = vadd.f32 %v3869_v31, %v3747_v63  ;;  %v3923_v62 = vadd.f32 %v3910_v51, %v3749_v44  ;;  %v3871_v60 = vpop.f32.mrb[29].mxu0  ;;  %v3912_v1 = vpop.f32.mrb[29].mxu1  ;;  %v3964_v31 = vmul.f32 %v6642_v39, %v9076_v21  ;;  %v10569_v39 = vld [vmem:[#allocation141_spill] sm:$0xff] }
 0x8de   : > { %v3922_v36 = vadd.f32 %v3871_v60, %v3748_v45  ;;  %v3924_v10 = vadd.f32 %v3912_v1, %v3750_v50  ;;  %v3873_v34 = vpop.f32.mrb[30].mxu0  ;;  %v3914_v46 = vpop.f32.mrb[30].mxu1 }
 0x8df   : > { %6643 = vtanh.f32 %v3921_v61  ;;  %v6234_v54 = vmul.f32 -1.442695, %v3923_v62  ;;  %v3874_v13 = vpop.f32.mrb[31].mxu0  ;;  %v3915_v3 = vpop.f32.mrb[31].mxu1 }
 0x8e0   : > { %6645 = vtanh.f32 %v3922_v36  ;;  %v6235_v49 = vmul.f32 -1.442695, %v3924_v10 }
 0x8e1   : > { %6647 = vpow2.f32 %v6234_v54 }
 0x8e2   : > { %6649 = vpow2.f32 %v6235_v49  ;;  %v10565_v49 = vld [vmem:[#allocation137_spill] sm:$0xff] }
 0x8e9   : > { %v6644_v63 = vpop.eup %6643 }
 0x8ea   : > { %v6646_v44 = vpop.eup %6645  ;;  %v3965_v45 = vmul.f32 %v6644_v63, %v6636_v40  ;;  %v10566_v40 = vld [vmem:[#allocation138_spill] sm:$0xff] }
 0x8eb   : > { %v6648_v50 = vpop.eup %6647  ;;  %v3966_v51 = vmul.f32 %v6646_v44, %v6640_v23  ;;  %v10568_v23 = vld [vmem:[#allocation140_spill] sm:$0xff]  ;;  %v10570_v63 = vld [vmem:[#allocation142_spill] sm:$0xff]  ;;  %v10571_v44 = vld [vmem:[#allocation143_spill] sm:$0xff] }
 0x8ec   : > { %v6650_v61 = vpop.eup %6649  ;;  %v9216_v62 = vadd.f32 %v3965_v45, %v3963_v25  ;;  %v3957_v60 = vadd.f32 1.0, %v6648_v50  ;;  %v10572_v25 = vld [vmem:[#allocation144_spill] sm:$0xff]  ;;  %v10573_v45 = vld [vmem:[#allocation145_spill] sm:$0xff]  ;;  %v10574_v50 = vld [vmem:[#allocation146_spill] sm:$0xff] }
 0x8ed   : > { %v9218_v1 = vadd.f32 %v3966_v51, %v3964_v31  ;;  %v3958_v36 = vadd.f32 1.0, %v6650_v61  ;;  %v10575_v31 = vld [vmem:[#allocation147_spill] sm:$0xff]  ;;  %v10576_v51 = vld [vmem:[#allocation148_spill] sm:$0xff]  ;;  %v10577_v61 = vld [vmem:[#allocation149_spill] sm:$0xff] }
 0x8ee   : > { %6651 = vtanh.f32 %v9216_v62 }
 0x8ef   : > { %6653 = vrcp.f32 %v3957_v60  ;;  %v10578_v60 = vld [vmem:[#allocation150_spill] sm:$0xff] }
 0x8f0   : > { %6655 = vtanh.f32 %v9218_v1 }
 0x8f1   : > { %6657 = vrcp.f32 %v3958_v36  ;;  %v10579_v36 = vld [vmem:[#allocation151_spill] sm:$0xff] }
 0x8f8   : > { %v6652_v10 = vpop.eup %6651 }
 0x8f9   : > { %v6654_v32 = vpop.eup %6653 }
 0x8fa   : > { %v6656_v34 = vpop.eup %6655  ;;  %v3971_v46 = vmul.f32 %v6654_v32, %v6652_v10  ;;  %v10580_v10 = vld [vmem:[#allocation152_spill] sm:$0xff]  ;;  %v10581_v32 = vld [vmem:[#allocation153_spill] sm:$0xff] }
 0x8fb   : > { %v6658_v54 = vpop.eup %6657 }
 0x8fc   : > { %v3972_v21 = vmul.f32 %v6658_v54, %v6656_v34  ;;  %3973 = vst [vmem:[#allocation3 + $0x30] sm:$0xff] %v3971_v46  ;;  %v9222_v3 = vpack.c.bf16 %v3971_v46, %v3971_v46  ;;  %v10582_v34 = vld [vmem:[#allocation154_spill] sm:$0xff]  ;;  %v10583_v46 = vld [vmem:[#allocation155_spill] sm:$0xff]  ;;  %v10584_v54 = vld [vmem:[#allocation156_spill] sm:$0xff] }
 0x8fe   : > { %3974 = vst [vmem:[#allocation3 + $0x38] sm:$0xff] %v3972_v21  ;;  %v3984_v13 = vpack.c.bf16 %v3972_v21, %v3972_v21  ;;  %v10585_v21 = vld [vmem:[#allocation157_spill] sm:$0xff] }
 0x900   : > { %4017 = vmatprep.mubr.bf16.mxu0 %v3984_v13  ;;  %4058 = vmatprep.mubr.bf16.mxu1 %v3984_v13 }
 0x901   : > { %4018 = vmatmul.mubr.bf16.vlgmr.msra.gmra.mrb[32].mxu0 %v9222_v3  ;;  %4059 = vmatmul.mubr.bf16.vlgmr.msra.gmra.mrb[32].mxu1 %v9222_v3 }
 0x902   : > { %4068 = vmatpush1.bf16.msra.mxu0 %v10300_v57  ;;  %4109 = vmatpush1.bf16.msra.mxu1 %v10301_v48 }
 0x903   : > { %4099 = vmatprep.mubr.bf16.mxu0 %v3984_v13  ;;  %4140 = vmatprep.mubr.bf16.mxu1 %v3984_v13  ;;  %v10586_v13 = vld [vmem:[#allocation158_spill] sm:$0xff] }
 0x904   : > { %4069 = vmatprep.subr.bf16.mxu0 %v10302_v20  ;;  %4110 = vmatprep.subr.bf16.mxu1 %v10303_v47 }
 0x906   : > { %4070 = vmatpush1.bf16.msra.mxu0 %v10304_v12  ;;  %4111 = vmatpush1.bf16.msra.mxu1 %v10305_v11 }
 0x907   : > { %4071 = vmatprep.subr.bf16.mxu0 %v10306_v5  ;;  %4112 = vmatprep.subr.bf16.mxu1 %v10307_v29 }
 0x90a   : > { %4072 = vmatpush1.bf16.msra.mxu0 %v10308_v30  ;;  %4113 = vmatpush1.bf16.msra.mxu1 %v10387_v9 }
 0x90b   : > { %4073 = vmatprep.subr.bf16.mxu0 %v10388_v8  ;;  %4114 = vmatprep.subr.bf16.mxu1 %v10389_v26 }
 0x90e   : > { %4074 = vmatpush1.bf16.msra.mxu0 %v10390_v6  ;;  %4115 = vmatpush1.bf16.msra.mxu1 %v10391_v0 }
 0x90f   : > { %4075 = vmatprep.subr.bf16.mxu0 %v10392_v41  ;;  %4116 = vmatprep.subr.bf16.mxu1 %v10393_v42 }
 0x912   : > { %4076 = vmatpush1.bf16.msra.mxu0 %v10394_v24  ;;  %4117 = vmatpush1.bf16.msra.mxu1 %v10395_v17 }
 0x913   : > { %4077 = vmatprep.subr.bf16.mxu0 %v10396_v18  ;;  %4118 = vmatprep.subr.bf16.mxu1 %v10397_v16 }
 0x916   : > { %4078 = vmatpush1.bf16.msra.mxu0 %v10476_v22  ;;  %4119 = vmatpush1.bf16.msra.mxu1 %v10477_v19 }
 0x917   : > { %4079 = vmatprep.subr.bf16.mxu0 %v10478_v59  ;;  %4120 = vmatprep.subr.bf16.mxu1 %v10479_v7 }
 0x91a   : > { %4080 = vmatpush1.bf16.msra.mxu0 %v10480_v4  ;;  %4121 = vmatpush1.bf16.msra.mxu1 %v10481_v37 }
 0x91b   : > { %4081 = vmatprep.subr.bf16.mxu0 %v10404_v43  ;;  %4122 = vmatprep.subr.bf16.mxu1 %v10405_v56 }
 0x91e   : > { %4082 = vmatpush1.bf16.msra.mxu0 %v10406_v58  ;;  %4123 = vmatpush1.bf16.msra.mxu1 %v10482_v52 }
 0x91f   : > { %4083 = vmatprep.subr.bf16.mxu0 %v10408_v27  ;;  %4124 = vmatprep.subr.bf16.mxu1 %v10409_v28 }
 0x922   : > { %4084 = vmatpush1.bf16.msra.mxu0 %v10410_v14  ;;  %4125 = vmatpush1.bf16.msra.mxu1 %v10411_v33 }
 0x923   : > { %4085 = vmatprep.subr.bf16.mxu0 %v10412_v15  ;;  %4126 = vmatprep.subr.bf16.mxu1 %v10413_v38 }
 0x926   : > { %4086 = vmatpush1.bf16.msra.mxu0 %v10414_v35  ;;  %4127 = vmatpush1.bf16.msra.mxu1 %v10337_v53 }
 0x927   : > { %4087 = vmatprep.subr.bf16.mxu0 %v10338_v2  ;;  %4128 = vmatprep.subr.bf16.mxu1 %v10565_v49 }
 0x92a   : > { %4088 = vmatpush1.bf16.msra.mxu0 %v10566_v40  ;;  %4129 = vmatpush1.bf16.msra.mxu1 %v10567_v55 }
 0x92b   : > { %4089 = vmatprep.subr.bf16.mxu0 %v10568_v23  ;;  %4130 = vmatprep.subr.bf16.mxu1 %v10569_v39 }
 0x92e   : > { %4090 = vmatpush1.bf16.msra.mxu0 %v10570_v63  ;;  %4131 = vmatpush1.bf16.msra.mxu1 %v10571_v44  ;;  %v3978_v44 = vld [vmem:[#allocation2 + $0x118] sm:$0xff] }
 0x92f   : > { %4091 = vmatprep.subr.bf16.mxu0 %v10572_v25  ;;  %4132 = vmatprep.subr.bf16.mxu1 %v10573_v45  ;;  %v3975_v45 = vld [vmem:[#allocation2 + $0x100] sm:$0xff]  ;;  %v3976_v25 = vld [vmem:[#allocation2 + $0x108] sm:$0xff] }
 0x932   : > { %4092 = vmatpush1.bf16.msra.mxu0 %v10574_v50  ;;  %4133 = vmatpush1.bf16.msra.mxu1 %v10575_v31 }
 0x933   : > { %4093 = vmatprep.subr.bf16.mxu0 %v10576_v51  ;;  %4134 = vmatprep.subr.bf16.mxu1 %v10577_v61  ;;  %v10587_v51 = vld [vmem:[#allocation159_spill] sm:$0xff]  ;;  %v10588_v61 = vld [vmem:[#allocation32_spill] sm:$0xff] }
 0x936   : > { %4094 = vmatpush1.bf16.msra.mxu0 %v10578_v60  ;;  %4135 = vmatpush1.bf16.msra.mxu1 %v10579_v36  ;;  %v10589_v60 = vld [vmem:[#allocation34_spill] sm:$0xff] }
 0x937   : > { %4095 = vmatprep.subr.bf16.mxu0 %v10580_v10  ;;  %4136 = vmatprep.subr.bf16.mxu1 %v10581_v32  ;;  %v10590_v32 = vld [vmem:[#allocation33_spill] sm:$0xff]  ;;  %v10599_v10 = vld [vmem:[#allocation43_spill] sm:$0xff] }
 0x93a   : > { %4096 = vmatpush1.bf16.msra.mxu0 %v10582_v34  ;;  %4137 = vmatpush1.bf16.msra.mxu1 %v10583_v46  ;;  %v10591_v34 = vld [vmem:[#allocation35_spill] sm:$0xff]  ;;  %v10592_v46 = vld [vmem:[#allocation36_spill] sm:$0xff] }
 0x93b   : > { %4097 = vmatprep.subr.bf16.mxu0 %v10584_v54  ;;  %4138 = vmatprep.subr.bf16.mxu1 %v10585_v21  ;;  %v10593_v54 = vld [vmem:[#allocation37_spill] sm:$0xff]  ;;  %v10594_v21 = vld [vmem:[#allocation38_spill] sm:$0xff] }
 0x93e   : > { %4098 = vmatpush1.bf16.msra.mxu0 %v10586_v13  ;;  %4139 = vmatpush1.bf16.msra.mxu1 %v10587_v51  ;;  %v10595_v13 = vld [vmem:[#allocation39_spill] sm:$0xff]  ;;  %v10596_v51 = vld [vmem:[#allocation40_spill] sm:$0xff] }
 0x93f   : > { %4217 = vmatprep.subr.bf16.mxu0 %v10588_v61  ;;  %4258 = vmatprep.subr.bf16.mxu1 %v10589_v60  ;;  %v10597_v61 = vld [vmem:[#allocation41_spill] sm:$0xff]  ;;  %v10598_v60 = vld [vmem:[#allocation42_spill] sm:$0xff] }
 0x941   : > { %4100 = vmatmul.mubr.bf16.vlgmr.msra.gmra.mrb[36].mxu0 %v9222_v3  ;;  %4141 = vmatmul.mubr.bf16.vlgmr.msra.gmra.mrb[36].mxu1 %v9222_v3  ;;  %v10600_v3 = vld [vmem:[#allocation44_spill] sm:$0xff] }
 0x942   : > { %4218 = vmatpush1.bf16.msra.mxu0 %v10590_v32  ;;  %4259 = vmatpush1.bf16.msra.mxu1 %v10591_v34  ;;  %v10601_v32 = vld [vmem:[#allocation45_spill] sm:$0xff]  ;;  %v10602_v34 = vld [vmem:[#allocation46_spill] sm:$0xff] }
 0x943   : > { %4219 = vmatprep.subr.bf16.mxu0 %v10592_v46  ;;  %4260 = vmatprep.subr.bf16.mxu1 %v10593_v54  ;;  %v10603_v46 = vld [vmem:[#allocation47_spill] sm:$0xff]  ;;  %v10604_v54 = vld [vmem:[#allocation48_spill] sm:$0xff] }
 0x946   : > { %4220 = vmatpush1.bf16.msra.mxu0 %v10594_v21  ;;  %4261 = vmatpush1.bf16.msra.mxu1 %v10595_v13  ;;  %v10605_v21 = vld [vmem:[#allocation49_spill] sm:$0xff]  ;;  %v10606_v13 = vld [vmem:[#allocation50_spill] sm:$0xff] }
 0x947   : > { %4221 = vmatprep.subr.bf16.mxu0 %v10596_v51  ;;  %4262 = vmatprep.subr.bf16.mxu1 %v10597_v61  ;;  %v10607_v51 = vld [vmem:[#allocation51_spill] sm:$0xff]  ;;  %v10608_v61 = vld [vmem:[#allocation52_spill] sm:$0xff] }
 0x94a   : > { %4222 = vmatpush1.bf16.msra.mxu0 %v10598_v60  ;;  %4263 = vmatpush1.bf16.msra.mxu1 %v10599_v10  ;;  %v10609_v60 = vld [vmem:[#allocation53_spill] sm:$0xff]  ;;  %v10610_v10 = vld [vmem:[#allocation54_spill] sm:$0xff] }
 0x94b   : > { %4223 = vmatprep.subr.bf16.mxu0 %v10600_v3  ;;  %4264 = vmatprep.subr.bf16.mxu1 %v10601_v32  ;;  %v10611_v3 = vld [vmem:[#allocation55_spill] sm:$0xff]  ;;  %v10612_v32 = vld [vmem:[#allocation56_spill] sm:$0xff] }
 0x94e   : > { %4224 = vmatpush1.bf16.msra.mxu0 %v10602_v34  ;;  %4265 = vmatpush1.bf16.msra.mxu1 %v10603_v46  ;;  %v10613_v34 = vld [vmem:[#allocation57_spill] sm:$0xff]  ;;  %v10614_v46 = vld [vmem:[#allocation58_spill] sm:$0xff] }
 0x94f   : > { %4225 = vmatprep.subr.bf16.mxu0 %v10604_v54  ;;  %4266 = vmatprep.subr.bf16.mxu1 %v10605_v21  ;;  %v10615_v54 = vld [vmem:[#allocation59_spill] sm:$0xff]  ;;  %v10616_v21 = vld [vmem:[#allocation60_spill] sm:$0xff] }
 0x952   : > { %4226 = vmatpush1.bf16.msra.mxu0 %v10606_v13  ;;  %4267 = vmatpush1.bf16.msra.mxu1 %v10607_v51  ;;  %v10617_v13 = vld [vmem:[#allocation61_spill] sm:$0xff]  ;;  %v10618_v51 = vld [vmem:[#allocation62_spill] sm:$0xff] }
 0x953   : > { %4227 = vmatprep.subr.bf16.mxu0 %v10608_v61  ;;  %4268 = vmatprep.subr.bf16.mxu1 %v10609_v60  ;;  %v10619_v61 = vld [vmem:[#allocation63_spill] sm:$0xff]  ;;  %v10620_v60 = vld [vmem:[#allocation64_spill] sm:$0xff] }
 0x956   : > { %4228 = vmatpush1.bf16.msra.mxu0 %v10610_v10  ;;  %4269 = vmatpush1.bf16.msra.mxu1 %v10611_v3  ;;  %v10621_v10 = vld [vmem:[#allocation65_spill] sm:$0xff]  ;;  %v10622_v3 = vld [vmem:[#allocation66_spill] sm:$0xff] }
 0x957   : > { %4229 = vmatprep.subr.bf16.mxu0 %v10612_v32  ;;  %4270 = vmatprep.subr.bf16.mxu1 %v10613_v34  ;;  %v10623_v32 = vld [vmem:[#allocation67_spill] sm:$0xff]  ;;  %v10624_v34 = vld [vmem:[#allocation68_spill] sm:$0xff] }
 0x95a   : > { %4230 = vmatpush1.bf16.msra.mxu0 %v10614_v46  ;;  %4271 = vmatpush1.bf16.msra.mxu1 %v10615_v54  ;;  %v10625_v46 = vld [vmem:[#allocation69_spill] sm:$0xff]  ;;  %v10626_v54 = vld [vmem:[#allocation70_spill] sm:$0xff] }
 0x95b   : > { %4231 = vmatprep.subr.bf16.mxu0 %v10616_v21  ;;  %4272 = vmatprep.subr.bf16.mxu1 %v10617_v13  ;;  %v10627_v21 = vld [vmem:[#allocation71_spill] sm:$0xff]  ;;  %v10628_v13 = vld [vmem:[#allocation72_spill] sm:$0xff] }
 0x95e   : > { %4232 = vmatpush1.bf16.msra.mxu0 %v10618_v51  ;;  %4273 = vmatpush1.bf16.msra.mxu1 %v10619_v61  ;;  %v10629_v51 = vld [vmem:[#allocation73_spill] sm:$0xff]  ;;  %v10630_v61 = vld [vmem:[#allocation74_spill] sm:$0xff] }
 0x95f   : > { %4233 = vmatprep.subr.bf16.mxu0 %v10620_v60  ;;  %4274 = vmatprep.subr.bf16.mxu1 %v10621_v10  ;;  %v10631_v60 = vld [vmem:[#allocation75_spill] sm:$0xff]  ;;  %v10632_v10 = vld [vmem:[#allocation76_spill] sm:$0xff] }
 0x962   : > { %4234 = vmatpush1.bf16.msra.mxu0 %v10622_v3  ;;  %4275 = vmatpush1.bf16.msra.mxu1 %v10623_v32  ;;  %v10633_v3 = vld [vmem:[#allocation77_spill] sm:$0xff]  ;;  %v10634_v32 = vld [vmem:[#allocation78_spill] sm:$0xff] }
 0x963   : > { %4235 = vmatprep.subr.bf16.mxu0 %v10624_v34  ;;  %4276 = vmatprep.subr.bf16.mxu1 %v10625_v46  ;;  %v10635_v34 = vld [vmem:[#allocation79_spill] sm:$0xff]  ;;  %v10636_v46 = vld [vmem:[#allocation80_spill] sm:$0xff] }
 0x966   : > { %4236 = vmatpush1.bf16.msra.mxu0 %v10626_v54  ;;  %4277 = vmatpush1.bf16.msra.mxu1 %v10627_v21  ;;  %v10637_v54 = vld [vmem:[#allocation81_spill] sm:$0xff]  ;;  %v10638_v21 = vld [vmem:[#allocation82_spill] sm:$0xff] }
 0x967   : > { %4237 = vmatprep.subr.bf16.mxu0 %v10628_v13  ;;  %4278 = vmatprep.subr.bf16.mxu1 %v10629_v51  ;;  %v10639_v13 = vld [vmem:[#allocation83_spill] sm:$0xff]  ;;  %v10640_v51 = vld [vmem:[#allocation84_spill] sm:$0xff] }
 0x96a   : > { %4238 = vmatpush1.bf16.msra.mxu0 %v10630_v61  ;;  %4279 = vmatpush1.bf16.msra.mxu1 %v10631_v60  ;;  %v10641_v61 = vld [vmem:[#allocation85_spill] sm:$0xff]  ;;  %v10642_v60 = vld [vmem:[#allocation86_spill] sm:$0xff] }
 0x96b   : > { %4239 = vmatprep.subr.bf16.mxu0 %v10632_v10  ;;  %4280 = vmatprep.subr.bf16.mxu1 %v10633_v3  ;;  %v10643_v10 = vld [vmem:[#allocation87_spill] sm:$0xff]  ;;  %v10644_v3 = vld [vmem:[#allocation88_spill] sm:$0xff] }
 0x96e   : > { %4240 = vmatpush1.bf16.msra.mxu0 %v10634_v32  ;;  %4281 = vmatpush1.bf16.msra.mxu1 %v10635_v34  ;;  %v10645_v32 = vld [vmem:[#allocation89_spill] sm:$0xff]  ;;  %v10646_v34 = vld [vmem:[#allocation90_spill] sm:$0xff] }
 0x96f   : > { %4241 = vmatprep.subr.bf16.mxu0 %v10636_v46  ;;  %4282 = vmatprep.subr.bf16.mxu1 %v10637_v54  ;;  %v10647_v46 = vld [vmem:[#allocation91_spill] sm:$0xff]  ;;  %v10648_v54 = vld [vmem:[#allocation92_spill] sm:$0xff] }
 0x972   : > { %4242 = vmatpush1.bf16.msra.mxu0 %v10638_v21  ;;  %4283 = vmatpush1.bf16.msra.mxu1 %v10639_v13  ;;  %v10649_v21 = vld [vmem:[#allocation93_spill] sm:$0xff]  ;;  %v10650_v13 = vld [vmem:[#allocation94_spill] sm:$0xff] }
 0x973   : > { %4243 = vmatprep.subr.bf16.mxu0 %v10640_v51  ;;  %4284 = vmatprep.subr.bf16.mxu1 %v10641_v61  ;;  %v10651_v51 = vld [vmem:[#allocation95_spill] sm:$0xff]  ;;  %v10652_v61 = vld [vmem:[#allocation96_spill] sm:$0xff] }
 0x976   : > { %4244 = vmatpush1.bf16.msra.mxu0 %v10642_v60  ;;  %4285 = vmatpush1.bf16.msra.mxu1 %v10643_v10  ;;  %v10653_v60 = vld [vmem:[#allocation97_spill] sm:$0xff] }
 0x977   : > { %4245 = vmatprep.subr.bf16.mxu0 %v10644_v3  ;;  %4286 = vmatprep.subr.bf16.mxu1 %v10645_v32 }
 0x97a   : > { %4246 = vmatpush1.bf16.msra.mxu0 %v10646_v34  ;;  %4287 = vmatpush1.bf16.msra.mxu1 %v10647_v46 }
 0x97b   : > { %4247 = vmatprep.subr.bf16.mxu0 %v10648_v54  ;;  %4288 = vmatprep.subr.bf16.mxu1 %v10649_v21  ;;  %v3977_v54 = vld [vmem:[#allocation2 + $0x110] sm:$0xff] }
 0x97e   : > { %4248 = vmatpush1.bf16.msra.mxu0 %v10650_v13  ;;  %4289 = vmatpush1.bf16.msra.mxu1 %v10651_v51 }
 0x97f   : > { %4299 = vmatprep.subr.bf16.mxu0 %v10652_v61  ;;  %4340 = vmatprep.subr.bf16.mxu1 %v10653_v60 }
 0x9d4   : > { %v4019_v10 = vpop.f32.mrb[32].mxu0  ;;  %v4060_v3 = vpop.f32.mrb[32].mxu1 }
 0x9d5   : > { %v4021_v36 = vpop.f32.mrb[33].mxu0  ;;  %v4062_v32 = vpop.f32.mrb[33].mxu1  ;;  %v4149_v21 = vadd.f32 %v4019_v10, %v3975_v45  ;;  %v4151_v13 = vadd.f32 %v4060_v3, %v3977_v54  ;;  %v3979_v10 = vld [vmem:[#allocation2 + $0x120] sm:$0xff]  ;;  %v3981_v54 = vld [vmem:[#allocation2 + $0x130] sm:$0xff] }
 0x9d6   : > { %v4023_v31 = vpop.f32.mrb[34].mxu0  ;;  %v4064_v34 = vpop.f32.mrb[34].mxu1  ;;  %v4150_v63 = vadd.f32 %v4021_v36, %v3976_v25  ;;  %v4152_v51 = vadd.f32 %v4062_v32, %v3978_v44  ;;  %v3980_v44 = vld [vmem:[#allocation2 + $0x128] sm:$0xff]  ;;  %v3982_v25 = vld [vmem:[#allocation2 + $0x138] sm:$0xff] }
 0x9d7   : > { %v4024_v50 = vpop.f32.mrb[35].mxu0  ;;  %v4065_v46 = vpop.f32.mrb[35].mxu1  ;;  %v6236_v39 = vmul.f32 -1.442695, %v4149_v21  ;;  %v6238_v61 = vmul.f32 -1.442695, %v4151_v13 }
 0x9d8   : > { %v6237_v23 = vmul.f32 -1.442695, %v4150_v63  ;;  %v6239_v60 = vmul.f32 -1.442695, %v4152_v51 }
 0x9d9   : > { %6659 = vpow2.f32 %v6236_v39 }
 0x9da   : > { %6661 = vpow2.f32 %v6238_v61 }
 0x9db   : > { %6663 = vpow2.f32 %v6237_v23 }
 0x9dc   : > { %6665 = vpow2.f32 %v6239_v60 }
 0x9e3   : > { %v6660_v31 = vpop.eup %6659 }
 0x9e4   : > { %v6662_v34 = vpop.eup %6661  ;;  %v4169_v55 = vadd.f32 1.0, %v6660_v31 }
 0x9e5   : > { %v6664_v50 = vpop.eup %6663  ;;  %v4171_v40 = vadd.f32 1.0, %v6662_v34 }
 0x9e6   : > { %v6666_v46 = vpop.eup %6665  ;;  %v4170_v49 = vadd.f32 1.0, %v6664_v50  ;;  %6667 = vrcp.f32 %v4169_v55 }
 0x9e7   : > { %v4172_v45 = vadd.f32 1.0, %v6666_v46  ;;  %6669 = vrcp.f32 %v4171_v40 }
 0x9e8   : > { %6671 = vrcp.f32 %v4170_v49 }
 0x9e9   : > { %6673 = vrcp.f32 %v4172_v45 }
 0x9f0   : > { %v6668_v40 = vpop.eup %6667 }
 0x9f1   : > { %v6670_v50 = vpop.eup %6669 }
 0x9f2   : > { %v6672_v49 = vpop.eup %6671  ;;  %v4195_v45 = vmul.f32 %v6670_v50, %v9216_v62  ;;  %v10656_v50 = vld [vmem:[#allocation139_spill] sm:$0xff] }
 0x9f3   : > { %v6674_v46 = vpop.eup %6673 }
 0xa14   : > { %v4101_v63 = vpop.f32.mrb[36].mxu0  ;;  %v4142_v51 = vpop.f32.mrb[36].mxu1 }
 0xa15   : > { %v4153_v39 = vadd.f32 %v4101_v63, %v3979_v10  ;;  %v4155_v23 = vadd.f32 %v4142_v51, %v3981_v54  ;;  %v4103_v61 = vpop.f32.mrb[37].mxu0  ;;  %v4144_v60 = vpop.f32.mrb[37].mxu1  ;;  %v4196_v63 = vmul.f32 %v6674_v46, %v9218_v1  ;;  %v10658_v46 = vld [vmem:[#allocation141_spill] sm:$0xff] }
 0xa16   : > { %v4154_v36 = vadd.f32 %v4103_v61, %v3980_v44  ;;  %v4156_v32 = vadd.f32 %v4144_v60, %v3982_v25  ;;  %v4105_v21 = vpop.f32.mrb[38].mxu0  ;;  %v4146_v13 = vpop.f32.mrb[38].mxu1 }
 0xa17   : > { %6675 = vtanh.f32 %v4153_v39  ;;  %v6240_v3 = vmul.f32 -1.442695, %v4155_v23  ;;  %v4106_v31 = vpop.f32.mrb[39].mxu0  ;;  %v4147_v34 = vpop.f32.mrb[39].mxu1 }
 0xa18   : > { %6677 = vtanh.f32 %v4154_v36  ;;  %v6241_v55 = vmul.f32 -1.442695, %v4156_v32 }
 0xa19   : > { %6679 = vpow2.f32 %v6240_v3 }
 0xa1a   : > { %6681 = vpow2.f32 %v6241_v55  ;;  %v10654_v55 = vld [vmem:[#allocation137_spill] sm:$0xff] }
 0xa21   : > { %v6676_v10 = vpop.eup %6675 }
 0xa22   : > { %v6678_v54 = vpop.eup %6677  ;;  %v4197_v44 = vmul.f32 %v6676_v10, %v6668_v40  ;;  %v10655_v40 = vld [vmem:[#allocation138_spill] sm:$0xff] }
 0xa23   : > { %v6680_v25 = vpop.eup %6679  ;;  %v4198_v51 = vmul.f32 %v6678_v54, %v6672_v49  ;;  %v10657_v49 = vld [vmem:[#allocation140_spill] sm:$0xff]  ;;  %v10659_v10 = vld [vmem:[#allocation142_spill] sm:$0xff]  ;;  %v10660_v54 = vld [vmem:[#allocation143_spill] sm:$0xff] }
 0xa24   : > { %v6682_v39 = vpop.eup %6681  ;;  %v9358_v23 = vadd.f32 %v4197_v44, %v4195_v45  ;;  %v4189_v61 = vadd.f32 1.0, %v6680_v25  ;;  %v10661_v45 = vld [vmem:[#allocation144_spill] sm:$0xff]  ;;  %v10662_v44 = vld [vmem:[#allocation145_spill] sm:$0xff]  ;;  %v10663_v25 = vld [vmem:[#allocation146_spill] sm:$0xff] }
 0xa25   : > { %v9360_v60 = vadd.f32 %v4198_v51, %v4196_v63  ;;  %v4190_v36 = vadd.f32 1.0, %v6682_v39  ;;  %v10664_v63 = vld [vmem:[#allocation147_spill] sm:$0xff]  ;;  %v10665_v51 = vld [vmem:[#allocation148_spill] sm:$0xff]  ;;  %v10666_v39 = vld [vmem:[#allocation149_spill] sm:$0xff] }
 0xa26   : > { %6683 = vtanh.f32 %v9358_v23 }
 0xa27   : > { %6685 = vrcp.f32 %v4189_v61  ;;  %v10667_v61 = vld [vmem:[#allocation150_spill] sm:$0xff] }
 0xa28   : > { %6687 = vtanh.f32 %v9360_v60 }
 0xa29   : > { %6689 = vrcp.f32 %v4190_v36  ;;  %v10668_v36 = vld [vmem:[#allocation151_spill] sm:$0xff] }
 0xa30   : > { %v6684_v32 = vpop.eup %6683 }
 0xa31   : > { %v6686_v62 = vpop.eup %6685 }
 0xa32   : > { %v6688_v21 = vpop.eup %6687  ;;  %v4203_v13 = vmul.f32 %v6686_v62, %v6684_v32  ;;  %v10669_v32 = vld [vmem:[#allocation152_spill] sm:$0xff]  ;;  %v10670_v62 = vld [vmem:[#allocation153_spill] sm:$0xff] }
 0xa33   : > { %v6690_v3 = vpop.eup %6689 }
 0xa34   : > { %v4204_v1 = vmul.f32 %v6690_v3, %v6688_v21  ;;  %4205 = vst [vmem:[#allocation3 + $0x40] sm:$0xff] %v4203_v13  ;;  %v9364_v34 = vpack.c.bf16 %v4203_v13, %v4203_v13  ;;  %v10671_v21 = vld [vmem:[#allocation154_spill] sm:$0xff]  ;;  %v10672_v13 = vld [vmem:[#allocation155_spill] sm:$0xff]  ;;  %v10673_v3 = vld [vmem:[#allocation156_spill] sm:$0xff] }
 0xa36   : > { %4206 = vst [vmem:[#allocation3 + $0x48] sm:$0xff] %v4204_v1  ;;  %v4216_v31 = vpack.c.bf16 %v4204_v1, %v4204_v1  ;;  %v10674_v1 = vld [vmem:[#allocation157_spill] sm:$0xff] }
 0xa38   : > { %4249 = vmatprep.mubr.bf16.mxu0 %v4216_v31  ;;  %4290 = vmatprep.mubr.bf16.mxu1 %v4216_v31 }
 0xa39   : > { %4250 = vmatmul.mubr.bf16.vlgmr.msra.gmra.mrb[40].mxu0 %v9364_v34  ;;  %4291 = vmatmul.mubr.bf16.vlgmr.msra.gmra.mrb[40].mxu1 %v9364_v34 }
 0xa3a   : > { %4300 = vmatpush1.bf16.msra.mxu0 %v10300_v57  ;;  %4341 = vmatpush1.bf16.msra.mxu1 %v10301_v48 }
 0xa3b   : > { %4331 = vmatprep.mubr.bf16.mxu0 %v4216_v31  ;;  %4372 = vmatprep.mubr.bf16.mxu1 %v4216_v31  ;;  %v10675_v31 = vld [vmem:[#allocation158_spill] sm:$0xff] }
 0xa3c   : > { %4301 = vmatprep.subr.bf16.mxu0 %v10302_v20  ;;  %4342 = vmatprep.subr.bf16.mxu1 %v10303_v47 }
 0xa3e   : > { %4302 = vmatpush1.bf16.msra.mxu0 %v10304_v12  ;;  %4343 = vmatpush1.bf16.msra.mxu1 %v10305_v11 }
 0xa3f   : > { %4303 = vmatprep.subr.bf16.mxu0 %v10306_v5  ;;  %4344 = vmatprep.subr.bf16.mxu1 %v10307_v29 }
 0xa42   : > { %4304 = vmatpush1.bf16.msra.mxu0 %v10308_v30  ;;  %4345 = vmatpush1.bf16.msra.mxu1 %v10387_v9 }
 0xa43   : > { %4305 = vmatprep.subr.bf16.mxu0 %v10388_v8  ;;  %4346 = vmatprep.subr.bf16.mxu1 %v10389_v26 }
 0xa46   : > { %4306 = vmatpush1.bf16.msra.mxu0 %v10390_v6  ;;  %4347 = vmatpush1.bf16.msra.mxu1 %v10391_v0 }
 0xa47   : > { %4307 = vmatprep.subr.bf16.mxu0 %v10392_v41  ;;  %4348 = vmatprep.subr.bf16.mxu1 %v10393_v42 }
 0xa4a   : > { %4308 = vmatpush1.bf16.msra.mxu0 %v10394_v24  ;;  %4349 = vmatpush1.bf16.msra.mxu1 %v10395_v17 }
 0xa4b   : > { %4309 = vmatprep.subr.bf16.mxu0 %v10396_v18  ;;  %4350 = vmatprep.subr.bf16.mxu1 %v10397_v16 }
 0xa4e   : > { %4310 = vmatpush1.bf16.msra.mxu0 %v10476_v22  ;;  %4351 = vmatpush1.bf16.msra.mxu1 %v10477_v19 }
 0xa4f   : > { %4311 = vmatprep.subr.bf16.mxu0 %v10478_v59  ;;  %4352 = vmatprep.subr.bf16.mxu1 %v10479_v7 }
 0xa52   : > { %4312 = vmatpush1.bf16.msra.mxu0 %v10480_v4  ;;  %4353 = vmatpush1.bf16.msra.mxu1 %v10481_v37 }
 0xa53   : > { %4313 = vmatprep.subr.bf16.mxu0 %v10404_v43  ;;  %4354 = vmatprep.subr.bf16.mxu1 %v10405_v56 }
 0xa56   : > { %4314 = vmatpush1.bf16.msra.mxu0 %v10406_v58  ;;  %4355 = vmatpush1.bf16.msra.mxu1 %v10482_v52 }
 0xa57   : > { %4315 = vmatprep.subr.bf16.mxu0 %v10408_v27  ;;  %4356 = vmatprep.subr.bf16.mxu1 %v10409_v28 }
 0xa5a   : > { %4316 = vmatpush1.bf16.msra.mxu0 %v10410_v14  ;;  %4357 = vmatpush1.bf16.msra.mxu1 %v10411_v33 }
 0xa5b   : > { %4317 = vmatprep.subr.bf16.mxu0 %v10412_v15  ;;  %4358 = vmatprep.subr.bf16.mxu1 %v10413_v38 }
 0xa5e   : > { %4318 = vmatpush1.bf16.msra.mxu0 %v10414_v35  ;;  %4359 = vmatpush1.bf16.msra.mxu1 %v10337_v53 }
 0xa5f   : > { %4319 = vmatprep.subr.bf16.mxu0 %v10338_v2  ;;  %4360 = vmatprep.subr.bf16.mxu1 %v10654_v55 }
 0xa62   : > { %4320 = vmatpush1.bf16.msra.mxu0 %v10655_v40  ;;  %4361 = vmatpush1.bf16.msra.mxu1 %v10656_v50 }
 0xa63   : > { %4321 = vmatprep.subr.bf16.mxu0 %v10657_v49  ;;  %4362 = vmatprep.subr.bf16.mxu1 %v10658_v46 }
 0xa66   : > { %4322 = vmatpush1.bf16.msra.mxu0 %v10659_v10  ;;  %4363 = vmatpush1.bf16.msra.mxu1 %v10660_v54  ;;  %v4210_v54 = vld [vmem:[#allocation2 + $0x158] sm:$0xff] }
 0xa67   : > { %4323 = vmatprep.subr.bf16.mxu0 %v10661_v45  ;;  %4364 = vmatprep.subr.bf16.mxu1 %v10662_v44  ;;  %v4207_v44 = vld [vmem:[#allocation2 + $0x140] sm:$0xff]  ;;  %v4208_v45 = vld [vmem:[#allocation2 + $0x148] sm:$0xff] }
 0xa6a   : > { %4324 = vmatpush1.bf16.msra.mxu0 %v10663_v25  ;;  %4365 = vmatpush1.bf16.msra.mxu1 %v10664_v63 }
 0xa6b   : > { %4325 = vmatprep.subr.bf16.mxu0 %v10665_v51  ;;  %4366 = vmatprep.subr.bf16.mxu1 %v10666_v39  ;;  %v10676_v51 = vld [vmem:[#allocation159_spill] sm:$0xff]  ;;  %v10677_v39 = vld [vmem:[#allocation32_spill] sm:$0xff] }
 0xa6e   : > { %4326 = vmatpush1.bf16.msra.mxu0 %v10667_v61  ;;  %4367 = vmatpush1.bf16.msra.mxu1 %v10668_v36  ;;  %v10678_v61 = vld [vmem:[#allocation34_spill] sm:$0xff] }
 0xa6f   : > { %4327 = vmatprep.subr.bf16.mxu0 %v10669_v32  ;;  %4368 = vmatprep.subr.bf16.mxu1 %v10670_v62  ;;  %v10679_v62 = vld [vmem:[#allocation33_spill] sm:$0xff]  ;;  %v10688_v32 = vld [vmem:[#allocation43_spill] sm:$0xff] }
 0xa72   : > { %4328 = vmatpush1.bf16.msra.mxu0 %v10671_v21  ;;  %4369 = vmatpush1.bf16.msra.mxu1 %v10672_v13  ;;  %v10680_v21 = vld [vmem:[#allocation35_spill] sm:$0xff]  ;;  %v10681_v13 = vld [vmem:[#allocation36_spill] sm:$0xff] }
 0xa73   : > { %4329 = vmatprep.subr.bf16.mxu0 %v10673_v3  ;;  %4370 = vmatprep.subr.bf16.mxu1 %v10674_v1  ;;  %v10682_v3 = vld [vmem:[#allocation37_spill] sm:$0xff]  ;;  %v10683_v1 = vld [vmem:[#allocation38_spill] sm:$0xff] }
 0xa76   : > { %4330 = vmatpush1.bf16.msra.mxu0 %v10675_v31  ;;  %4371 = vmatpush1.bf16.msra.mxu1 %v10676_v51  ;;  %v10684_v31 = vld [vmem:[#allocation39_spill] sm:$0xff]  ;;  %v10685_v51 = vld [vmem:[#allocation40_spill] sm:$0xff] }
 0xa77   : > { %4449 = vmatprep.subr.bf16.mxu0 %v10677_v39  ;;  %4490 = vmatprep.subr.bf16.mxu1 %v10678_v61  ;;  %v10686_v39 = vld [vmem:[#allocation41_spill] sm:$0xff]  ;;  %v10687_v61 = vld [vmem:[#allocation42_spill] sm:$0xff] }
 0xa79   : > { %4332 = vmatmul.mubr.bf16.vlgmr.msra.gmra.mrb[44].mxu0 %v9364_v34  ;;  %4373 = vmatmul.mubr.bf16.vlgmr.msra.gmra.mrb[44].mxu1 %v9364_v34  ;;  %v10689_v34 = vld [vmem:[#allocation44_spill] sm:$0xff] }
 0xa7a   : > { %4450 = vmatpush1.bf16.msra.mxu0 %v10679_v62  ;;  %4491 = vmatpush1.bf16.msra.mxu1 %v10680_v21  ;;  %v10690_v62 = vld [vmem:[#allocation45_spill] sm:$0xff]  ;;  %v10691_v21 = vld [vmem:[#allocation46_spill] sm:$0xff] }
 0xa7b   : > { %4451 = vmatprep.subr.bf16.mxu0 %v10681_v13  ;;  %4492 = vmatprep.subr.bf16.mxu1 %v10682_v3  ;;  %v10692_v13 = vld [vmem:[#allocation47_spill] sm:$0xff]  ;;  %v10693_v3 = vld [vmem:[#allocation48_spill] sm:$0xff] }
 0xa7e   : > { %4452 = vmatpush1.bf16.msra.mxu0 %v10683_v1  ;;  %4493 = vmatpush1.bf16.msra.mxu1 %v10684_v31  ;;  %v10694_v1 = vld [vmem:[#allocation49_spill] sm:$0xff]  ;;  %v10695_v31 = vld [vmem:[#allocation50_spill] sm:$0xff] }
 0xa7f   : > { %4453 = vmatprep.subr.bf16.mxu0 %v10685_v51  ;;  %4494 = vmatprep.subr.bf16.mxu1 %v10686_v39  ;;  %v10696_v51 = vld [vmem:[#allocation51_spill] sm:$0xff]  ;;  %v10697_v39 = vld [vmem:[#allocation52_spill] sm:$0xff] }
 0xa82   : > { %4454 = vmatpush1.bf16.msra.mxu0 %v10687_v61  ;;  %4495 = vmatpush1.bf16.msra.mxu1 %v10688_v32  ;;  %v10698_v61 = vld [vmem:[#allocation53_spill] sm:$0xff]  ;;  %v10699_v32 = vld [vmem:[#allocation54_spill] sm:$0xff] }
 0xa83   : > { %4455 = vmatprep.subr.bf16.mxu0 %v10689_v34  ;;  %4496 = vmatprep.subr.bf16.mxu1 %v10690_v62  ;;  %v10700_v34 = vld [vmem:[#allocation55_spill] sm:$0xff]  ;;  %v10701_v62 = vld [vmem:[#allocation56_spill] sm:$0xff] }
 0xa86   : > { %4456 = vmatpush1.bf16.msra.mxu0 %v10691_v21  ;;  %4497 = vmatpush1.bf16.msra.mxu1 %v10692_v13  ;;  %v10702_v21 = vld [vmem:[#allocation57_spill] sm:$0xff]  ;;  %v10703_v13 = vld [vmem:[#allocation58_spill] sm:$0xff] }
 0xa87   : > { %4457 = vmatprep.subr.bf16.mxu0 %v10693_v3  ;;  %4498 = vmatprep.subr.bf16.mxu1 %v10694_v1  ;;  %v10704_v3 = vld [vmem:[#allocation59_spill] sm:$0xff]  ;;  %v10705_v1 = vld [vmem:[#allocation60_spill] sm:$0xff] }
 0xa8a   : > { %4458 = vmatpush1.bf16.msra.mxu0 %v10695_v31  ;;  %4499 = vmatpush1.bf16.msra.mxu1 %v10696_v51  ;;  %v10706_v31 = vld [vmem:[#allocation61_spill] sm:$0xff]  ;;  %v10707_v51 = vld [vmem:[#allocation62_spill] sm:$0xff] }
 0xa8b   : > { %4459 = vmatprep.subr.bf16.mxu0 %v10697_v39  ;;  %4500 = vmatprep.subr.bf16.mxu1 %v10698_v61  ;;  %v10708_v39 = vld [vmem:[#allocation63_spill] sm:$0xff]  ;;  %v10709_v61 = vld [vmem:[#allocation64_spill] sm:$0xff] }
 0xa8e   : > { %4460 = vmatpush1.bf16.msra.mxu0 %v10699_v32  ;;  %4501 = vmatpush1.bf16.msra.mxu1 %v10700_v34  ;;  %v10710_v32 = vld [vmem:[#allocation65_spill] sm:$0xff]  ;;  %v10711_v34 = vld [vmem:[#allocation66_spill] sm:$0xff] }
 0xa8f   : > { %4461 = vmatprep.subr.bf16.mxu0 %v10701_v62  ;;  %4502 = vmatprep.subr.bf16.mxu1 %v10702_v21  ;;  %v10712_v62 = vld [vmem:[#allocation67_spill] sm:$0xff]  ;;  %v10713_v21 = vld [vmem:[#allocation68_spill] sm:$0xff] }
 0xa92   : > { %4462 = vmatpush1.bf16.msra.mxu0 %v10703_v13  ;;  %4503 = vmatpush1.bf16.msra.mxu1 %v10704_v3  ;;  %v10714_v13 = vld [vmem:[#allocation69_spill] sm:$0xff]  ;;  %v10715_v3 = vld [vmem:[#allocation70_spill] sm:$0xff] }
 0xa93   : > { %4463 = vmatprep.subr.bf16.mxu0 %v10705_v1  ;;  %4504 = vmatprep.subr.bf16.mxu1 %v10706_v31  ;;  %v10716_v1 = vld [vmem:[#allocation71_spill] sm:$0xff]  ;;  %v10717_v31 = vld [vmem:[#allocation72_spill] sm:$0xff] }
 0xa96   : > { %4464 = vmatpush1.bf16.msra.mxu0 %v10707_v51  ;;  %4505 = vmatpush1.bf16.msra.mxu1 %v10708_v39  ;;  %v10718_v51 = vld [vmem:[#allocation73_spill] sm:$0xff]  ;;  %v10719_v39 = vld [vmem:[#allocation74_spill] sm:$0xff] }
 0xa97   : > { %4465 = vmatprep.subr.bf16.mxu0 %v10709_v61  ;;  %4506 = vmatprep.subr.bf16.mxu1 %v10710_v32  ;;  %v10720_v61 = vld [vmem:[#allocation75_spill] sm:$0xff]  ;;  %v10721_v32 = vld [vmem:[#allocation76_spill] sm:$0xff] }
 0xa9a   : > { %4466 = vmatpush1.bf16.msra.mxu0 %v10711_v34  ;;  %4507 = vmatpush1.bf16.msra.mxu1 %v10712_v62  ;;  %v10722_v34 = vld [vmem:[#allocation77_spill] sm:$0xff]  ;;  %v10723_v62 = vld [vmem:[#allocation78_spill] sm:$0xff] }
 0xa9b   : > { %4467 = vmatprep.subr.bf16.mxu0 %v10713_v21  ;;  %4508 = vmatprep.subr.bf16.mxu1 %v10714_v13  ;;  %v10724_v21 = vld [vmem:[#allocation79_spill] sm:$0xff]  ;;  %v10725_v13 = vld [vmem:[#allocation80_spill] sm:$0xff] }
 0xa9e   : > { %4468 = vmatpush1.bf16.msra.mxu0 %v10715_v3  ;;  %4509 = vmatpush1.bf16.msra.mxu1 %v10716_v1  ;;  %v10726_v3 = vld [vmem:[#allocation81_spill] sm:$0xff]  ;;  %v10727_v1 = vld [vmem:[#allocation82_spill] sm:$0xff] }
 0xa9f   : > { %4469 = vmatprep.subr.bf16.mxu0 %v10717_v31  ;;  %4510 = vmatprep.subr.bf16.mxu1 %v10718_v51  ;;  %v10728_v31 = vld [vmem:[#allocation83_spill] sm:$0xff]  ;;  %v10729_v51 = vld [vmem:[#allocation84_spill] sm:$0xff] }
 0xaa2   : > { %4470 = vmatpush1.bf16.msra.mxu0 %v10719_v39  ;;  %4511 = vmatpush1.bf16.msra.mxu1 %v10720_v61  ;;  %v10730_v39 = vld [vmem:[#allocation85_spill] sm:$0xff]  ;;  %v10731_v61 = vld [vmem:[#allocation86_spill] sm:$0xff] }
 0xaa3   : > { %4471 = vmatprep.subr.bf16.mxu0 %v10721_v32  ;;  %4512 = vmatprep.subr.bf16.mxu1 %v10722_v34  ;;  %v10732_v32 = vld [vmem:[#allocation87_spill] sm:$0xff]  ;;  %v10733_v34 = vld [vmem:[#allocation88_spill] sm:$0xff] }
 0xaa6   : > { %4472 = vmatpush1.bf16.msra.mxu0 %v10723_v62  ;;  %4513 = vmatpush1.bf16.msra.mxu1 %v10724_v21  ;;  %v10734_v62 = vld [vmem:[#allocation89_spill] sm:$0xff]  ;;  %v10735_v21 = vld [vmem:[#allocation90_spill] sm:$0xff] }
 0xaa7   : > { %4473 = vmatprep.subr.bf16.mxu0 %v10725_v13  ;;  %4514 = vmatprep.subr.bf16.mxu1 %v10726_v3  ;;  %v10736_v13 = vld [vmem:[#allocation91_spill] sm:$0xff]  ;;  %v10737_v3 = vld [vmem:[#allocation92_spill] sm:$0xff] }
 0xaaa   : > { %4474 = vmatpush1.bf16.msra.mxu0 %v10727_v1  ;;  %4515 = vmatpush1.bf16.msra.mxu1 %v10728_v31  ;;  %v10738_v1 = vld [vmem:[#allocation93_spill] sm:$0xff]  ;;  %v10739_v31 = vld [vmem:[#allocation94_spill] sm:$0xff] }
 0xaab   : > { %4475 = vmatprep.subr.bf16.mxu0 %v10729_v51  ;;  %4516 = vmatprep.subr.bf16.mxu1 %v10730_v39  ;;  %v10740_v51 = vld [vmem:[#allocation95_spill] sm:$0xff]  ;;  %v10741_v39 = vld [vmem:[#allocation96_spill] sm:$0xff] }
 0xaae   : > { %4476 = vmatpush1.bf16.msra.mxu0 %v10731_v61  ;;  %4517 = vmatpush1.bf16.msra.mxu1 %v10732_v32  ;;  %v10742_v61 = vld [vmem:[#allocation97_spill] sm:$0xff] }
 0xaaf   : > { %4477 = vmatprep.subr.bf16.mxu0 %v10733_v34  ;;  %4518 = vmatprep.subr.bf16.mxu1 %v10734_v62 }
 0xab2   : > { %4478 = vmatpush1.bf16.msra.mxu0 %v10735_v21  ;;  %4519 = vmatpush1.bf16.msra.mxu1 %v10736_v13 }
 0xab3   : > { %4479 = vmatprep.subr.bf16.mxu0 %v10737_v3  ;;  %4520 = vmatprep.subr.bf16.mxu1 %v10738_v1  ;;  %v4209_v3 = vld [vmem:[#allocation2 + $0x150] sm:$0xff] }
 0xab6   : > { %4480 = vmatpush1.bf16.msra.mxu0 %v10739_v31  ;;  %4521 = vmatpush1.bf16.msra.mxu1 %v10740_v51 }
 0xab7   : > { %4531 = vmatprep.subr.bf16.mxu0 %v10741_v39  ;;  %4572 = vmatprep.subr.bf16.mxu1 %v10742_v61 }
 0xb0c   : > { %v4251_v32 = vpop.f32.mrb[40].mxu0  ;;  %v4292_v34 = vpop.f32.mrb[40].mxu1 }
 0xb0d   : > { %v4253_v36 = vpop.f32.mrb[41].mxu0  ;;  %v4294_v62 = vpop.f32.mrb[41].mxu1  ;;  %v4381_v1 = vadd.f32 %v4251_v32, %v4207_v44  ;;  %v4383_v31 = vadd.f32 %v4292_v34, %v4209_v3  ;;  %v4211_v32 = vld [vmem:[#allocation2 + $0x160] sm:$0xff]  ;;  %v4213_v3 = vld [vmem:[#allocation2 + $0x170] sm:$0xff] }
 0xb0e   : > { %v4255_v63 = vpop.f32.mrb[42].mxu0  ;;  %v4296_v21 = vpop.f32.mrb[42].mxu1  ;;  %v4382_v10 = vadd.f32 %v4253_v36, %v4208_v45  ;;  %v4384_v51 = vadd.f32 %v4294_v62, %v4210_v54  ;;  %v4212_v54 = vld [vmem:[#allocation2 + $0x168] sm:$0xff]  ;;  %v4214_v45 = vld [vmem:[#allocation2 + $0x178] sm:$0xff] }
 0xb0f   : > { %v4256_v25 = vpop.f32.mrb[43].mxu0  ;;  %v4297_v13 = vpop.f32.mrb[43].mxu1  ;;  %v6242_v46 = vmul.f32 -1.442695, %v4381_v1  ;;  %v6244_v39 = vmul.f32 -1.442695, %v4383_v31 }
 0xb10   : > { %v6243_v49 = vmul.f32 -1.442695, %v4382_v10  ;;  %v6245_v61 = vmul.f32 -1.442695, %v4384_v51 }
 0xb11   : > { %6691 = vpow2.f32 %v6242_v46 }
 0xb12   : > { %6693 = vpow2.f32 %v6244_v39 }
 0xb13   : > { %6695 = vpow2.f32 %v6243_v49 }
 0xb14   : > { %6697 = vpow2.f32 %v6245_v61 }
 0xb1b   : > { %v6692_v63 = vpop.eup %6691 }
 0xb1c   : > { %v6694_v21 = vpop.eup %6693  ;;  %v4401_v50 = vadd.f32 1.0, %v6692_v63 }
 0xb1d   : > { %v6696_v25 = vpop.eup %6695  ;;  %v4403_v40 = vadd.f32 1.0, %v6694_v21 }
 0xb1e   : > { %v6698_v13 = vpop.eup %6697  ;;  %v4402_v55 = vadd.f32 1.0, %v6696_v25  ;;  %6699 = vrcp.f32 %v4401_v50 }
 0xb1f   : > { %v4404_v44 = vadd.f32 1.0, %v6698_v13  ;;  %6701 = vrcp.f32 %v4403_v40 }
 0xb20   : > { %6703 = vrcp.f32 %v4402_v55 }
 0xb21   : > { %6705 = vrcp.f32 %v4404_v44 }
 0xb28   : > { %v6700_v40 = vpop.eup %6699 }
 0xb29   : > { %v6702_v25 = vpop.eup %6701 }
 0xb2a   : > { %v6704_v55 = vpop.eup %6703  ;;  %v4427_v44 = vmul.f32 %v6702_v25, %v9358_v23  ;;  %v10745_v25 = vld [vmem:[#allocation139_spill] sm:$0xff] }
 0xb2b   : > { %v6706_v13 = vpop.eup %6705 }
 0xb4c   : > { %v4333_v10 = vpop.f32.mrb[44].mxu0  ;;  %v4374_v51 = vpop.f32.mrb[44].mxu1 }
 0xb4d   : > { %v4385_v46 = vadd.f32 %v4333_v10, %v4211_v32  ;;  %v4387_v49 = vadd.f32 %v4374_v51, %v4213_v3  ;;  %v4335_v39 = vpop.f32.mrb[45].mxu0  ;;  %v4376_v61 = vpop.f32.mrb[45].mxu1  ;;  %v4428_v10 = vmul.f32 %v6706_v13, %v9360_v60  ;;  %v10747_v13 = vld [vmem:[#allocation141_spill] sm:$0xff] }
 0xb4e   : > { %v4386_v36 = vadd.f32 %v4335_v39, %v4212_v54  ;;  %v4388_v62 = vadd.f32 %v4376_v61, %v4214_v45  ;;  %v4337_v1 = vpop.f32.mrb[46].mxu0  ;;  %v4378_v31 = vpop.f32.mrb[46].mxu1 }
 0xb4f   : > { %6707 = vtanh.f32 %v4385_v46  ;;  %v6246_v34 = vmul.f32 -1.442695, %v4387_v49  ;;  %v4338_v63 = vpop.f32.mrb[47].mxu0  ;;  %v4379_v21 = vpop.f32.mrb[47].mxu1 }
 0xb50   : > { %6709 = vtanh.f32 %v4386_v36  ;;  %v6247_v50 = vmul.f32 -1.442695, %v4388_v62 }
 0xb51   : > { %6711 = vpow2.f32 %v6246_v34 }
 0xb52   : > { %6713 = vpow2.f32 %v6247_v50  ;;  %v10743_v50 = vld [vmem:[#allocation137_spill] sm:$0xff] }
 0xb59   : > { %v6708_v32 = vpop.eup %6707 }
 0xb5a   : > { %v6710_v3 = vpop.eup %6709  ;;  %v4429_v54 = vmul.f32 %v6708_v32, %v6700_v40  ;;  %v10744_v40 = vld [vmem:[#allocation138_spill] sm:$0xff] }
 0xb5b   : > { %v6712_v45 = vpop.eup %6711  ;;  %v4430_v51 = vmul.f32 %v6710_v3, %v6704_v55  ;;  %v10746_v55 = vld [vmem:[#allocation140_spill] sm:$0xff]  ;;  %v10748_v32 = vld [vmem:[#allocation142_spill] sm:$0xff]  ;;  %v10749_v3 = vld [vmem:[#allocation143_spill] sm:$0xff] }
 0xb5c   : > { %v6714_v46 = vpop.eup %6713  ;;  %v9500_v49 = vadd.f32 %v4429_v54, %v4427_v44  ;;  %v4421_v39 = vadd.f32 1.0, %v6712_v45  ;;  %v10750_v44 = vld [vmem:[#allocation144_spill] sm:$0xff]  ;;  %v10751_v54 = vld [vmem:[#allocation145_spill] sm:$0xff]  ;;  %v10752_v45 = vld [vmem:[#allocation146_spill] sm:$0xff] }
 0xb5d   : > { %v9502_v61 = vadd.f32 %v4430_v51, %v4428_v10  ;;  %v4422_v36 = vadd.f32 1.0, %v6714_v46  ;;  %v10753_v10 = vld [vmem:[#allocation147_spill] sm:$0xff]  ;;  %v10754_v51 = vld [vmem:[#allocation148_spill] sm:$0xff]  ;;  %v10755_v46 = vld [vmem:[#allocation149_spill] sm:$0xff] }
 0xb5e   : > { %6715 = vtanh.f32 %v9500_v49 }
 0xb5f   : > { %6717 = vrcp.f32 %v4421_v39  ;;  %v10756_v39 = vld [vmem:[#allocation150_spill] sm:$0xff] }
 0xb60   : > { %6719 = vtanh.f32 %v9502_v61 }
 0xb61   : > { %6721 = vrcp.f32 %v4422_v36  ;;  %v10757_v36 = vld [vmem:[#allocation151_spill] sm:$0xff] }
 0xb68   : > { %v6716_v62 = vpop.eup %6715 }
 0xb69   : > { %v6718_v23 = vpop.eup %6717 }
 0xb6a   : > { %v6720_v1 = vpop.eup %6719  ;;  %v4435_v31 = vmul.f32 %v6718_v23, %v6716_v62  ;;  %v10758_v62 = vld [vmem:[#allocation152_spill] sm:$0xff]  ;;  %v10759_v23 = vld [vmem:[#allocation153_spill] sm:$0xff] }
 0xb6b   : > { %v6722_v34 = vpop.eup %6721 }
 0xb6c   : > { %v4436_v60 = vmul.f32 %v6722_v34, %v6720_v1  ;;  %4437 = vst [vmem:[#allocation3 + $0x50] sm:$0xff] %v4435_v31  ;;  %v9506_v21 = vpack.c.bf16 %v4435_v31, %v4435_v31  ;;  %v10760_v1 = vld [vmem:[#allocation154_spill] sm:$0xff]  ;;  %v10761_v31 = vld [vmem:[#allocation155_spill] sm:$0xff]  ;;  %v10762_v34 = vld [vmem:[#allocation156_spill] sm:$0xff] }
 0xb6e   : > { %4438 = vst [vmem:[#allocation3 + $0x58] sm:$0xff] %v4436_v60  ;;  %v4448_v63 = vpack.c.bf16 %v4436_v60, %v4436_v60  ;;  %v10763_v60 = vld [vmem:[#allocation157_spill] sm:$0xff] }
 0xb70   : > { %4481 = vmatprep.mubr.bf16.mxu0 %v4448_v63  ;;  %4522 = vmatprep.mubr.bf16.mxu1 %v4448_v63 }
 0xb71   : > { %4482 = vmatmul.mubr.bf16.vlgmr.msra.gmra.mrb[48].mxu0 %v9506_v21  ;;  %4523 = vmatmul.mubr.bf16.vlgmr.msra.gmra.mrb[48].mxu1 %v9506_v21 }
 0xb72   : > { %4532 = vmatpush1.bf16.msra.mxu0 %v10300_v57  ;;  %4573 = vmatpush1.bf16.msra.mxu1 %v10301_v48 }
 0xb73   : > { %4563 = vmatprep.mubr.bf16.mxu0 %v4448_v63  ;;  %4604 = vmatprep.mubr.bf16.mxu1 %v4448_v63  ;;  %v10764_v63 = vld [vmem:[#allocation158_spill] sm:$0xff] }
 0xb74   : > { %4533 = vmatprep.subr.bf16.mxu0 %v10302_v20  ;;  %4574 = vmatprep.subr.bf16.mxu1 %v10303_v47 }
 0xb76   : > { %4534 = vmatpush1.bf16.msra.mxu0 %v10304_v12  ;;  %4575 = vmatpush1.bf16.msra.mxu1 %v10305_v11 }
 0xb77   : > { %4535 = vmatprep.subr.bf16.mxu0 %v10306_v5  ;;  %4576 = vmatprep.subr.bf16.mxu1 %v10307_v29 }
 0xb7a   : > { %4536 = vmatpush1.bf16.msra.mxu0 %v10308_v30  ;;  %4577 = vmatpush1.bf16.msra.mxu1 %v10387_v9 }
 0xb7b   : > { %4537 = vmatprep.subr.bf16.mxu0 %v10388_v8  ;;  %4578 = vmatprep.subr.bf16.mxu1 %v10389_v26 }
 0xb7e   : > { %4538 = vmatpush1.bf16.msra.mxu0 %v10390_v6  ;;  %4579 = vmatpush1.bf16.msra.mxu1 %v10391_v0 }
 0xb7f   : > { %4539 = vmatprep.subr.bf16.mxu0 %v10392_v41  ;;  %4580 = vmatprep.subr.bf16.mxu1 %v10393_v42 }
 0xb82   : > { %4540 = vmatpush1.bf16.msra.mxu0 %v10394_v24  ;;  %4581 = vmatpush1.bf16.msra.mxu1 %v10395_v17 }
 0xb83   : > { %4541 = vmatprep.subr.bf16.mxu0 %v10396_v18  ;;  %4582 = vmatprep.subr.bf16.mxu1 %v10397_v16 }
 0xb86   : > { %4542 = vmatpush1.bf16.msra.mxu0 %v10476_v22  ;;  %4583 = vmatpush1.bf16.msra.mxu1 %v10477_v19 }
 0xb87   : > { %4543 = vmatprep.subr.bf16.mxu0 %v10478_v59  ;;  %4584 = vmatprep.subr.bf16.mxu1 %v10479_v7 }
 0xb8a   : > { %4544 = vmatpush1.bf16.msra.mxu0 %v10480_v4  ;;  %4585 = vmatpush1.bf16.msra.mxu1 %v10481_v37 }
 0xb8b   : > { %4545 = vmatprep.subr.bf16.mxu0 %v10404_v43  ;;  %4586 = vmatprep.subr.bf16.mxu1 %v10405_v56 }
 0xb8e   : > { %4546 = vmatpush1.bf16.msra.mxu0 %v10406_v58  ;;  %4587 = vmatpush1.bf16.msra.mxu1 %v10482_v52 }
 0xb8f   : > { %4547 = vmatprep.subr.bf16.mxu0 %v10408_v27  ;;  %4588 = vmatprep.subr.bf16.mxu1 %v10409_v28 }
 0xb92   : > { %4548 = vmatpush1.bf16.msra.mxu0 %v10410_v14  ;;  %4589 = vmatpush1.bf16.msra.mxu1 %v10411_v33 }
 0xb93   : > { %4549 = vmatprep.subr.bf16.mxu0 %v10412_v15  ;;  %4590 = vmatprep.subr.bf16.mxu1 %v10413_v38 }
 0xb96   : > { %4550 = vmatpush1.bf16.msra.mxu0 %v10414_v35  ;;  %4591 = vmatpush1.bf16.msra.mxu1 %v10337_v53 }
 0xb97   : > { %4551 = vmatprep.subr.bf16.mxu0 %v10338_v2  ;;  %4592 = vmatprep.subr.bf16.mxu1 %v10743_v50 }
 0xb9a   : > { %4552 = vmatpush1.bf16.msra.mxu0 %v10744_v40  ;;  %4593 = vmatpush1.bf16.msra.mxu1 %v10745_v25 }
 0xb9b   : > { %4553 = vmatprep.subr.bf16.mxu0 %v10746_v55  ;;  %4594 = vmatprep.subr.bf16.mxu1 %v10747_v13 }
 0xb9e   : > { %4554 = vmatpush1.bf16.msra.mxu0 %v10748_v32  ;;  %4595 = vmatpush1.bf16.msra.mxu1 %v10749_v3  ;;  %v4442_v3 = vld [vmem:[#allocation2 + $0x198] sm:$0xff] }
 0xb9f   : > { %4555 = vmatprep.subr.bf16.mxu0 %v10750_v44  ;;  %4596 = vmatprep.subr.bf16.mxu1 %v10751_v54  ;;  %v4439_v54 = vld [vmem:[#allocation2 + $0x180] sm:$0xff]  ;;  %v4440_v44 = vld [vmem:[#allocation2 + $0x188] sm:$0xff] }
 0xba2   : > { %4556 = vmatpush1.bf16.msra.mxu0 %v10752_v45  ;;  %4597 = vmatpush1.bf16.msra.mxu1 %v10753_v10 }
 0xba3   : > { %4557 = vmatprep.subr.bf16.mxu0 %v10754_v51  ;;  %4598 = vmatprep.subr.bf16.mxu1 %v10755_v46  ;;  %v10765_v51 = vld [vmem:[#allocation159_spill] sm:$0xff]  ;;  %v10766_v46 = vld [vmem:[#allocation32_spill] sm:$0xff] }
 0xba6   : > { %4558 = vmatpush1.bf16.msra.mxu0 %v10756_v39  ;;  %4599 = vmatpush1.bf16.msra.mxu1 %v10757_v36  ;;  %v10767_v39 = vld [vmem:[#allocation34_spill] sm:$0xff] }
 0xba7   : > { %4559 = vmatprep.subr.bf16.mxu0 %v10758_v62  ;;  %4600 = vmatprep.subr.bf16.mxu1 %v10759_v23  ;;  %v10768_v23 = vld [vmem:[#allocation33_spill] sm:$0xff]  ;;  %v10777_v62 = vld [vmem:[#allocation43_spill] sm:$0xff] }
 0xbaa   : > { %4560 = vmatpush1.bf16.msra.mxu0 %v10760_v1  ;;  %4601 = vmatpush1.bf16.msra.mxu1 %v10761_v31  ;;  %v10769_v1 = vld [vmem:[#allocation35_spill] sm:$0xff]  ;;  %v10770_v31 = vld [vmem:[#allocation36_spill] sm:$0xff] }
 0xbab   : > { %4561 = vmatprep.subr.bf16.mxu0 %v10762_v34  ;;  %4602 = vmatprep.subr.bf16.mxu1 %v10763_v60  ;;  %v10771_v34 = vld [vmem:[#allocation37_spill] sm:$0xff]  ;;  %v10772_v60 = vld [vmem:[#allocation38_spill] sm:$0xff] }
 0xbae   : > { %4562 = vmatpush1.bf16.msra.mxu0 %v10764_v63  ;;  %4603 = vmatpush1.bf16.msra.mxu1 %v10765_v51  ;;  %v10773_v63 = vld [vmem:[#allocation39_spill] sm:$0xff]  ;;  %v10774_v51 = vld [vmem:[#allocation40_spill] sm:$0xff] }
 0xbaf   : > { %4681 = vmatprep.subr.bf16.mxu0 %v10766_v46  ;;  %4722 = vmatprep.subr.bf16.mxu1 %v10767_v39  ;;  %v10775_v46 = vld [vmem:[#allocation41_spill] sm:$0xff]  ;;  %v10776_v39 = vld [vmem:[#allocation42_spill] sm:$0xff] }
 0xbb1   : > { %4564 = vmatmul.mubr.bf16.vlgmr.msra.gmra.mrb[52].mxu0 %v9506_v21  ;;  %4605 = vmatmul.mubr.bf16.vlgmr.msra.gmra.mrb[52].mxu1 %v9506_v21  ;;  %v10778_v21 = vld [vmem:[#allocation44_spill] sm:$0xff] }
 0xbb2   : > { %4682 = vmatpush1.bf16.msra.mxu0 %v10768_v23  ;;  %4723 = vmatpush1.bf16.msra.mxu1 %v10769_v1  ;;  %v10779_v23 = vld [vmem:[#allocation45_spill] sm:$0xff]  ;;  %v10780_v1 = vld [vmem:[#allocation46_spill] sm:$0xff] }
 0xbb3   : > { %4683 = vmatprep.subr.bf16.mxu0 %v10770_v31  ;;  %4724 = vmatprep.subr.bf16.mxu1 %v10771_v34  ;;  %v10781_v31 = vld [vmem:[#allocation47_spill] sm:$0xff]  ;;  %v10782_v34 = vld [vmem:[#allocation48_spill] sm:$0xff] }
 0xbb6   : > { %4684 = vmatpush1.bf16.msra.mxu0 %v10772_v60  ;;  %4725 = vmatpush1.bf16.msra.mxu1 %v10773_v63  ;;  %v10783_v60 = vld [vmem:[#allocation49_spill] sm:$0xff]  ;;  %v10784_v63 = vld [vmem:[#allocation50_spill] sm:$0xff] }
 0xbb7   : > { %4685 = vmatprep.subr.bf16.mxu0 %v10774_v51  ;;  %4726 = vmatprep.subr.bf16.mxu1 %v10775_v46  ;;  %v10785_v51 = vld [vmem:[#allocation51_spill] sm:$0xff]  ;;  %v10786_v46 = vld [vmem:[#allocation52_spill] sm:$0xff] }
 0xbba   : > { %4686 = vmatpush1.bf16.msra.mxu0 %v10776_v39  ;;  %4727 = vmatpush1.bf16.msra.mxu1 %v10777_v62  ;;  %v10787_v39 = vld [vmem:[#allocation53_spill] sm:$0xff]  ;;  %v10788_v62 = vld [vmem:[#allocation54_spill] sm:$0xff] }
 0xbbb   : > { %4687 = vmatprep.subr.bf16.mxu0 %v10778_v21  ;;  %4728 = vmatprep.subr.bf16.mxu1 %v10779_v23  ;;  %v10789_v21 = vld [vmem:[#allocation55_spill] sm:$0xff]  ;;  %v10790_v23 = vld [vmem:[#allocation56_spill] sm:$0xff] }
 0xbbe   : > { %4688 = vmatpush1.bf16.msra.mxu0 %v10780_v1  ;;  %4729 = vmatpush1.bf16.msra.mxu1 %v10781_v31  ;;  %v10791_v1 = vld [vmem:[#allocation57_spill] sm:$0xff]  ;;  %v10792_v31 = vld [vmem:[#allocation58_spill] sm:$0xff] }
 0xbbf   : > { %4689 = vmatprep.subr.bf16.mxu0 %v10782_v34  ;;  %4730 = vmatprep.subr.bf16.mxu1 %v10783_v60  ;;  %v10793_v34 = vld [vmem:[#allocation59_spill] sm:$0xff]  ;;  %v10794_v60 = vld [vmem:[#allocation60_spill] sm:$0xff] }
 0xbc2   : > { %4690 = vmatpush1.bf16.msra.mxu0 %v10784_v63  ;;  %4731 = vmatpush1.bf16.msra.mxu1 %v10785_v51  ;;  %v10795_v63 = vld [vmem:[#allocation61_spill] sm:$0xff]  ;;  %v10796_v51 = vld [vmem:[#allocation62_spill] sm:$0xff] }
 0xbc3   : > { %4691 = vmatprep.subr.bf16.mxu0 %v10786_v46  ;;  %4732 = vmatprep.subr.bf16.mxu1 %v10787_v39  ;;  %v10797_v46 = vld [vmem:[#allocation63_spill] sm:$0xff]  ;;  %v10798_v39 = vld [vmem:[#allocation64_spill] sm:$0xff] }
 0xbc6   : > { %4692 = vmatpush1.bf16.msra.mxu0 %v10788_v62  ;;  %4733 = vmatpush1.bf16.msra.mxu1 %v10789_v21  ;;  %v10799_v62 = vld [vmem:[#allocation65_spill] sm:$0xff]  ;;  %v10800_v21 = vld [vmem:[#allocation66_spill] sm:$0xff] }
 0xbc7   : > { %4693 = vmatprep.subr.bf16.mxu0 %v10790_v23  ;;  %4734 = vmatprep.subr.bf16.mxu1 %v10791_v1  ;;  %v10801_v23 = vld [vmem:[#allocation67_spill] sm:$0xff]  ;;  %v10802_v1 = vld [vmem:[#allocation68_spill] sm:$0xff] }
 0xbca   : > { %4694 = vmatpush1.bf16.msra.mxu0 %v10792_v31  ;;  %4735 = vmatpush1.bf16.msra.mxu1 %v10793_v34  ;;  %v10803_v31 = vld [vmem:[#allocation69_spill] sm:$0xff]  ;;  %v10804_v34 = vld [vmem:[#allocation70_spill] sm:$0xff] }
 0xbcb   : > { %4695 = vmatprep.subr.bf16.mxu0 %v10794_v60  ;;  %4736 = vmatprep.subr.bf16.mxu1 %v10795_v63  ;;  %v10805_v60 = vld [vmem:[#allocation71_spill] sm:$0xff]  ;;  %v10806_v63 = vld [vmem:[#allocation72_spill] sm:$0xff] }
 0xbce   : > { %4696 = vmatpush1.bf16.msra.mxu0 %v10796_v51  ;;  %4737 = vmatpush1.bf16.msra.mxu1 %v10797_v46  ;;  %v10807_v51 = vld [vmem:[#allocation73_spill] sm:$0xff]  ;;  %v10808_v46 = vld [vmem:[#allocation74_spill] sm:$0xff] }
 0xbcf   : > { %4697 = vmatprep.subr.bf16.mxu0 %v10798_v39  ;;  %4738 = vmatprep.subr.bf16.mxu1 %v10799_v62  ;;  %v10809_v39 = vld [vmem:[#allocation75_spill] sm:$0xff]  ;;  %v10810_v62 = vld [vmem:[#allocation76_spill] sm:$0xff] }
 0xbd2   : > { %4698 = vmatpush1.bf16.msra.mxu0 %v10800_v21  ;;  %4739 = vmatpush1.bf16.msra.mxu1 %v10801_v23  ;;  %v10811_v21 = vld [vmem:[#allocation77_spill] sm:$0xff]  ;;  %v10812_v23 = vld [vmem:[#allocation78_spill] sm:$0xff] }
 0xbd3   : > { %4699 = vmatprep.subr.bf16.mxu0 %v10802_v1  ;;  %4740 = vmatprep.subr.bf16.mxu1 %v10803_v31  ;;  %v10813_v1 = vld [vmem:[#allocation79_spill] sm:$0xff]  ;;  %v10814_v31 = vld [vmem:[#allocation80_spill] sm:$0xff] }
 0xbd6   : > { %4700 = vmatpush1.bf16.msra.mxu0 %v10804_v34  ;;  %4741 = vmatpush1.bf16.msra.mxu1 %v10805_v60  ;;  %v10815_v34 = vld [vmem:[#allocation81_spill] sm:$0xff]  ;;  %v10816_v60 = vld [vmem:[#allocation82_spill] sm:$0xff] }
 0xbd7   : > { %4701 = vmatprep.subr.bf16.mxu0 %v10806_v63  ;;  %4742 = vmatprep.subr.bf16.mxu1 %v10807_v51  ;;  %v10817_v63 = vld [vmem:[#allocation83_spill] sm:$0xff]  ;;  %v10818_v51 = vld [vmem:[#allocation84_spill] sm:$0xff] }
 0xbda   : > { %4702 = vmatpush1.bf16.msra.mxu0 %v10808_v46  ;;  %4743 = vmatpush1.bf16.msra.mxu1 %v10809_v39  ;;  %v10819_v46 = vld [vmem:[#allocation85_spill] sm:$0xff]  ;;  %v10820_v39 = vld [vmem:[#allocation86_spill] sm:$0xff] }
 0xbdb   : > { %4703 = vmatprep.subr.bf16.mxu0 %v10810_v62  ;;  %4744 = vmatprep.subr.bf16.mxu1 %v10811_v21  ;;  %v10821_v62 = vld [vmem:[#allocation87_spill] sm:$0xff]  ;;  %v10822_v21 = vld [vmem:[#allocation88_spill] sm:$0xff] }
 0xbde   : > { %4704 = vmatpush1.bf16.msra.mxu0 %v10812_v23  ;;  %4745 = vmatpush1.bf16.msra.mxu1 %v10813_v1  ;;  %v10823_v23 = vld [vmem:[#allocation89_spill] sm:$0xff]  ;;  %v10824_v1 = vld [vmem:[#allocation90_spill] sm:$0xff] }
 0xbdf   : > { %4705 = vmatprep.subr.bf16.mxu0 %v10814_v31  ;;  %4746 = vmatprep.subr.bf16.mxu1 %v10815_v34  ;;  %v10825_v31 = vld [vmem:[#allocation91_spill] sm:$0xff]  ;;  %v10826_v34 = vld [vmem:[#allocation92_spill] sm:$0xff] }
 0xbe2   : > { %4706 = vmatpush1.bf16.msra.mxu0 %v10816_v60  ;;  %4747 = vmatpush1.bf16.msra.mxu1 %v10817_v63  ;;  %v10827_v60 = vld [vmem:[#allocation93_spill] sm:$0xff]  ;;  %v10828_v63 = vld [vmem:[#allocation94_spill] sm:$0xff] }
 0xbe3   : > { %4707 = vmatprep.subr.bf16.mxu0 %v10818_v51  ;;  %4748 = vmatprep.subr.bf16.mxu1 %v10819_v46  ;;  %v10829_v51 = vld [vmem:[#allocation95_spill] sm:$0xff]  ;;  %v10830_v46 = vld [vmem:[#allocation96_spill] sm:$0xff] }
 0xbe6   : > { %4708 = vmatpush1.bf16.msra.mxu0 %v10820_v39  ;;  %4749 = vmatpush1.bf16.msra.mxu1 %v10821_v62  ;;  %v10831_v39 = vld [vmem:[#allocation97_spill] sm:$0xff] }
 0xbe7   : > { %4709 = vmatprep.subr.bf16.mxu0 %v10822_v21  ;;  %4750 = vmatprep.subr.bf16.mxu1 %v10823_v23 }
 0xbea   : > { %4710 = vmatpush1.bf16.msra.mxu0 %v10824_v1  ;;  %4751 = vmatpush1.bf16.msra.mxu1 %v10825_v31 }
 0xbeb   : > { %4711 = vmatprep.subr.bf16.mxu0 %v10826_v34  ;;  %4752 = vmatprep.subr.bf16.mxu1 %v10827_v60  ;;  %v4441_v34 = vld [vmem:[#allocation2 + $0x190] sm:$0xff] }
 0xbee   : > { %4712 = vmatpush1.bf16.msra.mxu0 %v10828_v63  ;;  %4753 = vmatpush1.bf16.msra.mxu1 %v10829_v51 }
 0xbef   : > { %4763 = vmatprep.subr.bf16.mxu0 %v10830_v46  ;;  %4804 = vmatprep.subr.bf16.mxu1 %v10831_v39 }
 0xc44   : > { %v4483_v62 = vpop.f32.mrb[48].mxu0  ;;  %v4524_v21 = vpop.f32.mrb[48].mxu1 }
 0xc45   : > { %v4485_v36 = vpop.f32.mrb[49].mxu0  ;;  %v4526_v23 = vpop.f32.mrb[49].mxu1  ;;  %v4613_v60 = vadd.f32 %v4483_v62, %v4439_v54  ;;  %v4615_v63 = vadd.f32 %v4524_v21, %v4441_v34  ;;  %v4443_v62 = vld [vmem:[#allocation2 + $0x1a0] sm:$0xff]  ;;  %v4445_v21 = vld [vmem:[#allocation2 + $0x1b0] sm:$0xff] }
 0xc46   : > { %v4487_v10 = vpop.f32.mrb[50].mxu0  ;;  %v4528_v1 = vpop.f32.mrb[50].mxu1  ;;  %v4614_v32 = vadd.f32 %v4485_v36, %v4440_v44  ;;  %v4616_v51 = vadd.f32 %v4526_v23, %v4442_v3  ;;  %v4444_v3 = vld [vmem:[#allocation2 + $0x1a8] sm:$0xff]  ;;  %v4446_v44 = vld [vmem:[#allocation2 + $0x1b8] sm:$0xff] }
 0xc47   : > { %v4488_v45 = vpop.f32.mrb[51].mxu0  ;;  %v4529_v31 = vpop.f32.mrb[51].mxu1  ;;  %v6248_v13 = vmul.f32 -1.442695, %v4613_v60  ;;  %v6250_v46 = vmul.f32 -1.442695, %v4615_v63 }
 0xc48   : > { %v6249_v55 = vmul.f32 -1.442695, %v4614_v32  ;;  %v6251_v39 = vmul.f32 -1.442695, %v4616_v51 }
 0xc49   : > { %6723 = vpow2.f32 %v6248_v13 }
 0xc4a   : > { %6725 = vpow2.f32 %v6250_v46 }
 0xc4b   : > { %6727 = vpow2.f32 %v6249_v55 }
 0xc4c   : > { %6729 = vpow2.f32 %v6251_v39 }
 0xc53   : > { %v6724_v10 = vpop.eup %6723 }
 0xc54   : > { %v6726_v1 = vpop.eup %6725  ;;  %v4633_v25 = vadd.f32 1.0, %v6724_v10 }
 0xc55   : > { %v6728_v45 = vpop.eup %6727  ;;  %v4635_v40 = vadd.f32 1.0, %v6726_v1 }
 0xc56   : > { %v6730_v31 = vpop.eup %6729  ;;  %v4634_v50 = vadd.f32 1.0, %v6728_v45  ;;  %6731 = vrcp.f32 %v4633_v25 }
 0xc57   : > { %v4636_v54 = vadd.f32 1.0, %v6730_v31  ;;  %6733 = vrcp.f32 %v4635_v40 }
 0xc58   : > { %6735 = vrcp.f32 %v4634_v50 }
 0xc59   : > { %6737 = vrcp.f32 %v4636_v54 }
 0xc60   : > { %v6732_v40 = vpop.eup %6731 }
 0xc61   : > { %v6734_v45 = vpop.eup %6733 }
 0xc62   : > { %v6736_v50 = vpop.eup %6735  ;;  %v4659_v54 = vmul.f32 %v6734_v45, %v9500_v49 }
 0xc63   : > { %v6738_v31 = vpop.eup %6737 }
 0xc84   : > { %v4565_v32 = vpop.f32.mrb[52].mxu0  ;;  %v4606_v36 = vpop.f32.mrb[52].mxu1 }
 0xc85   : > { %v4617_v13 = vadd.f32 %v4565_v32, %v4443_v62  ;;  %v4619_v55 = vadd.f32 %v4606_v36, %v4445_v21  ;;  %v4567_v23 = vpop.f32.mrb[53].mxu0  ;;  %v4608_v34 = vpop.f32.mrb[53].mxu1  ;;  %v4660_v32 = vmul.f32 %v6738_v31, %v9502_v61 }
 0xc86   : > { %v4618_v60 = vadd.f32 %v4567_v23, %v4444_v3  ;;  %v4620_v63 = vadd.f32 %v4608_v34, %v4446_v44  ;;  %v4569_v51 = vpop.f32.mrb[54].mxu0  ;;  %v4610_v46 = vpop.f32.mrb[54].mxu1 }
 0xc87   : > { %6739 = vtanh.f32 %v4617_v13  ;;  %v6252_v39 = vmul.f32 -1.442695, %v4619_v55  ;;  %v4570_v10 = vpop.f32.mrb[55].mxu0  ;;  %v4611_v1 = vpop.f32.mrb[55].mxu1 }
 0xc88   : > { %6741 = vtanh.f32 %v4618_v60  ;;  %v6253_v25 = vmul.f32 -1.442695, %v4620_v63 }
 0xc89   : > { %6743 = vpow2.f32 %v6252_v39 }
 0xc8a   : > { %6745 = vpow2.f32 %v6253_v25 }
 0xc91   : > { %v6740_v62 = vpop.eup %6739 }
 0xc92   : > { %v6742_v21 = vpop.eup %6741  ;;  %v4661_v3 = vmul.f32 %v6740_v62, %v6732_v40 }
 0xc93   : > { %v6744_v44 = vpop.eup %6743  ;;  %v4662_v36 = vmul.f32 %v6742_v21, %v6736_v50 }
 0xc94   : > { %v6746_v13 = vpop.eup %6745  ;;  %v9642_v55 = vadd.f32 %v4661_v3, %v4659_v54  ;;  %v4653_v23 = vadd.f32 1.0, %v6744_v44 }
 0xc95   : > { %v9644_v34 = vadd.f32 %v4662_v36, %v4660_v32  ;;  %v4654_v60 = vadd.f32 1.0, %v6746_v13  ;;  %v4675_v13 = vld [vmem:[#allocation2 + $0x1e0] sm:$0xff] }
 0xc96   : > { %6747 = vtanh.f32 %v9642_v55 }
 0xc97   : > { %6749 = vrcp.f32 %v4653_v23  ;;  %v4677_v23 = vld [vmem:[#allocation2 + $0x1f0] sm:$0xff] }
 0xc98   : > { %6751 = vtanh.f32 %v9644_v34 }
 0xc99   : > { %6753 = vrcp.f32 %v4654_v60  ;;  %v4676_v60 = vld [vmem:[#allocation2 + $0x1e8] sm:$0xff] }
 0xca0   : > { %v6748_v63 = vpop.eup %6747 }
 0xca1   : > { %v6750_v49 = vpop.eup %6749 }
 0xca2   : > { %v6752_v51 = vpop.eup %6751  ;;  %v4667_v46 = vmul.f32 %v6750_v49, %v6748_v63  ;;  %v4678_v63 = vld [vmem:[#allocation2 + $0x1f8] sm:$0xff] }
 0xca3   : > { %v6754_v39 = vpop.eup %6753 }
 0xca4   : > { %v4668_v61 = vmul.f32 %v6754_v39, %v6752_v51  ;;  %4669 = vst [vmem:[#allocation3 + $0x60] sm:$0xff] %v4667_v46  ;;  %v9648_v1 = vpack.c.bf16 %v4667_v46, %v4667_v46 }
 0xca6   : > { %4670 = vst [vmem:[#allocation3 + $0x68] sm:$0xff] %v4668_v61  ;;  %v4680_v10 = vpack.c.bf16 %v4668_v61, %v4668_v61 }
 0xca8   : > { %4713 = vmatprep.mubr.bf16.mxu0 %v4680_v10  ;;  %4754 = vmatprep.mubr.bf16.mxu1 %v4680_v10 }
 0xca9   : > { %4714 = vmatmul.mubr.bf16.vlgmr.msra.gmra.mrb[56].mxu0 %v9648_v1  ;;  %4755 = vmatmul.mubr.bf16.vlgmr.msra.gmra.mrb[56].mxu1 %v9648_v1 }
 0xcaa   : > { %4764 = vmatpush1.bf16.msra.mxu0 %v10300_v57  ;;  %4805 = vmatpush1.bf16.msra.mxu1 %v10301_v48  ;;  %v10832_v57 = vld [vmem:[#allocation137_spill] sm:$0xff]  ;;  %v10833_v48 = vld [vmem:[#allocation138_spill] sm:$0xff] }
 0xcab   : > { %4795 = vmatprep.mubr.bf16.mxu0 %v4680_v10  ;;  %4836 = vmatprep.mubr.bf16.mxu1 %v4680_v10 }
 0xcac   : > { %4765 = vmatprep.subr.bf16.mxu0 %v10302_v20  ;;  %4806 = vmatprep.subr.bf16.mxu1 %v10303_v47  ;;  %v10834_v20 = vld [vmem:[#allocation139_spill] sm:$0xff]  ;;  %v10835_v47 = vld [vmem:[#allocation140_spill] sm:$0xff] }
 0xcae   : > { %4766 = vmatpush1.bf16.msra.mxu0 %v10304_v12  ;;  %4807 = vmatpush1.bf16.msra.mxu1 %v10305_v11  ;;  %v10836_v12 = vld [vmem:[#allocation141_spill] sm:$0xff]  ;;  %v10837_v11 = vld [vmem:[#allocation142_spill] sm:$0xff] }
 0xcaf   : > { %4767 = vmatprep.subr.bf16.mxu0 %v10306_v5  ;;  %4808 = vmatprep.subr.bf16.mxu1 %v10307_v29  ;;  %v10838_v5 = vld [vmem:[#allocation143_spill] sm:$0xff]  ;;  %v10839_v29 = vld [vmem:[#allocation144_spill] sm:$0xff] }
 0xcb2   : > { %4768 = vmatpush1.bf16.msra.mxu0 %v10308_v30  ;;  %4809 = vmatpush1.bf16.msra.mxu1 %v10387_v9  ;;  %v10840_v30 = vld [vmem:[#allocation145_spill] sm:$0xff]  ;;  %v10843_v9 = vld [vmem:[#allocation148_spill] sm:$0xff] }
 0xcb3   : > { %4769 = vmatprep.subr.bf16.mxu0 %v10388_v8  ;;  %4810 = vmatprep.subr.bf16.mxu1 %v10389_v26  ;;  %v10844_v8 = vld [vmem:[#allocation149_spill] sm:$0xff]  ;;  %v10845_v26 = vld [vmem:[#allocation150_spill] sm:$0xff] }
 0xcb6   : > { %4770 = vmatpush1.bf16.msra.mxu0 %v10390_v6  ;;  %4811 = vmatpush1.bf16.msra.mxu1 %v10391_v0  ;;  %v10846_v6 = vld [vmem:[#allocation151_spill] sm:$0xff]  ;;  %v10847_v0 = vld [vmem:[#allocation152_spill] sm:$0xff] }
 0xcb7   : > { %4771 = vmatprep.subr.bf16.mxu0 %v10392_v41  ;;  %4812 = vmatprep.subr.bf16.mxu1 %v10393_v42  ;;  %v10848_v41 = vld [vmem:[#allocation153_spill] sm:$0xff]  ;;  %v10849_v42 = vld [vmem:[#allocation154_spill] sm:$0xff] }
 0xcba   : > { %4772 = vmatpush1.bf16.msra.mxu0 %v10394_v24  ;;  %4813 = vmatpush1.bf16.msra.mxu1 %v10395_v17  ;;  %v10850_v24 = vld [vmem:[#allocation155_spill] sm:$0xff]  ;;  %v10851_v17 = vld [vmem:[#allocation156_spill] sm:$0xff] }
 0xcbb   : > { %4773 = vmatprep.subr.bf16.mxu0 %v10396_v18  ;;  %4814 = vmatprep.subr.bf16.mxu1 %v10397_v16  ;;  %v10852_v18 = vld [vmem:[#allocation157_spill] sm:$0xff]  ;;  %v10853_v16 = vld [vmem:[#allocation158_spill] sm:$0xff] }
 0xcbe   : > { %4774 = vmatpush1.bf16.msra.mxu0 %v10476_v22  ;;  %4815 = vmatpush1.bf16.msra.mxu1 %v10477_v19  ;;  %v4673_v22 = vld [vmem:[#allocation2 + $0x1d0] sm:$0xff]  ;;  %v4672_v19 = vld [vmem:[#allocation2 + $0x1c8] sm:$0xff] }
 0xcbf   : > { %4775 = vmatprep.subr.bf16.mxu0 %v10478_v59  ;;  %4816 = vmatprep.subr.bf16.mxu1 %v10479_v7  ;;  %v4674_v7 = vld [vmem:[#allocation2 + $0x1d8] sm:$0xff] }
 0xcc2   : > { %4776 = vmatpush1.bf16.msra.mxu0 %v10480_v4  ;;  %4817 = vmatpush1.bf16.msra.mxu1 %v10481_v37 }
 0xcc3   : > { %4777 = vmatprep.subr.bf16.mxu0 %v10404_v43  ;;  %4818 = vmatprep.subr.bf16.mxu1 %v10405_v56 }
 0xcc6   : > { %4778 = vmatpush1.bf16.msra.mxu0 %v10406_v58  ;;  %4819 = vmatpush1.bf16.msra.mxu1 %v10482_v52 }
 0xcc7   : > { %4779 = vmatprep.subr.bf16.mxu0 %v10408_v27  ;;  %4820 = vmatprep.subr.bf16.mxu1 %v10409_v28  ;;  %v10854_v28 = vld [vmem:[#allocation159_spill] sm:$0xff]  ;;  %v4671_v27 = vld [vmem:[#allocation2 + $0x1c0] sm:$0xff] }
 0xcca   : > { %4780 = vmatpush1.bf16.msra.mxu0 %v10410_v14  ;;  %4821 = vmatpush1.bf16.msra.mxu1 %v10411_v33 }
 0xccb   : > { %4781 = vmatprep.subr.bf16.mxu0 %v10412_v15  ;;  %4822 = vmatprep.subr.bf16.mxu1 %v10413_v38 }
 0xcce   : > { %4782 = vmatpush1.bf16.msra.mxu0 %v10414_v35  ;;  %4823 = vmatpush1.bf16.msra.mxu1 %v10337_v53  ;;  %v10841_v53 = vld [vmem:[#allocation146_spill] sm:$0xff] }
 0xccf   : > { %4783 = vmatprep.subr.bf16.mxu0 %v10338_v2  ;;  %4824 = vmatprep.subr.bf16.mxu1 %v10832_v57  ;;  %v10842_v2 = vld [vmem:[#allocation147_spill] sm:$0xff] }
 0xcd2   : > { %4784 = vmatpush1.bf16.msra.mxu0 %v10833_v48  ;;  %4825 = vmatpush1.bf16.msra.mxu1 %v10834_v20 }
 0xcd3   : > { %4785 = vmatprep.subr.bf16.mxu0 %v10835_v47  ;;  %4826 = vmatprep.subr.bf16.mxu1 %v10836_v12 }
 0xcd6   : > { %4786 = vmatpush1.bf16.msra.mxu0 %v10837_v11  ;;  %4827 = vmatpush1.bf16.msra.mxu1 %v10838_v5 }
 0xcd7   : > { %4787 = vmatprep.subr.bf16.mxu0 %v10839_v29  ;;  %4828 = vmatprep.subr.bf16.mxu1 %v10840_v30 }
 0xcda   : > { %4788 = vmatpush1.bf16.msra.mxu0 %v10841_v53  ;;  %4829 = vmatpush1.bf16.msra.mxu1 %v10842_v2 }
 0xcdb   : > { %4789 = vmatprep.subr.bf16.mxu0 %v10843_v9  ;;  %4830 = vmatprep.subr.bf16.mxu1 %v10844_v8 }
 0xcde   : > { %4790 = vmatpush1.bf16.msra.mxu0 %v10845_v26  ;;  %4831 = vmatpush1.bf16.msra.mxu1 %v10846_v6 }
 0xcdf   : > { %4791 = vmatprep.subr.bf16.mxu0 %v10847_v0  ;;  %4832 = vmatprep.subr.bf16.mxu1 %v10848_v41 }
 0xce2   : > { %4792 = vmatpush1.bf16.msra.mxu0 %v10849_v42  ;;  %4833 = vmatpush1.bf16.msra.mxu1 %v10850_v24 }
 0xce3   : > { %4793 = vmatprep.subr.bf16.mxu0 %v10851_v17  ;;  %4834 = vmatprep.subr.bf16.mxu1 %v10852_v18 }
 0xce6   : > { %4794 = vmatpush1.bf16.msra.mxu0 %v10853_v16  ;;  %4835 = vmatpush1.bf16.msra.mxu1 %v10854_v28 }
 0xce9   : > { %4796 = vmatmul.mubr.bf16.vlgmr.msra.gmra.mrb[60].mxu0 %v9648_v1  ;;  %4837 = vmatmul.mubr.bf16.vlgmr.msra.gmra.mrb[60].mxu1 %v9648_v1 }
 0xd7c   : > { %v4715_v14 = vpop.f32.mrb[56].mxu0  ;;  %v4756_v33 = vpop.f32.mrb[56].mxu1 }
 0xd7d   : > { %v4717_v15 = vpop.f32.mrb[57].mxu0  ;;  %v4758_v38 = vpop.f32.mrb[57].mxu1  ;;  %v4845_v59 = vadd.f32 %v4715_v14, %v4671_v27  ;;  %v4847_v4 = vadd.f32 %v4756_v33, %v4673_v22  ;;  %v6793_v27 = vld [vmem:[#allocation11 + $0x24] ss:$8 sps:$4 sm:$0xff] (!%p6260_p7)   ;;  %v6795_v22 = vld [vmem:[#allocation11 + $0x20] ss:$8 sps:$4 sm:$0xff] (!%p6260_p7)  }
 0xd7e   : > { %v4719_v35 = vpop.f32.mrb[58].mxu0  ;;  %v4760_v43 = vpop.f32.mrb[58].mxu1  ;;  %v4846_v37 = vadd.f32 %v4717_v15, %v4672_v19  ;;  %v4848_v52 = vadd.f32 %v4758_v38, %v4674_v7  ;;  %v6796_v19 = vld [vmem:[#allocation11 + $0x34] ss:$8 sps:$4 sm:$0xff] (!%p6260_p7)   ;;  %v6799_v7 = vld [vmem:[#allocation11 + $0x44] ss:$8 sps:$4 sm:$0xff] (!%p6260_p7)  }
 0xd7f   : > { %v4720_v56 = vpop.f32.mrb[59].mxu0  ;;  %v4761_v58 = vpop.f32.mrb[59].mxu1  ;;  %v6254_v25 = vmul.f32 -1.442695, %v4845_v59  ;;  %v6256_v40 = vmul.f32 -1.442695, %v4847_v4 }
 0xd80   : > { %v6255_v45 = vmul.f32 -1.442695, %v4846_v37  ;;  %v6257_v50 = vmul.f32 -1.442695, %v4848_v52  ;;  %v6789_v43 = vld [vmem:[#allocation11] ss:$8 sps:$4 sm:$0xff] (!%p6260_p7)  }
 0xd81   : > { %6755 = vpow2.f32 %v6254_v25  ;;  %v6790_v56 = vld [vmem:[#allocation11 + $0x14] ss:$8 sps:$4 sm:$0xff] (!%p6260_p7)   ;;  %v6792_v58 = vld [vmem:[#allocation11 + $0x10] ss:$8 sps:$4 sm:$0xff] (!%p6260_p7)   ;;  %v6801_v4 = vld [vmem:[#allocation11 + $0x40] ss:$8 sps:$4 sm:$0xff] (!%p6260_p7)  }
 0xd82   : > { %6757 = vpow2.f32 %v6256_v40  ;;  %v6798_v59 = vld [vmem:[#allocation11 + $0x30] ss:$8 sps:$4 sm:$0xff] (!%p6260_p7)   ;;  %v6802_v37 = vld [vmem:[#allocation11 + $0x54] ss:$8 sps:$4 sm:$0xff] (!%p6260_p7)   ;;  %v6805_v25 = vld [vmem:[#allocation11 + $0x64] ss:$8 sps:$4 sm:$0xff] (!%p6260_p7)  }
 0xd83   : > { %6759 = vpow2.f32 %v6255_v45  ;;  %v6804_v52 = vld [vmem:[#allocation11 + $0x50] ss:$8 sps:$4 sm:$0xff] (!%p6260_p7)   ;;  %v4910_v45 = vld [vmem:[#allocation3 + $0x18] sm:$0xff] (!%p6260_p7) }
 0xd84   : > { %6761 = vpow2.f32 %v6257_v50  ;;  %v4908_v40 = vld [vmem:[#allocation3 + $0x8] sm:$0xff] (!%p6260_p7) }
 0xd85   : > { %v4924_v50 = vpack.c.bf16 (!%p6260_p7), %v4910_v45, %v4908_v40  ;;  %v6868_v45 = vld [vmem:[#allocation14 + $0xb4] ss:$8 sps:$4 sm:$0xff] (!%p6260_p7)  }
 0xd87   : > { %5167 = vmatprep.mubr.bf16.mxu0 (!%p6260_p7), %v4924_v50  ;;  %v6870_v50 = vld [vmem:[#allocation14 + $0xb0] ss:$8 sps:$4 sm:$0xff] (!%p6260_p7)  }
 0xd8b   : > { %v6756_v31 = vpop.eup %6755 }
 0xd8c   : > { %v6758_v62 = vpop.eup %6757  ;;  %v4865_v3 = vadd.f32 1.0, %v6756_v31  ;;  %v6807_v31 = vld [vmem:[#allocation11 + $0x60] ss:$8 sps:$4 sm:$0xff] (!%p6260_p7)  }
 0xd8d   : > { %v6760_v21 = vpop.eup %6759  ;;  %v4867_v44 = vadd.f32 1.0, %v6758_v62  ;;  %v6808_v62 = vld [vmem:[#allocation11 + $0x74] ss:$8 sps:$4 sm:$0xff] (!%p6260_p7)  }
 0xd8e   : > { %v6762_v54 = vpop.eup %6761  ;;  %v4866_v32 = vadd.f32 1.0, %v6760_v21  ;;  %6763 = vrcp.f32 %v4865_v3  ;;  %v6810_v21 = vld [vmem:[#allocation11 + $0x70] ss:$8 sps:$4 sm:$0xff] (!%p6260_p7)  }
 0xd8f   : > { %v4868_v36 = vadd.f32 1.0, %v6762_v54  ;;  %6765 = vrcp.f32 %v4867_v44  ;;  %v6811_v54 = vld [vmem:[#allocation11 + $0x84] ss:$8 sps:$4 sm:$0xff] (!%p6260_p7)  }
 0xd90   : > { %6767 = vrcp.f32 %v4866_v32  ;;  %v6835_v3 = vld [vmem:[#allocation14 + $0x4] ss:$8 sps:$4 sm:$0xff] (!%p6260_p7)   ;;  %v6837_v44 = vld [vmem:[#allocation14] ss:$8 sps:$4 sm:$0xff] (!%p6260_p7)   ;;  %v6838_v32 = vld [vmem:[#allocation14 + $0x14] ss:$8 sps:$4 sm:$0xff] (!%p6260_p7)  }
 0xd91   : > { %6769 = vrcp.f32 %v4868_v36  ;;  %5436 = vmatprep.subr.bf16.mxu1 (!%p6260_p7), %v6835_v3  ;;  %v6840_v36 = vld [vmem:[#allocation14 + $0x10] ss:$8 sps:$4 sm:$0xff] (!%p6260_p7)   ;;  %v6877_v3 = vld [vmem:[#allocation14 + $0xe4] ss:$8 sps:$4 sm:$0xff] (!%p6260_p7)  }
 0xd92   : > { %5437 = vmatpush1.bf16.msra.mxu1 (!%p6260_p7), %v6837_v44  ;;  %v6879_v44 = vld [vmem:[#allocation14 + $0xe0] ss:$8 sps:$4 sm:$0xff] (!%p6260_p7)  }
 0xd93   : > { %5438 = vmatprep.subr.bf16.mxu1 (!%p6260_p7), %v6838_v32  ;;  %v6880_v32 = vld [vmem:[#allocation14 + $0xf4] ss:$8 sps:$4 sm:$0xff] (!%p6260_p7)  }
 0xd96   : > { %5439 = vmatpush1.bf16.msra.mxu1 (!%p6260_p7), %v6840_v36  ;;  %v6882_v36 = vld [vmem:[#allocation14 + $0xf0] ss:$8 sps:$4 sm:$0xff] (!%p6260_p7)  }
 0xd98   : > { %v6764_v29 = vpop.eup %6763 }
 0xd99   : > { %v6766_v30 = vpop.eup %6765 }
 0xd9a   : > { %v6768_v53 = vpop.eup %6767  ;;  %v4891_v26 = vmul.f32 %v6766_v30, %v9642_v55  ;;  %v6855_v30 = vld [vmem:[#allocation14 + $0x60] ss:$8 sps:$4 sm:$0xff] (!%p6260_p7)  }
 0xd9b   : > { %v6770_v2 = vpop.eup %6769 }
 0xd9c   : > { %v4892_v41 = vmul.f32 %v6770_v2, %v9644_v34  ;;  %v6787_v34 = vld [vmem:[#allocation11 + $0x4] ss:$8 sps:$4 sm:$0xff] (!%p6260_p7)   ;;  %v6856_v2 = vld [vmem:[#allocation14 + $0x74] ss:$8 sps:$4 sm:$0xff] (!%p6260_p7)  }
 0xd9d   : > { %5135 = vmatprep.subr.bf16.mxu0 (!%p6260_p7), %v6787_v34  ;;  %v4913_v34 = vld [vmem:[#allocation3 + $0x30] sm:$0xff] (!%p6260_p7) }
 0xd9e   : > { %5136 = vmatpush1.bf16.msra.mxu0 (!%p6260_p7), %v6789_v43  ;;  %v4916_v43 = vld [vmem:[#allocation3 + $0x48] sm:$0xff] (!%p6260_p7) }
 0xd9f   : > { %5137 = vmatprep.subr.bf16.mxu0 (!%p6260_p7), %v6790_v56  ;;  %v4918_v56 = vld [vmem:[#allocation3 + $0x58] sm:$0xff] (!%p6260_p7) }
 0xda2   : > { %5138 = vmatpush1.bf16.msra.mxu0 (!%p6260_p7), %v6792_v58 }
 0xda3   : > { %5139 = vmatprep.subr.bf16.mxu0 (!%p6260_p7), %v6793_v27  ;;  %v4928_v27 = vpack.c.bf16 (!%p6260_p7), %v4918_v56, %v4916_v43 }
 0xda6   : > { %5140 = vmatpush1.bf16.msra.mxu0 (!%p6260_p7), %v6795_v22  ;;  %v4915_v22 = vld [vmem:[#allocation3 + $0x40] sm:$0xff] (!%p6260_p7) }
 0xda7   : > { %5141 = vmatprep.subr.bf16.mxu0 (!%p6260_p7), %v6796_v19  ;;  %v4917_v19 = vld [vmem:[#allocation3 + $0x50] sm:$0xff] (!%p6260_p7) }
 0xdaa   : > { %5142 = vmatpush1.bf16.msra.mxu0 (!%p6260_p7), %v6798_v59  ;;  %v4920_v59 = vld [vmem:[#allocation3 + $0x68] sm:$0xff] (!%p6260_p7) }
 0xdab   : > { %5143 = vmatprep.subr.bf16.mxu0 (!%p6260_p7), %v6799_v7 }
 0xdae   : > { %5144 = vmatpush1.bf16.msra.mxu0 (!%p6260_p7), %v6801_v4  ;;  %v4927_v4 = vpack.c.bf16 (!%p6260_p7), %v4917_v19, %v4915_v22 }
 0xdaf   : > { %5145 = vmatprep.subr.bf16.mxu0 (!%p6260_p7), %v6802_v37 }
 0xdb2   : > { %5146 = vmatpush1.bf16.msra.mxu0 (!%p6260_p7), %v6804_v52  ;;  %v4919_v52 = vld [vmem:[#allocation3 + $0x60] sm:$0xff] (!%p6260_p7) }
 0xdb3   : > { %5147 = vmatprep.subr.bf16.mxu0 (!%p6260_p7), %v6805_v25 }
 0xdb6   : > { %5148 = vmatpush1.bf16.msra.mxu0 (!%p6260_p7), %v6807_v31  ;;  %v6871_v31 = vld [vmem:[#allocation14 + $0xc4] ss:$8 sps:$4 sm:$0xff] (!%p6260_p7)  }
 0xdb7   : > { %5149 = vmatprep.subr.bf16.mxu0 (!%p6260_p7), %v6808_v62  ;;  %v6873_v62 = vld [vmem:[#allocation14 + $0xc0] ss:$8 sps:$4 sm:$0xff] (!%p6260_p7)  }
 0xdba   : > { %5150 = vmatpush1.bf16.msra.mxu0 (!%p6260_p7), %v6810_v21  ;;  %v6874_v21 = vld [vmem:[#allocation14 + $0xd4] ss:$8 sps:$4 sm:$0xff] (!%p6260_p7)  }
 0xdbb   : > { %5151 = vmatprep.subr.bf16.mxu0 (!%p6260_p7), %v6811_v54  ;;  %v6876_v54 = vld [vmem:[#allocation14 + $0xd0] ss:$8 sps:$4 sm:$0xff] (!%p6260_p7)  }
 0xdbc   : > { %v4797_v49 = vpop.f32.mrb[60].mxu0  ;;  %v4838_v51 = vpop.f32.mrb[60].mxu1 }
 0xdbd   : > { %v4849_v46 = vadd.f32 %v4797_v49, %v4675_v13  ;;  %v4851_v39 = vadd.f32 %v4838_v51, %v4677_v23  ;;  %v4799_v61 = vpop.f32.mrb[61].mxu0  ;;  %v4840_v10 = vpop.f32.mrb[61].mxu1  ;;  %v6813_v13 = vld [vmem:[#allocation11 + $0x80] ss:$8 sps:$4 sm:$0xff] (!%p6260_p7)   ;;  %v6816_v49 = vld [vmem:[#allocation11 + $0x90] ss:$8 sps:$4 sm:$0xff] (!%p6260_p7)  }
 0xdbe   : > { %v4850_v1 = vadd.f32 %v4799_v61, %v4676_v60  ;;  %v4852_v57 = vadd.f32 %v4840_v10, %v4678_v63  ;;  %v4801_v48 = vpop.f32.mrb[62].mxu0  ;;  %v4842_v20 = vpop.f32.mrb[62].mxu1  ;;  %v6841_v23 = vld [vmem:[#allocation14 + $0x24] ss:$8 sps:$4 sm:$0xff] (!%p6260_p7)   ;;  %v6814_v60 = vld [vmem:[#allocation11 + $0x94] ss:$8 sps:$4 sm:$0xff] (!%p6260_p7)   ;;  %5152 = vmatpush1.bf16.msra.mxu0 (!%p6260_p7), %v6813_v13 }
 0xdbf   : > { %6771 = vtanh.f32 %v4849_v46  ;;  %v6258_v47 = vmul.f32 -1.442695, %v4851_v39  ;;  %v4802_v12 = vpop.f32.mrb[63].mxu0  ;;  %v4843_v11 = vpop.f32.mrb[63].mxu1  ;;  %v6843_v63 = vld [vmem:[#allocation14 + $0x20] ss:$8 sps:$4 sm:$0xff] (!%p6260_p7)   ;;  %5440 = vmatprep.subr.bf16.mxu1 (!%p6260_p7), %v6841_v23  ;;  %5153 = vmatprep.subr.bf16.mxu0 (!%p6260_p7), %v6814_v60 }
 0xdc0   : > { %6773 = vtanh.f32 %v4850_v1  ;;  %v6259_v5 = vmul.f32 -1.442695, %v4852_v57  ;;  %v6844_v51 = vld [vmem:[#allocation14 + $0x34] ss:$8 sps:$4 sm:$0xff] (!%p6260_p7)   ;;  %v6817_v46 = vld [vmem:[#allocation11 + $0xa4] ss:$8 sps:$4 sm:$0xff] (!%p6260_p7)   ;;  %5441 = vmatpush1.bf16.msra.mxu1 (!%p6260_p7), %v6843_v63 }
 0xdc1   : > { %6775 = vpow2.f32 %v6258_v47  ;;  %v6846_v39 = vld [vmem:[#allocation14 + $0x30] ss:$8 sps:$4 sm:$0xff] (!%p6260_p7)   ;;  %v6819_v61 = vld [vmem:[#allocation11 + $0xa0] ss:$8 sps:$4 sm:$0xff] (!%p6260_p7)   ;;  %5442 = vmatprep.subr.bf16.mxu1 (!%p6260_p7), %v6844_v51  ;;  %v6823_v47 = vld [vmem:[#allocation11 + $0xc4] ss:$8 sps:$4 sm:$0xff] (!%p6260_p7)  }
 0xdc2   : > { %6777 = vpow2.f32 %v6259_v5  ;;  %5154 = vmatpush1.bf16.msra.mxu0 (!%p6260_p7), %v6816_v49  ;;  %v6847_v10 = vld [vmem:[#allocation14 + $0x44] ss:$8 sps:$4 sm:$0xff] (!%p6260_p7)   ;;  %v6820_v1 = vld [vmem:[#allocation11 + $0xb4] ss:$8 sps:$4 sm:$0xff] (!%p6260_p7)   ;;  %v6849_v48 = vld [vmem:[#allocation14 + $0x40] ss:$8 sps:$4 sm:$0xff] (!%p6260_p7)  }
 0xdc3   : > { %5155 = vmatprep.subr.bf16.mxu0 (!%p6260_p7), %v6817_v46  ;;  %v6822_v57 = vld [vmem:[#allocation11 + $0xb0] ss:$8 sps:$4 sm:$0xff] (!%p6260_p7)   ;;  %v6825_v11 = vld [vmem:[#allocation11 + $0xc0] ss:$8 sps:$4 sm:$0xff] (!%p6260_p7)   ;;  %v4965_v46 = vlaneseq (!%p6260_p7) }
 0xdc4   : > { %v6850_v20 = vld [vmem:[#allocation14 + $0x54] ss:$8 sps:$4 sm:$0xff] (!%p6260_p7)   ;;  %5443 = vmatpush1.bf16.msra.mxu1 (!%p6260_p7), %v6846_v39  ;;  %v6852_v12 = vld [vmem:[#allocation14 + $0x50] ss:$8 sps:$4 sm:$0xff] (!%p6260_p7)   ;;  %v6853_v5 = vld [vmem:[#allocation14 + $0x64] ss:$8 sps:$4 sm:$0xff] (!%p6260_p7)  }
 0xdc5   : > { %5444 = vmatprep.subr.bf16.mxu1 (!%p6260_p7), %v6847_v10  ;;  %v6883_v13 = vld [vmem:[#allocation17 + $0x40] sm:$0xff] (!%p6260_p7)   ;;  %v9719_v60 = vld [vmem:[#allocation17 + $0x48] sm:$0xff] (!%p6260_p7)   ;;  %v9724_v49 = vld [vmem:[#allocation17 + $0x50] sm:$0xff] (!%p6260_p7)   ;;  %v9731_v39 = vshrl.u32 (!%p6260_p7), %v4965_v46, 7 }
 0xdc6   : > { %5156 = vmatpush1.bf16.msra.mxu0 (!%p6260_p7), %v6819_v61  ;;  %v6884_v23 = vld [vmem:[#allocation17] sm:$0xff] (!%p6260_p7)   ;;  %v9721_v63 = vld [vmem:[#allocation17 + $0x8] sm:$0xff] (!%p6260_p7)   ;;  %v9727_v51 = vld [vmem:[#allocation17 + $0x10] sm:$0xff] (!%p6260_p7)  }
 0xdc7   : > { %5157 = vmatprep.subr.bf16.mxu0 (!%p6260_p7), %v6820_v1  ;;  %v4967_v61 = vsub.s32 (!%p6260_p7), 0, %v9731_v39  ;;  %v4963_v10 = vld [vmem:[#allocation12] sm:$0x3] (!%p6260_p7)  ;;  %v4971_v1 = vsub.s32 (!%p6260_p7), 1, %v9731_v39 }
 0xdc8   : > { %5445 = vmatpush1.bf16.msra.mxu1 (!%p6260_p7), %v6849_v48  ;;  %v6889_v46 = vld [vmem:[#allocation17 + $0x58] sm:$0xff] (!%p6260_p7)  }
 0xdc9   : > { %v6772_v9 = vpop.eup %6771  ;;  %5446 = vmatprep.subr.bf16.mxu1 (!%p6260_p7), %v6850_v20  ;;  %v9739_v48 = vrot.slane (!%p6260_p7), %v4963_v10, %v4971_v1 }
 0xdca   : > { %v6774_v8 = vpop.eup %6773  ;;  %v4893_v6 = vmul.f32 %v6772_v9, %v6764_v29  ;;  %v6826_v29 = vld [vmem:[#allocation11 + $0xd4] ss:$8 sps:$4 sm:$0xff] (!%p6260_p7)   ;;  %5158 = vmatpush1.bf16.msra.mxu0 (!%p6260_p7), %v6822_v57  ;;  %v6829_v9 = vld [vmem:[#allocation11 + $0xe4] ss:$8 sps:$4 sm:$0xff] (!%p6260_p7)   ;;  %v4968_v57 = vrot.slane (!%p6260_p7), %v4963_v10, %v4967_v61 }
 0xdcb   : > { %v6776_v0 = vpop.eup %6775  ;;  %v4894_v42 = vmul.f32 %v6774_v8, %v6768_v53  ;;  %5159 = vmatprep.subr.bf16.mxu0 (!%p6260_p7), %v6823_v47  ;;  %v6828_v53 = vld [vmem:[#allocation11 + $0xd0] ss:$8 sps:$4 sm:$0xff] (!%p6260_p7)   ;;  %v6890_v10 = vld [vmem:[#allocation17 + $0x18] sm:$0xff] (!%p6260_p7)  }
 0xdcc   : > { %v6778_v24 = vpop.eup %6777  ;;  %v4895_v17 = vadd.f32 %v4893_v6, %v4891_v26  ;;  %v4885_v18 = vadd.f32 1.0, %v6776_v0  ;;  %5447 = vmatpush1.bf16.msra.mxu1 (!%p6260_p7), %v6852_v12  ;;  %v6858_v8 = vld [vmem:[#allocation14 + $0x70] ss:$8 sps:$4 sm:$0xff] (!%p6260_p7)   ;;  %v6831_v26 = vld [vmem:[#allocation11 + $0xe0] ss:$8 sps:$4 sm:$0xff] (!%p6260_p7)  }
 0xdcd   : > { %v4896_v16 = vadd.f32 %v4894_v42, %v4892_v41  ;;  %v4886_v28 = vadd.f32 1.0, %v6778_v24  ;;  %5448 = vmatprep.subr.bf16.mxu1 (!%p6260_p7), %v6853_v5  ;;  %v6859_v6 = vld [vmem:[#allocation14 + $0x84] ss:$8 sps:$4 sm:$0xff] (!%p6260_p7)   ;;  %v6832_v0 = vld [vmem:[#allocation11 + $0xf4] ss:$8 sps:$4 sm:$0xff] (!%p6260_p7)  }
 0xdce   : > { %6779 = vtanh.f32 %v4895_v17  ;;  %5160 = vmatpush1.bf16.msra.mxu0 (!%p6260_p7), %v6825_v11  ;;  %v6834_v41 = vld [vmem:[#allocation11 + $0xf0] ss:$8 sps:$4 sm:$0xff] (!%p6260_p7)   ;;  %v6861_v42 = vld [vmem:[#allocation14 + $0x80] ss:$8 sps:$4 sm:$0xff] (!%p6260_p7)  }
 0xdcf   : > { %6781 = vrcp.f32 %v4885_v18  ;;  %5161 = vmatprep.subr.bf16.mxu0 (!%p6260_p7), %v6826_v29  ;;  %v4907_v24 = vld [vmem:[#allocation3] sm:$0xff] (!%p6260_p7)  ;;  %v4909_v17 = vld [vmem:[#allocation3 + $0x10] sm:$0xff] (!%p6260_p7) }
 0xdd0   : > { %6783 = vtanh.f32 %v4896_v16  ;;  %5449 = vmatpush1.bf16.msra.mxu1 (!%p6260_p7), %v6855_v30  ;;  %v6862_v18 = vld [vmem:[#allocation14 + $0x94] ss:$8 sps:$4 sm:$0xff] (!%p6260_p7)  }
 0xdd1   : > { %6785 = vrcp.f32 %v4886_v28  ;;  %5450 = vmatprep.subr.bf16.mxu1 (!%p6260_p7), %v6856_v2  ;;  %v4912_v16 = vld [vmem:[#allocation3 + $0x28] sm:$0xff] (!%p6260_p7)  ;;  %v4914_v28 = vld [vmem:[#allocation3 + $0x38] sm:$0xff] (!%p6260_p7) }
 0xdd2   : > { %5162 = vmatpush1.bf16.msra.mxu0 (!%p6260_p7), %v6828_v53 }
 0xdd3   : > { %5163 = vmatprep.subr.bf16.mxu0 (!%p6260_p7), %v6829_v9 }
 0xdd4   : > { %5451 = vmatpush1.bf16.msra.mxu1 (!%p6260_p7), %v6858_v8 }
 0xdd5   : > { %5452 = vmatprep.subr.bf16.mxu1 (!%p6260_p7), %v6859_v6 }
 0xdd6   : > { %5164 = vmatpush1.bf16.msra.mxu0 (!%p6260_p7), %v6831_v26 }
 0xdd7   : > { %5165 = vmatprep.subr.bf16.mxu0 (!%p6260_p7), %v6832_v0 }
 0xdd8   : > { %v6780_v14 = vpop.eup %6779  ;;  %4906 = sbr.rel (%p6260_p7) target bundleno = 4255 (0x109f), region = 116  ;;  %5453 = vmatpush1.bf16.msra.mxu1 (!%p6260_p7), %v6861_v42 }
 0xdd9   : > { %v6782_v33 = vpop.eup %6781  ;;  %5454 = vmatprep.subr.bf16.mxu1 (!%p6260_p7), %v6862_v18 }
 0xdda   : > { %v6784_v15 = vpop.eup %6783  ;;  %v4899_v38 = vmul.f32 %v6782_v33, %v6780_v14  ;;  %v4923_v14 = vpack.c.bf16 (!%p6260_p7), %v4909_v17, %v4907_v24  ;;  %v6864_v33 = vld [vmem:[#allocation14 + $0x90] ss:$8 sps:$4 sm:$0xff] (!%p6260_p7)   ;;  %5166 = vmatpush1.bf16.msra.mxu0 (!%p6260_p7), %v6834_v41 }
 0xddb   : > { %v6786_v35 = vpop.eup %6785  ;;  %6347 = vmatprep.subr.bf16.mxu0 (!%p6260_p7), %v6883_v13 }
 0xddc   : > { %4901 = vst [vmem:[#allocation3 + $0x70] sm:$0xff] %v4899_v38  ;;  %v4900_v55 = vmul.f32 %v6786_v35, %v6784_v15  ;;  %v4926_v15 = vpack.c.bf16 (!%p6260_p7), %v4914_v28, %v4912_v16  ;;  %v6865_v38 = vld [vmem:[#allocation14 + $0xa4] ss:$8 sps:$4 sm:$0xff] (!%p6260_p7)   ;;  %5455 = vmatpush1.bf16.msra.mxu1 (!%p6260_p7), %v6864_v33  ;;  %v6867_v35 = vld [vmem:[#allocation14 + $0xa0] ss:$8 sps:$4 sm:$0xff] (!%p6260_p7)  }
 0xddd   : > { %5168 = vmatmul.mubr.bf16.vlgmr.msra.gmra.mrb[0].mxu0 (!%p6260_p7), %v4923_v14  ;;  %5456 = vmatprep.subr.bf16.mxu1 (!%p6260_p7), %v6865_v38 }
 0xdde   : > { %4902 = vst [vmem:[#allocation3 + $0x78] sm:$0xff] %v4900_v55  ;;  %5177 = vmatprep.mubr.bf16.mxu0 (!%p6260_p7), %v4926_v15  ;;  %v4911_v55 = vld [vmem:[#allocation3 + $0x20] sm:$0xff] (!%p6260_p7)  ;;  %6348 = vmatpush3.bf16.msra.mxu0 (!%p6260_p7), %v6884_v23 }
 0xddf   : > { %v4925_v58 = vpack.c.bf16 %v4913_v34, %v4911_v55  ;;  %6349 = vmatprep.subr.bf16.mxu0 %v9719_v60 }
 0xde0   : > { %5457 = vmatpush1.bf16.msra.mxu1 %v6867_v35 }
 0xde1   : > { %5458 = vmatprep.subr.bf16.mxu1 %v6868_v45 }
 0xde2   : > { %6350 = vmatpush3.bf16.msra.mxu0 %v9721_v63 }
 0xde3   : > { %v4921_v25 = vld [vmem:[#allocation3 + $0x70] sm:$0xff]  ;;  %6351 = vmatprep.subr.bf16.mxu0 %v9724_v49 }
 0xde4   : > { %v4929_v40 = vpack.c.bf16 %v4921_v25, %v4919_v52  ;;  %5459 = vmatpush1.bf16.msra.mxu1 %v6870_v50 }
 0xde5   : > { %5178 = vmatmul.mubr.bf16.gmra.mrb[4].mxu0 %v4925_v58  ;;  %v4922_v7 = vld [vmem:[#allocation3 + $0x78] sm:$0xff]  ;;  %5460 = vmatprep.subr.bf16.mxu1 %v6871_v31 }
 0xde6   : > { %5187 = vmatprep.mubr.bf16.mxu0 %v4928_v27  ;;  %v4930_v37 = vpack.c.bf16 %v4922_v7, %v4920_v59  ;;  %6352 = vmatpush3.bf16.msra.mxu0 %v9727_v51 }
 0xde7   : > { %6353 = vmatprep.subr.bf16.mxu0 %v6889_v46 }
 0xde8   : > { %5461 = vmatpush1.bf16.msra.mxu1 %v6873_v62 }
 0xde9   : > { %5462 = vmatprep.subr.bf16.mxu1 %v6874_v21 }
 0xdea   : > { %6354 = vmatpush3.bf16.msra.mxu0 %v6890_v10 }
 0xdec   : > { %5463 = vmatpush1.bf16.msra.mxu1 %v6876_v54 }
 0xded   : > { %5188 = vmatmul.mubr.bf16.gmra.mrb[8].mxu0 %v4927_v4  ;;  %5464 = vmatprep.subr.bf16.mxu1 %v6877_v3 }
 0xdee   : > { %5197 = vmatprep.mubr.bf16.mxu0 %v4930_v37 }
 0xdf0   : > { %5465 = vmatpush1.bf16.msra.mxu1 %v6879_v44 }
 0xdf1   : > { %5466 = vmatprep.subr.bf16.mxu1 %v6880_v32 }
 0xdf4   : > { %5467 = vmatpush1.bf16.msra.mxu1 %v6882_v36 }
 0xdf5   : > { %5198 = vmatmul.mubr.bf16.gmra.mrb[12].mxu0 %v4929_v40  ;;  %6387 = vmatprep.subr.bf16.mxu1 %v6883_v13 }
 0xeb0   : > { %v5169_v20 = vpop.f32.mrb[0].mxu0 }
 0xeb1   : > { %v5170_v47 = vadd.f32 %v5169_v20, %v4968_v57  ;;  %v5171_v12 = vpop.f32.mrb[1].mxu0  ;;  %v6894_v20 = vld [vmem:[#allocation17 + $0x28] sm:$0xff]  }
 0xeb2   : > { %v5172_v11 = vadd.f32 %v5171_v12, %v9739_v48  ;;  %v5173_v5 = vpop.f32.mrb[2].mxu0  ;;  %v6896_v12 = vld [vmem:[#allocation17 + $0x30] sm:$0xff]  }
 0xeb3   : > { %6899 = vtanh.f32 %v5170_v47  ;;  %v5174_v29 = vadd.f32 %v5173_v5, %v4968_v57  ;;  %v5175_v30 = vpop.f32.mrb[3].mxu0  ;;  %v6895_v47 = vld [vmem:[#allocation17 + $0x70] sm:$0xff]   ;;  %v6898_v5 = vld [vmem:[#allocation17 + $0x38] sm:$0xff]  }
 0xeb4   : > { %6901 = vtanh.f32 %v5172_v11  ;;  %v5176_v53 = vadd.f32 %v5175_v30, %v9739_v48  ;;  %v6897_v11 = vld [vmem:[#allocation17 + $0x78] sm:$0xff]  }
 0xeb5   : > { %6903 = vtanh.f32 %v5174_v29  ;;  %v5264_v29 = vld [vmem:[#allocation15] sm:$0x3] }
 0xeb6   : > { %6905 = vtanh.f32 %v5176_v53  ;;  %v5269_v30 = vrot.slane %v5264_v29, %v4967_v61  ;;  %v5273_v53 = vrot.slane %v5264_v29, %v4971_v1 }
 0xeb8   : > { %v5179_v2 = vpop.f32.mrb[4].mxu0 }
 0xeb9   : > { %v5180_v9 = vadd.f32 %v5179_v2, %v4968_v57  ;;  %v5181_v8 = vpop.f32.mrb[5].mxu0 }
 0xeba   : > { %v5182_v26 = vadd.f32 %v5181_v8, %v9739_v48  ;;  %v5183_v6 = vpop.f32.mrb[6].mxu0 }
 0xebb   : > { %6907 = vtanh.f32 %v5180_v9  ;;  %v5184_v0 = vadd.f32 %v5183_v6, %v4968_v57  ;;  %v5185_v41 = vpop.f32.mrb[7].mxu0 }
 0xebc   : > { %6909 = vtanh.f32 %v5182_v26  ;;  %v5186_v42 = vadd.f32 %v5185_v41, %v9739_v48 }
 0xebd   : > { %v6900_v24 = vpop.eup %6899  ;;  %6911 = vtanh.f32 %v5184_v0 }
 0xebe   : > { %v6902_v17 = vpop.eup %6901  ;;  %6913 = vtanh.f32 %v5186_v42 }
 0xebf   : > { %v6904_v18 = vpop.eup %6903 }
 0xec0   : > { %v6906_v16 = vpop.eup %6905  ;;  %v5189_v28 = vpop.f32.mrb[8].mxu0  ;;  %v5224_v14 = vpack.c.bf16 %v6904_v18, %v6900_v24 }
 0xec1   : > { %v5190_v33 = vadd.f32 %v5189_v28, %v4968_v57  ;;  %v5191_v15 = vpop.f32.mrb[9].mxu0  ;;  %v5225_v38 = vpack.c.bf16 %v6906_v16, %v6902_v17 }
 0xec2   : > { %v5192_v35 = vadd.f32 %v5191_v15, %v9739_v48  ;;  %v5193_v55 = vpop.f32.mrb[10].mxu0 }
 0xec3   : > { %6915 = vtanh.f32 %v5190_v33  ;;  %v5194_v34 = vadd.f32 %v5193_v55, %v4968_v57  ;;  %v5195_v43 = vpop.f32.mrb[11].mxu0  ;;  %5468 = vmatprep.mubr.bf16.mxu1 %v5225_v38 }
 0xec4   : > { %6917 = vtanh.f32 %v5192_v35  ;;  %v5196_v56 = vadd.f32 %v5195_v43, %v9739_v48  ;;  %5469 = vmatmul.mubr.bf16.vlgmr.msra.gmra.mrb[0].mxu1 %v5224_v14 }
 0xec5   : > { %v6908_v58 = vpop.eup %6907  ;;  %6919 = vtanh.f32 %v5194_v34  ;;  %6395 = vmatpush3.bf16.msra.mxu1 %v6884_v23 }
 0xec6   : > { %v6910_v27 = vpop.eup %6909  ;;  %6921 = vtanh.f32 %v5196_v56  ;;  %6388 = vmatprep.subr.bf16.mxu1 %v9719_v60 }
 0xec7   : > { %v6912_v22 = vpop.eup %6911 }
 0xec8   : > { %v6914_v19 = vpop.eup %6913  ;;  %v5199_v59 = vpop.f32.mrb[12].mxu0  ;;  %v5226_v7 = vpack.c.bf16 %v6912_v22, %v6908_v58 }
 0xec9   : > { %v5200_v4 = vadd.f32 %v5199_v59, %v4968_v57  ;;  %v5201_v37 = vpop.f32.mrb[13].mxu0  ;;  %v5227_v52 = vpack.c.bf16 %v6914_v19, %v6910_v27  ;;  %6396 = vmatpush3.bf16.msra.mxu1 %v9721_v63 }
 0xeca   : > { %v5202_v25 = vadd.f32 %v5201_v37, %v9739_v48  ;;  %v5203_v40 = vpop.f32.mrb[14].mxu0  ;;  %6389 = vmatprep.subr.bf16.mxu1 %v9724_v49 }
 0xecb   : > { %6923 = vtanh.f32 %v5200_v4  ;;  %v5204_v45 = vadd.f32 %v5203_v40, %v4968_v57  ;;  %v5205_v50 = vpop.f32.mrb[15].mxu0  ;;  %5478 = vmatprep.mubr.bf16.mxu1 %v5227_v52  ;;  %v6892_v57 = vld [vmem:[#allocation17 + $0x20] sm:$0xff]  }
 0xecc   : > { %6925 = vtanh.f32 %v5202_v25  ;;  %v5206_v31 = vadd.f32 %v5205_v50, %v9739_v48  ;;  %5479 = vmatmul.mubr.bf16.gmra.mrb[4].mxu1 %v5226_v7  ;;  %v6893_v48 = vld [vmem:[#allocation17 + $0x68] sm:$0xff]  }
 0xecd   : > { %v6916_v62 = vpop.eup %6915  ;;  %6927 = vtanh.f32 %v5204_v45  ;;  %6397 = vmatpush3.bf16.msra.mxu1 %v9727_v51  ;;  %v6891_v51 = vld [vmem:[#allocation17 + $0x60] sm:$0xff]  }
 0xece   : > { %v6918_v21 = vpop.eup %6917  ;;  %6929 = vtanh.f32 %v5206_v31  ;;  %6390 = vmatprep.subr.bf16.mxu1 %v6889_v46  ;;  %6355 = vmatprep.subr.bf16.mxu0 %v6891_v51 }
 0xecf   : > { %v6920_v54 = vpop.eup %6919  ;;  %6356 = vmatpush3.bf16.msra.mxu0 %v6892_v57 }
 0xed0   : > { %v6922_v3 = vpop.eup %6921  ;;  %v5228_v44 = vpack.c.bf16 %v6920_v54, %v6916_v62  ;;  %6357 = vmatprep.subr.bf16.mxu0 %v6893_v48 }
 0xed1   : > { %v5229_v32 = vpack.c.bf16 %v6922_v3, %v6918_v21  ;;  %6398 = vmatpush3.bf16.msra.mxu1 %v6890_v10 }
 0xed2   : > { %6391 = vmatprep.subr.bf16.mxu1 %v6891_v51 }
 0xed3   : > { %5488 = vmatprep.mubr.bf16.mxu1 %v5229_v32  ;;  %6358 = vmatpush3.bf16.msra.mxu0 %v6894_v20 }
 0xed4   : > { %5489 = vmatmul.mubr.bf16.gmra.mrb[8].mxu1 %v5228_v44  ;;  %6359 = vmatprep.subr.bf16.mxu0 %v6895_v47 }
 0xed5   : > { %v6924_v36 = vpop.eup %6923  ;;  %6399 = vmatpush3.bf16.msra.mxu1 %v6892_v57 }
 0xed6   : > { %v6926_v13 = vpop.eup %6925  ;;  %6392 = vmatprep.subr.bf16.mxu1 %v6893_v48 }
 0xed7   : > { %v6928_v23 = vpop.eup %6927  ;;  %6360 = vmatpush3.bf16.msra.mxu0 %v6896_v12 }
 0xed8   : > { %v6930_v60 = vpop.eup %6929  ;;  %v5230_v63 = vpack.c.bf16 %v6928_v23, %v6924_v36  ;;  %6361 = vmatprep.subr.bf16.mxu0 %v6897_v11 }
 0xed9   : > { %v5231_v49 = vpack.c.bf16 %v6930_v60, %v6926_v13  ;;  %6400 = vmatpush3.bf16.msra.mxu1 %v6894_v20 }
 0xeda   : > { %6393 = vmatprep.subr.bf16.mxu1 %v6895_v47  ;;  %v6325_v47 = vld [vmem:[#allocation18] ss:$0 sm:$0xff] }
 0xedb   : > { %5498 = vmatprep.mubr.bf16.mxu1 %v5231_v49  ;;  %6362 = vmatpush3.bf16.msra.mxu0 %v6898_v5 }
 0xedc   : > { %5499 = vmatmul.mubr.bf16.gmra.mrb[12].mxu1 %v5230_v63 }
 0xedd   : > { %6401 = vmatpush3.bf16.msra.mxu1 %v6896_v12 }
 0xede   : > { %6394 = vmatprep.subr.bf16.mxu1 %v6897_v11 }
 0xee1   : > { %6402 = vmatpush3.bf16.msra.mxu1 %v6898_v5 }
 0xf97   : > { %v5470_v2 = vpop.f32.mrb[0].mxu1 }
 0xf98   : > { %v5471_v9 = vadd.f32 %v5470_v2, %v5269_v30  ;;  %v5472_v8 = vpop.f32.mrb[1].mxu1 }
 0xf99   : > { %v5473_v26 = vadd.f32 %v5472_v8, %v5273_v53  ;;  %v5474_v6 = vpop.f32.mrb[2].mxu1 }
 0xf9a   : > { %6931 = vtanh.f32 %v5471_v9  ;;  %v5475_v0 = vadd.f32 %v5474_v6, %v5269_v30  ;;  %v5476_v41 = vpop.f32.mrb[3].mxu1 }
 0xf9b   : > { %6933 = vtanh.f32 %v5473_v26  ;;  %v5477_v42 = vadd.f32 %v5476_v41, %v5273_v53 }
 0xf9c   : > { %6935 = vtanh.f32 %v5475_v0 }
 0xf9d   : > { %6937 = vtanh.f32 %v5477_v42 }
 0xf9f   : > { %v5480_v24 = vpop.f32.mrb[4].mxu1 }
 0xfa0   : > { %v5481_v17 = vadd.f32 %v5480_v24, %v5269_v30  ;;  %v5482_v18 = vpop.f32.mrb[5].mxu1 }
 0xfa1   : > { %v5483_v16 = vadd.f32 %v5482_v18, %v5273_v53  ;;  %v5484_v61 = vpop.f32.mrb[6].mxu1 }
 0xfa2   : > { %6939 = vtanh.f32 %v5481_v17  ;;  %v5485_v39 = vadd.f32 %v5484_v61, %v5269_v30  ;;  %v5486_v1 = vpop.f32.mrb[7].mxu1 }
 0xfa3   : > { %6941 = vtanh.f32 %v5483_v16  ;;  %v5487_v28 = vadd.f32 %v5486_v1, %v5273_v53 }
 0xfa4   : > { %v6932_v14 = vpop.eup %6931  ;;  %6943 = vtanh.f32 %v5485_v39 }
 0xfa5   : > { %v6934_v33 = vpop.eup %6933  ;;  %6945 = vtanh.f32 %v5487_v28 }
 0xfa6   : > { %v6936_v15 = vpop.eup %6935 }
 0xfa7   : > { %v6938_v38 = vpop.eup %6937  ;;  %v5490_v35 = vpop.f32.mrb[8].mxu1  ;;  %v5525_v55 = vpack.c.bf16 %v6936_v15, %v6932_v14 }
 0xfa8   : > { %v5491_v34 = vadd.f32 %v5490_v35, %v5269_v30  ;;  %v5492_v43 = vpop.f32.mrb[9].mxu1  ;;  %v5526_v56 = vpack.c.bf16 %v6938_v38, %v6934_v33 }
 0xfa9   : > { %v5493_v58 = vadd.f32 %v5492_v43, %v5273_v53  ;;  %v5494_v27 = vpop.f32.mrb[10].mxu1 }
 0xfaa   : > { %6947 = vtanh.f32 %v5491_v34  ;;  %v5495_v22 = vadd.f32 %v5494_v27, %v5269_v30  ;;  %v5496_v19 = vpop.f32.mrb[11].mxu1  ;;  %5700 = vmatprep.mubr.bf16.mxu0 %v5526_v56 }
 0xfab   : > { %6949 = vtanh.f32 %v5493_v58  ;;  %v5497_v59 = vadd.f32 %v5496_v19, %v5273_v53  ;;  %5701 = vmatmul.mubr.bf16.vlgmr.msra.gmra.mrb[16].mxu0 %v5525_v55 }
 0xfac   : > { %v6940_v7 = vpop.eup %6939  ;;  %6951 = vtanh.f32 %v5495_v22 }
 0xfad   : > { %v6942_v4 = vpop.eup %6941  ;;  %6953 = vtanh.f32 %v5497_v59 }
 0xfae   : > { %v6944_v37 = vpop.eup %6943 }
 0xfaf   : > { %v6946_v52 = vpop.eup %6945  ;;  %v5500_v25 = vpop.f32.mrb[12].mxu1  ;;  %v5527_v40 = vpack.c.bf16 %v6944_v37, %v6940_v7 }
 0xfb0   : > { %v5501_v45 = vadd.f32 %v5500_v25, %v5269_v30  ;;  %v5502_v50 = vpop.f32.mrb[13].mxu1  ;;  %v5528_v31 = vpack.c.bf16 %v6946_v52, %v6942_v4 }
 0xfb1   : > { %v5503_v62 = vadd.f32 %v5502_v50, %v5273_v53  ;;  %v5504_v21 = vpop.f32.mrb[14].mxu1 }
 0xfb2   : > { %6955 = vtanh.f32 %v5501_v45  ;;  %v5505_v54 = vadd.f32 %v5504_v21, %v5269_v30  ;;  %v5506_v3 = vpop.f32.mrb[15].mxu1  ;;  %5708 = vmatprep.mubr.bf16.mxu0 %v5528_v31 }
 0xfb3   : > { %6957 = vtanh.f32 %v5503_v62  ;;  %v5507_v44 = vadd.f32 %v5506_v3, %v5273_v53  ;;  %5709 = vmatmul.mubr.bf16.gmra.mrb[20].mxu0 %v5527_v40 }
 0xfb4   : > { %v6948_v32 = vpop.eup %6947  ;;  %6959 = vtanh.f32 %v5505_v54 }
 0xfb5   : > { %v6950_v36 = vpop.eup %6949  ;;  %6961 = vtanh.f32 %v5507_v44 }
 0xfb6   : > { %v6952_v13 = vpop.eup %6951 }
 0xfb7   : > { %v6954_v23 = vpop.eup %6953  ;;  %v5529_v60 = vpack.c.bf16 %v6952_v13, %v6948_v32 }
 0xfb8   : > { %v5530_v63 = vpack.c.bf16 %v6954_v23, %v6950_v36 }
 0xfba   : > { %5716 = vmatprep.mubr.bf16.mxu1 %v5530_v63 }
 0xfbb   : > { %5717 = vmatmul.mubr.bf16.vlgmr.msra.gmra.mrb[16].mxu1 %v5529_v60 }
 0xfbc   : > { %v6956_v49 = vpop.eup %6955 }
 0xfbd   : > { %v6958_v46 = vpop.eup %6957 }
 0xfbe   : > { %v6960_v10 = vpop.eup %6959 }
 0xfbf   : > { %v6962_v51 = vpop.eup %6961  ;;  %v5531_v57 = vpack.c.bf16 %v6960_v10, %v6956_v49 }
 0xfc0   : > { %v5532_v48 = vpack.c.bf16 %v6962_v51, %v6958_v46 }
 0xfc2   : > { %5724 = vmatprep.mubr.bf16.mxu1 %v5532_v48 }
 0xfc3   : > { %5725 = vmatmul.mubr.bf16.gmra.mrb[20].mxu1 %v5531_v57 }
0x107e   : > { %v6363_v20 = vpop.f32.mrb[16].mxu0 }
0x107f   : > { %v6364_v12 = vpop.f32.mrb[17].mxu0 }
0x1080   : > { %v6365_v11 = vadd.f32 %v6364_v12, %v6363_v20  ;;  %v6366_v5 = vpop.f32.mrb[18].mxu0 }
0x1081   : > { %v6367_v29 = vpop.f32.mrb[19].mxu0 }
0x1082   : > { %v5703_v30 = vadd.f32 %v6365_v11, %v6325_v47  ;;  %v6368_v53 = vadd.f32 %v6367_v29, %v6366_v5 }
0x1084   : > { %5733 = vst [vmem:[%s10855_s16] sm:$0xff] %v5703_v30  ;;  %v5706_v2 = vadd.f32 %v6368_v53, %v6325_v47 }
0x1086   : > { %5734 = vst [vmem:[%s10855_s16 + $0x8] sm:$0xff] %v5706_v2  ;;  %v6369_v9 = vpop.f32.mrb[20].mxu0 }
0x1087   : > { %v6370_v8 = vpop.f32.mrb[21].mxu0 }
0x1088   : > { %v6371_v26 = vadd.f32 %v6370_v8, %v6369_v9  ;;  %v6372_v6 = vpop.f32.mrb[22].mxu0 }
0x1089   : > { %v6373_v0 = vpop.f32.mrb[23].mxu0 }
0x108a   : > { %v5711_v41 = vadd.f32 %v6371_v26, %v6325_v47  ;;  %v6374_v42 = vadd.f32 %v6373_v0, %v6372_v6 }
0x108c   : > { %5735 = vst [vmem:[%s10855_s16 + $0x10] sm:$0xff] %v5711_v41  ;;  %v5714_v24 = vadd.f32 %v6374_v42, %v6325_v47 }
0x108e   : > { %5736 = vst [vmem:[%s10855_s16 + $0x18] sm:$0xff] %v5714_v24  ;;  %v6375_v17 = vpop.f32.mrb[16].mxu1 }
0x108f   : > { %v6376_v18 = vpop.f32.mrb[17].mxu1 }
0x1090   : > { %v6377_v16 = vadd.f32 %v6376_v18, %v6375_v17  ;;  %v6378_v61 = vpop.f32.mrb[18].mxu1 }
0x1091   : > { %v6379_v39 = vpop.f32.mrb[19].mxu1 }
0x1092   : > { %v5719_v1 = vadd.f32 %v6377_v16, %v6325_v47  ;;  %v6380_v28 = vadd.f32 %v6379_v39, %v6378_v61 }
0x1094   : > { %5737 = vst [vmem:[%s10855_s16 + $0x20] sm:$0xff] %v5719_v1  ;;  %v5722_v14 = vadd.f32 %v6380_v28, %v6325_v47 }
0x1096   : > { %5738 = vst [vmem:[%s10855_s16 + $0x28] sm:$0xff] %v5722_v14  ;;  %v6381_v33 = vpop.f32.mrb[20].mxu1 }
0x1097   : > { %v6382_v15 = vpop.f32.mrb[21].mxu1 }
0x1098   : > { %v6383_v38 = vadd.f32 %v6382_v15, %v6381_v33  ;;  %v6384_v35 = vpop.f32.mrb[22].mxu1 }
0x1099   : > { %v6385_v55 = vpop.f32.mrb[23].mxu1 }
0x109a   : > { %v5727_v34 = vadd.f32 %v6383_v38, %v6325_v47  ;;  %v6386_v43 = vadd.f32 %v6385_v55, %v6384_v35 }
0x109c   : > { %5739 = vst [vmem:[%s10855_s16 + $0x30] sm:$0xff] %v5727_v34  ;;  %v5730_v56 = vadd.f32 %v6386_v43, %v6325_v47 }
0x109e   : > { %5740 = vst [vmem:[%s10855_s16 + $0x38] sm:$0xff] %v5730_v56 }
0x109f PF: > { %s10856_s20 = sld [smem:[#allocation29_spill]]  ;;  %s10857_s17 = sld [smem:[#allocation27_spill]] }
0x10a0   : > { %s10858_s6 = sld [smem:[#allocation30_spill]]  ;;  %s10859_s18 = smov %s7303_s19 }
0x10a5   : > { %p28_p1 = scmp.ge.s32.totalorder %s10856_s20, 8  }
0x10a6   : > { %s10860_s19 = smov %s10858_s6 }
0x10a7   :  { %30 = sbr.rel (!%p28_p1) target bundleno = 16 (0x10), region = 165 }
0x10ae   :  { %5752 = vsyncpa [#allocation5], 1 }
0x10af   :  { %5754 = vsyncpa [#allocation5 + $0x1], 1 }
0x10b0   :  { %5755 = vsyncpa [#allocation7], 1 }
0x10b1   :  { %5757 = vsyncpa [#allocation7 + $0x1], 1 }
0x10b2   :  { %5758 = vsyncpa [#allocation10], 1 }
0x10b3   :  { %5760 = vsyncpa [#allocation10 + $0x1], 1 }
0x10b4   :  { %5761 = vsyncpa [#allocation13], 1 }
0x10b5   :  { %5762 = vsyncpa [#allocation16], 1 }
0x10b6   :  { %5763 = vsyncpa [#allocation19], 1 }

</bundles_post_ra>
